<compile_context>
chip_gen: v5e
topology: v5e:2x2
jax: 0.10.0
libtpu: 0.0.40
codegen_flags: <defaults>
</compile_context>

<pallas_src>
import math
import functools

import numpy as np
import jax
import jax.numpy as jnp
from jax import tree_util
from jax.experimental import pallas as pl
from jax.experimental.pallas import tpu as pltpu


# ----------------------------------------------------------------------------------
# Packed dense-conv weights (built once, OUTSIDE jit)
# ----------------------------------------------------------------------------------
class PackedConv:
    """(Kp, Np) bf16 matmul weight + (1, Np) f32 bias, with static conv metadata."""

    def __init__(self, w, b, kh, kw, cin, cout):
        self.w = w          # [Kp, Np] bf16,  Kp = round_up(kh*kw*cin, 128)
        self.b = b          # [1, Np]  f32
        self.kh = kh
        self.kw = kw
        self.cin = cin
        self.cout = cout


tree_util.register_pytree_node(
    PackedConv,
    lambda p: ((p.w, p.b), (p.kh, p.kw, p.cin, p.cout)),
    lambda aux, ch: PackedConv(ch[0], ch[1], *aux))


def _round_up(x, m):
    return ((x + m - 1) // m) * m


def _w_to_km(w):
    """[cout, cin, kh, kw] (PyTorch layout) -> [kh*kw*cin, cout], matching im2col."""
    cout, cin, kh, kw = w.shape
    return jnp.transpose(w, (2, 3, 1, 0)).reshape(kh * kw * cin, cout)


def _pack_matrix(wk, b, kh, kw, cin, cout):
    K, N = wk.shape
    Kp, Np = _round_up(K, 128), _round_up(N, 128)
    w_p = jnp.pad(wk, ((0, Kp - K), (0, Np - N))).astype(jnp.bfloat16)
    bb = jnp.zeros((N,), jnp.float32) if b is None else b.astype(jnp.float32)
    b_p = jnp.pad(bb, (0, Np - N)).reshape(1, Np)
    return PackedConv(w_p, b_p, kh, kw, cin, cout)


def pack_conv(p):
    w, b = p['w'], p['b']
    cout, cin, kh, kw = w.shape
    return _pack_matrix(_w_to_km(w), b, kh, kw, cin, cout)


def pack_conv_pair(pA, pB):
    """Row-stack two conv weights along K (for the K-fused octave convs)."""
    wA, wB = pA['w'], pB['w']
    coutA, cinA, kh, kw = wA.shape
    coutB, cinB, kh2, kw2 = wB.shape
    assert coutA == coutB and kh == kh2 and kw == kw2
    wk = jnp.concatenate([_w_to_km(wA), _w_to_km(wB)], axis=0)
    return _pack_matrix(wk, None, kh, kw, cinA + cinB, coutA)


# ----------------------------------------------------------------------------------
# Pallas matmul kernel with fused bias + (optional) LeakyReLU epilogue
# ----------------------------------------------------------------------------------
def _mm_kernel(a_ref, w_ref, b_ref, o_ref, *, act, slope):
    acc = jnp.dot(a_ref[...], w_ref[...], preferred_element_type=jnp.float32)
    acc = acc + b_ref[...]                        # (1, TN) broadcasts over (TM, TN)
    if act == 'lrelu':
        acc = jnp.where(acc >= 0, acc, slope * acc)
    o_ref[...] = acc


def matmul_packed(a, pc, act=None, slope=0.01):
    """a:[M,K] @ packed (Kp,Np) bf16 weight (+bias, +LeakyReLU) -> [M, cout] f32."""
    M, K = a.shape
    Kp, Np = pc.w.shape
    N = pc.cout
    assert K == pc.kh * pc.kw * pc.cin and Kp >= K

    a16 = a.astype(jnp.bfloat16)

    if M <= 128:
        # Launch/pipeline overhead dominates and a <=128-row tile under-fills the
        # 256-wide MXU -> let XLA fuse the tiny contraction instead.
        out = jnp.dot(jnp.pad(a16, ((0, 0), (0, Kp - K))), pc.w,
                      preferred_element_type=jnp.float32) + pc.b
        if act == 'lrelu':
            out = jnp.where(out >= 0, out, slope * out)
        return out[:, :N]

    Mp = _round_up(M, 16)                         # bf16 sublane packing
    if Mp > 256:
        Mp = _round_up(Mp, 256)
    TM = 256 if Mp % 256 == 0 else Mp
    TN = 256 if Np % 256 == 0 else 128            # match 256-wide MXU when possible
    a_p = jnp.pad(a16, ((0, Mp - M), (0, Kp - K)))

    out = pl.pallas_call(
        functools.partial(_mm_kernel, act=act, slope=slope),
        out_shape=jax.ShapeDtypeStruct((Mp, Np), jnp.float32),
        grid=(Mp // TM, Np // TN),
        in_specs=[pl.BlockSpec((TM, Kp), lambda i, j: (i, 0)),
                  pl.BlockSpec((Kp, TN), lambda i, j: (0, j)),
                  pl.BlockSpec((1, TN), lambda i, j: (0, j))],
        out_specs=pl.BlockSpec((TM, TN), lambda i, j: (i, j)),
        compiler_params=pltpu.CompilerParams(
            dimension_semantics=("parallel", "parallel")),
    )(a_p, pc.w, pc.b)
    return out[:M, :N]


# ----------------------------------------------------------------------------------
# Conv helpers (NHWC)
# ----------------------------------------------------------------------------------
def _shift(x, i, j, oh, ow, stride):
    return x[:, i:i + stride * (oh - 1) + 1:stride,
             j:j + stride * (ow - 1) + 1:stride, :]


def _pad_hw(x, padding, pad_mode):
    if padding == 0:
        return x
    mode = 'reflect' if pad_mode == 'reflect' else 'constant'
    return jnp.pad(x, ((0, 0), (padding, padding), (padding, padding), (0, 0)),
                   mode=mode)


def _im2col_cols(x, kh, kw, *, stride=1, padding=0, pad_mode='reflect'):
    x = _pad_hw(x, padding, pad_mode)
    Hp, Wp = x.shape[1], x.shape[2]
    oh = (Hp - kh) // stride + 1
    ow = (Wp - kw) // stride + 1
    cols = [_shift(x, i, j, oh, ow, stride) for i in range(kh) for j in range(kw)]
    return cols, oh, ow


def im2col(x, kh, kw, *, stride=1, padding=0, pad_mode='reflect'):
    """bf16/NHWC patches, K ordered (i, j, ci): returns ([N,oh,ow,kh*kw*C], oh, ow)."""
    cols, oh, ow = _im2col_cols(x, kh, kw, stride=stride, padding=padding,
                                pad_mode=pad_mode)
    patches = cols[0] if len(cols) == 1 else jnp.concatenate(cols, axis=-1)
    return patches, oh, ow


def conv_dense_packed(x, pc, *, stride=1, padding=0, pad_mode='zeros', act=None):
    """Dense conv: bf16 im2col + packed Pallas matmul (fused bias/act)."""
    N, _, _, C = x.shape
    patches, oh, ow = im2col(x.astype(jnp.bfloat16), pc.kh, pc.kw, stride=stride,
                             padding=padding, pad_mode=pad_mode)
    a = patches.reshape(N * oh * ow, pc.kh * pc.kw * C)
    out = matmul_packed(a, pc, act=act)
    return out.reshape(N, oh, ow, pc.cout)


def conv_grouped(x, w, b=None, *, stride=1, padding=0, pad_mode='reflect',
                 act=None, slope=0.01):
    """Grouped conv (depthwise or small channels-per-group) as lane-dense shifted
    multiply-accumulates.  Requires cout == cin, which holds for every grouped conv
    in this model (octave depthwise + AdaConv spatial/pointwise)."""
    N, H, W, C = x.shape
    cout, cpg, kh, kw = w.shape
    if cout != C:
        raise NotImplementedError("grouped conv with cout != cin")
    xp = _pad_hw(x, padding, pad_mode)
    Hp, Wp = xp.shape[1], xp.shape[2]
    oh = (Hp - kh) // stride + 1
    ow = (Wp - kw) // stride + 1

    # static masks selecting local output channel d within each group (lane dim)
    masks = [jnp.asarray((np.arange(cout) % cpg) == d, jnp.float32)
             for d in range(cpg)]

    out = jnp.zeros((N, oh, ow, cout), jnp.float32)
    for i in range(kh):
        for j in range(kw):
            xs = _shift(xp, i, j, oh, ow, stride)
            for s in range(-(cpg - 1), cpg):
                # combine all (c, d) pairs with d - c == s into one weight vector
                wv = None
                for d in range(cpg):
                    c = d - s
                    if 0 <= c < cpg:
                        term = masks[d] * w[:, c, i, j]
                        wv = term if wv is None else wv + term
                xr = xs if s == 0 else jnp.roll(xs, s, axis=-1)
                out = out + xr * wv
    if b is not None:
        out = out + b
    if act == 'lrelu':
        out = jnp.where(out >= 0, out, slope * out)
    return out


# ----------------------------------------------------------------------------------
# Elementwise / pooling glue (NHWC)
# ----------------------------------------------------------------------------------
def lrelu(x, slope=0.01):
    return jnp.where(x >= 0, x, slope * x)


def instance_norm(x, eps=1e-5):
    mean = x.mean(axis=(1, 2), keepdims=True)
    var = x.var(axis=(1, 2), keepdims=True)
    return (x - mean) * jax.lax.rsqrt(var + eps)


def avg_pool2(x):
    N, H, W, C = x.shape
    return x.reshape(N, H // 2, 2, W // 2, 2, C).mean(axis=(2, 4))


def upsample2(x):
    return jnp.repeat(jnp.repeat(x, 2, axis=1), 2, axis=2)


def adaptive_avg_pool(x, out_h, out_w):
    N, H, W, C = x.shape
    rows = []
    for i in range(out_h):
        hs = (i * H) // out_h
        he = -(-((i + 1) * H) // out_h)
        cols = []
        for j in range(out_w):
            ws = (j * W) // out_w
            we = -(-((j + 1) * W) // out_w)
            cols.append(x[:, hs:he, ws:we, :].mean(axis=(1, 2)))
        rows.append(jnp.stack(cols, axis=1))   # [N, out_w, C]
    return jnp.stack(rows, axis=1)             # [N, out_h, out_w, C]


# ----------------------------------------------------------------------------------
# Octave conv forwards
# ----------------------------------------------------------------------------------
def _trim_match(hf, lf):
    # static shape-matching trims (the torch while-loops, resolved at trace time)
    while hf.shape[2] != 2 * lf.shape[2]:
        if hf.shape[2] > 2 * lf.shape[2]:
            hf = hf[:, :, :-1, :]
        else:
            lf = lf[:, :, :-1, :]
    while hf.shape[1] != 2 * lf.shape[1]:
        if hf.shape[1] > 2 * lf.shape[1]:
            hf = hf[:, :-1, :, :]
        else:
            lf = lf[:, :-1, :, :]
    return hf, lf


def oct_dense_forward(packed, hf, lf, act=None):
    """Dense OctConvNormal.  Both cross paths are fused into ONE matmul per output
    frequency via K-concatenation of the im2col panels."""
    hf, lf = _trim_match(hf, lf)
    pc_h, pc_l = packed['h'], packed['l']
    k = pc_h.kh
    pad = (k - 1) // 2
    N = hf.shape[0]
    hf16 = hf.astype(jnp.bfloat16)
    lf16 = lf.astype(jnp.bfloat16)

    # hf_out = [im2col(hf) | im2col(upsample2(lf))] @ [W_H2H ; W_L2H]
    cols_a, oh, ow = _im2col_cols(hf16, k, k, padding=pad, pad_mode='reflect')
    cols_b, _, _ = _im2col_cols(upsample2(lf16), k, k, padding=pad,
                                pad_mode='reflect')
    a_h = jnp.concatenate(cols_a + cols_b, axis=-1).reshape(N * oh * ow, -1)
    hf_o = matmul_packed(a_h, pc_h, act=act).reshape(N, oh, ow, pc_h.cout)

    # lf_out = [im2col(lf) | im2col(avg_pool2(hf))] @ [W_L2L ; W_H2L]
    cols_c, ohl, owl = _im2col_cols(lf16, k, k, padding=pad, pad_mode='reflect')
    cols_d, _, _ = _im2col_cols(avg_pool2(hf16), k, k, padding=pad,
                                pad_mode='reflect')
    a_l = jnp.concatenate(cols_c + cols_d, axis=-1).reshape(N * ohl * owl, -1)
    lf_o = matmul_packed(a_l, pc_l, act=act).reshape(N, ohl, owl, pc_l.cout)
    return hf_o, lf_o


def oct_depthwise_forward(p, hf, lf, *, stride, padding, act=None):
    hf_o = conv_grouped(hf, p['H2H']['w'], None, stride=stride, padding=padding,
                        pad_mode='reflect', act=act)
    lf_o = conv_grouped(lf, p['L2L']['w'], None, stride=stride, padding=padding,
                        pad_mode='reflect', act=act)
    return hf_o, lf_o


# ----------------------------------------------------------------------------------
# Parameter init (deterministic, PyTorch-like fan_in uniform, PyTorch weight layout)
# ----------------------------------------------------------------------------------
def _conv_init(key, cout, cin_pg, kh, kw, bias=True):
    k1, k2 = jax.random.split(key)
    fan_in = cin_pg * kh * kw
    bound = 1.0 / math.sqrt(fan_in)
    w = jax.random.uniform(k1, (cout, cin_pg, kh, kw), jnp.float32, -bound, bound)
    b = jax.random.uniform(k2, (cout,), jnp.float32, -bound, bound) if bias else None
    return {'w': w, 'b': b}


def init_oct_normal(key, cin, cout, k, groups, alpha=0.5):
    hf_in = int(cin * (1 - alpha)); hf_out = int(cout * (1 - alpha))
    lf_in = cin - hf_in;            lf_out = cout - hf_out
    l2l_g = math.ceil(alpha * groups)
    h2h_g = math.ceil(groups - alpha * groups)
    keys = jax.random.split(key, 4)
    p = {'L2L': _conv_init(keys[0], lf_out, lf_in // l2l_g, k, k, bias=False),
         'H2H': _conv_init(keys[1], hf_out, hf_in // h2h_g, k, k, bias=False)}
    if groups != cin:   # not depthwise -> cross paths exist
        p['L2H'] = _conv_init(keys[2], hf_out, lf_in // groups, k, k, bias=False)
        p['H2L'] = _conv_init(keys[3], lf_out, hf_in // groups, k, k, bias=False)
    return p


def init_kernel_predictor(key, in_ch, out_ch, n_groups, style_ch, k):
    keys = jax.random.split(key, 3)
    return {'spatial':   _conv_init(keys[0], in_ch * out_ch // n_groups, style_ch, k, k, True),
            'pointwise': _conv_init(keys[1], out_ch * out_ch // n_groups, style_ch, 1, 1, True),
            'bias':      _conv_init(keys[2], out_ch, style_ch, 1, 1, True)}


def init_ada_oct(key, in_ch, group_div, style_ch):
    h_in = in_ch // 2; l_in = in_ch - h_in
    ngh = h_in // group_div; ngl = l_in // group_div
    sh = style_ch // 2; sl = style_ch - sh
    keys = jax.random.split(key, 5)
    return {'kp_h': init_kernel_predictor(keys[0], h_in, h_in, ngh, sh, 3),
            'kp_l': init_kernel_predictor(keys[1], l_in, l_in, ngl, sl, 3),
            'ada_h': {'conv': _conv_init(keys[2], h_in, h_in, 3, 3, True)},
            'ada_l': {'conv': _conv_init(keys[3], l_in, l_in, 3, 3, True)},
            'oct':  init_oct_normal(keys[4], in_ch, in_ch, 3, groups=in_ch)}


def init_encoder(key, in_dim=3, nf=64):
    keys = iter(jax.random.split(key, 16))
    p = {}
    p['conv']   = _conv_init(next(keys), nf, in_dim, 7, 7, True)
    p['oct1_1'] = {'convh': _conv_init(next(keys), nf // 2, nf, 3, 3, False),
                   'convl': _conv_init(next(keys), nf // 2, nf, 3, 3, False)}
    p['oct1_2'] = init_oct_normal(next(keys), nf, 2 * nf, 1, groups=1)
    p['oct1_3'] = init_oct_normal(next(keys), 2 * nf, 2 * nf, 3, groups=1)
    p['oct2_1'] = init_oct_normal(next(keys), 2 * nf, 2 * nf, 3, groups=2 * nf)
    p['oct2_2'] = init_oct_normal(next(keys), 2 * nf, 4 * nf, 1, groups=1)
    p['oct2_3'] = init_oct_normal(next(keys), 4 * nf, 4 * nf, 3, groups=1)
    return p


def init_decoder(key, nf=64, out_dim=3, style_channel=256):
    keys = iter(jax.random.split(key, 16))
    p = {}
    p['ada1']   = init_ada_oct(next(keys), 4 * nf, 1, style_channel)
    p['oct1_2'] = init_oct_normal(next(keys), 4 * nf, 2 * nf, 1, groups=1)
    p['aftup1'] = {'conv_h': _conv_init(next(keys), nf, nf, 3, 3, True),
                   'conv_l': _conv_init(next(keys), nf, nf, 3, 3, True)}
    p['ada2']   = init_ada_oct(next(keys), 2 * nf, 2, style_channel)
    p['oct2_2'] = init_oct_normal(next(keys), 2 * nf, nf, 1, groups=1)
    p['aftup2'] = {'conv_h': _conv_init(next(keys), nf // 2, nf // 2, 3, 3, True),
                   'conv_l': _conv_init(next(keys), nf // 2, nf // 2, 3, 3, True)}
    p['ada3']   = init_ada_oct(next(keys), nf, 4, style_channel)
    p['oct3_2'] = {'convh': _conv_init(next(keys), nf // 2, nf // 2, 1, 1, False),
                   'convl': _conv_init(next(keys), nf // 2, nf // 2, 1, 1, False)}
    p['conv4']  = _conv_init(next(keys), out_dim, nf // 2, 1, 1, True)
    return p


# ----------------------------------------------------------------------------------
# Weight pre-packing (runs once, OUTSIDE jit)
# ----------------------------------------------------------------------------------
def _pack_oct_dense(p):
    return {'h': pack_conv_pair(p['H2H'], p['L2H']),
            'l': pack_conv_pair(p['L2L'], p['H2L'])}


def _prepack_kp(p):
    return {'spatial': pack_conv(p['spatial']),
            'pointwise': pack_conv(p['pointwise']),
            'bias': pack_conv(p['bias'])}


def _prepack_ada(p):
    return {'kp_h': _prepack_kp(p['kp_h']),
            'kp_l': _prepack_kp(p['kp_l']),
            'ada_h': pack_conv(p['ada_h']['conv']),
            'ada_l': pack_conv(p['ada_l']['conv']),
            'oct': p['oct']}                        # depthwise -> keep raw weights


def prepack_encoder(p):
    return {'conv': pack_conv(p['conv']),
            'oct1_1': {'convh': pack_conv(p['oct1_1']['convh']),
                       'convl': pack_conv(p['oct1_1']['convl'])},
            'oct1_2': _pack_oct_dense(p['oct1_2']),
            'oct1_3': _pack_oct_dense(p['oct1_3']),
            'oct2_1': p['oct2_1'],                  # depthwise -> raw
            'oct2_2': _pack_oct_dense(p['oct2_2']),
            'oct2_3': _pack_oct_dense(p['oct2_3'])}


def prepack_decoder(p):
    return {'ada1': _prepack_ada(p['ada1']),
            'oct1_2': _pack_oct_dense(p['oct1_2']),
            'aftup1': {'conv_h': pack_conv(p['aftup1']['conv_h']),
                       'conv_l': pack_conv(p['aftup1']['conv_l'])},
            'ada2': _prepack_ada(p['ada2']),
            'oct2_2': _pack_oct_dense(p['oct2_2']),
            'aftup2': {'conv_h': pack_conv(p['aftup2']['conv_h']),
                       'conv_l': pack_conv(p['aftup2']['conv_l'])},
            'ada3': _prepack_ada(p['ada3']),
            'oct3_2': {'convh': pack_conv(p['oct3_2']['convh']),
                       'convl': pack_conv(p['oct3_2']['convl'])},
            'conv4': pack_conv(p['conv4'])}


# ----------------------------------------------------------------------------------
# Forward passes (mirroring the PyTorch modules), activations in NHWC
# ----------------------------------------------------------------------------------
def kernel_predictor_forward(pq, w, in_ch, out_ch, n_groups, k):
    B = w.shape[0]
    ws = conv_dense_packed(w, pq['spatial'], stride=1,
                           padding=math.ceil((k - 1) / 2), pad_mode='reflect')
    ws = jnp.transpose(ws, (0, 3, 1, 2))               # NCHW ordering for reshape
    w_spatial = ws.reshape(B, out_ch, in_ch // n_groups, k, k)
    pooled = w.mean(axis=(1, 2), keepdims=True)        # AdaptiveAvgPool2d((1,1))
    wp = conv_dense_packed(pooled, pq['pointwise'], stride=1, padding=0)
    w_pointwise = wp.reshape(B, out_ch, out_ch // n_groups, 1, 1)
    bb = conv_dense_packed(pooled, pq['bias'], stride=1, padding=0)
    bias = bb.reshape(B, out_ch)
    return w_spatial, w_pointwise, bias


def ada_conv_forward(pc_conv, x, w_spatial, w_pointwise, bias, final_act=None):
    # batch = 1 (the torch reference concatenates per-sample outputs over channels)
    x = instance_norm(x)
    ws = w_spatial[0]      # [out, in/ng, k, k]
    wp = w_pointwise[0]    # [out, out/ng, 1, 1]
    b = bias[0]            # [out]
    k = ws.shape[-1]
    y = conv_grouped(x, ws, None, stride=1, padding=(k - 1) // 2,
                     pad_mode='reflect')
    y = conv_grouped(y, wp, b, stride=1, padding=0)
    y = conv_dense_packed(y, pc_conv, stride=1, padding=1, pad_mode='reflect',
                          act=final_act)
    return y


def ada_oct_forward(pq, c_hf, c_lf, s_hf, s_lf, *, in_ch, group_div):
    h_in = in_ch // 2; l_in = in_ch - h_in
    ngh = h_in // group_div; ngl = l_in // group_div
    ws_h, wp_h, b_h = kernel_predictor_forward(pq['kp_h'], s_hf, h_in, h_in, ngh, 3)
    ws_l, wp_l, b_l = kernel_predictor_forward(pq['kp_l'], s_lf, l_in, l_in, ngl, 3)
    out_h = ada_conv_forward(pq['ada_h'], c_hf, ws_h, wp_h, b_h, final_act='lrelu')
    out_l = ada_conv_forward(pq['ada_l'], c_lf, ws_l, wp_l, b_l, final_act='lrelu')
    hf, lf = oct_depthwise_forward(pq['oct'], out_h, out_l, stride=1, padding=1,
                                   act='lrelu')
    return hf, lf


def encoder_forward(pq, x, cond, nf=64):
    out = conv_dense_packed(x, pq['conv'], stride=1, padding=3, pad_mode='zeros')
    hf = conv_dense_packed(out, pq['oct1_1']['convh'], stride=2, padding=1,
                           pad_mode='reflect', act='lrelu')
    lf = conv_dense_packed(avg_pool2(out), pq['oct1_1']['convl'], stride=2,
                           padding=1, pad_mode='reflect', act='lrelu')
    hf, lf = oct_dense_forward(pq['oct1_2'], hf, lf, act='lrelu')
    hf, lf = oct_dense_forward(pq['oct1_3'], hf, lf, act='lrelu')
    hf, lf = oct_depthwise_forward(pq['oct2_1'], hf, lf, stride=2, padding=1,
                                   act='lrelu')
    hf, lf = oct_dense_forward(pq['oct2_2'], hf, lf, act='lrelu')
    hf, lf = oct_dense_forward(pq['oct2_3'], hf, lf, act='lrelu')
    if cond == 'style':
        return adaptive_avg_pool(hf, 3, 3), adaptive_avg_pool(lf, 3, 3)
    return hf, lf


def decoder_forward(pq, content, style, nf=64):
    c_hf, c_lf = content
    s_hf, s_lf = style
    hf, lf = ada_oct_forward(pq['ada1'], c_hf, c_lf, s_hf, s_lf, in_ch=4 * nf, group_div=1)
    hf, lf = oct_dense_forward(pq['oct1_2'], hf, lf, act=None)
    hf, lf = upsample2(hf), upsample2(lf)
    hf = conv_dense_packed(hf, pq['aftup1']['conv_h'], stride=1, padding=1,
                           pad_mode='reflect')
    lf = conv_dense_packed(lf, pq['aftup1']['conv_l'], stride=1, padding=1,
                           pad_mode='reflect')
    hf, lf = ada_oct_forward(pq['ada2'], hf, lf, s_hf, s_lf, in_ch=2 * nf, group_div=2)
    hf, lf = oct_dense_forward(pq['oct2_2'], hf, lf, act=None)
    hf, lf = upsample2(hf), upsample2(lf)
    hf = conv_dense_packed(hf, pq['aftup2']['conv_h'], stride=1, padding=1,
                           pad_mode='reflect')
    lf = conv_dense_packed(lf, pq['aftup2']['conv_l'], stride=1, padding=1,
                           pad_mode='reflect')
    hf, lf = ada_oct_forward(pq['ada3'], hf, lf, s_hf, s_lf, in_ch=nf, group_div=4)
    # OctConvLast (freq_ratio = (1, 1))
    out_h = conv_dense_packed(hf, pq['oct3_2']['convh'], stride=1, padding=0,
                              pad_mode='reflect')
    out_l = conv_dense_packed(upsample2(lf), pq['oct3_2']['convl'], stride=1,
                              padding=0, pad_mode='reflect')
    out = out_h * 1.0 + out_l * 1.0
    out = conv_dense_packed(out, pq['conv4'], stride=1, padding=0, pad_mode='zeros')
    return out


def aesfa_forward(params, real_A, real_B):
    xA = jnp.transpose(real_A, (0, 2, 3, 1))   # NCHW -> NHWC (internal layout)
    xB = jnp.transpose(real_B, (0, 2, 3, 1))
    content_A = encoder_forward(params['netE'], xA, 'content')
    style_B = encoder_forward(params['netS'], xB, 'style')
    out = decoder_forward(params['netG'], content_A, style_B)
    return jnp.transpose(out, (0, 3, 1, 2))    # back to NCHW


# ----------------------------------------------------------------------------------
if __name__ == "__main__":
    key = jax.random.PRNGKey(0)
    k_params, k_a, k_b = jax.random.split(key, 3)
    k_e, k_s, k_g = jax.random.split(k_params, 3)
    raw_params = {'netE': init_encoder(k_e),
                  'netS': init_encoder(k_s),
                  'netG': init_decoder(k_g)}
    # Pre-pack all static dense-conv weights once, outside jit.
    params = {'netE': prepack_encoder(raw_params['netE']),
              'netS': prepack_encoder(raw_params['netS']),
              'netG': prepack_decoder(raw_params['netG'])}

    # batch must be 1: AdaConv2d in the reference concatenates per-sample outputs
    # along dim=1 (channels), which only works for a single sample.
    real_A = jax.random.normal(k_a, (1, 3, 32, 32), jnp.float32)
    real_B = jax.random.normal(k_b, (1, 3, 32, 32), jnp.float32)

    fwd = jax.jit(aesfa_forward)
    out = jax.block_until_ready(fwd(params, real_A, real_B))

    assert out.shape == (1, 3, 32, 32), out.shape
    assert bool(jnp.all(jnp.isfinite(out)))
    print("KERNEL_OK")
</pallas_src>

<mosaic_0001>
module attributes {stable_mosaic.version = 11 : i64} {
  func.func @_mm_kernel(%arg0: i32, %arg1: i32, %arg2: memref<256x256xbf16, #tpu.memory_space<vmem>>, %arg3: memref<256x128xbf16, #tpu.memory_space<vmem>>, %arg4: memref<1x128xf32, #tpu.memory_space<vmem>>, %arg5: memref<256x128xf32, #tpu.memory_space<vmem>>) attributes {dimension_semantics = [#tpu.dimension_semantics<parallel>, #tpu.dimension_semantics<parallel>], iteration_bounds = array<i64: 4, 1>, scalar_prefetch = 0 : i64, scratch_operands = 0 : i64, tpu.core_type = #tpu.core_type<tc>, window_params = [{transform_indices = @transform_0, window_bounds = array<i64: 256, 256>}, {transform_indices = @transform_1, window_bounds = array<i64: 256, 128>}, {transform_indices = @transform_2, window_bounds = array<i64: 1, 128>}, {transform_indices = @transform_3, window_bounds = array<i64: 256, 128>}]} {
    %c0 = arith.constant 0 : index
    %c0_0 = arith.constant 0 : index
    %0 = vector.load %arg2[%c0, %c0_0] : memref<256x256xbf16, #tpu.memory_space<vmem>>, vector<256x256xbf16>
    %c0_1 = arith.constant 0 : index
    %c0_2 = arith.constant 0 : index
    %1 = vector.load %arg3[%c0_1, %c0_2] : memref<256x128xbf16, #tpu.memory_space<vmem>>, vector<256x128xbf16>
    %cst = arith.constant dense<0.000000e+00> : vector<256x128xf32>
    %2 = tpu.matmul %0, %1, %cst {dimension_numbers = #tpu.dot_dimension_numbers<[1], [0], [0], [1], [0, 0, 1, 1], [], []>} : vector<256x256xbf16>, vector<256x128xbf16>, vector<256x128xf32> -> vector<256x128xf32>
    %c0_3 = arith.constant 0 : index
    %c0_4 = arith.constant 0 : index
    %3 = vector.load %arg4[%c0_3, %c0_4] : memref<1x128xf32, #tpu.memory_space<vmem>>, vector<1x128xf32>
    %4 = vector.broadcast %3 : vector<1x128xf32> to vector<256x128xf32>
    %5 = arith.addf %2, %4 : vector<256x128xf32>
    %c0_5 = arith.constant 0 : index
    %c0_6 = arith.constant 0 : index
    %6 = vector.load %arg5[%c0_5, %c0_6] : memref<256x128xf32, #tpu.memory_space<vmem>>, vector<256x128xf32>
    tpu.vector_store %arg5[%c0_5, %c0_6], %5 {strides = array<i32>} : memref<256x128xf32, #tpu.memory_space<vmem>>, vector<256x128xf32>,
    return
  }
  func.func @transform_0(%arg0: i32, %arg1: i32) -> (i32, i32) {
    %c0_i32 = arith.constant 0 : i32
    %c0_i32_0 = arith.constant 0 : i32
    return %arg0, %c0_i32 : i32, i32
  }
  func.func @transform_1(%arg0: i32, %arg1: i32) -> (i32, i32) {
    %c0_i32 = arith.constant 0 : i32
    %c0_i32_0 = arith.constant 0 : i32
    return %c0_i32, %arg1 : i32, i32
  }
  func.func @transform_2(%arg0: i32, %arg1: i32) -> (i32, i32) {
    %c0_i32 = arith.constant 0 : i32
    %c0_i32_0 = arith.constant 0 : i32
    return %c0_i32, %arg1 : i32, i32
  }
  func.func @transform_3(%arg0: i32, %arg1: i32) -> (i32, i32) {
    %c0_i32 = arith.constant 0 : i32
    return %arg0, %arg1 : i32, i32
  }
}

module attributes {stable_mosaic.version = 11 : i64} {
  func.func @_mm_kernel(%arg0: i32, %arg1: i32, %arg2: memref<256x640xbf16, #tpu.memory_space<vmem>>, %arg3: memref<640x128xbf16, #tpu.memory_space<vmem>>, %arg4: memref<1x128xf32, #tpu.memory_space<vmem>>, %arg5: memref<256x128xf32, #tpu.memory_space<vmem>>) attributes {dimension_semantics = [#tpu.dimension_semantics<parallel>, #tpu.dimension_semantics<parallel>], iteration_bounds = array<i64: 1, 1>, scalar_prefetch = 0 : i64, scratch_operands = 0 : i64, tpu.core_type = #tpu.core_type<tc>, window_params = [{transform_indices = @transform_0, window_bounds = array<i64: 256, 640>}, {transform_indices = @transform_1, window_bounds = array<i64: 640, 128>}, {transform_indices = @transform_2, window_bounds = array<i64: 1, 128>}, {transform_indices = @transform_3, window_bounds = array<i64: 256, 128>}]} {
    %c0 = arith.constant 0 : index
    %c0_0 = arith.constant 0 : index
    %0 = vector.load %arg2[%c0, %c0_0] : memref<256x640xbf16, #tpu.memory_space<vmem>>, vector<256x640xbf16>
    %c0_1 = arith.constant 0 : index
    %c0_2 = arith.constant 0 : index
    %1 = vector.load %arg3[%c0_1, %c0_2] : memref<640x128xbf16, #tpu.memory_space<vmem>>, vector<640x128xbf16>
    %cst = arith.constant dense<0.000000e+00> : vector<256x128xf32>
    %2 = tpu.matmul %0, %1, %cst {dimension_numbers = #tpu.dot_dimension_numbers<[1], [0], [0], [1], [0, 0, 1, 1], [], []>} : vector<256x640xbf16>, vector<640x128xbf16>, vector<256x128xf32> -> vector<256x128xf32>
    %c0_3 = arith.constant 0 : index
    %c0_4 = arith.constant 0 : index
    %3 = vector.load %arg4[%c0_3, %c0_4] : memref<1x128xf32, #tpu.memory_space<vmem>>, vector<1x128xf32>
    %4 = vector.broadcast %3 : vector<1x128xf32> to vector<256x128xf32>
    %5 = arith.addf %2, %4 : vector<256x128xf32>
    %cst_5 = arith.constant 0.000000e+00 : f32
    %6 = vector.broadcast %cst_5 : f32 to vector<256x128xf32>
    %7 = arith.cmpf oge, %5, %6 : vector<256x128xf32>
    %cst_6 = arith.constant 0.00999999977 : f32
    %8 = vector.broadcast %cst_6 : f32 to vector<256x128xf32>
    %9 = arith.mulf %8, %5 : vector<256x128xf32>
    %10 = arith.select %7, %5, %9 : vector<256x128xi1>, vector<256x128xf32>
    %c0_7 = arith.constant 0 : index
    %c0_8 = arith.constant 0 : index
    %11 = vector.load %arg5[%c0_7, %c0_8] : memref<256x128xf32, #tpu.memory_space<vmem>>, vector<256x128xf32>
    tpu.vector_store %arg5[%c0_7, %c0_8], %10 {strides = array<i32>} : memref<256x128xf32, #tpu.memory_space<vmem>>, vector<256x128xf32>,
    return
  }
  func.func @transform_0(%arg0: i32, %arg1: i32) -> (i32, i32) {
    %c0_i32 = arith.constant 0 : i32
    %c0_i32_0 = arith.constant 0 : i32
    return %arg0, %c0_i32 : i32, i32
  }
  func.func @transform_1(%arg0: i32, %arg1: i32) -> (i32, i32) {
    %c0_i32 = arith.constant 0 : i32
    %c0_i32_0 = arith.constant 0 : i32
    return %c0_i32, %arg1 : i32, i32
  }
  func.func @transform_2(%arg0: i32, %arg1: i32) -> (i32, i32) {
    %c0_i32 = arith.constant 0 : i32
    %c0_i32_0 = arith.constant 0 : i32
    return %c0_i32, %arg1 : i32, i32
  }
  func.func @transform_3(%arg0: i32, %arg1: i32) -> (i32, i32) {
    %c0_i32 = arith.constant 0 : i32
    return %arg0, %arg1 : i32, i32
  }
}

module attributes {stable_mosaic.version = 11 : i64} {
  func.func @_mm_kernel(%arg0: i32, %arg1: i32, %arg2: memref<256x128xbf16, #tpu.memory_space<vmem>>, %arg3: memref<128x128xbf16, #tpu.memory_space<vmem>>, %arg4: memref<1x128xf32, #tpu.memory_space<vmem>>, %arg5: memref<256x128xf32, #tpu.memory_space<vmem>>) attributes {dimension_semantics = [#tpu.dimension_semantics<parallel>, #tpu.dimension_semantics<parallel>], iteration_bounds = array<i64: 1, 1>, scalar_prefetch = 0 : i64, scratch_operands = 0 : i64, tpu.core_type = #tpu.core_type<tc>, window_params = [{transform_indices = @transform_0, window_bounds = array<i64: 256, 128>}, {transform_indices = @transform_1, window_bounds = array<i64: 128, 128>}, {transform_indices = @transform_2, window_bounds = array<i64: 1, 128>}, {transform_indices = @transform_3, window_bounds = array<i64: 256, 128>}]} {
    %c0 = arith.constant 0 : index
    %c0_0 = arith.constant 0 : index
    %0 = vector.load %arg2[%c0, %c0_0] : memref<256x128xbf16, #tpu.memory_space<vmem>>, vector<256x128xbf16>
    %c0_1 = arith.constant 0 : index
    %c0_2 = arith.constant 0 : index
    %1 = vector.load %arg3[%c0_1, %c0_2] : memref<128x128xbf16, #tpu.memory_space<vmem>>, vector<128x128xbf16>
    %cst = arith.constant dense<0.000000e+00> : vector<256x128xf32>
    %2 = tpu.matmul %0, %1, %cst {dimension_numbers = #tpu.dot_dimension_numbers<[1], [0], [0], [1], [0, 0, 1, 1], [], []>} : vector<256x128xbf16>, vector<128x128xbf16>, vector<256x128xf32> -> vector<256x128xf32>
    %c0_3 = arith.constant 0 : index
    %c0_4 = arith.constant 0 : index
    %3 = vector.load %arg4[%c0_3, %c0_4] : memref<1x128xf32, #tpu.memory_space<vmem>>, vector<1x128xf32>
    %4 = vector.broadcast %3 : vector<1x128xf32> to vector<256x128xf32>
    %5 = arith.addf %2, %4 : vector<256x128xf32>
    %cst_5 = arith.constant 0.000000e+00 : f32
    %6 = vector.broadcast %cst_5 : f32 to vector<256x128xf32>
    %7 = arith.cmpf oge, %5, %6 : vector<256x128xf32>
    %cst_6 = arith.constant 0.00999999977 : f32
    %8 = vector.broadcast %cst_6 : f32 to vector<256x128xf32>
    %9 = arith.mulf %8, %5 : vector<256x128xf32>
    %10 = arith.select %7, %5, %9 : vector<256x128xi1>, vector<256x128xf32>
    %c0_7 = arith.constant 0 : index
    %c0_8 = arith.constant 0 : index
    %11 = vector.load %arg5[%c0_7, %c0_8] : memref<256x128xf32, #tpu.memory_space<vmem>>, vector<256x128xf32>
    tpu.vector_store %arg5[%c0_7, %c0_8], %10 {strides = array<i32>} : memref<256x128xf32, #tpu.memory_space<vmem>>, vector<256x128xf32>,
    return
  }
  func.func @transform_0(%arg0: i32, %arg1: i32) -> (i32, i32) {
    %c0_i32 = arith.constant 0 : i32
    %c0_i32_0 = arith.constant 0 : i32
    return %arg0, %c0_i32 : i32, i32
  }
  func.func @transform_1(%arg0: i32, %arg1: i32) -> (i32, i32) {
    %c0_i32 = arith.constant 0 : i32
    %c0_i32_0 = arith.constant 0 : i32
    return %c0_i32, %arg1 : i32, i32
  }
  func.func @transform_2(%arg0: i32, %arg1: i32) -> (i32, i32) {
    %c0_i32 = arith.constant 0 : i32
    %c0_i32_0 = arith.constant 0 : i32
    return %c0_i32, %arg1 : i32, i32
  }
  func.func @transform_3(%arg0: i32, %arg1: i32) -> (i32, i32) {
    %c0_i32 = arith.constant 0 : i32
    return %arg0, %arg1 : i32, i32
  }
}

module attributes {stable_mosaic.version = 11 : i64} {
  func.func @_mm_kernel(%arg0: i32, %arg1: i32, %arg2: memref<256x1152xbf16, #tpu.memory_space<vmem>>, %arg3: memref<1152x128xbf16, #tpu.memory_space<vmem>>, %arg4: memref<1x128xf32, #tpu.memory_space<vmem>>, %arg5: memref<256x128xf32, #tpu.memory_space<vmem>>) attributes {dimension_semantics = [#tpu.dimension_semantics<parallel>, #tpu.dimension_semantics<parallel>], iteration_bounds = array<i64: 1, 1>, scalar_prefetch = 0 : i64, scratch_operands = 0 : i64, tpu.core_type = #tpu.core_type<tc>, window_params = [{transform_indices = @transform_0, window_bounds = array<i64: 256, 1152>}, {transform_indices = @transform_1, window_bounds = array<i64: 1152, 128>}, {transform_indices = @transform_2, window_bounds = array<i64: 1, 128>}, {transform_indices = @transform_3, window_bounds = array<i64: 256, 128>}]} {
    %c0 = arith.constant 0 : index
    %c0_0 = arith.constant 0 : index
    %0 = vector.load %arg2[%c0, %c0_0] : memref<256x1152xbf16, #tpu.memory_space<vmem>>, vector<256x1152xbf16>
    %c0_1 = arith.constant 0 : index
    %c0_2 = arith.constant 0 : index
    %1 = vector.load %arg3[%c0_1, %c0_2] : memref<1152x128xbf16, #tpu.memory_space<vmem>>, vector<1152x128xbf16>
    %cst = arith.constant dense<0.000000e+00> : vector<256x128xf32>
    %2 = tpu.matmul %0, %1, %cst {dimension_numbers = #tpu.dot_dimension_numbers<[1], [0], [0], [1], [0, 0, 1, 1], [], []>} : vector<256x1152xbf16>, vector<1152x128xbf16>, vector<256x128xf32> -> vector<256x128xf32>
    %c0_3 = arith.constant 0 : index
    %c0_4 = arith.constant 0 : index
    %3 = vector.load %arg4[%c0_3, %c0_4] : memref<1x128xf32, #tpu.memory_space<vmem>>, vector<1x128xf32>
    %4 = vector.broadcast %3 : vector<1x128xf32> to vector<256x128xf32>
    %5 = arith.addf %2, %4 : vector<256x128xf32>
    %cst_5 = arith.constant 0.000000e+00 : f32
    %6 = vector.broadcast %cst_5 : f32 to vector<256x128xf32>
    %7 = arith.cmpf oge, %5, %6 : vector<256x128xf32>
    %cst_6 = arith.constant 0.00999999977 : f32
    %8 = vector.broadcast %cst_6 : f32 to vector<256x128xf32>
    %9 = arith.mulf %8, %5 : vector<256x128xf32>
    %10 = arith.select %7, %5, %9 : vector<256x128xi1>, vector<256x128xf32>
    %c0_7 = arith.constant 0 : index
    %c0_8 = arith.constant 0 : index
    %11 = vector.load %arg5[%c0_7, %c0_8] : memref<256x128xf32, #tpu.memory_space<vmem>>, vector<256x128xf32>
    tpu.vector_store %arg5[%c0_7, %c0_8], %10 {strides = array<i32>} : memref<256x128xf32, #tpu.memory_space<vmem>>, vector<256x128xf32>,
    return
  }
  func.func @transform_0(%arg0: i32, %arg1: i32) -> (i32, i32) {
    %c0_i32 = arith.constant 0 : i32
    %c0_i32_0 = arith.constant 0 : i32
    return %arg0, %c0_i32 : i32, i32
  }
  func.func @transform_1(%arg0: i32, %arg1: i32) -> (i32, i32) {
    %c0_i32 = arith.constant 0 : i32
    %c0_i32_0 = arith.constant 0 : i32
    return %c0_i32, %arg1 : i32, i32
  }
  func.func @transform_2(%arg0: i32, %arg1: i32) -> (i32, i32) {
    %c0_i32 = arith.constant 0 : i32
    %c0_i32_0 = arith.constant 0 : i32
    return %c0_i32, %arg1 : i32, i32
  }
  func.func @transform_3(%arg0: i32, %arg1: i32) -> (i32, i32) {
    %c0_i32 = arith.constant 0 : i32
    return %arg0, %arg1 : i32, i32
  }
}

module attributes {stable_mosaic.version = 11 : i64} {
  func.func @_mm_kernel(%arg0: i32, %arg1: i32, %arg2: memref<256x640xbf16, #tpu.memory_space<vmem>>, %arg3: memref<640x128xbf16, #tpu.memory_space<vmem>>, %arg4: memref<1x128xf32, #tpu.memory_space<vmem>>, %arg5: memref<256x128xf32, #tpu.memory_space<vmem>>) attributes {dimension_semantics = [#tpu.dimension_semantics<parallel>, #tpu.dimension_semantics<parallel>], iteration_bounds = array<i64: 1, 1>, scalar_prefetch = 0 : i64, scratch_operands = 0 : i64, tpu.core_type = #tpu.core_type<tc>, window_params = [{transform_indices = @transform_0, window_bounds = array<i64: 256, 640>}, {transform_indices = @transform_1, window_bounds = array<i64: 640, 128>}, {transform_indices = @transform_2, window_bounds = array<i64: 1, 128>}, {transform_indices = @transform_3, window_bounds = array<i64: 256, 128>}]} {
    %c0 = arith.constant 0 : index
    %c0_0 = arith.constant 0 : index
    %0 = vector.load %arg2[%c0, %c0_0] : memref<256x640xbf16, #tpu.memory_space<vmem>>, vector<256x640xbf16>
    %c0_1 = arith.constant 0 : index
    %c0_2 = arith.constant 0 : index
    %1 = vector.load %arg3[%c0_1, %c0_2] : memref<640x128xbf16, #tpu.memory_space<vmem>>, vector<640x128xbf16>
    %cst = arith.constant dense<0.000000e+00> : vector<256x128xf32>
    %2 = tpu.matmul %0, %1, %cst {dimension_numbers = #tpu.dot_dimension_numbers<[1], [0], [0], [1], [0, 0, 1, 1], [], []>} : vector<256x640xbf16>, vector<640x128xbf16>, vector<256x128xf32> -> vector<256x128xf32>
    %c0_3 = arith.constant 0 : index
    %c0_4 = arith.constant 0 : index
    %3 = vector.load %arg4[%c0_3, %c0_4] : memref<1x128xf32, #tpu.memory_space<vmem>>, vector<1x128xf32>
    %4 = vector.broadcast %3 : vector<1x128xf32> to vector<256x128xf32>
    %5 = arith.addf %2, %4 : vector<256x128xf32>
    %c0_5 = arith.constant 0 : index
    %c0_6 = arith.constant 0 : index
    %6 = vector.load %arg5[%c0_5, %c0_6] : memref<256x128xf32, #tpu.memory_space<vmem>>, vector<256x128xf32>
    tpu.vector_store %arg5[%c0_5, %c0_6], %5 {strides = array<i32>} : memref<256x128xf32, #tpu.memory_space<vmem>>, vector<256x128xf32>,
    return
  }
  func.func @transform_0(%arg0: i32, %arg1: i32) -> (i32, i32) {
    %c0_i32 = arith.constant 0 : i32
    %c0_i32_0 = arith.constant 0 : i32
    return %arg0, %c0_i32 : i32, i32
  }
  func.func @transform_1(%arg0: i32, %arg1: i32) -> (i32, i32) {
    %c0_i32 = arith.constant 0 : i32
    %c0_i32_0 = arith.constant 0 : i32
    return %c0_i32, %arg1 : i32, i32
  }
  func.func @transform_2(%arg0: i32, %arg1: i32) -> (i32, i32) {
    %c0_i32 = arith.constant 0 : i32
    %c0_i32_0 = arith.constant 0 : i32
    return %c0_i32, %arg1 : i32, i32
  }
  func.func @transform_3(%arg0: i32, %arg1: i32) -> (i32, i32) {
    %c0_i32 = arith.constant 0 : i32
    return %arg0, %arg1 : i32, i32
  }
}

module attributes {stable_mosaic.version = 11 : i64} {
  func.func @_mm_kernel(%arg0: i32, %arg1: i32, %arg2: memref<256x128xbf16, #tpu.memory_space<vmem>>, %arg3: memref<128x128xbf16, #tpu.memory_space<vmem>>, %arg4: memref<1x128xf32, #tpu.memory_space<vmem>>, %arg5: memref<256x128xf32, #tpu.memory_space<vmem>>) attributes {dimension_semantics = [#tpu.dimension_semantics<parallel>, #tpu.dimension_semantics<parallel>], iteration_bounds = array<i64: 1, 1>, scalar_prefetch = 0 : i64, scratch_operands = 0 : i64, tpu.core_type = #tpu.core_type<tc>, window_params = [{transform_indices = @transform_0, window_bounds = array<i64: 256, 128>}, {transform_indices = @transform_1, window_bounds = array<i64: 128, 128>}, {transform_indices = @transform_2, window_bounds = array<i64: 1, 128>}, {transform_indices = @transform_3, window_bounds = array<i64: 256, 128>}]} {
    %c0 = arith.constant 0 : index
    %c0_0 = arith.constant 0 : index
    %0 = vector.load %arg2[%c0, %c0_0] : memref<256x128xbf16, #tpu.memory_space<vmem>>, vector<256x128xbf16>
    %c0_1 = arith.constant 0 : index
    %c0_2 = arith.constant 0 : index
    %1 = vector.load %arg3[%c0_1, %c0_2] : memref<128x128xbf16, #tpu.memory_space<vmem>>, vector<128x128xbf16>
    %cst = arith.constant dense<0.000000e+00> : vector<256x128xf32>
    %2 = tpu.matmul %0, %1, %cst {dimension_numbers = #tpu.dot_dimension_numbers<[1], [0], [0], [1], [0, 0, 1, 1], [], []>} : vector<256x128xbf16>, vector<128x128xbf16>, vector<256x128xf32> -> vector<256x128xf32>
    %c0_3 = arith.constant 0 : index
    %c0_4 = arith.constant 0 : index
    %3 = vector.load %arg4[%c0_3, %c0_4] : memref<1x128xf32, #tpu.memory_space<vmem>>, vector<1x128xf32>
    %4 = vector.broadcast %3 : vector<1x128xf32> to vector<256x128xf32>
    %5 = arith.addf %2, %4 : vector<256x128xf32>
    %c0_5 = arith.constant 0 : index
    %c0_6 = arith.constant 0 : index
    %6 = vector.load %arg5[%c0_5, %c0_6] : memref<256x128xf32, #tpu.memory_space<vmem>>, vector<256x128xf32>
    tpu.vector_store %arg5[%c0_5, %c0_6], %5 {strides = array<i32>} : memref<256x128xf32, #tpu.memory_space<vmem>>, vector<256x128xf32>,
    return
  }
  func.func @transform_0(%arg0: i32, %arg1: i32) -> (i32, i32) {
    %c0_i32 = arith.constant 0 : i32
    %c0_i32_0 = arith.constant 0 : i32
    return %arg0, %c0_i32 : i32, i32
  }
  func.func @transform_1(%arg0: i32, %arg1: i32) -> (i32, i32) {
    %c0_i32 = arith.constant 0 : i32
    %c0_i32_0 = arith.constant 0 : i32
    return %c0_i32, %arg1 : i32, i32
  }
  func.func @transform_2(%arg0: i32, %arg1: i32) -> (i32, i32) {
    %c0_i32 = arith.constant 0 : i32
    %c0_i32_0 = arith.constant 0 : i32
    return %c0_i32, %arg1 : i32, i32
  }
  func.func @transform_3(%arg0: i32, %arg1: i32) -> (i32, i32) {
    %c0_i32 = arith.constant 0 : i32
    return %arg0, %arg1 : i32, i32
  }
}

module attributes {stable_mosaic.version = 11 : i64} {
  func.func @_mm_kernel(%arg0: i32, %arg1: i32, %arg2: memref<256x384xbf16, #tpu.memory_space<vmem>>, %arg3: memref<384x128xbf16, #tpu.memory_space<vmem>>, %arg4: memref<1x128xf32, #tpu.memory_space<vmem>>, %arg5: memref<256x128xf32, #tpu.memory_space<vmem>>) attributes {dimension_semantics = [#tpu.dimension_semantics<parallel>, #tpu.dimension_semantics<parallel>], iteration_bounds = array<i64: 1, 1>, scalar_prefetch = 0 : i64, scratch_operands = 0 : i64, tpu.core_type = #tpu.core_type<tc>, window_params = [{transform_indices = @transform_0, window_bounds = array<i64: 256, 384>}, {transform_indices = @transform_1, window_bounds = array<i64: 384, 128>}, {transform_indices = @transform_2, window_bounds = array<i64: 1, 128>}, {transform_indices = @transform_3, window_bounds = array<i64: 256, 128>}]} {
    %c0 = arith.constant 0 : index
    %c0_0 = arith.constant 0 : index
    %0 = vector.load %arg2[%c0, %c0_0] : memref<256x384xbf16, #tpu.memory_space<vmem>>, vector<256x384xbf16>
    %c0_1 = arith.constant 0 : index
    %c0_2 = arith.constant 0 : index
    %1 = vector.load %arg3[%c0_1, %c0_2] : memref<384x128xbf16, #tpu.memory_space<vmem>>, vector<384x128xbf16>
    %cst = arith.constant dense<0.000000e+00> : vector<256x128xf32>
    %2 = tpu.matmul %0, %1, %cst {dimension_numbers = #tpu.dot_dimension_numbers<[1], [0], [0], [1], [0, 0, 1, 1], [], []>} : vector<256x384xbf16>, vector<384x128xbf16>, vector<256x128xf32> -> vector<256x128xf32>
    %c0_3 = arith.constant 0 : index
    %c0_4 = arith.constant 0 : index
    %3 = vector.load %arg4[%c0_3, %c0_4] : memref<1x128xf32, #tpu.memory_space<vmem>>, vector<1x128xf32>
    %4 = vector.broadcast %3 : vector<1x128xf32> to vector<256x128xf32>
    %5 = arith.addf %2, %4 : vector<256x128xf32>
    %c0_5 = arith.constant 0 : index
    %c0_6 = arith.constant 0 : index
    %6 = vector.load %arg5[%c0_5, %c0_6] : memref<256x128xf32, #tpu.memory_space<vmem>>, vector<256x128xf32>
    tpu.vector_store %arg5[%c0_5, %c0_6], %5 {strides = array<i32>} : memref<256x128xf32, #tpu.memory_space<vmem>>, vector<256x128xf32>,
    return
  }
  func.func @transform_0(%arg0: i32, %arg1: i32) -> (i32, i32) {
    %c0_i32 = arith.constant 0 : i32
    %c0_i32_0 = arith.constant 0 : i32
    return %arg0, %c0_i32 : i32, i32
  }
  func.func @transform_1(%arg0: i32, %arg1: i32) -> (i32, i32) {
    %c0_i32 = arith.constant 0 : i32
    %c0_i32_0 = arith.constant 0 : i32
    return %c0_i32, %arg1 : i32, i32
  }
  func.func @transform_2(%arg0: i32, %arg1: i32) -> (i32, i32) {
    %c0_i32 = arith.constant 0 : i32
    %c0_i32_0 = arith.constant 0 : i32
    return %c0_i32, %arg1 : i32, i32
  }
  func.func @transform_3(%arg0: i32, %arg1: i32) -> (i32, i32) {
    %c0_i32 = arith.constant 0 : i32
    return %arg0, %arg1 : i32, i32
  }
}

module attributes {stable_mosaic.version = 11 : i64} {
  func.func @_mm_kernel(%arg0: i32, %arg1: i32, %arg2: memref<256x384xbf16, #tpu.memory_space<vmem>>, %arg3: memref<384x128xbf16, #tpu.memory_space<vmem>>, %arg4: memref<1x128xf32, #tpu.memory_space<vmem>>, %arg5: memref<256x128xf32, #tpu.memory_space<vmem>>) attributes {dimension_semantics = [#tpu.dimension_semantics<parallel>, #tpu.dimension_semantics<parallel>], iteration_bounds = array<i64: 1, 1>, scalar_prefetch = 0 : i64, scratch_operands = 0 : i64, tpu.core_type = #tpu.core_type<tc>, window_params = [{transform_indices = @transform_0, window_bounds = array<i64: 256, 384>}, {transform_indices = @transform_1, window_bounds = array<i64: 384, 128>}, {transform_indices = @transform_2, window_bounds = array<i64: 1, 128>}, {transform_indices = @transform_3, window_bounds = array<i64: 256, 128>}]} {
    %c0 = arith.constant 0 : index
    %c0_0 = arith.constant 0 : index
    %0 = vector.load %arg2[%c0, %c0_0] : memref<256x384xbf16, #tpu.memory_space<vmem>>, vector<256x384xbf16>
    %c0_1 = arith.constant 0 : index
    %c0_2 = arith.constant 0 : index
    %1 = vector.load %arg3[%c0_1, %c0_2] : memref<384x128xbf16, #tpu.memory_space<vmem>>, vector<384x128xbf16>
    %cst = arith.constant dense<0.000000e+00> : vector<256x128xf32>
    %2 = tpu.matmul %0, %1, %cst {dimension_numbers = #tpu.dot_dimension_numbers<[1], [0], [0], [1], [0, 0, 1, 1], [], []>} : vector<256x384xbf16>, vector<384x128xbf16>, vector<256x128xf32> -> vector<256x128xf32>
    %c0_3 = arith.constant 0 : index
    %c0_4 = arith.constant 0 : index
    %3 = vector.load %arg4[%c0_3, %c0_4] : memref<1x128xf32, #tpu.memory_space<vmem>>, vector<1x128xf32>
    %4 = vector.broadcast %3 : vector<1x128xf32> to vector<256x128xf32>
    %5 = arith.addf %2, %4 : vector<256x128xf32>
    %cst_5 = arith.constant 0.000000e+00 : f32
    %6 = vector.broadcast %cst_5 : f32 to vector<256x128xf32>
    %7 = arith.cmpf oge, %5, %6 : vector<256x128xf32>
    %cst_6 = arith.constant 0.00999999977 : f32
    %8 = vector.broadcast %cst_6 : f32 to vector<256x128xf32>
    %9 = arith.mulf %8, %5 : vector<256x128xf32>
    %10 = arith.select %7, %5, %9 : vector<256x128xi1>, vector<256x128xf32>
    %c0_7 = arith.constant 0 : index
    %c0_8 = arith.constant 0 : index
    %11 = vector.load %arg5[%c0_7, %c0_8] : memref<256x128xf32, #tpu.memory_space<vmem>>, vector<256x128xf32>
    tpu.vector_store %arg5[%c0_7, %c0_8], %10 {strides = array<i32>} : memref<256x128xf32, #tpu.memory_space<vmem>>, vector<256x128xf32>,
    return
  }
  func.func @transform_0(%arg0: i32, %arg1: i32) -> (i32, i32) {
    %c0_i32 = arith.constant 0 : i32
    %c0_i32_0 = arith.constant 0 : i32
    return %arg0, %c0_i32 : i32, i32
  }
  func.func @transform_1(%arg0: i32, %arg1: i32) -> (i32, i32) {
    %c0_i32 = arith.constant 0 : i32
    %c0_i32_0 = arith.constant 0 : i32
    return %c0_i32, %arg1 : i32, i32
  }
  func.func @transform_2(%arg0: i32, %arg1: i32) -> (i32, i32) {
    %c0_i32 = arith.constant 0 : i32
    %c0_i32_0 = arith.constant 0 : i32
    return %c0_i32, %arg1 : i32, i32
  }
  func.func @transform_3(%arg0: i32, %arg1: i32) -> (i32, i32) {
    %c0_i32 = arith.constant 0 : i32
    return %arg0, %arg1 : i32, i32
  }
}

module attributes {stable_mosaic.version = 11 : i64} {
  func.func @_mm_kernel(%arg0: i32, %arg1: i32, %arg2: memref<256x128xbf16, #tpu.memory_space<vmem>>, %arg3: memref<128x128xbf16, #tpu.memory_space<vmem>>, %arg4: memref<1x128xf32, #tpu.memory_space<vmem>>, %arg5: memref<256x128xf32, #tpu.memory_space<vmem>>) attributes {dimension_semantics = [#tpu.dimension_semantics<parallel>, #tpu.dimension_semantics<parallel>], iteration_bounds = array<i64: 4, 1>, scalar_prefetch = 0 : i64, scratch_operands = 0 : i64, tpu.core_type = #tpu.core_type<tc>, window_params = [{transform_indices = @transform_0, window_bounds = array<i64: 256, 128>}, {transform_indices = @transform_1, window_bounds = array<i64: 128, 128>}, {transform_indices = @transform_2, window_bounds = array<i64: 1, 128>}, {transform_indices = @transform_3, window_bounds = array<i64: 256, 128>}]} {
    %c0 = arith.constant 0 : index
    %c0_0 = arith.constant 0 : index
    %0 = vector.load %arg2[%c0, %c0_0] : memref<256x128xbf16, #tpu.memory_space<vmem>>, vector<256x128xbf16>
    %c0_1 = arith.constant 0 : index
    %c0_2 = arith.constant 0 : index
    %1 = vector.load %arg3[%c0_1, %c0_2] : memref<128x128xbf16, #tpu.memory_space<vmem>>, vector<128x128xbf16>
    %cst = arith.constant dense<0.000000e+00> : vector<256x128xf32>
    %2 = tpu.matmul %0, %1, %cst {dimension_numbers = #tpu.dot_dimension_numbers<[1], [0], [0], [1], [0, 0, 1, 1], [], []>} : vector<256x128xbf16>, vector<128x128xbf16>, vector<256x128xf32> -> vector<256x128xf32>
    %c0_3 = arith.constant 0 : index
    %c0_4 = arith.constant 0 : index
    %3 = vector.load %arg4[%c0_3, %c0_4] : memref<1x128xf32, #tpu.memory_space<vmem>>, vector<1x128xf32>
    %4 = vector.broadcast %3 : vector<1x128xf32> to vector<256x128xf32>
    %5 = arith.addf %2, %4 : vector<256x128xf32>
    %c0_5 = arith.constant 0 : index
    %c0_6 = arith.constant 0 : index
    %6 = vector.load %arg5[%c0_5, %c0_6] : memref<256x128xf32, #tpu.memory_space<vmem>>, vector<256x128xf32>
    tpu.vector_store %arg5[%c0_5, %c0_6], %5 {strides = array<i32>} : memref<256x128xf32, #tpu.memory_space<vmem>>, vector<256x128xf32>,
    return
  }
  func.func @transform_0(%arg0: i32, %arg1: i32) -> (i32, i32) {
    %c0_i32 = arith.constant 0 : i32
    %c0_i32_0 = arith.constant 0 : i32
    return %arg0, %c0_i32 : i32, i32
  }
  func.func @transform_1(%arg0: i32, %arg1: i32) -> (i32, i32) {
    %c0_i32 = arith.constant 0 : i32
    %c0_i32_0 = arith.constant 0 : i32
    return %c0_i32, %arg1 : i32, i32
  }
  func.func @transform_2(%arg0: i32, %arg1: i32) -> (i32, i32) {
    %c0_i32 = arith.constant 0 : i32
    %c0_i32_0 = arith.constant 0 : i32
    return %c0_i32, %arg1 : i32, i32
  }
  func.func @transform_3(%arg0: i32, %arg1: i32) -> (i32, i32) {
    %c0_i32 = arith.constant 0 : i32
    return %arg0, %arg1 : i32, i32
  }
}

module attributes {stable_mosaic.version = 11 : i64} {
  func.func @_mm_kernel(%arg0: i32, %arg1: i32, %arg2: memref<256x384xbf16, #tpu.memory_space<vmem>>, %arg3: memref<384x128xbf16, #tpu.memory_space<vmem>>, %arg4: memref<1x128xf32, #tpu.memory_space<vmem>>, %arg5: memref<256x128xf32, #tpu.memory_space<vmem>>) attributes {dimension_semantics = [#tpu.dimension_semantics<parallel>, #tpu.dimension_semantics<parallel>], iteration_bounds = array<i64: 4, 1>, scalar_prefetch = 0 : i64, scratch_operands = 0 : i64, tpu.core_type = #tpu.core_type<tc>, window_params = [{transform_indices = @transform_0, window_bounds = array<i64: 256, 384>}, {transform_indices = @transform_1, window_bounds = array<i64: 384, 128>}, {transform_indices = @transform_2, window_bounds = array<i64: 1, 128>}, {transform_indices = @transform_3, window_bounds = array<i64: 256, 128>}]} {
    %c0 = arith.constant 0 : index
    %c0_0 = arith.constant 0 : index
    %0 = vector.load %arg2[%c0, %c0_0] : memref<256x384xbf16, #tpu.memory_space<vmem>>, vector<256x384xbf16>
    %c0_1 = arith.constant 0 : index
    %c0_2 = arith.constant 0 : index
    %1 = vector.load %arg3[%c0_1, %c0_2] : memref<384x128xbf16, #tpu.memory_space<vmem>>, vector<384x128xbf16>
    %cst = arith.constant dense<0.000000e+00> : vector<256x128xf32>
    %2 = tpu.matmul %0, %1, %cst {dimension_numbers = #tpu.dot_dimension_numbers<[1], [0], [0], [1], [0, 0, 1, 1], [], []>} : vector<256x384xbf16>, vector<384x128xbf16>, vector<256x128xf32> -> vector<256x128xf32>
    %c0_3 = arith.constant 0 : index
    %c0_4 = arith.constant 0 : index
    %3 = vector.load %arg4[%c0_3, %c0_4] : memref<1x128xf32, #tpu.memory_space<vmem>>, vector<1x128xf32>
    %4 = vector.broadcast %3 : vector<1x128xf32> to vector<256x128xf32>
    %5 = arith.addf %2, %4 : vector<256x128xf32>
    %c0_5 = arith.constant 0 : index
    %c0_6 = arith.constant 0 : index
    %6 = vector.load %arg5[%c0_5, %c0_6] : memref<256x128xf32, #tpu.memory_space<vmem>>, vector<256x128xf32>
    tpu.vector_store %arg5[%c0_5, %c0_6], %5 {strides = array<i32>} : memref<256x128xf32, #tpu.memory_space<vmem>>, vector<256x128xf32>,
    return
  }
  func.func @transform_0(%arg0: i32, %arg1: i32) -> (i32, i32) {
    %c0_i32 = arith.constant 0 : i32
    %c0_i32_0 = arith.constant 0 : i32
    return %arg0, %c0_i32 : i32, i32
  }
  func.func @transform_1(%arg0: i32, %arg1: i32) -> (i32, i32) {
    %c0_i32 = arith.constant 0 : i32
    %c0_i32_0 = arith.constant 0 : i32
    return %c0_i32, %arg1 : i32, i32
  }
  func.func @transform_2(%arg0: i32, %arg1: i32) -> (i32, i32) {
    %c0_i32 = arith.constant 0 : i32
    %c0_i32_0 = arith.constant 0 : i32
    return %c0_i32, %arg1 : i32, i32
  }
  func.func @transform_3(%arg0: i32, %arg1: i32) -> (i32, i32) {
    %c0_i32 = arith.constant 0 : i32
    return %arg0, %arg1 : i32, i32
  }
}

module attributes {stable_mosaic.version = 11 : i64} {
  func.func @_mm_kernel(%arg0: i32, %arg1: i32, %arg2: memref<256x384xbf16, #tpu.memory_space<vmem>>, %arg3: memref<384x128xbf16, #tpu.memory_space<vmem>>, %arg4: memref<1x128xf32, #tpu.memory_space<vmem>>, %arg5: memref<256x128xf32, #tpu.memory_space<vmem>>) attributes {dimension_semantics = [#tpu.dimension_semantics<parallel>, #tpu.dimension_semantics<parallel>], iteration_bounds = array<i64: 4, 1>, scalar_prefetch = 0 : i64, scratch_operands = 0 : i64, tpu.core_type = #tpu.core_type<tc>, window_params = [{transform_indices = @transform_0, window_bounds = array<i64: 256, 384>}, {transform_indices = @transform_1, window_bounds = array<i64: 384, 128>}, {transform_indices = @transform_2, window_bounds = array<i64: 1, 128>}, {transform_indices = @transform_3, window_bounds = array<i64: 256, 128>}]} {
    %c0 = arith.constant 0 : index
    %c0_0 = arith.constant 0 : index
    %0 = vector.load %arg2[%c0, %c0_0] : memref<256x384xbf16, #tpu.memory_space<vmem>>, vector<256x384xbf16>
    %c0_1 = arith.constant 0 : index
    %c0_2 = arith.constant 0 : index
    %1 = vector.load %arg3[%c0_1, %c0_2] : memref<384x128xbf16, #tpu.memory_space<vmem>>, vector<384x128xbf16>
    %cst = arith.constant dense<0.000000e+00> : vector<256x128xf32>
    %2 = tpu.matmul %0, %1, %cst {dimension_numbers = #tpu.dot_dimension_numbers<[1], [0], [0], [1], [0, 0, 1, 1], [], []>} : vector<256x384xbf16>, vector<384x128xbf16>, vector<256x128xf32> -> vector<256x128xf32>
    %c0_3 = arith.constant 0 : index
    %c0_4 = arith.constant 0 : index
    %3 = vector.load %arg4[%c0_3, %c0_4] : memref<1x128xf32, #tpu.memory_space<vmem>>, vector<1x128xf32>
    %4 = vector.broadcast %3 : vector<1x128xf32> to vector<256x128xf32>
    %5 = arith.addf %2, %4 : vector<256x128xf32>
    %cst_5 = arith.constant 0.000000e+00 : f32
    %6 = vector.broadcast %cst_5 : f32 to vector<256x128xf32>
    %7 = arith.cmpf oge, %5, %6 : vector<256x128xf32>
    %cst_6 = arith.constant 0.00999999977 : f32
    %8 = vector.broadcast %cst_6 : f32 to vector<256x128xf32>
    %9 = arith.mulf %8, %5 : vector<256x128xf32>
    %10 = arith.select %7, %5, %9 : vector<256x128xi1>, vector<256x128xf32>
    %c0_7 = arith.constant 0 : index
    %c0_8 = arith.constant 0 : index
    %11 = vector.load %arg5[%c0_7, %c0_8] : memref<256x128xf32, #tpu.memory_space<vmem>>, vector<256x128xf32>
    tpu.vector_store %arg5[%c0_7, %c0_8], %10 {strides = array<i32>} : memref<256x128xf32, #tpu.memory_space<vmem>>, vector<256x128xf32>,
    return
  }
  func.func @transform_0(%arg0: i32, %arg1: i32) -> (i32, i32) {
    %c0_i32 = arith.constant 0 : i32
    %c0_i32_0 = arith.constant 0 : i32
    return %arg0, %c0_i32 : i32, i32
  }
  func.func @transform_1(%arg0: i32, %arg1: i32) -> (i32, i32) {
    %c0_i32 = arith.constant 0 : i32
    %c0_i32_0 = arith.constant 0 : i32
    return %c0_i32, %arg1 : i32, i32
  }
  func.func @transform_2(%arg0: i32, %arg1: i32) -> (i32, i32) {
    %c0_i32 = arith.constant 0 : i32
    %c0_i32_0 = arith.constant 0 : i32
    return %c0_i32, %arg1 : i32, i32
  }
  func.func @transform_3(%arg0: i32, %arg1: i32) -> (i32, i32) {
    %c0_i32 = arith.constant 0 : i32
    return %arg0, %arg1 : i32, i32
  }
}

</mosaic_0001>

<bundles_post_ra>
// kernel: aesfa_forward.18
= control target key start
LH: loop header
LB: loop body
LE: loop exit
PB: predicated region body
PF: predicated region fallthrough
CT: control target
= control target key end

     0   :  { %s1204_s12 = smov 0   ;;  %s1206_s13 = smov 0   ;;  %s1432_s0 = inlined_call_operand.vmem [shape: bf16[1024,256], index: 0, kind: input, shape index: {}]   ;;  %s1433_s1 = inlined_call_operand.vmem [shape: bf16[256,128], index: 1, kind: input, shape index: {}]   ;;  %s1434_s2 = inlined_call_operand.vmem [shape: f32[1,128], index: 2, kind: input, shape index: {}]   ;;  %s1435_s3 = inlined_call_operand.vmem [shape: f32[1024,128], index: 3, kind: output, shape index: {}]  }
   0x1   :  { %s1208_s14 = smov 0  }
   0x2 LB: > { %s25_s15 = sadd.s32 1, %s1178_s13  ;;  %p870_p0 = scmp.ge.s32.totalorder %s1182_s14, 1  ;;  %s1182_s14 = sphi %s1208_s14, %s13_s14   ;;  %s1178_s13 = sphi %s1206_s13, %s1437_s13   ;;  %s1174_s12 = sphi %s1204_s12, %s1436_s12  }
   0x3   : > { %p27_p1 = scmp.ge.s32.totalorder %s25_s15, 4  ;;  %p170_p2 = scmp.lt.s32.totalorder %s1182_s14, 5 }
   0x5   : > { %s1439_s15 = smov (%p27_p1, %s25_s15), 0  ;;  %p171_p3 = pnand %p870_p0, %p170_p2 }
   0x6   : > { %s871_s28 = sshll.u32 (!%p171_p3), %s1174_s12, 5 }
   0x7   : > { %174 = sbr.rel (%p171_p3) target bundleno = 301 (0x12d), region = 32  ;;  %p206_p4 = scmp.lt.s32.totalorder (!%p171_p3), %s871_s28, 127 }
   0xc   : > { %v1110_v0 = vld [vmem:[%s1433_s1 + $0x38] sm:$0xff]  ;;  %v1109_v2 = vld [vmem:[%s1433_s1 + $0x30] sm:$0xff]  ;;  %v1108_v4 = vld [vmem:[%s1433_s1 + $0x28] sm:$0xff]  ;;  %s1441_s28 = smov (!%p206_p4, %s871_s28), 127 }
   0xd   : > { %v1118_v1 = vld [vmem:[%s1433_s1 + $0x78] sm:$0xff]  ;;  %552 = vmatpush.bf16.msra.mxu0 %v1110_v0  ;;  %1119 = vmatpush.bf16.msra.mxu2 %v1110_v0  ;;  %v1117_v3 = vld [vmem:[%s1433_s1 + $0x70] sm:$0xff]  ;;  %v1116_v5 = vld [vmem:[%s1433_s1 + $0x68] sm:$0xff]  ;;  %s1070_s17 = sshll.u32 %s1441_s28, 3 }
   0xe   : > { %641 = vmatpush.bf16.msra.mxu1 %v1118_v1  ;;  %1127 = vmatpush.bf16.msra.mxu3 %v1118_v1  ;;  %v1107_v6 = vld [vmem:[%s1433_s1 + $0x20] sm:$0xff]  ;;  %v1106_v8 = vld [vmem:[%s1433_s1 + $0x18] sm:$0xff]  ;;  %v1105_v10 = vld [vmem:[%s1433_s1 + $0x10] sm:$0xff]  ;;  %s1272_s22 = scalar_lea.vmem %s1432_s0, %s1070_s17  ;;  %s1358_s7 = scalar_lea.vmem %s1435_s3, %s1070_s17 }
   0xf   : > { %v1115_v7 = vld [vmem:[%s1433_s1 + $0x60] sm:$0xff]  ;;  %v1114_v9 = vld [vmem:[%s1433_s1 + $0x58] sm:$0xff]  ;;  %v1113_v11 = vld [vmem:[%s1433_s1 + $0x50] sm:$0xff] }
  0x10   : > { %v1104_v12 = vld [vmem:[%s1433_s1 + $0x8] sm:$0xff]  ;;  %v1103_v14 = vld [vmem:[%s1433_s1] sm:$0xff]  ;;  %v886_v28 = vld [vmem:[%s1272_s22 + $0x10] sm:$0xf] }
  0x11   : > { %553 = vmatpush.bf16.msra.mxu0 %v1109_v2  ;;  %1120 = vmatpush.bf16.msra.mxu2 %v1109_v2  ;;  %v1112_v13 = vld [vmem:[%s1433_s1 + $0x48] sm:$0xff]  ;;  %v1111_v15 = vld [vmem:[%s1433_s1 + $0x40] sm:$0xff]  ;;  %v1074_v29 = vld [vmem:[%s1272_s22 + $0x14] sm:$0xf0] }
  0x12   : > { %642 = vmatpush.bf16.msra.mxu1 %v1117_v3  ;;  %1128 = vmatpush.bf16.msra.mxu3 %v1117_v3  ;;  %v878_v16 = vld [vmem:[%s1272_s22] sm:$0xf]  ;;  %v1072_v17 = vld [vmem:[%s1272_s22 + $0x4] sm:$0xf0]  ;;  %v1071_v20 = vld [vmem:[%s1272_s22 + $0x4] sm:$0xf]  ;;  %v887_v36 = vor.u32 %v1074_v29, %v886_v28 }
  0x13   : > { %v942_v18 = vld [vmem:[%s1272_s22 + $0x80] sm:$0xf]  ;;  %v1088_v19 = vld [vmem:[%s1272_s22 + $0x84] sm:$0xf0]  ;;  %v880_v21 = vld [vmem:[%s1272_s22 + $0x8] sm:$0xf0]  ;;  %v879_v24 = vor.u32 %v1072_v17, %v878_v16 }
  0x14   : > { %v1087_v22 = vld [vmem:[%s1272_s22 + $0x84] sm:$0xf]  ;;  %v944_v23 = vld [vmem:[%s1272_s22 + $0x88] sm:$0xf0]  ;;  %v943_v25 = vor.u32 %v1088_v19, %v942_v18  ;;  %v883_v26 = vor.u32 %v1071_v20, %v880_v21  ;;  %v950_v30 = vld [vmem:[%s1272_s22 + $0x90] sm:$0xf] }
  0x15   : > { %554 = vmatpush.bf16.msra.mxu0 %v1108_v4  ;;  %1121 = vmatpush.bf16.msra.mxu2 %v1108_v4  ;;  %v947_v27 = vor.u32 %v1087_v22, %v944_v23  ;;  %v1090_v31 = vld [vmem:[%s1272_s22 + $0x94] sm:$0xf0]  ;;  %v1073_v32 = vld [vmem:[%s1272_s22 + $0x14] sm:$0xf]  ;;  %v888_v33 = vld [vmem:[%s1272_s22 + $0x18] sm:$0xf0] }
  0x16   : > { %643 = vmatpush.bf16.msra.mxu1 %v1116_v5  ;;  %1129 = vmatpush.bf16.msra.mxu3 %v1116_v5  ;;  %v1089_v34 = vld [vmem:[%s1272_s22 + $0x94] sm:$0xf]  ;;  %v952_v35 = vld [vmem:[%s1272_s22 + $0x98] sm:$0xf0]  ;;  %v951_v37 = vor.u32 %v1090_v31, %v950_v30  ;;  %v891_v38 = vor.u32 %v1073_v32, %v888_v33  ;;  %v894_v40 = vld [vmem:[%s1272_s22 + $0x20] sm:$0xf] }
  0x17   : > { %v955_v39 = vor.u32 %v1089_v34, %v952_v35  ;;  %v1076_v41 = vld [vmem:[%s1272_s22 + $0x24] sm:$0xf0]  ;;  %v958_v42 = vld [vmem:[%s1272_s22 + $0xa0] sm:$0xf]  ;;  %v1075_v44 = vld [vmem:[%s1272_s22 + $0x24] sm:$0xf] }
  0x18   : > { %v1092_v43 = vld [vmem:[%s1272_s22 + $0xa4] sm:$0xf0]  ;;  %v896_v45 = vld [vmem:[%s1272_s22 + $0x28] sm:$0xf0]  ;;  %v1091_v46 = vld [vmem:[%s1272_s22 + $0xa4] sm:$0xf]  ;;  %v895_v48 = vor.u32 %v1076_v41, %v894_v40 }
  0x19   : > { %555 = vmatpush.bf16.msra.mxu0 %v1107_v6  ;;  %1122 = vmatpush.bf16.msra.mxu2 %v1107_v6  ;;  %v960_v47 = vld [vmem:[%s1272_s22 + $0xa8] sm:$0xf0]  ;;  %v959_v49 = vor.u32 %v1092_v43, %v958_v42  ;;  %v899_v50 = vor.u32 %v1075_v44, %v896_v45  ;;  %v902_v52 = vld [vmem:[%s1272_s22 + $0x30] sm:$0xf]  ;;  %v1078_v53 = vld [vmem:[%s1272_s22 + $0x34] sm:$0xf0] }
  0x1a   : > { %644 = vmatpush.bf16.msra.mxu1 %v1115_v7  ;;  %1130 = vmatpush.bf16.msra.mxu3 %v1115_v7  ;;  %v963_v51 = vor.u32 %v1091_v46, %v960_v47  ;;  %v966_v54 = vld [vmem:[%s1272_s22 + $0xb0] sm:$0xf]  ;;  %v1094_v55 = vld [vmem:[%s1272_s22 + $0xb4] sm:$0xf0]  ;;  %v1077_v56 = vld [vmem:[%s1272_s22 + $0x34] sm:$0xf]  ;;  %v903_v60 = vor.u32 %v1078_v53, %v902_v52 }
  0x1b   : > { %v904_v57 = vld [vmem:[%s1272_s22 + $0x38] sm:$0xf0]  ;;  %v1093_v58 = vld [vmem:[%s1272_s22 + $0xb4] sm:$0xf]  ;;  %v967_v61 = vor.u32 %v1094_v55, %v966_v54  ;;  %v910_v0 = vld [vmem:[%s1272_s22 + $0x40] sm:$0xf] }
  0x1c   : > { %v968_v59 = vld [vmem:[%s1272_s22 + $0xb8] sm:$0xf0]  ;;  %v907_v62 = vor.u32 %v1077_v56, %v904_v57  ;;  %v1080_v1 = vld [vmem:[%s1272_s22 + $0x44] sm:$0xf0]  ;;  %v974_v2 = vld [vmem:[%s1272_s22 + $0xc0] sm:$0xf] }
  0x1d   : > { %556 = vmatpush.bf16.msra.mxu0 %v1106_v8  ;;  %1123 = vmatpush.bf16.msra.mxu2 %v1106_v8  ;;  %v971_v63 = vor.u32 %v1093_v58, %v968_v59  ;;  %v1096_v3 = vld [vmem:[%s1272_s22 + $0xc4] sm:$0xf0]  ;;  %v1079_v4 = vld [vmem:[%s1272_s22 + $0x44] sm:$0xf]  ;;  %v912_v5 = vld [vmem:[%s1272_s22 + $0x48] sm:$0xf0]  ;;  %v911_v8 = vor.u32 %v1080_v1, %v910_v0 }
  0x1e   : > { %645 = vmatpush.bf16.msra.mxu1 %v1114_v9  ;;  %1131 = vmatpush.bf16.msra.mxu3 %v1114_v9  ;;  %v1095_v6 = vld [vmem:[%s1272_s22 + $0xc4] sm:$0xf]  ;;  %v976_v7 = vld [vmem:[%s1272_s22 + $0xc8] sm:$0xf0]  ;;  %v975_v9 = vor.u32 %v1096_v3, %v974_v2  ;;  %v1081_v16 = vld [vmem:[%s1272_s22 + $0x54] sm:$0xf] }
  0x1f   : > { %v920_v17 = vld [vmem:[%s1272_s22 + $0x58] sm:$0xf0]  ;;  %v1097_v18 = vld [vmem:[%s1272_s22 + $0xd4] sm:$0xf]  ;;  %v1083_v28 = vld [vmem:[%s1272_s22 + $0x64] sm:$0xf] }
  0x20   : > { %v984_v19 = vld [vmem:[%s1272_s22 + $0xd8] sm:$0xf0]  ;;  %v923_v22 = vor.u32 %v1081_v16, %v920_v17  ;;  %v928_v29 = vld [vmem:[%s1272_s22 + $0x68] sm:$0xf0]  ;;  %v1099_v30 = vld [vmem:[%s1272_s22 + $0xe4] sm:$0xf] }
  0x21   : > { %557 = vmatpush.bf16.msra.mxu0 %v1105_v10  ;;  %1124 = vmatpush.bf16.msra.mxu2 %v1105_v10  ;;  %v915_v10 = vor.u32 %v1079_v4, %v912_v5  ;;  %v987_v23 = vor.u32 %v1097_v18, %v984_v19  ;;  %v992_v31 = vld [vmem:[%s1272_s22 + $0xe8] sm:$0xf0]  ;;  %v931_v34 = vor.u32 %v1083_v28, %v928_v29  ;;  %v1085_v40 = vld [vmem:[%s1272_s22 + $0x74] sm:$0xf]  ;;  %v936_v41 = vld [vmem:[%s1272_s22 + $0x78] sm:$0xf0] }
  0x22   : > { %646 = vmatpush.bf16.msra.mxu1 %v1113_v11  ;;  %1132 = vmatpush.bf16.msra.mxu3 %v1113_v11  ;;  %v979_v11 = vor.u32 %v1095_v6, %v976_v7  ;;  %v995_v35 = vor.u32 %v1099_v30, %v992_v31  ;;  %v1101_v42 = vld [vmem:[%s1272_s22 + $0xf4] sm:$0xf]  ;;  %v1000_v43 = vld [vmem:[%s1272_s22 + $0xf8] sm:$0xf0]  ;;  %v939_v46 = vor.u32 %v1085_v40, %v936_v41 }
  0x23   : > { %v1003_v47 = vor.u32 %v1101_v42, %v1000_v43 }
  0x25   : > { %558 = vmatpush.bf16.msra.mxu0 %v1104_v12  ;;  %1125 = vmatpush.bf16.msra.mxu2 %v1104_v12  ;;  %v918_v12 = vld [vmem:[%s1272_s22 + $0x50] sm:$0xf] }
  0x26   : > { %647 = vmatpush.bf16.msra.mxu1 %v1112_v13  ;;  %1133 = vmatpush.bf16.msra.mxu3 %v1112_v13  ;;  %v1082_v13 = vld [vmem:[%s1272_s22 + $0x54] sm:$0xf0] }
  0x27   : > { %v919_v20 = vor.u32 %v1082_v13, %v918_v12 }
  0x29   : > { %559 = vmatpush.bf16.msra.mxu0 %v1103_v14  ;;  %1126 = vmatpush.bf16.msra.mxu2 %v1103_v14  ;;  %v982_v14 = vld [vmem:[%s1272_s22 + $0xd0] sm:$0xf] }
  0x2a   : > { %648 = vmatpush.bf16.msra.mxu1 %v1111_v15  ;;  %1134 = vmatpush.bf16.msra.mxu3 %v1111_v15  ;;  %v1098_v15 = vld [vmem:[%s1272_s22 + $0xd4] sm:$0xf0] }
  0x2b   : > { %v983_v21 = vor.u32 %v1098_v15, %v982_v14 }
  0x2c   : > { %560 = vmatmul.bf16.vlgmr.msra.gmra.mxu0 %v879_v24  ;;  %600 = vmatmul.bf16.vlgmr.msra.gmra.mxu2 %v943_v25  ;;  %v926_v24 = vld [vmem:[%s1272_s22 + $0x60] sm:$0xf]  ;;  %v1084_v25 = vld [vmem:[%s1272_s22 + $0x64] sm:$0xf0] }
  0x2d   : > { %649 = vmatmul.bf16.vlgmr.msra.gmra.mxu1 %v883_v26  ;;  %689 = vmatmul.bf16.vlgmr.msra.gmra.mxu3 %v947_v27  ;;  %v990_v26 = vld [vmem:[%s1272_s22 + $0xe0] sm:$0xf]  ;;  %v1100_v27 = vld [vmem:[%s1272_s22 + $0xe4] sm:$0xf0]  ;;  %v927_v32 = vor.u32 %v1084_v25, %v926_v24 }
  0x2e   : > { %v991_v33 = vor.u32 %v1100_v27, %v990_v26 }
  0x3c   : > { %565 = vmatmul.bf16.gmra.mxu0 %v887_v36  ;;  %605 = vmatmul.bf16.gmra.mxu2 %v951_v37  ;;  %v934_v36 = vld [vmem:[%s1272_s22 + $0x70] sm:$0xf]  ;;  %v1086_v37 = vld [vmem:[%s1272_s22 + $0x74] sm:$0xf0] }
  0x3d   : > { %654 = vmatmul.bf16.gmra.mxu1 %v891_v38  ;;  %694 = vmatmul.bf16.gmra.mxu3 %v955_v39  ;;  %v998_v38 = vld [vmem:[%s1272_s22 + $0xf0] sm:$0xf]  ;;  %v1102_v39 = vld [vmem:[%s1272_s22 + $0xf4] sm:$0xf0]  ;;  %v935_v44 = vor.u32 %v1086_v37, %v934_v36 }
  0x3e   : > { %v999_v45 = vor.u32 %v1102_v39, %v998_v38 }
  0x4c   : > { %570 = vmatmul.bf16.gmra.mxu0 %v895_v48  ;;  %610 = vmatmul.bf16.gmra.mxu2 %v959_v49  ;;  %v1350_v48 = vld [vmem:[%s1434_s2] ss:$0 sm:$0xff] }
  0x4d   : > { %659 = vmatmul.bf16.gmra.mxu1 %v899_v50  ;;  %699 = vmatmul.bf16.gmra.mxu3 %v963_v51 }
  0x5c   : > { %575 = vmatmul.bf16.gmra.mxu0 %v903_v60  ;;  %615 = vmatmul.bf16.gmra.mxu2 %v967_v61 }
  0x5d   : > { %664 = vmatmul.bf16.gmra.mxu1 %v907_v62  ;;  %704 = vmatmul.bf16.gmra.mxu3 %v971_v63 }
  0x6c   : > { %580 = vmatmul.bf16.gmra.mxu0 %v911_v8  ;;  %620 = vmatmul.bf16.gmra.mxu2 %v975_v9 }
  0x6d   : > { %669 = vmatmul.bf16.gmra.mxu1 %v915_v10  ;;  %709 = vmatmul.bf16.gmra.mxu3 %v979_v11 }
  0x7c   : > { %585 = vmatmul.bf16.gmra.mxu0 %v919_v20  ;;  %625 = vmatmul.bf16.gmra.mxu2 %v983_v21 }
  0x7d   : > { %674 = vmatmul.bf16.gmra.mxu1 %v923_v22  ;;  %714 = vmatmul.bf16.gmra.mxu3 %v987_v23 }
  0x8c   : > { %590 = vmatmul.bf16.gmra.mxu0 %v927_v32  ;;  %630 = vmatmul.bf16.gmra.mxu2 %v991_v33 }
  0x8d   : > { %679 = vmatmul.bf16.gmra.mxu1 %v931_v34  ;;  %719 = vmatmul.bf16.gmra.mxu3 %v995_v35 }
  0x9c   : > { %595 = vmatmul.bf16.gmra.mxu0 %v935_v44  ;;  %635 = vmatmul.bf16.gmra.mxu2 %v999_v45 }
  0x9d   : > { %684 = vmatmul.bf16.gmra.mxu1 %v939_v46  ;;  %724 = vmatmul.bf16.gmra.mxu3 %v1003_v47 }
  0xa9   : > { %v561_v49 = vpop.f32.mrf.mxu0 }
  0xaa   : > { %v562_v50 = vadd.f32 %v1350_v48, %v561_v49  ;;  %v650_v51 = vpop.f32.mrf.mxu1 }
  0xac   : > { %v651_v52 = vadd.f32 %v650_v51, %v562_v50 }
  0xae   : > { %730 = vst [vmem:[%s1358_s7] sm:$0xff] %v651_v52 }
  0xaf   : > { %v601_v53 = vpop.f32.mrf.mxu2 }
  0xb0   : > { %v602_v54 = vadd.f32 %v1350_v48, %v601_v53  ;;  %v690_v55 = vpop.f32.mrf.mxu3 }
  0xb1   : > { %v563_v56 = vpop.f32.mrf.mxu0 }
  0xb2   : > { %v691_v57 = vadd.f32 %v690_v55, %v602_v54  ;;  %v564_v58 = vadd.f32 %v1350_v48, %v563_v56  ;;  %v652_v59 = vpop.f32.mrf.mxu1 }
  0xb4   : > { %746 = vst [vmem:[%s1358_s7 + $0x80] sm:$0xff] %v691_v57  ;;  %v653_v60 = vadd.f32 %v652_v59, %v564_v58 }
  0xb6   : > { %731 = vst [vmem:[%s1358_s7 + $0x8] sm:$0xff] %v653_v60 }
  0xb7   : > { %v603_v61 = vpop.f32.mrf.mxu2 }
  0xb8   : > { %v604_v62 = vadd.f32 %v1350_v48, %v603_v61  ;;  %v692_v63 = vpop.f32.mrf.mxu3 }
  0xb9   : > { %v566_v0 = vpop.f32.mrf.mxu0 }
  0xba   : > { %v693_v1 = vadd.f32 %v692_v63, %v604_v62  ;;  %v567_v2 = vadd.f32 %v1350_v48, %v566_v0  ;;  %v655_v3 = vpop.f32.mrf.mxu1 }
  0xbc   : > { %747 = vst [vmem:[%s1358_s7 + $0x88] sm:$0xff] %v693_v1  ;;  %v656_v4 = vadd.f32 %v655_v3, %v567_v2 }
  0xbe   : > { %732 = vst [vmem:[%s1358_s7 + $0x10] sm:$0xff] %v656_v4 }
  0xbf   : > { %v606_v5 = vpop.f32.mrf.mxu2 }
  0xc0   : > { %v607_v6 = vadd.f32 %v1350_v48, %v606_v5  ;;  %v695_v7 = vpop.f32.mrf.mxu3 }
  0xc1   : > { %v568_v8 = vpop.f32.mrf.mxu0 }
  0xc2   : > { %v696_v9 = vadd.f32 %v695_v7, %v607_v6  ;;  %v569_v10 = vadd.f32 %v1350_v48, %v568_v8  ;;  %v657_v11 = vpop.f32.mrf.mxu1 }
  0xc4   : > { %748 = vst [vmem:[%s1358_s7 + $0x90] sm:$0xff] %v696_v9  ;;  %v658_v12 = vadd.f32 %v657_v11, %v569_v10 }
  0xc6   : > { %733 = vst [vmem:[%s1358_s7 + $0x18] sm:$0xff] %v658_v12 }
  0xc7   : > { %v608_v13 = vpop.f32.mrf.mxu2 }
  0xc8   : > { %v609_v14 = vadd.f32 %v1350_v48, %v608_v13  ;;  %v697_v15 = vpop.f32.mrf.mxu3 }
  0xc9   : > { %v571_v16 = vpop.f32.mrf.mxu0 }
  0xca   : > { %v698_v17 = vadd.f32 %v697_v15, %v609_v14  ;;  %v572_v18 = vadd.f32 %v1350_v48, %v571_v16  ;;  %v660_v19 = vpop.f32.mrf.mxu1 }
  0xcc   : > { %749 = vst [vmem:[%s1358_s7 + $0x98] sm:$0xff] %v698_v17  ;;  %v661_v20 = vadd.f32 %v660_v19, %v572_v18 }
  0xce   : > { %734 = vst [vmem:[%s1358_s7 + $0x20] sm:$0xff] %v661_v20 }
  0xcf   : > { %v611_v21 = vpop.f32.mrf.mxu2 }
  0xd0   : > { %v612_v22 = vadd.f32 %v1350_v48, %v611_v21  ;;  %v700_v23 = vpop.f32.mrf.mxu3 }
  0xd1   : > { %v573_v24 = vpop.f32.mrf.mxu0 }
  0xd2   : > { %v701_v25 = vadd.f32 %v700_v23, %v612_v22  ;;  %v574_v26 = vadd.f32 %v1350_v48, %v573_v24  ;;  %v662_v27 = vpop.f32.mrf.mxu1 }
  0xd4   : > { %750 = vst [vmem:[%s1358_s7 + $0xa0] sm:$0xff] %v701_v25  ;;  %v663_v28 = vadd.f32 %v662_v27, %v574_v26 }
  0xd6   : > { %735 = vst [vmem:[%s1358_s7 + $0x28] sm:$0xff] %v663_v28 }
  0xd7   : > { %v613_v29 = vpop.f32.mrf.mxu2 }
  0xd8   : > { %v614_v30 = vadd.f32 %v1350_v48, %v613_v29  ;;  %v702_v31 = vpop.f32.mrf.mxu3 }
  0xd9   : > { %v576_v32 = vpop.f32.mrf.mxu0 }
  0xda   : > { %v703_v33 = vadd.f32 %v702_v31, %v614_v30  ;;  %v577_v34 = vadd.f32 %v1350_v48, %v576_v32  ;;  %v665_v35 = vpop.f32.mrf.mxu1 }
  0xdc   : > { %751 = vst [vmem:[%s1358_s7 + $0xa8] sm:$0xff] %v703_v33  ;;  %v666_v36 = vadd.f32 %v665_v35, %v577_v34 }
  0xde   : > { %736 = vst [vmem:[%s1358_s7 + $0x30] sm:$0xff] %v666_v36 }
  0xdf   : > { %v616_v37 = vpop.f32.mrf.mxu2 }
  0xe0   : > { %v617_v38 = vadd.f32 %v1350_v48, %v616_v37  ;;  %v705_v39 = vpop.f32.mrf.mxu3 }
  0xe1   : > { %v578_v40 = vpop.f32.mrf.mxu0 }
  0xe2   : > { %v706_v41 = vadd.f32 %v705_v39, %v617_v38  ;;  %v579_v42 = vadd.f32 %v1350_v48, %v578_v40  ;;  %v667_v43 = vpop.f32.mrf.mxu1 }
  0xe4   : > { %752 = vst [vmem:[%s1358_s7 + $0xb0] sm:$0xff] %v706_v41  ;;  %v668_v44 = vadd.f32 %v667_v43, %v579_v42 }
  0xe6   : > { %737 = vst [vmem:[%s1358_s7 + $0x38] sm:$0xff] %v668_v44 }
  0xe7   : > { %v618_v45 = vpop.f32.mrf.mxu2 }
  0xe8   : > { %v619_v46 = vadd.f32 %v1350_v48, %v618_v45  ;;  %v707_v47 = vpop.f32.mrf.mxu3 }
  0xe9   : > { %v581_v49 = vpop.f32.mrf.mxu0 }
  0xea   : > { %v708_v50 = vadd.f32 %v707_v47, %v619_v46  ;;  %v582_v51 = vadd.f32 %v1350_v48, %v581_v49  ;;  %v670_v52 = vpop.f32.mrf.mxu1 }
  0xec   : > { %753 = vst [vmem:[%s1358_s7 + $0xb8] sm:$0xff] %v708_v50  ;;  %v671_v53 = vadd.f32 %v670_v52, %v582_v51 }
  0xee   : > { %738 = vst [vmem:[%s1358_s7 + $0x40] sm:$0xff] %v671_v53 }
  0xef   : > { %v621_v54 = vpop.f32.mrf.mxu2 }
  0xf0   : > { %v622_v55 = vadd.f32 %v1350_v48, %v621_v54  ;;  %v710_v56 = vpop.f32.mrf.mxu3 }
  0xf1   : > { %v583_v57 = vpop.f32.mrf.mxu0 }
  0xf2   : > { %v711_v58 = vadd.f32 %v710_v56, %v622_v55  ;;  %v584_v59 = vadd.f32 %v1350_v48, %v583_v57  ;;  %v672_v60 = vpop.f32.mrf.mxu1 }
  0xf4   : > { %754 = vst [vmem:[%s1358_s7 + $0xc0] sm:$0xff] %v711_v58  ;;  %v673_v61 = vadd.f32 %v672_v60, %v584_v59 }
  0xf6   : > { %739 = vst [vmem:[%s1358_s7 + $0x48] sm:$0xff] %v673_v61 }
  0xf7   : > { %v623_v62 = vpop.f32.mrf.mxu2 }
  0xf8   : > { %v624_v63 = vadd.f32 %v1350_v48, %v623_v62  ;;  %v712_v0 = vpop.f32.mrf.mxu3 }
  0xf9   : > { %v586_v1 = vpop.f32.mrf.mxu0 }
  0xfa   : > { %v713_v2 = vadd.f32 %v712_v0, %v624_v63  ;;  %v587_v3 = vadd.f32 %v1350_v48, %v586_v1  ;;  %v675_v4 = vpop.f32.mrf.mxu1 }
  0xfc   : > { %755 = vst [vmem:[%s1358_s7 + $0xc8] sm:$0xff] %v713_v2  ;;  %v676_v5 = vadd.f32 %v675_v4, %v587_v3 }
  0xfe   : > { %740 = vst [vmem:[%s1358_s7 + $0x50] sm:$0xff] %v676_v5 }
  0xff   : > { %v626_v6 = vpop.f32.mrf.mxu2 }
 0x100   : > { %v627_v7 = vadd.f32 %v1350_v48, %v626_v6  ;;  %v715_v8 = vpop.f32.mrf.mxu3 }
 0x101   : > { %v588_v9 = vpop.f32.mrf.mxu0 }
 0x102   : > { %v716_v10 = vadd.f32 %v715_v8, %v627_v7  ;;  %v589_v11 = vadd.f32 %v1350_v48, %v588_v9  ;;  %v677_v12 = vpop.f32.mrf.mxu1 }
 0x104   : > { %756 = vst [vmem:[%s1358_s7 + $0xd0] sm:$0xff] %v716_v10  ;;  %v678_v13 = vadd.f32 %v677_v12, %v589_v11 }
 0x106   : > { %741 = vst [vmem:[%s1358_s7 + $0x58] sm:$0xff] %v678_v13 }
 0x107   : > { %v628_v14 = vpop.f32.mrf.mxu2 }
 0x108   : > { %v629_v15 = vadd.f32 %v1350_v48, %v628_v14  ;;  %v717_v16 = vpop.f32.mrf.mxu3 }
 0x109   : > { %v591_v17 = vpop.f32.mrf.mxu0 }
 0x10a   : > { %v718_v18 = vadd.f32 %v717_v16, %v629_v15  ;;  %v592_v19 = vadd.f32 %v1350_v48, %v591_v17  ;;  %v680_v20 = vpop.f32.mrf.mxu1 }
 0x10c   : > { %757 = vst [vmem:[%s1358_s7 + $0xd8] sm:$0xff] %v718_v18  ;;  %v681_v21 = vadd.f32 %v680_v20, %v592_v19 }
 0x10e   : > { %742 = vst [vmem:[%s1358_s7 + $0x60] sm:$0xff] %v681_v21 }
 0x10f   : > { %v631_v22 = vpop.f32.mrf.mxu2 }
 0x110   : > { %v632_v23 = vadd.f32 %v1350_v48, %v631_v22  ;;  %v720_v24 = vpop.f32.mrf.mxu3 }
 0x111   : > { %v593_v25 = vpop.f32.mrf.mxu0 }
 0x112   : > { %v721_v26 = vadd.f32 %v720_v24, %v632_v23  ;;  %v594_v27 = vadd.f32 %v1350_v48, %v593_v25  ;;  %v682_v28 = vpop.f32.mrf.mxu1 }
 0x114   : > { %758 = vst [vmem:[%s1358_s7 + $0xe0] sm:$0xff] %v721_v26  ;;  %v683_v29 = vadd.f32 %v682_v28, %v594_v27 }
 0x116   : > { %743 = vst [vmem:[%s1358_s7 + $0x68] sm:$0xff] %v683_v29 }
 0x117   : > { %v633_v30 = vpop.f32.mrf.mxu2 }
 0x118   : > { %v634_v31 = vadd.f32 %v1350_v48, %v633_v30  ;;  %v722_v32 = vpop.f32.mrf.mxu3 }
 0x119   : > { %v596_v33 = vpop.f32.mrf.mxu0 }
 0x11a   : > { %v723_v34 = vadd.f32 %v722_v32, %v634_v31  ;;  %v597_v35 = vadd.f32 %v1350_v48, %v596_v33  ;;  %v685_v36 = vpop.f32.mrf.mxu1 }
 0x11c   : > { %759 = vst [vmem:[%s1358_s7 + $0xe8] sm:$0xff] %v723_v34  ;;  %v686_v37 = vadd.f32 %v685_v36, %v597_v35 }
 0x11e   : > { %744 = vst [vmem:[%s1358_s7 + $0x70] sm:$0xff] %v686_v37 }
 0x11f   : > { %v636_v38 = vpop.f32.mrf.mxu2 }
 0x120   : > { %v637_v39 = vadd.f32 %v1350_v48, %v636_v38  ;;  %v725_v40 = vpop.f32.mrf.mxu3 }
 0x121   : > { %v598_v41 = vpop.f32.mrf.mxu0 }
 0x122   : > { %v726_v42 = vadd.f32 %v725_v40, %v637_v39  ;;  %v599_v43 = vadd.f32 %v1350_v48, %v598_v41  ;;  %v687_v44 = vpop.f32.mrf.mxu1 }
 0x124   : > { %760 = vst [vmem:[%s1358_s7 + $0xf0] sm:$0xff] %v726_v42  ;;  %v688_v45 = vadd.f32 %v687_v44, %v599_v43 }
 0x126   : > { %745 = vst [vmem:[%s1358_s7 + $0x78] sm:$0xff] %v688_v45 }
 0x127   : > { %v638_v46 = vpop.f32.mrf.mxu2 }
 0x128   : > { %v639_v47 = vadd.f32 %v1350_v48, %v638_v46  ;;  %v727_v49 = vpop.f32.mrf.mxu3 }
 0x12a   : > { %v728_v50 = vadd.f32 %v727_v49, %v639_v47 }
 0x12c   : > { %761 = vst [vmem:[%s1358_s7 + $0xf8] sm:$0xff] %v728_v50 }
 0x12d PF: > { %s13_s14 = sadd.s32 1, %s1182_s14   ;;  %s1436_s12 = smov %s1178_s13 }
 0x12e   : > { %p10_p5 = scmp.ge.s32.totalorder %s13_s14, 6   ;;  %s1437_s13 = smov %s1439_s15 }
 0x130   :  { %12 = sbr.rel (!%p10_p5) target bundleno = 2 (0x2), region = 68 }

// kernel: aesfa_forward.19
= control target key start
LH: loop header
LB: loop body
LE: loop exit
PB: predicated region body
PF: predicated region fallthrough
CT: control target
= control target key end

     0   :  { %s2901_s1 = inlined_call_operand.vmem [shape: bf16[640,128], index: 1, kind: input, shape index: {}]   ;;  %s2902_s2 = inlined_call_operand.vmem [shape: f32[1,128], index: 2, kind: input, shape index: {}]   ;;  %s2903_s0 = inlined_call_operand.vmem [shape: bf16[256,640], index: 0, kind: input, shape index: {}]   ;;  %s2904_s3 = inlined_call_operand.vmem [shape: f32[256,128], index: 3, kind: output, shape index: {}]  }
   0x1   :  { %v1994_v0 = vld [vmem:[%s2901_s1 + $0x38] sm:$0xff]  ;;  %v1993_v1 = vld [vmem:[%s2901_s1 + $0x30] sm:$0xff]  ;;  %v1992_v2 = vld [vmem:[%s2901_s1 + $0x28] sm:$0xff] }
   0x2   :  { %2027 = vmatpush.bf16.msra.mxu1 %v1994_v0  ;;  %2028 = vmatpush.bf16.msra.mxu2 %v1994_v0  ;;  %v1991_v3 = vld [vmem:[%s2901_s1 + $0x20] sm:$0xff]  ;;  %v1990_v4 = vld [vmem:[%s2901_s1 + $0x18] sm:$0xff]  ;;  %v1989_v5 = vld [vmem:[%s2901_s1 + $0x10] sm:$0xff] }
   0x3   :  { %2029 = vmatpush.bf16.msra.mxu3 %v1994_v0  ;;  %850 = vmatpush.bf16.msra.mxu0 %v1994_v0  ;;  %v1988_v6 = vld [vmem:[%s2901_s1 + $0x8] sm:$0xff]  ;;  %v1987_v7 = vld [vmem:[%s2901_s1] sm:$0xff]  ;;  %v1929_v9 = vld [vmem:[%s2903_s0 + $0xb0] sm:$0xf0] }
   0x4   :  { %v1509_v8 = vld [vmem:[%s2903_s0 + $0xa0] sm:$0xf]  ;;  %v1949_v11 = vld [vmem:[%s2903_s0 + $0x150] sm:$0xf0]  ;;  %v2010_v16 = vld [vmem:[%s2901_s1 + $0xb8] sm:$0xff] }
   0x5   :  { %v1589_v10 = vld [vmem:[%s2903_s0 + $0x140] sm:$0xf]  ;;  %v1969_v13 = vld [vmem:[%s2903_s0 + $0x1f0] sm:$0xf0]  ;;  %v2018_v17 = vld [vmem:[%s2901_s1 + $0xf8] sm:$0xff]  ;;  %v1510_v18 = vor.u32 %v1929_v9, %v1509_v8 }
   0x6   :  { %2030 = vmatpush.bf16.msra.mxu1 %v1993_v1  ;;  %2031 = vmatpush.bf16.msra.mxu2 %v1993_v1  ;;  %v1669_v12 = vld [vmem:[%s2903_s0 + $0x1e0] sm:$0xf]  ;;  %v1909_v15 = vld [vmem:[%s2903_s0 + $0x10] sm:$0xf0]  ;;  %v1590_v19 = vor.u32 %v1949_v11, %v1589_v10  ;;  %v2002_v22 = vld [vmem:[%s2901_s1 + $0x78] sm:$0xff] }
   0x7   :  { %2032 = vmatpush.bf16.msra.mxu3 %v1993_v1  ;;  %851 = vmatpush.bf16.msra.mxu0 %v1993_v1  ;;  %v1429_v14 = vld [vmem:[%s2903_s0] sm:$0xf]  ;;  %v1670_v20 = vor.u32 %v1969_v13, %v1669_v12  ;;  %v2026_v23 = vld [vmem:[%s2901_s1 + $0x138] sm:$0xff]  ;;  %v2009_v24 = vld [vmem:[%s2901_s1 + $0xb0] sm:$0xff] }
   0x8   :  { %v1430_v21 = vor.u32 %v1909_v15, %v1429_v14  ;;  %v2017_v25 = vld [vmem:[%s2901_s1 + $0xf0] sm:$0xff]  ;;  %v2008_v28 = vld [vmem:[%s2901_s1 + $0xa8] sm:$0xff]  ;;  %v2007_v33 = vld [vmem:[%s2901_s1 + $0xa0] sm:$0xff] }
   0x9   :  { %v2001_v26 = vld [vmem:[%s2901_s1 + $0x70] sm:$0xff]  ;;  %v2016_v29 = vld [vmem:[%s2901_s1 + $0xe8] sm:$0xff]  ;;  %v2015_v34 = vld [vmem:[%s2901_s1 + $0xe0] sm:$0xff] }
   0xa   :  { %2033 = vmatpush.bf16.msra.mxu1 %v1992_v2  ;;  %2034 = vmatpush.bf16.msra.mxu2 %v1992_v2  ;;  %v2025_v27 = vld [vmem:[%s2901_s1 + $0x130] sm:$0xff]  ;;  %v2000_v30 = vld [vmem:[%s2901_s1 + $0x68] sm:$0xff]  ;;  %v1934_v35 = vld [vmem:[%s2903_s0 + $0xd8] sm:$0xf0] }
   0xb   :  { %2035 = vmatpush.bf16.msra.mxu3 %v1992_v2  ;;  %852 = vmatpush.bf16.msra.mxu0 %v1992_v2  ;;  %v2024_v31 = vld [vmem:[%s2901_s1 + $0x128] sm:$0xff]  ;;  %v1954_v37 = vld [vmem:[%s2903_s0 + $0x178] sm:$0xf0]  ;;  %v1999_v42 = vld [vmem:[%s2901_s1 + $0x60] sm:$0xff] }
   0xc   :  { %v1529_v32 = vld [vmem:[%s2903_s0 + $0xc8] sm:$0xf]  ;;  %v1974_v39 = vld [vmem:[%s2903_s0 + $0x218] sm:$0xf0]  ;;  %v2023_v43 = vld [vmem:[%s2901_s1 + $0x120] sm:$0xff] }
   0xd   :  { %v1609_v36 = vld [vmem:[%s2903_s0 + $0x168] sm:$0xf]  ;;  %v1914_v41 = vld [vmem:[%s2903_s0 + $0x38] sm:$0xf0]  ;;  %v1530_v46 = vor.u32 %v1934_v35, %v1529_v32  ;;  %v2005_v52 = vld [vmem:[%s2901_s1 + $0x90] sm:$0xff] }
   0xe   :  { %2036 = vmatpush.bf16.msra.mxu1 %v1991_v3  ;;  %2037 = vmatpush.bf16.msra.mxu2 %v1991_v3  ;;  %v1689_v38 = vld [vmem:[%s2903_s0 + $0x208] sm:$0xf]  ;;  %v2006_v44 = vld [vmem:[%s2901_s1 + $0x98] sm:$0xff]  ;;  %v1610_v47 = vor.u32 %v1954_v37, %v1609_v36  ;;  %v2013_v53 = vld [vmem:[%s2901_s1 + $0xd0] sm:$0xff] }
   0xf   :  { %2038 = vmatpush.bf16.msra.mxu3 %v1991_v3  ;;  %853 = vmatpush.bf16.msra.mxu0 %v1991_v3  ;;  %v1449_v40 = vld [vmem:[%s2903_s0 + $0x28] sm:$0xf]  ;;  %v2014_v45 = vld [vmem:[%s2901_s1 + $0xd8] sm:$0xff]  ;;  %v1690_v48 = vor.u32 %v1974_v39, %v1689_v38  ;;  %v1997_v54 = vld [vmem:[%s2901_s1 + $0x50] sm:$0xff] }
  0x10   :  { %v1450_v49 = vor.u32 %v1914_v41, %v1449_v40  ;;  %v1998_v50 = vld [vmem:[%s2901_s1 + $0x58] sm:$0xff]  ;;  %v2021_v55 = vld [vmem:[%s2901_s1 + $0x110] sm:$0xff]  ;;  %v2004_v56 = vld [vmem:[%s2901_s1 + $0x88] sm:$0xff] }
  0x11   :  { %v2022_v51 = vld [vmem:[%s2901_s1 + $0x118] sm:$0xff]  ;;  %v2012_v57 = vld [vmem:[%s2901_s1 + $0xc8] sm:$0xff]  ;;  %v1549_v60 = vld [vmem:[%s2903_s0 + $0xf0] sm:$0xf] }
  0x12   :  { %2039 = vmatpush.bf16.msra.mxu1 %v1990_v4  ;;  %2040 = vmatpush.bf16.msra.mxu2 %v1990_v4  ;;  %v1996_v58 = vld [vmem:[%s2901_s1 + $0x48] sm:$0xff]  ;;  %v2003_v61 = vld [vmem:[%s2901_s1 + $0x80] sm:$0xff]  ;;  %v1629_v0 = vld [vmem:[%s2903_s0 + $0x190] sm:$0xf] }
  0x13   :  { %2041 = vmatpush.bf16.msra.mxu3 %v1990_v4  ;;  %854 = vmatpush.bf16.msra.mxu0 %v1990_v4  ;;  %v2020_v59 = vld [vmem:[%s2901_s1 + $0x108] sm:$0xff]  ;;  %v2011_v62 = vld [vmem:[%s2901_s1 + $0xc0] sm:$0xff]  ;;  %v1709_v2 = vld [vmem:[%s2903_s0 + $0x230] sm:$0xf] }
  0x14   :  { %v1939_v63 = vld [vmem:[%s2903_s0 + $0x100] sm:$0xf0]  ;;  %v1469_v4 = vld [vmem:[%s2903_s0 + $0x50] sm:$0xf]  ;;  %v1569_v12 = vld [vmem:[%s2903_s0 + $0x118] sm:$0xf] }
  0x15   :  { %v1959_v1 = vld [vmem:[%s2903_s0 + $0x1a0] sm:$0xf0]  ;;  %v1550_v8 = vor.u32 %v1939_v63, %v1549_v60  ;;  %v1944_v13 = vld [vmem:[%s2903_s0 + $0x128] sm:$0xf0]  ;;  %v1649_v14 = vld [vmem:[%s2903_s0 + $0x1b8] sm:$0xf] }
  0x16   :  { %2042 = vmatpush.bf16.msra.mxu1 %v1989_v5  ;;  %2043 = vmatpush.bf16.msra.mxu2 %v1989_v5  ;;  %v1979_v3 = vld [vmem:[%s2903_s0 + $0x240] sm:$0xf0]  ;;  %v1630_v9 = vor.u32 %v1959_v1, %v1629_v0  ;;  %v1964_v15 = vld [vmem:[%s2903_s0 + $0x1c8] sm:$0xf0]  ;;  %v1451_v37 = vld [vmem:[%s2903_s0 + $0x3c] sm:$0xf0] }
  0x17   :  { %2044 = vmatpush.bf16.msra.mxu3 %v1989_v5  ;;  %855 = vmatpush.bf16.msra.mxu0 %v1989_v5  ;;  %v1919_v5 = vld [vmem:[%s2903_s0 + $0x60] sm:$0xf0]  ;;  %v1710_v10 = vor.u32 %v1979_v3, %v1709_v2  ;;  %v1912_v36 = vld [vmem:[%s2903_s0 + $0x2c] sm:$0xf]  ;;  %v1457_v38 = vld [vmem:[%s2903_s0 + $0x30] sm:$0xf] }
  0x18   :  { %v1470_v11 = vor.u32 %v1919_v5, %v1469_v4  ;;  %v1915_v39 = vld [vmem:[%s2903_s0 + $0x40] sm:$0xf0]  ;;  %v1913_v40 = vld [vmem:[%s2903_s0 + $0x34] sm:$0xf]  ;;  %v1459_v41 = vld [vmem:[%s2903_s0 + $0x44] sm:$0xf0] }
  0x19   :  { %v1922_v60 = vld [vmem:[%s2903_s0 + $0x7c] sm:$0xf]  ;;  %v1925_v63 = vld [vmem:[%s2903_s0 + $0x90] sm:$0xf0]  ;;  %v1923_v0 = vld [vmem:[%s2903_s0 + $0x84] sm:$0xf] }
  0x1a   :  { %2045 = vmatpush.bf16.msra.mxu1 %v1988_v6  ;;  %2046 = vmatpush.bf16.msra.mxu2 %v1988_v6  ;;  %v1499_v1 = vld [vmem:[%s2903_s0 + $0x94] sm:$0xf0]  ;;  %v1505_v2 = vld [vmem:[%s2903_s0 + $0x88] sm:$0xf]  ;;  %v1926_v3 = vld [vmem:[%s2903_s0 + $0x98] sm:$0xf0] }
  0x1b   :  { %2047 = vmatpush.bf16.msra.mxu3 %v1988_v6  ;;  %856 = vmatpush.bf16.msra.mxu0 %v1988_v6  ;;  %v1995_v6 = vld [vmem:[%s2901_s1 + $0x40] sm:$0xff] }
  0x1e   :  { %2048 = vmatpush.bf16.msra.mxu1 %v1987_v7  ;;  %2049 = vmatpush.bf16.msra.mxu2 %v1987_v7 }
  0x1f   :  { %2050 = vmatpush.bf16.msra.mxu3 %v1987_v7  ;;  %857 = vmatpush.bf16.msra.mxu0 %v1987_v7  ;;  %v2019_v7 = vld [vmem:[%s2901_s1 + $0x100] sm:$0xff] }
  0x21   :  { %878 = vmatmul.bf16.vlgmr.msra.gmra.mxu1 %v1510_v18  ;;  %898 = vmatmul.bf16.vlgmr.msra.gmra.mxu2 %v1590_v19  ;;  %v1489_v18 = vld [vmem:[%s2903_s0 + $0x78] sm:$0xf]  ;;  %v1924_v19 = vld [vmem:[%s2903_s0 + $0x88] sm:$0xf0] }
  0x22   :  { %1028 = vmatpush.bf16.msrb.mxu2 %v2010_v16  ;;  %918 = vmatmul.bf16.vlgmr.msra.gmra.mxu3 %v1670_v20  ;;  %v1729_v16 = vld [vmem:[%s2903_s0 + $0x258] sm:$0xf]  ;;  %v1570_v20 = vor.u32 %v1944_v13, %v1569_v12  ;;  %v1930_v12 = vld [vmem:[%s2903_s0 + $0xb8] sm:$0xf0]  ;;  %v1928_v13 = vld [vmem:[%s2903_s0 + $0xac] sm:$0xf] }
  0x23   :  { %1117 = vmatpush.bf16.msrb.mxu3 %v2018_v17  ;;  %858 = vmatmul.bf16.vlgmr.msra.gmra.mxu0 %v1430_v21  ;;  %v1984_v17 = vld [vmem:[%s2903_s0 + $0x268] sm:$0xf0]  ;;  %v1650_v21 = vor.u32 %v1964_v15, %v1649_v14  ;;  %v1519_v14 = vld [vmem:[%s2903_s0 + $0xbc] sm:$0xf0]  ;;  %v1525_v15 = vld [vmem:[%s2903_s0 + $0xb0] sm:$0xf] }
  0x24   :  { %939 = vmatpush.bf16.msrb.mxu1 %v2002_v22  ;;  %1206 = vmatpush.bf16.msrb.mxu0 %v2026_v23  ;;  %v1730_v22 = vor.u32 %v1984_v17, %v1729_v16  ;;  %v1490_v23 = vor.u32 %v1924_v19, %v1489_v18  ;;  %v1931_v16 = vld [vmem:[%s2903_s0 + $0xc0] sm:$0xf0] }
  0x26   :  { %1029 = vmatpush.bf16.msrb.mxu2 %v2009_v24  ;;  %v1907_v24 = vld [vmem:[%s2903_s0 + $0x4] sm:$0xf] }
  0x27   :  { %1118 = vmatpush.bf16.msrb.mxu3 %v2017_v25  ;;  %v1431_v25 = vld [vmem:[%s2903_s0 + $0x14] sm:$0xf0] }
  0x28   :  { %940 = vmatpush.bf16.msrb.mxu1 %v2001_v26  ;;  %1207 = vmatpush.bf16.msrb.mxu0 %v2025_v27  ;;  %v1437_v26 = vld [vmem:[%s2903_s0 + $0x8] sm:$0xf]  ;;  %v1910_v27 = vld [vmem:[%s2903_s0 + $0x18] sm:$0xf0]  ;;  %v1434_v32 = vor.u32 %v1907_v24, %v1431_v25 }
  0x2a   :  { %1030 = vmatpush.bf16.msrb.mxu2 %v2008_v28  ;;  %v1908_v28 = vld [vmem:[%s2903_s0 + $0xc] sm:$0xf] }
  0x2b   :  { %1119 = vmatpush.bf16.msrb.mxu3 %v2016_v29  ;;  %v1439_v29 = vld [vmem:[%s2903_s0 + $0x1c] sm:$0xf0] }
  0x2c   :  { %941 = vmatpush.bf16.msrb.mxu1 %v2000_v30  ;;  %1208 = vmatpush.bf16.msrb.mxu0 %v2024_v31  ;;  %v1445_v30 = vld [vmem:[%s2903_s0 + $0x10] sm:$0xf]  ;;  %v1911_v31 = vld [vmem:[%s2903_s0 + $0x20] sm:$0xf0] }
  0x2d   :  { %v1446_v35 = vor.u32 %v1911_v31, %v1445_v30  ;;  %v1932_v31 = vld [vmem:[%s2903_s0 + $0xcc] sm:$0xf] }
  0x2e   :  { %1031 = vmatpush.bf16.msrb.mxu2 %v2007_v33  ;;  %v1438_v33 = vor.u32 %v1910_v27, %v1437_v26 }
  0x2f   :  { %1120 = vmatpush.bf16.msrb.mxu3 %v2015_v34  ;;  %v1442_v34 = vor.u32 %v1908_v28, %v1439_v29 }
  0x30   :  { %942 = vmatpush.bf16.msrb.mxu1 %v1999_v42  ;;  %1209 = vmatpush.bf16.msrb.mxu0 %v2023_v43  ;;  %v1465_v42 = vld [vmem:[%s2903_s0 + $0x38] sm:$0xf]  ;;  %v1916_v43 = vld [vmem:[%s2903_s0 + $0x48] sm:$0xf0] }
  0x31   :  { %883 = vmatmul.bf16.gmra.mxu1 %v1530_v46  ;;  %903 = vmatmul.bf16.gmra.mxu2 %v1610_v47  ;;  %v1462_v46 = vor.u32 %v1913_v40, %v1459_v41  ;;  %v1466_v47 = vor.u32 %v1916_v43, %v1465_v42 }
  0x32   :  { %1032 = vmatpush.bf16.msrb.mxu2 %v2006_v44  ;;  %923 = vmatmul.bf16.gmra.mxu3 %v1690_v48  ;;  %v1454_v44 = vor.u32 %v1912_v36, %v1451_v37  ;;  %v1917_v48 = vld [vmem:[%s2903_s0 + $0x54] sm:$0xf]  ;;  %v1539_v36 = vld [vmem:[%s2903_s0 + $0xe4] sm:$0xf0]  ;;  %v1545_v37 = vld [vmem:[%s2903_s0 + $0xd8] sm:$0xf] }
  0x33   :  { %1121 = vmatpush.bf16.msrb.mxu3 %v2014_v45  ;;  %863 = vmatmul.bf16.gmra.mxu0 %v1450_v49  ;;  %v1458_v45 = vor.u32 %v1915_v39, %v1457_v38  ;;  %v1471_v49 = vld [vmem:[%s2903_s0 + $0x64] sm:$0xf0]  ;;  %v1936_v38 = vld [vmem:[%s2903_s0 + $0xe8] sm:$0xf0] }
  0x34   :  { %943 = vmatpush.bf16.msrb.mxu1 %v1998_v50  ;;  %1210 = vmatpush.bf16.msrb.mxu0 %v2022_v51  ;;  %v1477_v50 = vld [vmem:[%s2903_s0 + $0x58] sm:$0xf]  ;;  %v1920_v51 = vld [vmem:[%s2903_s0 + $0x68] sm:$0xf0] }
  0x36   :  { %1033 = vmatpush.bf16.msrb.mxu2 %v2005_v52  ;;  %v1918_v52 = vld [vmem:[%s2903_s0 + $0x5c] sm:$0xf] }
  0x37   :  { %1122 = vmatpush.bf16.msrb.mxu3 %v2013_v53  ;;  %v1479_v53 = vld [vmem:[%s2903_s0 + $0x6c] sm:$0xf0] }
  0x38   :  { %944 = vmatpush.bf16.msrb.mxu1 %v1997_v54  ;;  %1211 = vmatpush.bf16.msrb.mxu0 %v2021_v55  ;;  %v1485_v54 = vld [vmem:[%s2903_s0 + $0x60] sm:$0xf]  ;;  %v1921_v55 = vld [vmem:[%s2903_s0 + $0x70] sm:$0xf0] }
  0x3a   :  { %1034 = vmatpush.bf16.msrb.mxu2 %v2004_v56  ;;  %v1474_v56 = vor.u32 %v1917_v48, %v1471_v49 }
  0x3b   :  { %1123 = vmatpush.bf16.msrb.mxu3 %v2012_v57  ;;  %v1478_v57 = vor.u32 %v1920_v51, %v1477_v50 }
  0x3c   :  { %945 = vmatpush.bf16.msrb.mxu1 %v1996_v58  ;;  %1212 = vmatpush.bf16.msrb.mxu0 %v2020_v59  ;;  %v1482_v58 = vor.u32 %v1918_v52, %v1479_v53  ;;  %v1486_v59 = vor.u32 %v1921_v55, %v1485_v54 }
  0x3e   :  { %1035 = vmatpush.bf16.msrb.mxu2 %v2003_v61  ;;  %v1491_v61 = vld [vmem:[%s2903_s0 + $0x8c] sm:$0xf0] }
  0x3f   :  { %1124 = vmatpush.bf16.msrb.mxu3 %v2011_v62  ;;  %v1497_v62 = vld [vmem:[%s2903_s0 + $0x80] sm:$0xf]  ;;  %v1494_v4 = vor.u32 %v1922_v60, %v1491_v61  ;;  %v1940_v60 = vld [vmem:[%s2903_s0 + $0x108] sm:$0xf0]  ;;  %v1938_v61 = vld [vmem:[%s2903_s0 + $0xfc] sm:$0xf] }
  0x40   :  { %946 = vmatpush.bf16.msrb.mxu1 %v1995_v6  ;;  %1213 = vmatpush.bf16.msrb.mxu0 %v2019_v7  ;;  %v1498_v5 = vor.u32 %v1925_v63, %v1497_v62  ;;  %v1502_v6 = vor.u32 %v1923_v0, %v1499_v1  ;;  %v1506_v7 = vor.u32 %v1926_v3, %v1505_v2  ;;  %v1559_v62 = vld [vmem:[%s2903_s0 + $0x10c] sm:$0xf0]  ;;  %v1565_v63 = vld [vmem:[%s2903_s0 + $0x100] sm:$0xf]  ;;  %v1941_v0 = vld [vmem:[%s2903_s0 + $0x110] sm:$0xf0] }
  0x41   :  { %888 = vmatmul.bf16.gmra.mxu1 %v1550_v8  ;;  %908 = vmatmul.bf16.gmra.mxu2 %v1630_v9  ;;  %v2387_v8 = vld [vmem:[%s2902_s2] ss:$0 sm:$0xff]  ;;  %v1927_v9 = vld [vmem:[%s2903_s0 + $0xa4] sm:$0xf] }
  0x42   :  { %928 = vmatmul.bf16.gmra.mxu3 %v1710_v10  ;;  %v1511_v10 = vld [vmem:[%s2903_s0 + $0xb4] sm:$0xf0] }
  0x43   :  { %868 = vmatmul.bf16.gmra.mxu0 %v1470_v11  ;;  %v1517_v11 = vld [vmem:[%s2903_s0 + $0xa8] sm:$0xf]  ;;  %v1514_v17 = vor.u32 %v1927_v9, %v1511_v10  ;;  %v1562_v9 = vor.u32 %v1938_v61, %v1559_v62  ;;  %v1566_v10 = vor.u32 %v1941_v0, %v1565_v63  ;;  %v1591_v61 = vld [vmem:[%s2903_s0 + $0x154] sm:$0xf0]  ;;  %v1950_v63 = vld [vmem:[%s2903_s0 + $0x158] sm:$0xf0] }
  0x44   :  { %v1518_v18 = vor.u32 %v1930_v12, %v1517_v11  ;;  %v1597_v62 = vld [vmem:[%s2903_s0 + $0x148] sm:$0xf]  ;;  %v1948_v0 = vld [vmem:[%s2903_s0 + $0x14c] sm:$0xf] }
  0x51   :  { %893 = vmatmul.bf16.gmra.mxu1 %v1570_v20  ;;  %913 = vmatmul.bf16.gmra.mxu2 %v1650_v21  ;;  %v1522_v20 = vor.u32 %v1928_v13, %v1519_v14  ;;  %v1526_v21 = vor.u32 %v1931_v16, %v1525_v15 }
  0x52   :  { %933 = vmatmul.bf16.gmra.mxu3 %v1730_v22 }
  0x53   :  { %873 = vmatmul.bf16.gmra.mxu0 %v1490_v23 }
  0x61   :  { %947 = vmatmul.bf16.vlgmr.msrb.gmra.mxu1 %v1434_v32  ;;  %1036 = vmatmul.bf16.vlgmr.msrb.gmra.mxu2 %v1438_v33  ;;  %v1531_v32 = vld [vmem:[%s2903_s0 + $0xdc] sm:$0xf0]  ;;  %v1537_v33 = vld [vmem:[%s2903_s0 + $0xd0] sm:$0xf] }
  0x62   :  { %1125 = vmatmul.bf16.vlgmr.msrb.gmra.mxu3 %v1442_v34  ;;  %v1935_v34 = vld [vmem:[%s2903_s0 + $0xe0] sm:$0xf0]  ;;  %v1534_v42 = vor.u32 %v1932_v31, %v1531_v32  ;;  %v1579_v31 = vld [vmem:[%s2903_s0 + $0x134] sm:$0xf0]  ;;  %v1585_v32 = vld [vmem:[%s2903_s0 + $0x128] sm:$0xf] }
  0x63   :  { %1214 = vmatmul.bf16.vlgmr.msrb.gmra.mxu0 %v1446_v35  ;;  %v1933_v35 = vld [vmem:[%s2903_s0 + $0xd4] sm:$0xf]  ;;  %v1538_v43 = vor.u32 %v1935_v34, %v1537_v33  ;;  %v1946_v33 = vld [vmem:[%s2903_s0 + $0x138] sm:$0xf0] }
  0x71   :  { %952 = vmatmul.bf16.gmra.mxu1 %v1454_v44  ;;  %1041 = vmatmul.bf16.gmra.mxu2 %v1458_v45 }
  0x72   :  { %1130 = vmatmul.bf16.gmra.mxu3 %v1462_v46  ;;  %v1542_v46 = vor.u32 %v1933_v35, %v1539_v36 }
  0x73   :  { %1219 = vmatmul.bf16.gmra.mxu0 %v1466_v47  ;;  %v1546_v47 = vor.u32 %v1936_v38, %v1545_v37 }
  0x81   :  { %957 = vmatmul.bf16.gmra.mxu1 %v1474_v56  ;;  %1046 = vmatmul.bf16.gmra.mxu2 %v1478_v57  ;;  %v1937_v57 = vld [vmem:[%s2903_s0 + $0xf4] sm:$0xf] }
  0x82   :  { %1135 = vmatmul.bf16.gmra.mxu3 %v1482_v58  ;;  %v1551_v58 = vld [vmem:[%s2903_s0 + $0x104] sm:$0xf0] }
  0x83   :  { %1224 = vmatmul.bf16.gmra.mxu0 %v1486_v59  ;;  %v1557_v59 = vld [vmem:[%s2903_s0 + $0xf8] sm:$0xf] }
  0x91   :  { %962 = vmatmul.bf16.gmra.mxu1 %v1494_v4  ;;  %1051 = vmatmul.bf16.gmra.mxu2 %v1498_v5  ;;  %v1554_v4 = vor.u32 %v1937_v57, %v1551_v58  ;;  %v1558_v5 = vor.u32 %v1940_v60, %v1557_v59  ;;  %v1947_v60 = vld [vmem:[%s2903_s0 + $0x144] sm:$0xf] }
  0x92   :  { %1140 = vmatmul.bf16.gmra.mxu3 %v1502_v6 }
  0x93   :  { %1229 = vmatmul.bf16.gmra.mxu0 %v1506_v7 }
  0x9e   :  { %v879_v19 = vpop.f32.mrf.mxu1 }
  0x9f   :  { %v2414_v22 = vadd.f32 %v2387_v8, %v879_v19 }
  0xa0   :  { %v2416_v23 = vpop.f32.mrf.mxu0 }
  0xa1   :  { %967 = vmatmul.bf16.gmra.mxu1 %v1514_v17  ;;  %1056 = vmatmul.bf16.gmra.mxu2 %v1518_v18 }
  0xa2   :  { %1145 = vmatmul.bf16.gmra.mxu3 %v1522_v20  ;;  %v1942_v20 = vld [vmem:[%s2903_s0 + $0x11c] sm:$0xf] }
  0xa3   :  { %1234 = vmatmul.bf16.gmra.mxu0 %v1526_v21  ;;  %v1571_v21 = vld [vmem:[%s2903_s0 + $0x12c] sm:$0xf0] }
  0xa4   :  { %v899_v24 = vpop.f32.mrf.mxu2  ;;  %v1574_v37 = vor.u32 %v1942_v20, %v1571_v21 }
  0xa5   :  { %v2419_v25 = vadd.f32 %v2387_v8, %v899_v24  ;;  %v919_v26 = vpop.f32.mrf.mxu3  ;;  %v1577_v24 = vld [vmem:[%s2903_s0 + $0x120] sm:$0xf] }
  0xa6   :  { %v2422_v27 = vadd.f32 %v2387_v8, %v919_v26  ;;  %v881_v28 = vpop.f32.mrf.mxu1  ;;  %v1945_v26 = vld [vmem:[%s2903_s0 + $0x130] sm:$0xf0] }
  0xa7   :  { %v2425_v29 = vadd.f32 %v2387_v8, %v881_v28  ;;  %v1943_v28 = vld [vmem:[%s2903_s0 + $0x124] sm:$0xf]  ;;  %v1578_v38 = vor.u32 %v1945_v26, %v1577_v24  ;;  %v860_v26 = vadd.f32 %v2387_v8, %v2416_v23  ;;  %v1611_v23 = vld [vmem:[%s2903_s0 + $0x17c] sm:$0xf0] }
  0xa8   :  { %v2427_v30 = vpop.f32.mrf.mxu0 }
  0xac   :  { %v901_v39 = vpop.f32.mrf.mxu2 }
  0xad   :  { %v2454_v40 = vadd.f32 %v2387_v8, %v901_v39  ;;  %v921_v41 = vpop.f32.mrf.mxu3 }
  0xae   :  { %v2457_v44 = vadd.f32 %v2387_v8, %v921_v41  ;;  %v884_v45 = vpop.f32.mrf.mxu1 }
  0xaf   :  { %v2460_v48 = vadd.f32 %v2387_v8, %v884_v45 }
  0xb0   :  { %v2462_v49 = vpop.f32.mrf.mxu0 }
  0xb1   :  { %972 = vmatmul.bf16.gmra.mxu1 %v1534_v42  ;;  %1061 = vmatmul.bf16.gmra.mxu2 %v1538_v43  ;;  %v1582_v42 = vor.u32 %v1943_v28, %v1579_v31  ;;  %v1586_v43 = vor.u32 %v1946_v33, %v1585_v32 }
  0xb2   :  { %1150 = vmatmul.bf16.gmra.mxu3 %v1542_v46 }
  0xb3   :  { %1239 = vmatmul.bf16.gmra.mxu0 %v1546_v47 }
  0xb4   :  { %v904_v50 = vpop.f32.mrf.mxu2 }
  0xb5   :  { %v2465_v51 = vadd.f32 %v2387_v8, %v904_v50  ;;  %v924_v52 = vpop.f32.mrf.mxu3 }
  0xb6   :  { %v2468_v53 = vadd.f32 %v2387_v8, %v924_v52  ;;  %v886_v54 = vpop.f32.mrf.mxu1 }
  0xb7   :  { %v2471_v55 = vadd.f32 %v2387_v8, %v886_v54 }
  0xb8   :  { %v2473_v56 = vpop.f32.mrf.mxu0 }
  0xbc   :  { %v906_v1 = vpop.f32.mrf.mxu2 }
  0xbd   :  { %v2500_v2 = vadd.f32 %v2387_v8, %v906_v1  ;;  %v926_v3 = vpop.f32.mrf.mxu3  ;;  %v1599_v1 = vld [vmem:[%s2903_s0 + $0x15c] sm:$0xf0] }
  0xbe   :  { %v2503_v6 = vadd.f32 %v2387_v8, %v926_v3  ;;  %v889_v7 = vpop.f32.mrf.mxu1  ;;  %v1605_v3 = vld [vmem:[%s2903_s0 + $0x150] sm:$0xf]  ;;  %v1602_v20 = vor.u32 %v1948_v0, %v1599_v1 }
  0xbf   :  { %v2506_v11 = vadd.f32 %v2387_v8, %v889_v7 }
  0xc0   :  { %v2508_v12 = vpop.f32.mrf.mxu0 }
  0xc1   :  { %977 = vmatmul.bf16.gmra.mxu1 %v1554_v4  ;;  %1066 = vmatmul.bf16.gmra.mxu2 %v1558_v5  ;;  %v1951_v4 = vld [vmem:[%s2903_s0 + $0x160] sm:$0xf0] }
  0xc2   :  { %1155 = vmatmul.bf16.gmra.mxu3 %v1562_v9  ;;  %v1606_v21 = vor.u32 %v1951_v4, %v1605_v3 }
  0xc3   :  { %1244 = vmatmul.bf16.gmra.mxu0 %v1566_v10  ;;  %v1594_v10 = vor.u32 %v1947_v60, %v1591_v61 }
  0xc4   :  { %v909_v13 = vpop.f32.mrf.mxu2 }
  0xc5   :  { %v2511_v14 = vadd.f32 %v2387_v8, %v909_v13  ;;  %v929_v15 = vpop.f32.mrf.mxu3  ;;  %v1598_v13 = vor.u32 %v1950_v63, %v1597_v62  ;;  %v1956_v62 = vld [vmem:[%s2903_s0 + $0x188] sm:$0xf0] }
  0xc6   :  { %v2514_v16 = vadd.f32 %v2387_v8, %v929_v15  ;;  %v891_v17 = vpop.f32.mrf.mxu1 }
  0xc7   :  { %v2517_v18 = vadd.f32 %v2387_v8, %v891_v17 }
  0xc8   :  { %v2519_v19 = vpop.f32.mrf.mxu0 }
  0xcc   :  { %v911_v34 = vpop.f32.mrf.mxu2 }
  0xcd   :  { %v2546_v35 = vadd.f32 %v2387_v8, %v911_v34  ;;  %v931_v36 = vpop.f32.mrf.mxu3 }
  0xce   :  { %v2549_v39 = vadd.f32 %v2387_v8, %v931_v36  ;;  %v894_v41 = vpop.f32.mrf.mxu1 }
  0xcf   :  { %v2552_v45 = vadd.f32 %v2387_v8, %v894_v41  ;;  %v862_v41 = vadd.f32 %v2387_v8, %v2427_v30  ;;  %v1619_v30 = vld [vmem:[%s2903_s0 + $0x184] sm:$0xf0] }
  0xd0   :  { %v2554_v46 = vpop.f32.mrf.mxu0 }
  0xd1   :  { %982 = vmatmul.bf16.gmra.mxu1 %v1574_v37  ;;  %1071 = vmatmul.bf16.gmra.mxu2 %v1578_v38  ;;  %v1952_v38 = vld [vmem:[%s2903_s0 + $0x16c] sm:$0xf] }
  0xd2   :  { %1160 = vmatmul.bf16.gmra.mxu3 %v1582_v42  ;;  %v1614_v4 = vor.u32 %v1952_v38, %v1611_v23  ;;  %v1631_v23 = vld [vmem:[%s2903_s0 + $0x1a4] sm:$0xf0] }
  0xd3   :  { %1249 = vmatmul.bf16.gmra.mxu0 %v1586_v43  ;;  %v1617_v43 = vld [vmem:[%s2903_s0 + $0x170] sm:$0xf] }
  0xd4   :  { %v914_v47 = vpop.f32.mrf.mxu2 }
  0xd5   :  { %v2557_v50 = vadd.f32 %v2387_v8, %v914_v47  ;;  %v934_v52 = vpop.f32.mrf.mxu3  ;;  %v1955_v47 = vld [vmem:[%s2903_s0 + $0x180] sm:$0xf0] }
  0xd6   :  { %v2560_v54 = vadd.f32 %v2387_v8, %v934_v52  ;;  %v896_v57 = vpop.f32.mrf.mxu1  ;;  %v1953_v52 = vld [vmem:[%s2903_s0 + $0x174] sm:$0xf] }
  0xd7   :  { %v2563_v58 = vadd.f32 %v2387_v8, %v896_v57  ;;  %v1625_v57 = vld [vmem:[%s2903_s0 + $0x178] sm:$0xf] }
  0xd8   :  { %v2565_v59 = vpop.f32.mrf.mxu0 }
  0xdc   :  { %v916_v5 = vpop.f32.mrf.mxu2 }
  0xdd   :  { %v2592_v7 = vadd.f32 %v2387_v8, %v916_v5  ;;  %v936_v9 = vpop.f32.mrf.mxu3  ;;  %v1618_v5 = vor.u32 %v1955_v47, %v1617_v43  ;;  %v1637_v43 = vld [vmem:[%s2903_s0 + $0x198] sm:$0xf]  ;;  %v1960_v47 = vld [vmem:[%s2903_s0 + $0x1a8] sm:$0xf0] }
  0xde   :  { %v2595_v15 = vadd.f32 %v2387_v8, %v936_v9  ;;  %v948_v17 = vpop.f32.mrf.mxu1 }
  0xdf   :  { %v949_v28 = vadd.f32 %v948_v17, %v860_v26 }
  0xe0   :  { %v1215_v24 = vpop.f32.mrf.mxu0 }
  0xe1   :  { %987 = vmatmul.bf16.gmra.mxu1 %v1594_v10  ;;  %1076 = vmatmul.bf16.gmra.mxu2 %v1598_v13  ;;  %v1622_v10 = vor.u32 %v1953_v52, %v1619_v30  ;;  %v1626_v13 = vor.u32 %v1956_v62, %v1625_v57  ;;  %v1958_v52 = vld [vmem:[%s2903_s0 + $0x19c] sm:$0xf]  ;;  %v1645_v30 = vld [vmem:[%s2903_s0 + $0x1a0] sm:$0xf] }
  0xe2   :  { %1165 = vmatmul.bf16.gmra.mxu3 %v1602_v20 }
  0xe3   :  { %1254 = vmatmul.bf16.gmra.mxu0 %v1606_v21  ;;  %v865_v21 = vadd.f32 %v2387_v8, %v2462_v49  ;;  %v1957_v49 = vld [vmem:[%s2903_s0 + $0x194] sm:$0xf] }
  0xe4   :  { %v1037_v31 = vpop.f32.mrf.mxu2 }
  0xe5   :  { %v1038_v32 = vadd.f32 %v1037_v31, %v949_v28  ;;  %v1126_v33 = vpop.f32.mrf.mxu3 }
  0xe6   :  { %v950_v34 = vpop.f32.mrf.mxu1 }
  0xe7   :  { %v1127_v36 = vadd.f32 %v1126_v33, %v1038_v32  ;;  %v951_v61 = vadd.f32 %v950_v34, %v862_v41 }
  0xe8   :  { %v1217_v37 = vpop.f32.mrf.mxu0 }
  0xe9   :  { %v1216_v42 = vadd.f32 %v1215_v24, %v1127_v36 }
  0xeb   :  { %vm1295_vm0 = vcmp.ge.f32.partialorder %v1216_v42, 0.0  ;;  %v1327_v60 = vmul.f32 0.01, %v1216_v42 }
  0xec   :  { %v1039_v63 = vpop.f32.mrf.mxu2 }
  0xed   :  { %v1359_v0 = vsel %vm1295_vm0, %v1216_v42, %v1327_v60  ;;  %v1040_v1 = vadd.f32 %v1039_v63, %v951_v61  ;;  %v1128_v3 = vpop.f32.mrf.mxu3  ;;  %v1961_v61 = vld [vmem:[%s2903_s0 + $0x1b0] sm:$0xf0] }
  0xee   :  { %1391 = vst [vmem:[%s2904_s3] sm:$0xff] %v1359_v0  ;;  %v953_v9 = vpop.f32.mrf.mxu1 }
  0xef   :  { %v1129_v17 = vadd.f32 %v1128_v3, %v1040_v1  ;;  %v954_v28 = vadd.f32 %v953_v9, %v865_v21  ;;  %v1634_v3 = vor.u32 %v1957_v49, %v1631_v23  ;;  %v1965_v23 = vld [vmem:[%s2903_s0 + $0x1d0] sm:$0xf0] }
  0xf0   :  { %v1220_v20 = vpop.f32.mrf.mxu0 }
  0xf1   :  { %v1218_v24 = vadd.f32 %v1217_v37, %v1129_v17  ;;  %992 = vmatmul.bf16.gmra.mxu1 %v1614_v4  ;;  %1081 = vmatmul.bf16.gmra.mxu2 %v1618_v5  ;;  %v867_v37 = vadd.f32 %v2387_v8, %v2473_v56  ;;  %v1639_v56 = vld [vmem:[%s2903_s0 + $0x1ac] sm:$0xf0]  ;;  %v1638_v4 = vor.u32 %v1960_v47, %v1637_v43  ;;  %v1963_v43 = vld [vmem:[%s2903_s0 + $0x1c4] sm:$0xf]  ;;  %v1665_v47 = vld [vmem:[%s2903_s0 + $0x1c8] sm:$0xf] }
  0xf2   :  { %1170 = vmatmul.bf16.gmra.mxu3 %v1622_v10  ;;  %v1642_v9 = vor.u32 %v1958_v52, %v1639_v56  ;;  %v1646_v10 = vor.u32 %v1961_v61, %v1645_v30  ;;  %v1966_v30 = vld [vmem:[%s2903_s0 + $0x1d8] sm:$0xf0] }
  0xf3   :  { %1259 = vmatmul.bf16.gmra.mxu0 %v1626_v13  ;;  %vm1296_vm1 = vcmp.ge.f32.partialorder %v1218_v24, 0.0  ;;  %v1328_v26 = vmul.f32 0.01, %v1218_v24 }
  0xf4   :  { %v1042_v31 = vpop.f32.mrf.mxu2 }
  0xf5   :  { %v1360_v32 = vsel %vm1296_vm1, %v1218_v24, %v1328_v26  ;;  %v1043_v33 = vadd.f32 %v1042_v31, %v954_v28  ;;  %v1131_v34 = vpop.f32.mrf.mxu3 }
  0xf6   :  { %1392 = vst [vmem:[%s2904_s3 + $0x8] sm:$0xff] %v1360_v32  ;;  %v955_v36 = vpop.f32.mrf.mxu1 }
  0xf7   :  { %v1132_v38 = vadd.f32 %v1131_v34, %v1043_v33  ;;  %v956_v60 = vadd.f32 %v955_v36, %v867_v37  ;;  %v1651_v37 = vld [vmem:[%s2903_s0 + $0x1cc] sm:$0xf0] }
  0xf8   :  { %v1222_v41 = vpop.f32.mrf.mxu0 }
  0xf9   :  { %v1221_v42 = vadd.f32 %v1220_v20, %v1132_v38  ;;  %v870_v20 = vadd.f32 %v2387_v8, %v2508_v12  ;;  %v1962_v12 = vld [vmem:[%s2903_s0 + $0x1bc] sm:$0xf] }
  0xfb   :  { %vm1297_vm2 = vcmp.ge.f32.partialorder %v1221_v42, 0.0  ;;  %v1329_v57 = vmul.f32 0.01, %v1221_v42 }
  0xfc   :  { %v1044_v62 = vpop.f32.mrf.mxu2 }
  0xfd   :  { %v1361_v63 = vsel %vm1297_vm2, %v1221_v42, %v1329_v57  ;;  %v1045_v0 = vadd.f32 %v1044_v62, %v956_v60  ;;  %v1133_v1 = vpop.f32.mrf.mxu3  ;;  %v1657_v42 = vld [vmem:[%s2903_s0 + $0x1c0] sm:$0xf] }
  0xfe   :  { %1393 = vst [vmem:[%s2904_s3 + $0x10] sm:$0xff] %v1361_v63  ;;  %v958_v5 = vpop.f32.mrf.mxu1  ;;  %v1654_v63 = vor.u32 %v1962_v12, %v1651_v37  ;;  %v1677_v12 = vld [vmem:[%s2903_s0 + $0x1e8] sm:$0xf] }
  0xff   :  { %v1134_v13 = vadd.f32 %v1133_v1, %v1045_v0  ;;  %v959_v26 = vadd.f32 %v958_v5, %v870_v20  ;;  %v1658_v0 = vor.u32 %v1965_v23, %v1657_v42  ;;  %v1971_v23 = vld [vmem:[%s2903_s0 + $0x200] sm:$0xf0] }
 0x100   :  { %v1225_v17 = vpop.f32.mrf.mxu0 }
 0x101   :  { %v1223_v21 = vadd.f32 %v1222_v41, %v1134_v13  ;;  %997 = vmatmul.bf16.gmra.mxu1 %v1634_v3  ;;  %1086 = vmatmul.bf16.gmra.mxu2 %v1638_v4  ;;  %v872_v41 = vadd.f32 %v2387_v8, %v2519_v19  ;;  %v1659_v19 = vld [vmem:[%s2903_s0 + $0x1d4] sm:$0xf0]  ;;  %v1666_v4 = vor.u32 %v1966_v30, %v1665_v47 }
 0x102   :  { %1175 = vmatmul.bf16.gmra.mxu3 %v1642_v9  ;;  %v1662_v3 = vor.u32 %v1963_v43, %v1659_v19 }
 0x103   :  { %1264 = vmatmul.bf16.gmra.mxu0 %v1646_v10  ;;  %vm1298_vm3 = vcmp.ge.f32.partialorder %v1223_v21, 0.0  ;;  %v1330_v24 = vmul.f32 0.01, %v1223_v21  ;;  %v875_v10 = vadd.f32 %v2387_v8, %v2554_v46  ;;  %v1967_v46 = vld [vmem:[%s2903_s0 + $0x1e4] sm:$0xf] }
 0x104   :  { %v1047_v28 = vpop.f32.mrf.mxu2 }
 0x105   :  { %v1362_v31 = vsel %vm1298_vm3, %v1223_v21, %v1330_v24  ;;  %v1048_v32 = vadd.f32 %v1047_v28, %v959_v26  ;;  %v1136_v33 = vpop.f32.mrf.mxu3 }
 0x106   :  { %1394 = vst [vmem:[%s2904_s3 + $0x18] sm:$0xff] %v1362_v31  ;;  %v960_v34 = vpop.f32.mrf.mxu1 }
 0x107   :  { %v1137_v36 = vadd.f32 %v1136_v33, %v1048_v32  ;;  %v961_v56 = vadd.f32 %v960_v34, %v872_v41  ;;  %v877_v34 = vadd.f32 %v2387_v8, %v2565_v59  ;;  %v1970_v41 = vld [vmem:[%s2903_s0 + $0x1f8] sm:$0xf0]  ;;  %v1679_v8 = vld [vmem:[%s2903_s0 + $0x1fc] sm:$0xf0]  ;;  %v1685_v59 = vld [vmem:[%s2903_s0 + $0x1f0] sm:$0xf] }
 0x108   :  { %v1227_v38 = vpop.f32.mrf.mxu0  ;;  %v1678_v30 = vor.u32 %v1970_v41, %v1677_v12 }
 0x109   :  { %v1226_v49 = vadd.f32 %v1225_v17, %v1137_v36 }
 0x10b   :  { %vm1299_vm4 = vcmp.ge.f32.partialorder %v1226_v49, 0.0  ;;  %v1331_v52 = vmul.f32 0.01, %v1226_v49 }
 0x10c   :  { %v1049_v57 = vpop.f32.mrf.mxu2 }
 0x10d   :  { %v1363_v60 = vsel %vm1299_vm4, %v1226_v49, %v1331_v52  ;;  %v1050_v61 = vadd.f32 %v1049_v57, %v961_v56  ;;  %v1138_v62 = vpop.f32.mrf.mxu3  ;;  %v1968_v49 = vld [vmem:[%s2903_s0 + $0x1ec] sm:$0xf] }
 0x10e   :  { %1395 = vst [vmem:[%s2904_s3 + $0x20] sm:$0xff] %v1363_v60  ;;  %v963_v1 = vpop.f32.mrf.mxu1  ;;  %v1682_v60 = vor.u32 %v1968_v49, %v1679_v8 }
 0x10f   :  { %v1139_v5 = vadd.f32 %v1138_v62, %v1050_v61  ;;  %v964_v20 = vadd.f32 %v963_v1, %v875_v10  ;;  %v1686_v61 = vor.u32 %v1971_v23, %v1685_v59 }
 0x110   :  { %v1230_v9 = vpop.f32.mrf.mxu0 }
 0x111   :  { %v1228_v13 = vadd.f32 %v1227_v38, %v1139_v5  ;;  %1002 = vmatmul.bf16.gmra.mxu1 %v1654_v63  ;;  %1091 = vmatmul.bf16.gmra.mxu2 %v1658_v0  ;;  %v1671_v38 = vld [vmem:[%s2903_s0 + $0x1f4] sm:$0xf0] }
 0x112   :  { %1180 = vmatmul.bf16.gmra.mxu3 %v1662_v3  ;;  %v1674_v56 = vor.u32 %v1967_v46, %v1671_v38 }
 0x113   :  { %1269 = vmatmul.bf16.gmra.mxu0 %v1666_v4  ;;  %vm1300_vm5 = vcmp.ge.f32.partialorder %v1228_v13, 0.0  ;;  %v1332_v17 = vmul.f32 0.01, %v1228_v13 }
 0x114   :  { %v1052_v21 = vpop.f32.mrf.mxu2 }
 0x115   :  { %v1364_v24 = vsel %vm1300_vm5, %v1228_v13, %v1332_v17  ;;  %v1053_v26 = vadd.f32 %v1052_v21, %v964_v20  ;;  %v1141_v28 = vpop.f32.mrf.mxu3  ;;  %v1972_v21 = vld [vmem:[%s2903_s0 + $0x20c] sm:$0xf] }
 0x116   :  { %1396 = vst [vmem:[%s2904_s3 + $0x28] sm:$0xff] %v1364_v24  ;;  %v965_v31 = vpop.f32.mrf.mxu1 }
 0x117   :  { %v1142_v32 = vadd.f32 %v1141_v28, %v1053_v26  ;;  %v966_v42 = vadd.f32 %v965_v31, %v877_v34  ;;  %v1697_v26 = vld [vmem:[%s2903_s0 + $0x210] sm:$0xf]  ;;  %v1975_v28 = vld [vmem:[%s2903_s0 + $0x220] sm:$0xf0]  ;;  %v1973_v31 = vld [vmem:[%s2903_s0 + $0x214] sm:$0xf] }
 0x118   :  { %v1232_v33 = vpop.f32.mrf.mxu0  ;;  %v1698_v59 = vor.u32 %v1975_v28, %v1697_v26 }
 0x119   :  { %v1231_v36 = vadd.f32 %v1230_v9, %v1142_v32  ;;  %v1699_v32 = vld [vmem:[%s2903_s0 + $0x224] sm:$0xf0] }
 0x11b   :  { %vm1301_vm6 = vcmp.ge.f32.partialorder %v1231_v36, 0.0  ;;  %v1333_v37 = vmul.f32 0.01, %v1231_v36 }
 0x11c   :  { %v1054_v43 = vpop.f32.mrf.mxu2 }
 0x11d   :  { %v1365_v19 = vsel %vm1301_vm6, %v1231_v36, %v1333_v37  ;;  %v1055_v47 = vadd.f32 %v1054_v43, %v966_v42  ;;  %v1143_v52 = vpop.f32.mrf.mxu3  ;;  %v1976_v36 = vld [vmem:[%s2903_s0 + $0x228] sm:$0xf0]  ;;  %v1702_v42 = vor.u32 %v1973_v31, %v1699_v32 }
 0x11e   :  { %1397 = vst [vmem:[%s2904_s3 + $0x30] sm:$0xff] %v1365_v19  ;;  %v968_v57 = vpop.f32.mrf.mxu1 }
 0x11f   :  { %v1144_v62 = vadd.f32 %v1143_v52, %v1055_v47  ;;  %v969_v3 = vadd.f32 %v968_v57, %v2414_v22  ;;  %v1691_v22 = vld [vmem:[%s2903_s0 + $0x21c] sm:$0xf0] }
 0x120   :  { %v1235_v63 = vpop.f32.mrf.mxu0  ;;  %v1694_v8 = vor.u32 %v1972_v21, %v1691_v22 }
 0x121   :  { %v1233_v0 = vadd.f32 %v1232_v33, %v1144_v62  ;;  %1007 = vmatmul.bf16.gmra.mxu1 %v1674_v56  ;;  %1096 = vmatmul.bf16.gmra.mxu2 %v1678_v30  ;;  %v1705_v33 = vld [vmem:[%s2903_s0 + $0x218] sm:$0xf] }
 0x122   :  { %1185 = vmatmul.bf16.gmra.mxu3 %v1682_v60  ;;  %v1706_v23 = vor.u32 %v1976_v36, %v1705_v33 }
 0x123   :  { %1274 = vmatmul.bf16.gmra.mxu0 %v1686_v61  ;;  %vm1302_vm7 = vcmp.ge.f32.partialorder %v1233_v0, 0.0  ;;  %v1334_v1 = vmul.f32 0.01, %v1233_v0 }
 0x124   :  { %v1057_v4 = vpop.f32.mrf.mxu2 }
 0x125   :  { %v1366_v5 = vsel %vm1302_vm7, %v1233_v0, %v1334_v1  ;;  %v1058_v9 = vadd.f32 %v1057_v4, %v969_v3  ;;  %v1146_v10 = vpop.f32.mrf.mxu3  ;;  %v1977_v0 = vld [vmem:[%s2903_s0 + $0x234] sm:$0xf]  ;;  %v1717_v3 = vld [vmem:[%s2903_s0 + $0x238] sm:$0xf]  ;;  %v1980_v4 = vld [vmem:[%s2903_s0 + $0x248] sm:$0xf0] }
 0x126   :  { %1398 = vst [vmem:[%s2904_s3 + $0x38] sm:$0xff] %v1366_v5  ;;  %v970_v13 = vpop.f32.mrf.mxu1  ;;  %v1978_v5 = vld [vmem:[%s2903_s0 + $0x23c] sm:$0xf]  ;;  %v1718_v31 = vor.u32 %v1980_v4, %v1717_v3 }
 0x127   :  { %v1147_v17 = vadd.f32 %v1146_v10, %v1058_v9  ;;  %v971_v34 = vadd.f32 %v970_v13, %v2425_v29  ;;  %v1719_v9 = vld [vmem:[%s2903_s0 + $0x24c] sm:$0xf0]  ;;  %v1725_v10 = vld [vmem:[%s2903_s0 + $0x240] sm:$0xf] }
 0x128   :  { %v1237_v20 = vpop.f32.mrf.mxu0  ;;  %v1722_v33 = vor.u32 %v1978_v5, %v1719_v9 }
 0x129   :  { %v1236_v24 = vadd.f32 %v1235_v63, %v1147_v17 }
 0x12b   :  { %vm1303_vm8 = vcmp.ge.f32.partialorder %v1236_v24, 0.0  ;;  %v1335_v46 = vmul.f32 0.01, %v1236_v24 }
 0x12c   :  { %v1059_v38 = vpop.f32.mrf.mxu2 }
 0x12d   :  { %v1367_v12 = vsel %vm1303_vm8, %v1236_v24, %v1335_v46  ;;  %v1060_v41 = vadd.f32 %v1059_v38, %v971_v34  ;;  %v1148_v49 = vpop.f32.mrf.mxu3 }
 0x12e   :  { %1399 = vst [vmem:[%s2904_s3 + $0x40] sm:$0xff] %v1367_v12  ;;  %v973_v37 = vpop.f32.mrf.mxu1 }
 0x12f   :  { %v1149_v43 = vadd.f32 %v1148_v49, %v1060_v41  ;;  %v974_v52 = vadd.f32 %v973_v37, %v2460_v48  ;;  %v1711_v48 = vld [vmem:[%s2903_s0 + $0x244] sm:$0xf0] }
 0x130   :  { %v1240_v19 = vpop.f32.mrf.mxu0  ;;  %v1714_v28 = vor.u32 %v1977_v0, %v1711_v48 }
 0x131   :  { %v1238_v29 = vadd.f32 %v1237_v20, %v1149_v43  ;;  %1012 = vmatmul.bf16.gmra.mxu1 %v1694_v8  ;;  %1101 = vmatmul.bf16.gmra.mxu2 %v1698_v59  ;;  %v1981_v20 = vld [vmem:[%s2903_s0 + $0x250] sm:$0xf0]  ;;  %v1982_v43 = vld [vmem:[%s2903_s0 + $0x25c] sm:$0xf] }
 0x132   :  { %1190 = vmatmul.bf16.gmra.mxu3 %v1702_v42  ;;  %v1726_v46 = vor.u32 %v1981_v20, %v1725_v10 }
 0x133   :  { %1279 = vmatmul.bf16.gmra.mxu0 %v1706_v23  ;;  %vm1304_vm9 = vcmp.ge.f32.partialorder %v1238_v29, 0.0  ;;  %v1336_v47 = vmul.f32 0.01, %v1238_v29 }
 0x134   :  { %v1062_v56 = vpop.f32.mrf.mxu2 }
 0x135   :  { %v1368_v30 = vsel %vm1304_vm9, %v1238_v29, %v1336_v47  ;;  %v1063_v57 = vadd.f32 %v1062_v56, %v974_v52  ;;  %v1151_v60 = vpop.f32.mrf.mxu3  ;;  %v1737_v29 = vld [vmem:[%s2903_s0 + $0x260] sm:$0xf]  ;;  %v1985_v47 = vld [vmem:[%s2903_s0 + $0x270] sm:$0xf0]  ;;  %v1983_v52 = vld [vmem:[%s2903_s0 + $0x264] sm:$0xf] }
 0x136   :  { %1400 = vst [vmem:[%s2904_s3 + $0x48] sm:$0xff] %v1368_v30  ;;  %v975_v61 = vpop.f32.mrf.mxu1  ;;  %v1739_v56 = vld [vmem:[%s2903_s0 + $0x274] sm:$0xf0]  ;;  %v1745_v30 = vld [vmem:[%s2903_s0 + $0x268] sm:$0xf]  ;;  %v1738_v3 = vor.u32 %v1985_v47, %v1737_v29 }
 0x137   :  { %v1152_v62 = vadd.f32 %v1151_v60, %v1063_v57  ;;  %v976_v17 = vadd.f32 %v975_v61, %v2471_v55  ;;  %v1986_v61 = vld [vmem:[%s2903_s0 + $0x278] sm:$0xf0]  ;;  %v1742_v5 = vor.u32 %v1983_v52, %v1739_v56 }
 0x138   :  { %v1242_v63 = vpop.f32.mrf.mxu0  ;;  %v1746_v9 = vor.u32 %v1986_v61, %v1745_v30 }
 0x139   :  { %v1241_v1 = vadd.f32 %v1240_v19, %v1152_v62 }
 0x13b   :  { %vm1305_vm10 = vcmp.ge.f32.partialorder %v1241_v1, 0.0  ;;  %v1337_v13 = vmul.f32 0.01, %v1241_v1 }
 0x13c   :  { %v1064_v21 = vpop.f32.mrf.mxu2 }
 0x13d   :  { %v1369_v24 = vsel %vm1305_vm10, %v1241_v1, %v1337_v13  ;;  %v1065_v22 = vadd.f32 %v1064_v21, %v976_v17  ;;  %v1153_v26 = vpop.f32.mrf.mxu3 }
 0x13e   :  { %1401 = vst [vmem:[%s2904_s3 + $0x50] sm:$0xff] %v1369_v24  ;;  %v978_v32 = vpop.f32.mrf.mxu1 }
 0x13f   :  { %v1154_v34 = vadd.f32 %v1153_v26, %v1065_v22  ;;  %v979_v12 = vadd.f32 %v978_v32, %v2506_v11  ;;  %v1731_v11 = vld [vmem:[%s2903_s0 + $0x26c] sm:$0xf0] }
 0x140   :  { %v1245_v36 = vpop.f32.mrf.mxu0  ;;  %v1734_v48 = vor.u32 %v1982_v43, %v1731_v11 }
 0x141   :  { %v1243_v55 = vadd.f32 %v1242_v63, %v1154_v34  ;;  %1017 = vmatmul.bf16.gmra.mxu1 %v1714_v28  ;;  %1106 = vmatmul.bf16.gmra.mxu2 %v1718_v31 }
 0x142   :  { %1195 = vmatmul.bf16.gmra.mxu3 %v1722_v33 }
 0x143   :  { %1284 = vmatmul.bf16.gmra.mxu0 %v1726_v46  ;;  %vm1306_vm11 = vcmp.ge.f32.partialorder %v1243_v55, 0.0  ;;  %v1338_v38 = vmul.f32 0.01, %v1243_v55 }
 0x144   :  { %v1067_v41 = vpop.f32.mrf.mxu2 }
 0x145   :  { %v1370_v49 = vsel %vm1306_vm11, %v1243_v55, %v1338_v38  ;;  %v1068_v8 = vadd.f32 %v1067_v41, %v979_v12  ;;  %v1156_v59 = vpop.f32.mrf.mxu3 }
 0x146   :  { %1402 = vst [vmem:[%s2904_s3 + $0x58] sm:$0xff] %v1370_v49  ;;  %v980_v37 = vpop.f32.mrf.mxu1 }
 0x147   :  { %v1157_v42 = vadd.f32 %v1156_v59, %v1068_v8  ;;  %v981_v60 = vadd.f32 %v980_v37, %v2517_v18 }
 0x148   :  { %v1247_v23 = vpop.f32.mrf.mxu0 }
 0x149   :  { %v1246_v19 = vadd.f32 %v1245_v36, %v1157_v42 }
 0x14b   :  { %vm1307_vm12 = vcmp.ge.f32.partialorder %v1246_v19, 0.0  ;;  %v1339_v57 = vmul.f32 0.01, %v1246_v19 }
 0x14c   :  { %v1069_v62 = vpop.f32.mrf.mxu2 }
 0x14d   :  { %v1371_v63 = vsel %vm1307_vm12, %v1246_v19, %v1339_v57  ;;  %v1070_v0 = vadd.f32 %v1069_v62, %v981_v60  ;;  %v1158_v1 = vpop.f32.mrf.mxu3 }
 0x14e   :  { %1403 = vst [vmem:[%s2904_s3 + $0x60] sm:$0xff] %v1371_v63  ;;  %v983_v4 = vpop.f32.mrf.mxu1 }
 0x14f   :  { %v1159_v10 = vadd.f32 %v1158_v1, %v1070_v0  ;;  %v984_v20 = vadd.f32 %v983_v4, %v2552_v45 }
 0x150   :  { %v1250_v13 = vpop.f32.mrf.mxu0 }
 0x151   :  { %v1248_v18 = vadd.f32 %v1247_v23, %v1159_v10  ;;  %1022 = vmatmul.bf16.gmra.mxu1 %v1734_v48  ;;  %1111 = vmatmul.bf16.gmra.mxu2 %v1738_v3 }
 0x152   :  { %1200 = vmatmul.bf16.gmra.mxu3 %v1742_v5 }
 0x153   :  { %1289 = vmatmul.bf16.gmra.mxu0 %v1746_v9  ;;  %vm1308_vm13 = vcmp.ge.f32.partialorder %v1248_v18, 0.0  ;;  %v1340_v17 = vmul.f32 0.01, %v1248_v18 }
 0x154   :  { %v1072_v21 = vpop.f32.mrf.mxu2 }
 0x155   :  { %v1372_v24 = vsel %vm1308_vm13, %v1248_v18, %v1340_v17  ;;  %v1073_v22 = vadd.f32 %v1072_v21, %v984_v20  ;;  %v1161_v26 = vpop.f32.mrf.mxu3 }
 0x156   :  { %1404 = vst [vmem:[%s2904_s3 + $0x68] sm:$0xff] %v1372_v24  ;;  %v985_v28 = vpop.f32.mrf.mxu1 }
 0x157   :  { %v1162_v31 = vadd.f32 %v1161_v26, %v1073_v22  ;;  %v986_v34 = vadd.f32 %v985_v28, %v2563_v58 }
 0x158   :  { %v1252_v32 = vpop.f32.mrf.mxu0 }
 0x159   :  { %v1251_v33 = vadd.f32 %v1250_v13, %v1162_v31 }
 0x15b   :  { %vm1309_vm14 = vcmp.ge.f32.partialorder %v1251_v33, 0.0  ;;  %v1341_v46 = vmul.f32 0.01, %v1251_v33 }
 0x15c   :  { %v1074_v36 = vpop.f32.mrf.mxu2 }
 0x15d   :  { %v1373_v55 = vsel %vm1309_vm14, %v1251_v33, %v1341_v46  ;;  %v1075_v38 = vadd.f32 %v1074_v36, %v986_v34  ;;  %v1163_v45 = vpop.f32.mrf.mxu3 }
 0x15e   :  { %1405 = vst [vmem:[%s2904_s3 + $0x70] sm:$0xff] %v1373_v55  ;;  %v988_v12 = vpop.f32.mrf.mxu1 }
 0x15f   :  { %v1164_v41 = vadd.f32 %v1163_v45, %v1075_v38  ;;  %v989_v37 = vadd.f32 %v988_v12, %v2419_v25 }
 0x160   :  { %v1255_v49 = vpop.f32.mrf.mxu0 }
 0x161   :  { %v1253_v8 = vadd.f32 %v1252_v32, %v1164_v41 }
 0x163   :  { %vm1310_vm15 = vcmp.ge.f32.partialorder %v1253_v8, 0.0  ;;  %v1342_v59 = vmul.f32 0.01, %v1253_v8 }
 0x164   :  { %v1077_v42 = vpop.f32.mrf.mxu2 }
 0x165   :  { %v1374_v23 = vsel %vm1310_vm15, %v1253_v8, %v1342_v59  ;;  %v1078_v43 = vadd.f32 %v1077_v42, %v989_v37  ;;  %v1166_v58 = vpop.f32.mrf.mxu3 }
 0x166   :  { %1406 = vst [vmem:[%s2904_s3 + $0x78] sm:$0xff] %v1374_v23  ;;  %v990_v19 = vpop.f32.mrf.mxu1 }
 0x167   :  { %v1167_v11 = vadd.f32 %v1166_v58, %v1078_v43  ;;  %v991_v56 = vadd.f32 %v990_v19, %v2454_v40 }
 0x168   :  { %v1257_v29 = vpop.f32.mrf.mxu0 }
 0x169   :  { %v1256_v47 = vadd.f32 %v1255_v49, %v1167_v11 }
 0x16b   :  { %vm1311_vm0 = vcmp.ge.f32.partialorder %v1256_v47, 0.0  ;;  %v1343_v52 = vmul.f32 0.01, %v1256_v47 }
 0x16c   :  { %v1079_v30 = vpop.f32.mrf.mxu2 }
 0x16d   :  { %v1375_v57 = vsel %vm1311_vm0, %v1256_v47, %v1343_v52  ;;  %v1080_v60 = vadd.f32 %v1079_v30, %v991_v56  ;;  %v1168_v25 = vpop.f32.mrf.mxu3 }
 0x16e   :  { %1407 = vst [vmem:[%s2904_s3 + $0x80] sm:$0xff] %v1375_v57  ;;  %v993_v61 = vpop.f32.mrf.mxu1 }
 0x16f   :  { %v1169_v62 = vadd.f32 %v1168_v25, %v1080_v60  ;;  %v994_v48 = vadd.f32 %v993_v61, %v2465_v51 }
 0x170   :  { %v1260_v63 = vpop.f32.mrf.mxu0 }
 0x171   :  { %v1258_v0 = vadd.f32 %v1257_v29, %v1169_v62 }
 0x173   :  { %vm1312_vm1 = vcmp.ge.f32.partialorder %v1258_v0, 0.0  ;;  %v1344_v1 = vmul.f32 0.01, %v1258_v0 }
 0x174   :  { %v1082_v3 = vpop.f32.mrf.mxu2 }
 0x175   :  { %v1376_v4 = vsel %vm1312_vm1, %v1258_v0, %v1344_v1  ;;  %v1083_v5 = vadd.f32 %v1082_v3, %v994_v48  ;;  %v1171_v40 = vpop.f32.mrf.mxu3 }
 0x176   :  { %1408 = vst [vmem:[%s2904_s3 + $0x88] sm:$0xff] %v1376_v4  ;;  %v995_v9 = vpop.f32.mrf.mxu1 }
 0x177   :  { %v1172_v10 = vadd.f32 %v1171_v40, %v1083_v5  ;;  %v996_v20 = vadd.f32 %v995_v9, %v2500_v2 }
 0x178   :  { %v1262_v13 = vpop.f32.mrf.mxu0 }
 0x179   :  { %v1261_v18 = vadd.f32 %v1260_v63, %v1172_v10 }
 0x17b   :  { %vm1313_vm2 = vcmp.ge.f32.partialorder %v1261_v18, 0.0  ;;  %v1345_v17 = vmul.f32 0.01, %v1261_v18 }
 0x17c   :  { %v1084_v21 = vpop.f32.mrf.mxu2 }
 0x17d   :  { %v1377_v24 = vsel %vm1313_vm2, %v1261_v18, %v1345_v17  ;;  %v1085_v22 = vadd.f32 %v1084_v21, %v996_v20  ;;  %v1173_v51 = vpop.f32.mrf.mxu3 }
 0x17e   :  { %1409 = vst [vmem:[%s2904_s3 + $0x90] sm:$0xff] %v1377_v24  ;;  %v998_v26 = vpop.f32.mrf.mxu1 }
 0x17f   :  { %v1174_v28 = vadd.f32 %v1173_v51, %v1085_v22  ;;  %v999_v46 = vadd.f32 %v998_v26, %v2511_v14 }
 0x180   :  { %v1265_v31 = vpop.f32.mrf.mxu0 }
 0x181   :  { %v1263_v32 = vadd.f32 %v1262_v13, %v1174_v28 }
 0x183   :  { %vm1314_vm3 = vcmp.ge.f32.partialorder %v1263_v32, 0.0  ;;  %v1346_v33 = vmul.f32 0.01, %v1263_v32 }
 0x184   :  { %v1087_v34 = vpop.f32.mrf.mxu2 }
 0x185   :  { %v1378_v36 = vsel %vm1314_vm3, %v1263_v32, %v1346_v33  ;;  %v1088_v55 = vadd.f32 %v1087_v34, %v999_v46  ;;  %v1176_v2 = vpop.f32.mrf.mxu3 }
 0x186   :  { %1410 = vst [vmem:[%s2904_s3 + $0x98] sm:$0xff] %v1378_v36  ;;  %v1000_v38 = vpop.f32.mrf.mxu1 }
 0x187   :  { %v1177_v45 = vadd.f32 %v1176_v2, %v1088_v55  ;;  %v1001_v8 = vadd.f32 %v1000_v38, %v2546_v35 }
 0x188   :  { %v1267_v12 = vpop.f32.mrf.mxu0 }
 0x189   :  { %v1266_v41 = vadd.f32 %v1265_v31, %v1177_v45 }
 0x18b   :  { %vm1315_vm4 = vcmp.ge.f32.partialorder %v1266_v41, 0.0  ;;  %v1347_v49 = vmul.f32 0.01, %v1266_v41 }
 0x18c   :  { %v1089_v59 = vpop.f32.mrf.mxu2 }
 0x18d   :  { %v1379_v37 = vsel %vm1315_vm4, %v1266_v41, %v1347_v49  ;;  %v1090_v42 = vadd.f32 %v1089_v59, %v1001_v8  ;;  %v1178_v14 = vpop.f32.mrf.mxu3 }
 0x18e   :  { %1411 = vst [vmem:[%s2904_s3 + $0xa0] sm:$0xff] %v1379_v37  ;;  %v1003_v23 = vpop.f32.mrf.mxu1 }
 0x18f   :  { %v1179_v43 = vadd.f32 %v1178_v14, %v1090_v42  ;;  %v1004_v29 = vadd.f32 %v1003_v23, %v2557_v50 }
 0x190   :  { %v1270_v58 = vpop.f32.mrf.mxu0 }
 0x191   :  { %v1268_v19 = vadd.f32 %v1267_v12, %v1179_v43 }
 0x193   :  { %vm1316_vm5 = vcmp.ge.f32.partialorder %v1268_v19, 0.0  ;;  %v1348_v11 = vmul.f32 0.01, %v1268_v19 }
 0x194   :  { %v1092_v47 = vpop.f32.mrf.mxu2 }
 0x195   :  { %v1380_v52 = vsel %vm1316_vm5, %v1268_v19, %v1348_v11  ;;  %v1093_v56 = vadd.f32 %v1092_v47, %v1004_v29  ;;  %v1181_v35 = vpop.f32.mrf.mxu3 }
 0x196   :  { %1412 = vst [vmem:[%s2904_s3 + $0xa8] sm:$0xff] %v1380_v52  ;;  %v1005_v30 = vpop.f32.mrf.mxu1 }
 0x197   :  { %v1182_v57 = vadd.f32 %v1181_v35, %v1093_v56  ;;  %v1006_v62 = vadd.f32 %v1005_v30, %v2592_v7 }
 0x198   :  { %v1272_v60 = vpop.f32.mrf.mxu0 }
 0x199   :  { %v1271_v25 = vadd.f32 %v1270_v58, %v1182_v57 }
 0x19b   :  { %vm1317_vm6 = vcmp.ge.f32.partialorder %v1271_v25, 0.0  ;;  %v1349_v61 = vmul.f32 0.01, %v1271_v25 }
 0x19c   :  { %v1094_v63 = vpop.f32.mrf.mxu2 }
 0x19d   :  { %v1381_v0 = vsel %vm1317_vm6, %v1271_v25, %v1349_v61  ;;  %v1095_v1 = vadd.f32 %v1094_v63, %v1006_v62  ;;  %v1183_v50 = vpop.f32.mrf.mxu3 }
 0x19e   :  { %1413 = vst [vmem:[%s2904_s3 + $0xb0] sm:$0xff] %v1381_v0  ;;  %v1008_v48 = vpop.f32.mrf.mxu1 }
 0x19f   :  { %v1184_v3 = vadd.f32 %v1183_v50, %v1095_v1  ;;  %v1009_v9 = vadd.f32 %v1008_v48, %v2422_v27 }
 0x1a0   :  { %v1275_v4 = vpop.f32.mrf.mxu0 }
 0x1a1   :  { %v1273_v5 = vadd.f32 %v1272_v60, %v1184_v3 }
 0x1a3   :  { %vm1318_vm7 = vcmp.ge.f32.partialorder %v1273_v5, 0.0  ;;  %v1350_v40 = vmul.f32 0.01, %v1273_v5 }
 0x1a4   :  { %v1097_v10 = vpop.f32.mrf.mxu2 }
 0x1a5   :  { %v1382_v13 = vsel %vm1318_vm7, %v1273_v5, %v1350_v40  ;;  %v1098_v18 = vadd.f32 %v1097_v10, %v1009_v9  ;;  %v1186_v7 = vpop.f32.mrf.mxu3 }
 0x1a6   :  { %1414 = vst [vmem:[%s2904_s3 + $0xb8] sm:$0xff] %v1382_v13  ;;  %v1010_v17 = vpop.f32.mrf.mxu1 }
 0x1a7   :  { %v1187_v20 = vadd.f32 %v1186_v7, %v1098_v18  ;;  %v1011_v51 = vadd.f32 %v1010_v17, %v2457_v44 }
 0x1a8   :  { %v1277_v21 = vpop.f32.mrf.mxu0 }
 0x1a9   :  { %v1276_v24 = vadd.f32 %v1275_v4, %v1187_v20 }
 0x1ab   :  { %vm1319_vm8 = vcmp.ge.f32.partialorder %v1276_v24, 0.0  ;;  %v1351_v22 = vmul.f32 0.01, %v1276_v24 }
 0x1ac   :  { %v1099_v26 = vpop.f32.mrf.mxu2 }
 0x1ad   :  { %v1383_v28 = vsel %vm1319_vm8, %v1276_v24, %v1351_v22  ;;  %v1100_v31 = vadd.f32 %v1099_v26, %v1011_v51  ;;  %v1188_v27 = vpop.f32.mrf.mxu3 }
 0x1ae   :  { %1415 = vst [vmem:[%s2904_s3 + $0xc0] sm:$0xff] %v1383_v28  ;;  %v1013_v32 = vpop.f32.mrf.mxu1 }
 0x1af   :  { %v1189_v33 = vadd.f32 %v1188_v27, %v1100_v31  ;;  %v1014_v55 = vadd.f32 %v1013_v32, %v2468_v53 }
 0x1b0   :  { %v1280_v46 = vpop.f32.mrf.mxu0 }
 0x1b1   :  { %v1278_v34 = vadd.f32 %v1277_v21, %v1189_v33 }
 0x1b3   :  { %vm1320_vm9 = vcmp.ge.f32.partialorder %v1278_v34, 0.0  ;;  %v1352_v36 = vmul.f32 0.01, %v1278_v34 }
 0x1b4   :  { %v1102_v2 = vpop.f32.mrf.mxu2 }
 0x1b5   :  { %v1384_v38 = vsel %vm1320_vm9, %v1278_v34, %v1352_v36  ;;  %v1103_v45 = vadd.f32 %v1102_v2, %v1014_v55  ;;  %v1191_v44 = vpop.f32.mrf.mxu3 }
 0x1b6   :  { %1416 = vst [vmem:[%s2904_s3 + $0xc8] sm:$0xff] %v1384_v38  ;;  %v1015_v12 = vpop.f32.mrf.mxu1 }
 0x1b7   :  { %v1192_v41 = vadd.f32 %v1191_v44, %v1103_v45  ;;  %v1016_v37 = vadd.f32 %v1015_v12, %v2503_v6 }
 0x1b8   :  { %v1282_v49 = vpop.f32.mrf.mxu0 }
 0x1b9   :  { %v1281_v8 = vadd.f32 %v1280_v46, %v1192_v41 }
 0x1bb   :  { %vm1321_vm10 = vcmp.ge.f32.partialorder %v1281_v8, 0.0  ;;  %v1353_v59 = vmul.f32 0.01, %v1281_v8 }
 0x1bc   :  { %v1104_v42 = vpop.f32.mrf.mxu2 }
 0x1bd   :  { %v1385_v14 = vsel %vm1321_vm10, %v1281_v8, %v1353_v59  ;;  %v1105_v23 = vadd.f32 %v1104_v42, %v1016_v37  ;;  %v1193_v53 = vpop.f32.mrf.mxu3 }
 0x1be   :  { %1417 = vst [vmem:[%s2904_s3 + $0xd0] sm:$0xff] %v1385_v14  ;;  %v1018_v43 = vpop.f32.mrf.mxu1 }
 0x1bf   :  { %v1194_v58 = vadd.f32 %v1193_v53, %v1105_v23  ;;  %v1019_v47 = vadd.f32 %v1018_v43, %v2514_v16 }
 0x1c0   :  { %v1285_v11 = vpop.f32.mrf.mxu0 }
 0x1c1   :  { %v1283_v19 = vadd.f32 %v1282_v49, %v1194_v58 }
 0x1c3   :  { %vm1322_vm11 = vcmp.ge.f32.partialorder %v1283_v19, 0.0  ;;  %v1354_v29 = vmul.f32 0.01, %v1283_v19 }
 0x1c4   :  { %v1107_v52 = vpop.f32.mrf.mxu2 }
 0x1c5   :  { %v1386_v56 = vsel %vm1322_vm11, %v1283_v19, %v1354_v29  ;;  %v1108_v35 = vadd.f32 %v1107_v52, %v1019_v47  ;;  %v1196_v6 = vpop.f32.mrf.mxu3 }
 0x1c6   :  { %1418 = vst [vmem:[%s2904_s3 + $0xd8] sm:$0xff] %v1386_v56  ;;  %v1020_v30 = vpop.f32.mrf.mxu1 }
 0x1c7   :  { %v1197_v57 = vadd.f32 %v1196_v6, %v1108_v35  ;;  %v1021_v61 = vadd.f32 %v1020_v30, %v2549_v39 }
 0x1c8   :  { %v1287_v62 = vpop.f32.mrf.mxu0 }
 0x1c9   :  { %v1286_v60 = vadd.f32 %v1285_v11, %v1197_v57 }
 0x1cb   :  { %vm1323_vm12 = vcmp.ge.f32.partialorder %v1286_v60, 0.0  ;;  %v1355_v25 = vmul.f32 0.01, %v1286_v60 }
 0x1cc   :  { %v1109_v63 = vpop.f32.mrf.mxu2 }
 0x1cd   :  { %v1387_v0 = vsel %vm1323_vm12, %v1286_v60, %v1355_v25  ;;  %v1110_v1 = vadd.f32 %v1109_v63, %v1021_v61  ;;  %v1198_v16 = vpop.f32.mrf.mxu3 }
 0x1ce   :  { %1419 = vst [vmem:[%s2904_s3 + $0xe0] sm:$0xff] %v1387_v0  ;;  %v1023_v50 = vpop.f32.mrf.mxu1 }
 0x1cf   :  { %v1199_v48 = vadd.f32 %v1198_v16, %v1110_v1  ;;  %v1024_v5 = vadd.f32 %v1023_v50, %v2560_v54 }
 0x1d0   :  { %v1290_v13 = vpop.f32.mrf.mxu0 }
 0x1d1   :  { %v1288_v3 = vadd.f32 %v1287_v62, %v1199_v48 }
 0x1d3   :  { %vm1324_vm13 = vcmp.ge.f32.partialorder %v1288_v3, 0.0  ;;  %v1356_v4 = vmul.f32 0.01, %v1288_v3 }
 0x1d4   :  { %v1112_v40 = vpop.f32.mrf.mxu2 }
 0x1d5   :  { %v1388_v9 = vsel %vm1324_vm13, %v1288_v3, %v1356_v4  ;;  %v1113_v10 = vadd.f32 %v1112_v40, %v1024_v5  ;;  %v1201_v39 = vpop.f32.mrf.mxu3 }
 0x1d6   :  { %1420 = vst [vmem:[%s2904_s3 + $0xe8] sm:$0xff] %v1388_v9  ;;  %v1025_v7 = vpop.f32.mrf.mxu1 }
 0x1d7   :  { %v1202_v18 = vadd.f32 %v1201_v39, %v1113_v10  ;;  %v1026_v21 = vadd.f32 %v1025_v7, %v2595_v15 }
 0x1d8   :  { %v1292_v28 = vpop.f32.mrf.mxu0 }
 0x1d9   :  { %v1291_v17 = vadd.f32 %v1290_v13, %v1202_v18 }
 0x1db   :  { %vm1325_vm14 = vcmp.ge.f32.partialorder %v1291_v17, 0.0  ;;  %v1357_v20 = vmul.f32 0.01, %v1291_v17 }
 0x1dc   :  { %v1114_v24 = vpop.f32.mrf.mxu2 }
 0x1dd   :  { %v1389_v22 = vsel %vm1325_vm14, %v1291_v17, %v1357_v20  ;;  %v1115_v51 = vadd.f32 %v1114_v24, %v1026_v21  ;;  %v1203_v54 = vpop.f32.mrf.mxu3 }
 0x1de   :  { %1421 = vst [vmem:[%s2904_s3 + $0xf0] sm:$0xff] %v1389_v22 }
 0x1df   :  { %v1204_v26 = vadd.f32 %v1203_v54, %v1115_v51 }
 0x1e1   :  { %v1293_v31 = vadd.f32 %v1292_v28, %v1204_v26 }
 0x1e3   :  { %vm1326_vm15 = vcmp.ge.f32.partialorder %v1293_v31, 0.0  ;;  %v1358_v27 = vmul.f32 0.01, %v1293_v31 }
 0x1e5   :  { %v1390_v32 = vsel %vm1326_vm15, %v1293_v31, %v1358_v27 }
 0x1e6   :  { %1422 = vst [vmem:[%s2904_s3 + $0xf8] sm:$0xff] %v1390_v32 }

// kernel: aesfa_forward.20
= control target key start
LH: loop header
LB: loop body
LE: loop exit
PB: predicated region body
PF: predicated region fallthrough
CT: control target
= control target key end

     0   :  { %s801_s1 = inlined_call_operand.vmem [shape: bf16[128,128], index: 1, kind: input, shape index: {}]   ;;  %s802_s2 = inlined_call_operand.vmem [shape: f32[1,128], index: 2, kind: input, shape index: {}]   ;;  %s803_s0 = inlined_call_operand.vmem [shape: bf16[256,128], index: 0, kind: input, shape index: {}]   ;;  %s804_s3 = inlined_call_operand.vmem [shape: f32[256,128], index: 3, kind: output, shape index: {}]  }
   0x1   :  { %v550_v0 = vld [vmem:[%s801_s1 + $0x38] sm:$0xff]  ;;  %v549_v1 = vld [vmem:[%s801_s1 + $0x30] sm:$0xff]  ;;  %v548_v2 = vld [vmem:[%s801_s1 + $0x28] sm:$0xff] }
   0x2   :  { %210 = vmatpush.bf16.msra.mxu0 %v550_v0  ;;  %551 = vmatpush.bf16.msra.mxu1 %v550_v0  ;;  %v547_v3 = vld [vmem:[%s801_s1 + $0x20] sm:$0xff]  ;;  %v546_v4 = vld [vmem:[%s801_s1 + $0x18] sm:$0xff]  ;;  %v545_v5 = vld [vmem:[%s801_s1 + $0x10] sm:$0xff] }
   0x3   :  { %552 = vmatpush.bf16.msra.mxu2 %v550_v0  ;;  %553 = vmatpush.bf16.msra.mxu3 %v550_v0  ;;  %v544_v6 = vld [vmem:[%s801_s1 + $0x8] sm:$0xff]  ;;  %v543_v7 = vld [vmem:[%s801_s1] sm:$0xff]  ;;  %v529_v16 = vld [vmem:[%s803_s0 + $0x10] sm:$0xff] }
   0x4   :  { %v527_v8 = vld [vmem:[%s803_s0] sm:$0xff]  ;;  %v528_v12 = vld [vmem:[%s803_s0 + $0x8] sm:$0xff]  ;;  %v533_v17 = vld [vmem:[%s803_s0 + $0x30] sm:$0xff] }
   0x5   :  { %v531_v9 = vld [vmem:[%s803_s0 + $0x20] sm:$0xff]  ;;  %v532_v13 = vld [vmem:[%s803_s0 + $0x28] sm:$0xff]  ;;  %v537_v18 = vld [vmem:[%s803_s0 + $0x50] sm:$0xff] }
   0x6   :  { %211 = vmatpush.bf16.msra.mxu0 %v549_v1  ;;  %554 = vmatpush.bf16.msra.mxu1 %v549_v1  ;;  %v535_v10 = vld [vmem:[%s803_s0 + $0x40] sm:$0xff]  ;;  %v536_v14 = vld [vmem:[%s803_s0 + $0x48] sm:$0xff]  ;;  %v541_v19 = vld [vmem:[%s803_s0 + $0x70] sm:$0xff] }
   0x7   :  { %555 = vmatpush.bf16.msra.mxu2 %v549_v1  ;;  %556 = vmatpush.bf16.msra.mxu3 %v549_v1  ;;  %v539_v11 = vld [vmem:[%s803_s0 + $0x60] sm:$0xff]  ;;  %v540_v15 = vld [vmem:[%s803_s0 + $0x68] sm:$0xff]  ;;  %v530_v20 = vld [vmem:[%s803_s0 + $0x18] sm:$0xff] }
   0x8   :  { %v534_v21 = vld [vmem:[%s803_s0 + $0x38] sm:$0xff]  ;;  %v671_v24 = vld [vmem:[%s802_s2] ss:$0 sm:$0xff] }
   0x9   :  { %v538_v22 = vld [vmem:[%s803_s0 + $0x58] sm:$0xff] }
   0xa   :  { %212 = vmatpush.bf16.msra.mxu0 %v548_v2  ;;  %557 = vmatpush.bf16.msra.mxu1 %v548_v2  ;;  %v542_v23 = vld [vmem:[%s803_s0 + $0x78] sm:$0xff] }
   0xb   :  { %558 = vmatpush.bf16.msra.mxu2 %v548_v2  ;;  %559 = vmatpush.bf16.msra.mxu3 %v548_v2 }
   0xe   :  { %213 = vmatpush.bf16.msra.mxu0 %v547_v3  ;;  %560 = vmatpush.bf16.msra.mxu1 %v547_v3 }
   0xf   :  { %561 = vmatpush.bf16.msra.mxu2 %v547_v3  ;;  %562 = vmatpush.bf16.msra.mxu3 %v547_v3 }
  0x12   :  { %214 = vmatpush.bf16.msra.mxu0 %v546_v4  ;;  %563 = vmatpush.bf16.msra.mxu1 %v546_v4 }
  0x13   :  { %564 = vmatpush.bf16.msra.mxu2 %v546_v4  ;;  %565 = vmatpush.bf16.msra.mxu3 %v546_v4 }
  0x16   :  { %215 = vmatpush.bf16.msra.mxu0 %v545_v5  ;;  %566 = vmatpush.bf16.msra.mxu1 %v545_v5 }
  0x17   :  { %567 = vmatpush.bf16.msra.mxu2 %v545_v5  ;;  %568 = vmatpush.bf16.msra.mxu3 %v545_v5 }
  0x1a   :  { %216 = vmatpush.bf16.msra.mxu0 %v544_v6  ;;  %569 = vmatpush.bf16.msra.mxu1 %v544_v6 }
  0x1b   :  { %570 = vmatpush.bf16.msra.mxu2 %v544_v6  ;;  %571 = vmatpush.bf16.msra.mxu3 %v544_v6 }
  0x1e   :  { %217 = vmatpush.bf16.msra.mxu0 %v543_v7  ;;  %572 = vmatpush.bf16.msra.mxu1 %v543_v7 }
  0x1f   :  { %573 = vmatpush.bf16.msra.mxu2 %v543_v7  ;;  %574 = vmatpush.bf16.msra.mxu3 %v543_v7 }
  0x21   :  { %218 = vmatmul.bf16.vlgmr.msra.gmra.mxu0 %v527_v8  ;;  %238 = vmatmul.bf16.vlgmr.msra.gmra.mxu1 %v531_v9 }
  0x22   :  { %258 = vmatmul.bf16.vlgmr.msra.gmra.mxu2 %v535_v10  ;;  %278 = vmatmul.bf16.vlgmr.msra.gmra.mxu3 %v539_v11 }
  0x31   :  { %223 = vmatmul.bf16.gmra.mxu0 %v528_v12  ;;  %243 = vmatmul.bf16.gmra.mxu1 %v532_v13 }
  0x32   :  { %263 = vmatmul.bf16.gmra.mxu2 %v536_v14  ;;  %283 = vmatmul.bf16.gmra.mxu3 %v540_v15 }
  0x41   :  { %228 = vmatmul.bf16.gmra.mxu0 %v529_v16  ;;  %248 = vmatmul.bf16.gmra.mxu1 %v533_v17 }
  0x42   :  { %268 = vmatmul.bf16.gmra.mxu2 %v537_v18  ;;  %288 = vmatmul.bf16.gmra.mxu3 %v541_v19 }
  0x51   :  { %233 = vmatmul.bf16.gmra.mxu0 %v530_v20  ;;  %253 = vmatmul.bf16.gmra.mxu1 %v534_v21 }
  0x52   :  { %273 = vmatmul.bf16.gmra.mxu2 %v538_v22  ;;  %293 = vmatmul.bf16.gmra.mxu3 %v542_v23 }
  0x9e   :  { %v219_v25 = vpop.f32.mrf.mxu0  ;;  %v239_v26 = vpop.f32.mrf.mxu1 }
  0x9f   :  { %v220_v27 = vadd.f32 %v671_v24, %v219_v25  ;;  %v240_v28 = vadd.f32 %v671_v24, %v239_v26 }
  0xa1   :  { %vm299_vm0 = vcmp.ge.f32.partialorder %v220_v27, 0.0  ;;  %v331_v29 = vmul.f32 0.01, %v220_v27  ;;  %vm307_vm1 = vcmp.ge.f32.partialorder %v240_v28, 0.0  ;;  %v339_v30 = vmul.f32 0.01, %v240_v28 }
  0xa3   :  { %v363_v31 = vsel %vm299_vm0, %v220_v27, %v331_v29  ;;  %v371_v32 = vsel %vm307_vm1, %v240_v28, %v339_v30 }
  0xa4   :  { %395 = vst [vmem:[%s804_s3] sm:$0xff] %v363_v31 }
  0xa5   :  { %403 = vst [vmem:[%s804_s3 + $0x40] sm:$0xff] %v371_v32  ;;  %v259_v33 = vpop.f32.mrf.mxu2  ;;  %v279_v34 = vpop.f32.mrf.mxu3 }
  0xa6   :  { %v260_v35 = vadd.f32 %v671_v24, %v259_v33  ;;  %v280_v36 = vadd.f32 %v671_v24, %v279_v34  ;;  %v221_v37 = vpop.f32.mrf.mxu0  ;;  %v241_v38 = vpop.f32.mrf.mxu1 }
  0xa7   :  { %v222_v39 = vadd.f32 %v671_v24, %v221_v37  ;;  %v242_v40 = vadd.f32 %v671_v24, %v241_v38 }
  0xa8   :  { %vm315_vm2 = vcmp.ge.f32.partialorder %v260_v35, 0.0  ;;  %v347_v41 = vmul.f32 0.01, %v260_v35  ;;  %vm323_vm3 = vcmp.ge.f32.partialorder %v280_v36, 0.0  ;;  %v355_v42 = vmul.f32 0.01, %v280_v36 }
  0xa9   :  { %vm300_vm4 = vcmp.ge.f32.partialorder %v222_v39, 0.0  ;;  %v332_v43 = vmul.f32 0.01, %v222_v39  ;;  %vm308_vm5 = vcmp.ge.f32.partialorder %v242_v40, 0.0  ;;  %v340_v44 = vmul.f32 0.01, %v242_v40 }
  0xaa   :  { %v379_v45 = vsel %vm315_vm2, %v260_v35, %v347_v41  ;;  %v387_v46 = vsel %vm323_vm3, %v280_v36, %v355_v42 }
  0xab   :  { %411 = vst [vmem:[%s804_s3 + $0x80] sm:$0xff] %v379_v45  ;;  %v364_v47 = vsel %vm300_vm4, %v222_v39, %v332_v43  ;;  %v372_v48 = vsel %vm308_vm5, %v242_v40, %v340_v44 }
  0xac   :  { %419 = vst [vmem:[%s804_s3 + $0xc0] sm:$0xff] %v387_v46 }
  0xad   :  { %396 = vst [vmem:[%s804_s3 + $0x8] sm:$0xff] %v364_v47  ;;  %v261_v49 = vpop.f32.mrf.mxu2  ;;  %v281_v50 = vpop.f32.mrf.mxu3 }
  0xae   :  { %404 = vst [vmem:[%s804_s3 + $0x48] sm:$0xff] %v372_v48  ;;  %v262_v51 = vadd.f32 %v671_v24, %v261_v49  ;;  %v282_v52 = vadd.f32 %v671_v24, %v281_v50  ;;  %v224_v53 = vpop.f32.mrf.mxu0  ;;  %v244_v54 = vpop.f32.mrf.mxu1 }
  0xaf   :  { %v225_v55 = vadd.f32 %v671_v24, %v224_v53  ;;  %v245_v56 = vadd.f32 %v671_v24, %v244_v54 }
  0xb0   :  { %vm316_vm6 = vcmp.ge.f32.partialorder %v262_v51, 0.0  ;;  %v348_v57 = vmul.f32 0.01, %v262_v51  ;;  %vm324_vm7 = vcmp.ge.f32.partialorder %v282_v52, 0.0  ;;  %v356_v58 = vmul.f32 0.01, %v282_v52 }
  0xb1   :  { %vm301_vm8 = vcmp.ge.f32.partialorder %v225_v55, 0.0  ;;  %v333_v59 = vmul.f32 0.01, %v225_v55  ;;  %vm309_vm9 = vcmp.ge.f32.partialorder %v245_v56, 0.0  ;;  %v341_v60 = vmul.f32 0.01, %v245_v56 }
  0xb2   :  { %v380_v61 = vsel %vm316_vm6, %v262_v51, %v348_v57  ;;  %v388_v62 = vsel %vm324_vm7, %v282_v52, %v356_v58 }
  0xb3   :  { %412 = vst [vmem:[%s804_s3 + $0x88] sm:$0xff] %v380_v61  ;;  %v365_v63 = vsel %vm301_vm8, %v225_v55, %v333_v59  ;;  %v373_v0 = vsel %vm309_vm9, %v245_v56, %v341_v60 }
  0xb4   :  { %420 = vst [vmem:[%s804_s3 + $0xc8] sm:$0xff] %v388_v62 }
  0xb5   :  { %397 = vst [vmem:[%s804_s3 + $0x10] sm:$0xff] %v365_v63  ;;  %v264_v1 = vpop.f32.mrf.mxu2  ;;  %v284_v2 = vpop.f32.mrf.mxu3 }
  0xb6   :  { %405 = vst [vmem:[%s804_s3 + $0x50] sm:$0xff] %v373_v0  ;;  %v265_v3 = vadd.f32 %v671_v24, %v264_v1  ;;  %v285_v4 = vadd.f32 %v671_v24, %v284_v2  ;;  %v226_v5 = vpop.f32.mrf.mxu0  ;;  %v246_v6 = vpop.f32.mrf.mxu1 }
  0xb7   :  { %v227_v7 = vadd.f32 %v671_v24, %v226_v5  ;;  %v247_v8 = vadd.f32 %v671_v24, %v246_v6 }
  0xb8   :  { %vm317_vm10 = vcmp.ge.f32.partialorder %v265_v3, 0.0  ;;  %v349_v9 = vmul.f32 0.01, %v265_v3  ;;  %vm325_vm11 = vcmp.ge.f32.partialorder %v285_v4, 0.0  ;;  %v357_v10 = vmul.f32 0.01, %v285_v4 }
  0xb9   :  { %vm302_vm12 = vcmp.ge.f32.partialorder %v227_v7, 0.0  ;;  %v334_v11 = vmul.f32 0.01, %v227_v7  ;;  %vm310_vm13 = vcmp.ge.f32.partialorder %v247_v8, 0.0  ;;  %v342_v12 = vmul.f32 0.01, %v247_v8 }
  0xba   :  { %v381_v13 = vsel %vm317_vm10, %v265_v3, %v349_v9  ;;  %v389_v14 = vsel %vm325_vm11, %v285_v4, %v357_v10 }
  0xbb   :  { %413 = vst [vmem:[%s804_s3 + $0x90] sm:$0xff] %v381_v13  ;;  %v366_v15 = vsel %vm302_vm12, %v227_v7, %v334_v11  ;;  %v374_v16 = vsel %vm310_vm13, %v247_v8, %v342_v12 }
  0xbc   :  { %421 = vst [vmem:[%s804_s3 + $0xd0] sm:$0xff] %v389_v14 }
  0xbd   :  { %398 = vst [vmem:[%s804_s3 + $0x18] sm:$0xff] %v366_v15  ;;  %v266_v17 = vpop.f32.mrf.mxu2  ;;  %v286_v18 = vpop.f32.mrf.mxu3 }
  0xbe   :  { %406 = vst [vmem:[%s804_s3 + $0x58] sm:$0xff] %v374_v16  ;;  %v267_v19 = vadd.f32 %v671_v24, %v266_v17  ;;  %v287_v20 = vadd.f32 %v671_v24, %v286_v18  ;;  %v229_v21 = vpop.f32.mrf.mxu0  ;;  %v249_v22 = vpop.f32.mrf.mxu1 }
  0xbf   :  { %v230_v23 = vadd.f32 %v671_v24, %v229_v21  ;;  %v250_v25 = vadd.f32 %v671_v24, %v249_v22 }
  0xc0   :  { %vm318_vm14 = vcmp.ge.f32.partialorder %v267_v19, 0.0  ;;  %v350_v26 = vmul.f32 0.01, %v267_v19  ;;  %vm326_vm15 = vcmp.ge.f32.partialorder %v287_v20, 0.0  ;;  %v358_v27 = vmul.f32 0.01, %v287_v20 }
  0xc1   :  { %vm303_vm0 = vcmp.ge.f32.partialorder %v230_v23, 0.0  ;;  %v335_v28 = vmul.f32 0.01, %v230_v23  ;;  %vm311_vm1 = vcmp.ge.f32.partialorder %v250_v25, 0.0  ;;  %v343_v29 = vmul.f32 0.01, %v250_v25 }
  0xc2   :  { %v382_v30 = vsel %vm318_vm14, %v267_v19, %v350_v26  ;;  %v390_v31 = vsel %vm326_vm15, %v287_v20, %v358_v27 }
  0xc3   :  { %414 = vst [vmem:[%s804_s3 + $0x98] sm:$0xff] %v382_v30  ;;  %v367_v32 = vsel %vm303_vm0, %v230_v23, %v335_v28  ;;  %v375_v33 = vsel %vm311_vm1, %v250_v25, %v343_v29 }
  0xc4   :  { %422 = vst [vmem:[%s804_s3 + $0xd8] sm:$0xff] %v390_v31 }
  0xc5   :  { %399 = vst [vmem:[%s804_s3 + $0x20] sm:$0xff] %v367_v32  ;;  %v269_v34 = vpop.f32.mrf.mxu2  ;;  %v289_v35 = vpop.f32.mrf.mxu3 }
  0xc6   :  { %407 = vst [vmem:[%s804_s3 + $0x60] sm:$0xff] %v375_v33  ;;  %v270_v36 = vadd.f32 %v671_v24, %v269_v34  ;;  %v290_v37 = vadd.f32 %v671_v24, %v289_v35  ;;  %v231_v38 = vpop.f32.mrf.mxu0  ;;  %v251_v39 = vpop.f32.mrf.mxu1 }
  0xc7   :  { %v232_v40 = vadd.f32 %v671_v24, %v231_v38  ;;  %v252_v41 = vadd.f32 %v671_v24, %v251_v39 }
  0xc8   :  { %vm319_vm2 = vcmp.ge.f32.partialorder %v270_v36, 0.0  ;;  %v351_v42 = vmul.f32 0.01, %v270_v36  ;;  %vm327_vm3 = vcmp.ge.f32.partialorder %v290_v37, 0.0  ;;  %v359_v43 = vmul.f32 0.01, %v290_v37 }
  0xc9   :  { %vm304_vm4 = vcmp.ge.f32.partialorder %v232_v40, 0.0  ;;  %v336_v44 = vmul.f32 0.01, %v232_v40  ;;  %vm312_vm5 = vcmp.ge.f32.partialorder %v252_v41, 0.0  ;;  %v344_v45 = vmul.f32 0.01, %v252_v41 }
  0xca   :  { %v383_v46 = vsel %vm319_vm2, %v270_v36, %v351_v42  ;;  %v391_v47 = vsel %vm327_vm3, %v290_v37, %v359_v43 }
  0xcb   :  { %415 = vst [vmem:[%s804_s3 + $0xa0] sm:$0xff] %v383_v46  ;;  %v368_v48 = vsel %vm304_vm4, %v232_v40, %v336_v44  ;;  %v376_v49 = vsel %vm312_vm5, %v252_v41, %v344_v45 }
  0xcc   :  { %423 = vst [vmem:[%s804_s3 + $0xe0] sm:$0xff] %v391_v47 }
  0xcd   :  { %400 = vst [vmem:[%s804_s3 + $0x28] sm:$0xff] %v368_v48  ;;  %v271_v50 = vpop.f32.mrf.mxu2  ;;  %v291_v51 = vpop.f32.mrf.mxu3 }
  0xce   :  { %408 = vst [vmem:[%s804_s3 + $0x68] sm:$0xff] %v376_v49  ;;  %v272_v52 = vadd.f32 %v671_v24, %v271_v50  ;;  %v292_v53 = vadd.f32 %v671_v24, %v291_v51  ;;  %v234_v54 = vpop.f32.mrf.mxu0  ;;  %v254_v55 = vpop.f32.mrf.mxu1 }
  0xcf   :  { %v235_v56 = vadd.f32 %v671_v24, %v234_v54  ;;  %v255_v57 = vadd.f32 %v671_v24, %v254_v55 }
  0xd0   :  { %vm320_vm6 = vcmp.ge.f32.partialorder %v272_v52, 0.0  ;;  %v352_v58 = vmul.f32 0.01, %v272_v52  ;;  %vm328_vm7 = vcmp.ge.f32.partialorder %v292_v53, 0.0  ;;  %v360_v59 = vmul.f32 0.01, %v292_v53 }
  0xd1   :  { %vm305_vm8 = vcmp.ge.f32.partialorder %v235_v56, 0.0  ;;  %v337_v60 = vmul.f32 0.01, %v235_v56  ;;  %vm313_vm9 = vcmp.ge.f32.partialorder %v255_v57, 0.0  ;;  %v345_v61 = vmul.f32 0.01, %v255_v57 }
  0xd2   :  { %v384_v62 = vsel %vm320_vm6, %v272_v52, %v352_v58  ;;  %v392_v63 = vsel %vm328_vm7, %v292_v53, %v360_v59 }
  0xd3   :  { %416 = vst [vmem:[%s804_s3 + $0xa8] sm:$0xff] %v384_v62  ;;  %v369_v0 = vsel %vm305_vm8, %v235_v56, %v337_v60  ;;  %v377_v1 = vsel %vm313_vm9, %v255_v57, %v345_v61 }
  0xd4   :  { %424 = vst [vmem:[%s804_s3 + $0xe8] sm:$0xff] %v392_v63 }
  0xd5   :  { %401 = vst [vmem:[%s804_s3 + $0x30] sm:$0xff] %v369_v0  ;;  %v274_v2 = vpop.f32.mrf.mxu2  ;;  %v294_v3 = vpop.f32.mrf.mxu3 }
  0xd6   :  { %409 = vst [vmem:[%s804_s3 + $0x70] sm:$0xff] %v377_v1  ;;  %v275_v4 = vadd.f32 %v671_v24, %v274_v2  ;;  %v295_v5 = vadd.f32 %v671_v24, %v294_v3  ;;  %v236_v6 = vpop.f32.mrf.mxu0  ;;  %v256_v7 = vpop.f32.mrf.mxu1 }
  0xd7   :  { %v237_v8 = vadd.f32 %v671_v24, %v236_v6  ;;  %v257_v9 = vadd.f32 %v671_v24, %v256_v7 }
  0xd8   :  { %vm321_vm10 = vcmp.ge.f32.partialorder %v275_v4, 0.0  ;;  %v353_v10 = vmul.f32 0.01, %v275_v4  ;;  %vm329_vm11 = vcmp.ge.f32.partialorder %v295_v5, 0.0  ;;  %v361_v11 = vmul.f32 0.01, %v295_v5 }
  0xd9   :  { %vm306_vm12 = vcmp.ge.f32.partialorder %v237_v8, 0.0  ;;  %v338_v12 = vmul.f32 0.01, %v237_v8  ;;  %vm314_vm13 = vcmp.ge.f32.partialorder %v257_v9, 0.0  ;;  %v346_v13 = vmul.f32 0.01, %v257_v9 }
  0xda   :  { %v385_v14 = vsel %vm321_vm10, %v275_v4, %v353_v10  ;;  %v393_v15 = vsel %vm329_vm11, %v295_v5, %v361_v11 }
  0xdb   :  { %417 = vst [vmem:[%s804_s3 + $0xb0] sm:$0xff] %v385_v14  ;;  %v370_v16 = vsel %vm306_vm12, %v237_v8, %v338_v12  ;;  %v378_v17 = vsel %vm314_vm13, %v257_v9, %v346_v13 }
  0xdc   :  { %425 = vst [vmem:[%s804_s3 + $0xf0] sm:$0xff] %v393_v15 }
  0xdd   :  { %402 = vst [vmem:[%s804_s3 + $0x38] sm:$0xff] %v370_v16  ;;  %v276_v18 = vpop.f32.mrf.mxu2  ;;  %v296_v19 = vpop.f32.mrf.mxu3 }
  0xde   :  { %410 = vst [vmem:[%s804_s3 + $0x78] sm:$0xff] %v378_v17  ;;  %v277_v20 = vadd.f32 %v671_v24, %v276_v18  ;;  %v297_v21 = vadd.f32 %v671_v24, %v296_v19 }
  0xe0   :  { %vm322_vm14 = vcmp.ge.f32.partialorder %v277_v20, 0.0  ;;  %v354_v22 = vmul.f32 0.01, %v277_v20  ;;  %vm330_vm15 = vcmp.ge.f32.partialorder %v297_v21, 0.0  ;;  %v362_v23 = vmul.f32 0.01, %v297_v21 }
  0xe2   :  { %v386_v25 = vsel %vm322_vm14, %v277_v20, %v354_v22  ;;  %v394_v26 = vsel %vm330_vm15, %v297_v21, %v362_v23 }
  0xe3   :  { %418 = vst [vmem:[%s804_s3 + $0xb8] sm:$0xff] %v386_v25 }
  0xe4   :  { %426 = vst [vmem:[%s804_s3 + $0xf8] sm:$0xff] %v394_v26 }

// kernel: aesfa_forward.21
= control target key start
LH: loop header
LB: loop body
LE: loop exit
PB: predicated region body
PF: predicated region fallthrough
CT: control target
= control target key end

     0   :  { %s4953_s1 = inlined_call_operand.vmem [shape: bf16[1152,128], index: 1, kind: input, shape index: {}]   ;;  %s4954_s2 = inlined_call_operand.vmem [shape: f32[1,128], index: 2, kind: input, shape index: {}]   ;;  %s4955_s0 = inlined_call_operand.vmem [shape: bf16[256,1152], index: 0, kind: input, shape index: {}]   ;;  %s4956_s3 = inlined_call_operand.vmem [shape: f32[256,128], index: 3, kind: output, shape index: {}]  }
   0x1   :  { %v3438_v0 = vld [vmem:[%s4953_s1 + $0x38] sm:$0xff]  ;;  %v3437_v1 = vld [vmem:[%s4953_s1 + $0x30] sm:$0xff]  ;;  %v3436_v2 = vld [vmem:[%s4953_s1 + $0x28] sm:$0xff] }
   0x2   :  { %3503 = vmatpush.bf16.msra.mxu1 %v3438_v0  ;;  %3504 = vmatpush.bf16.msra.mxu2 %v3438_v0  ;;  %v3435_v3 = vld [vmem:[%s4953_s1 + $0x20] sm:$0xff]  ;;  %v3434_v4 = vld [vmem:[%s4953_s1 + $0x18] sm:$0xff]  ;;  %v3433_v5 = vld [vmem:[%s4953_s1 + $0x10] sm:$0xff] }
   0x3   :  { %3505 = vmatpush.bf16.msra.mxu3 %v3438_v0  ;;  %1490 = vmatpush.bf16.msra.mxu0 %v3438_v0  ;;  %v3432_v6 = vld [vmem:[%s4953_s1 + $0x8] sm:$0xff]  ;;  %v3431_v7 = vld [vmem:[%s4953_s1] sm:$0xff]  ;;  %v3454_v16 = vld [vmem:[%s4953_s1 + $0xb8] sm:$0xff] }
   0x4   :  { %v2569_v8 = vld [vmem:[%s4955_s0 + $0x120] sm:$0xf]  ;;  %v3327_v9 = vld [vmem:[%s4955_s0 + $0x140] sm:$0xf0]  ;;  %v3462_v17 = vld [vmem:[%s4953_s1 + $0xf8] sm:$0xff] }
   0x5   :  { %v2713_v10 = vld [vmem:[%s4955_s0 + $0x240] sm:$0xf]  ;;  %v3363_v11 = vld [vmem:[%s4955_s0 + $0x260] sm:$0xf0]  ;;  %v2570_v18 = vor.u32 %v3327_v9, %v2569_v8  ;;  %v3446_v22 = vld [vmem:[%s4953_s1 + $0x78] sm:$0xff] }
   0x6   :  { %3506 = vmatpush.bf16.msra.mxu1 %v3437_v1  ;;  %3507 = vmatpush.bf16.msra.mxu2 %v3437_v1  ;;  %v2857_v12 = vld [vmem:[%s4955_s0 + $0x360] sm:$0xf]  ;;  %v3399_v13 = vld [vmem:[%s4955_s0 + $0x380] sm:$0xf0]  ;;  %v2714_v19 = vor.u32 %v3363_v11, %v2713_v10  ;;  %v3470_v23 = vld [vmem:[%s4953_s1 + $0x138] sm:$0xff] }
   0x7   :  { %3508 = vmatpush.bf16.msra.mxu3 %v3437_v1  ;;  %1491 = vmatpush.bf16.msra.mxu0 %v3437_v1  ;;  %v2425_v14 = vld [vmem:[%s4955_s0] sm:$0xf]  ;;  %v3291_v15 = vld [vmem:[%s4955_s0 + $0x20] sm:$0xf0]  ;;  %v2858_v20 = vor.u32 %v3399_v13, %v2857_v12  ;;  %v3453_v24 = vld [vmem:[%s4953_s1 + $0xb0] sm:$0xff] }
   0x8   :  { %v2426_v21 = vor.u32 %v3291_v15, %v2425_v14  ;;  %v3461_v25 = vld [vmem:[%s4953_s1 + $0xf0] sm:$0xff]  ;;  %v3452_v28 = vld [vmem:[%s4953_s1 + $0xa8] sm:$0xff]  ;;  %v3451_v33 = vld [vmem:[%s4953_s1 + $0xa0] sm:$0xff] }
   0x9   :  { %v3445_v26 = vld [vmem:[%s4953_s1 + $0x70] sm:$0xff]  ;;  %v3460_v29 = vld [vmem:[%s4953_s1 + $0xe8] sm:$0xff]  ;;  %v3459_v34 = vld [vmem:[%s4953_s1 + $0xe0] sm:$0xff] }
   0xa   :  { %3509 = vmatpush.bf16.msra.mxu1 %v3436_v2  ;;  %3510 = vmatpush.bf16.msra.mxu2 %v3436_v2  ;;  %v3469_v27 = vld [vmem:[%s4953_s1 + $0x130] sm:$0xff]  ;;  %v3444_v30 = vld [vmem:[%s4953_s1 + $0x68] sm:$0xff]  ;;  %v3443_v42 = vld [vmem:[%s4953_s1 + $0x60] sm:$0xff] }
   0xb   :  { %3511 = vmatpush.bf16.msra.mxu3 %v3436_v2  ;;  %1492 = vmatpush.bf16.msra.mxu0 %v3436_v2  ;;  %v3468_v31 = vld [vmem:[%s4953_s1 + $0x128] sm:$0xff]  ;;  %v3467_v43 = vld [vmem:[%s4953_s1 + $0x120] sm:$0xff]  ;;  %v3450_v44 = vld [vmem:[%s4953_s1 + $0x98] sm:$0xff] }
   0xc   :  { %v2605_v32 = vld [vmem:[%s4955_s0 + $0x168] sm:$0xf]  ;;  %v3336_v35 = vld [vmem:[%s4955_s0 + $0x188] sm:$0xf0]  ;;  %v3458_v45 = vld [vmem:[%s4953_s1 + $0xd8] sm:$0xff] }
   0xd   :  { %v2749_v36 = vld [vmem:[%s4955_s0 + $0x288] sm:$0xf]  ;;  %v3372_v37 = vld [vmem:[%s4955_s0 + $0x2a8] sm:$0xf0]  ;;  %v2606_v46 = vor.u32 %v3336_v35, %v2605_v32  ;;  %v3442_v50 = vld [vmem:[%s4953_s1 + $0x58] sm:$0xff] }
   0xe   :  { %3512 = vmatpush.bf16.msra.mxu1 %v3435_v3  ;;  %3513 = vmatpush.bf16.msra.mxu2 %v3435_v3  ;;  %v2893_v38 = vld [vmem:[%s4955_s0 + $0x3a8] sm:$0xf]  ;;  %v3408_v39 = vld [vmem:[%s4955_s0 + $0x3c8] sm:$0xf0]  ;;  %v2750_v47 = vor.u32 %v3372_v37, %v2749_v36  ;;  %v3466_v51 = vld [vmem:[%s4953_s1 + $0x118] sm:$0xff] }
   0xf   :  { %3514 = vmatpush.bf16.msra.mxu3 %v3435_v3  ;;  %1493 = vmatpush.bf16.msra.mxu0 %v3435_v3  ;;  %v2461_v40 = vld [vmem:[%s4955_s0 + $0x48] sm:$0xf]  ;;  %v3300_v41 = vld [vmem:[%s4955_s0 + $0x68] sm:$0xf0]  ;;  %v2894_v48 = vor.u32 %v3408_v39, %v2893_v38  ;;  %v3449_v52 = vld [vmem:[%s4953_s1 + $0x90] sm:$0xff] }
  0x10   :  { %v2462_v49 = vor.u32 %v3300_v41, %v2461_v40  ;;  %v3457_v53 = vld [vmem:[%s4953_s1 + $0xd0] sm:$0xff]  ;;  %v3448_v56 = vld [vmem:[%s4953_s1 + $0x88] sm:$0xff]  ;;  %v3447_v61 = vld [vmem:[%s4953_s1 + $0x80] sm:$0xff] }
  0x11   :  { %v3441_v54 = vld [vmem:[%s4953_s1 + $0x50] sm:$0xff]  ;;  %v3456_v57 = vld [vmem:[%s4953_s1 + $0xc8] sm:$0xff]  ;;  %v3455_v62 = vld [vmem:[%s4953_s1 + $0xc0] sm:$0xff] }
  0x12   :  { %3515 = vmatpush.bf16.msra.mxu1 %v3434_v4  ;;  %3516 = vmatpush.bf16.msra.mxu2 %v3434_v4  ;;  %v3465_v55 = vld [vmem:[%s4953_s1 + $0x110] sm:$0xff]  ;;  %v3440_v58 = vld [vmem:[%s4953_s1 + $0x48] sm:$0xff]  ;;  %v3486_v12 = vld [vmem:[%s4953_s1 + $0x1b8] sm:$0xff] }
  0x13   :  { %3517 = vmatpush.bf16.msra.mxu3 %v3434_v4  ;;  %1494 = vmatpush.bf16.msra.mxu0 %v3434_v4  ;;  %v3464_v59 = vld [vmem:[%s4953_s1 + $0x108] sm:$0xff]  ;;  %v2641_v60 = vld [vmem:[%s4955_s0 + $0x1b0] sm:$0xf]  ;;  %v3345_v63 = vld [vmem:[%s4955_s0 + $0x1d0] sm:$0xf0] }
  0x14   :  { %v2785_v0 = vld [vmem:[%s4955_s0 + $0x2d0] sm:$0xf]  ;;  %v3381_v1 = vld [vmem:[%s4955_s0 + $0x2f0] sm:$0xf0]  ;;  %v2642_v8 = vor.u32 %v3345_v63, %v2641_v60  ;;  %v3494_v13 = vld [vmem:[%s4953_s1 + $0x1f8] sm:$0xff] }
  0x15   :  { %v2929_v2 = vld [vmem:[%s4955_s0 + $0x3f0] sm:$0xf]  ;;  %v3417_v3 = vld [vmem:[%s4955_s0 + $0x410] sm:$0xf0]  ;;  %v2786_v9 = vor.u32 %v3381_v1, %v2785_v0  ;;  %v3478_v14 = vld [vmem:[%s4953_s1 + $0x178] sm:$0xff] }
  0x16   :  { %3518 = vmatpush.bf16.msra.mxu1 %v3433_v5  ;;  %3519 = vmatpush.bf16.msra.mxu2 %v3433_v5  ;;  %v2497_v4 = vld [vmem:[%s4955_s0 + $0x90] sm:$0xf]  ;;  %v2930_v10 = vor.u32 %v3417_v3, %v2929_v2  ;;  %v3502_v15 = vld [vmem:[%s4953_s1 + $0x238] sm:$0xff]  ;;  %v3288_v32 = vld [vmem:[%s4955_s0 + $0xc] sm:$0xf] }
  0x17   :  { %3520 = vmatpush.bf16.msra.mxu3 %v3433_v5  ;;  %1495 = vmatpush.bf16.msra.mxu0 %v3433_v5  ;;  %v3309_v5 = vld [vmem:[%s4955_s0 + $0xb0] sm:$0xf0]  ;;  %v3306_v60 = vld [vmem:[%s4955_s0 + $0x9c] sm:$0xf]  ;;  %v3311_v63 = vld [vmem:[%s4955_s0 + $0xc0] sm:$0xf0] }
  0x18   :  { %v2498_v11 = vor.u32 %v3309_v5, %v2497_v4  ;;  %v3293_v35 = vld [vmem:[%s4955_s0 + $0x30] sm:$0xf0]  ;;  %v3484_v4 = vld [vmem:[%s4953_s1 + $0x1a8] sm:$0xff] }
  0x19   :  { %v3485_v40 = vld [vmem:[%s4953_s1 + $0x1b0] sm:$0xff]  ;;  %v3492_v5 = vld [vmem:[%s4953_s1 + $0x1e8] sm:$0xff] }
  0x1a   :  { %3521 = vmatpush.bf16.msra.mxu1 %v3432_v6  ;;  %3522 = vmatpush.bf16.msra.mxu2 %v3432_v6  ;;  %v3493_v41 = vld [vmem:[%s4953_s1 + $0x1f0] sm:$0xff] }
  0x1b   :  { %3523 = vmatpush.bf16.msra.mxu3 %v3432_v6  ;;  %1496 = vmatpush.bf16.msra.mxu0 %v3432_v6  ;;  %v3439_v6 = vld [vmem:[%s4953_s1 + $0x40] sm:$0xff] }
  0x1e   :  { %3524 = vmatpush.bf16.msra.mxu1 %v3431_v7  ;;  %3525 = vmatpush.bf16.msra.mxu2 %v3431_v7 }
  0x1f   :  { %3526 = vmatpush.bf16.msra.mxu3 %v3431_v7  ;;  %1497 = vmatpush.bf16.msra.mxu0 %v3431_v7  ;;  %v3463_v7 = vld [vmem:[%s4953_s1 + $0x100] sm:$0xff] }
  0x21   :  { %1518 = vmatmul.bf16.vlgmr.msra.gmra.mxu1 %v2570_v18  ;;  %1538 = vmatmul.bf16.vlgmr.msra.gmra.mxu2 %v2714_v19  ;;  %v2821_v18 = vld [vmem:[%s4955_s0 + $0x318] sm:$0xf]  ;;  %v3390_v19 = vld [vmem:[%s4955_s0 + $0x338] sm:$0xf0] }
  0x22   :  { %1668 = vmatpush.bf16.msrb.mxu2 %v3454_v16  ;;  %1558 = vmatmul.bf16.vlgmr.msra.gmra.mxu3 %v2858_v20  ;;  %v2677_v16 = vld [vmem:[%s4955_s0 + $0x1f8] sm:$0xf] }
  0x23   :  { %1757 = vmatpush.bf16.msrb.mxu3 %v3462_v17  ;;  %1498 = vmatmul.bf16.vlgmr.msra.gmra.mxu0 %v2426_v21  ;;  %v3354_v17 = vld [vmem:[%s4955_s0 + $0x218] sm:$0xf0]  ;;  %v2965_v20 = vld [vmem:[%s4955_s0 + $0x438] sm:$0xf] }
  0x24   :  { %1579 = vmatpush.bf16.msrb.mxu1 %v3446_v22  ;;  %1846 = vmatpush.bf16.msrb.mxu0 %v3470_v23  ;;  %v3426_v21 = vld [vmem:[%s4955_s0 + $0x458] sm:$0xf0]  ;;  %v2533_v22 = vld [vmem:[%s4955_s0 + $0xd8] sm:$0xf] }
  0x25   :  { %v3318_v23 = vld [vmem:[%s4955_s0 + $0xf8] sm:$0xf0] }
  0x26   :  { %1669 = vmatpush.bf16.msrb.mxu2 %v3453_v24  ;;  %v2678_v24 = vor.u32 %v3354_v17, %v2677_v16 }
  0x27   :  { %1758 = vmatpush.bf16.msrb.mxu3 %v3461_v25  ;;  %v2822_v25 = vor.u32 %v3390_v19, %v2821_v18 }
  0x28   :  { %1580 = vmatpush.bf16.msrb.mxu1 %v3445_v26  ;;  %1847 = vmatpush.bf16.msrb.mxu0 %v3469_v27  ;;  %v2966_v26 = vor.u32 %v3426_v21, %v2965_v20  ;;  %v2534_v27 = vor.u32 %v3318_v23, %v2533_v22  ;;  %v3899_v20 = vld [vmem:[%s4954_s2] ss:$0 sm:$0xff]  ;;  %v3323_v21 = vld [vmem:[%s4955_s0 + $0x124] sm:$0xf]  ;;  %v2571_v22 = vld [vmem:[%s4955_s0 + $0x144] sm:$0xf0] }
  0x29   :  { %v2577_v23 = vld [vmem:[%s4955_s0 + $0x128] sm:$0xf] }
  0x2a   :  { %1670 = vmatpush.bf16.msrb.mxu2 %v3452_v28  ;;  %v3287_v28 = vld [vmem:[%s4955_s0 + $0x4] sm:$0xf] }
  0x2b   :  { %1759 = vmatpush.bf16.msrb.mxu3 %v3460_v29  ;;  %v2427_v29 = vld [vmem:[%s4955_s0 + $0x24] sm:$0xf0] }
  0x2c   :  { %1581 = vmatpush.bf16.msrb.mxu1 %v3444_v30  ;;  %1848 = vmatpush.bf16.msrb.mxu0 %v3468_v31  ;;  %v2433_v30 = vld [vmem:[%s4955_s0 + $0x8] sm:$0xf]  ;;  %v3292_v31 = vld [vmem:[%s4955_s0 + $0x28] sm:$0xf0]  ;;  %v2430_v36 = vor.u32 %v3287_v28, %v2427_v29  ;;  %v3329_v28 = vld [vmem:[%s4955_s0 + $0x150] sm:$0xf0]  ;;  %v2574_v29 = vor.u32 %v3323_v21, %v2571_v22 }
  0x2d   :  { %v2434_v37 = vor.u32 %v3292_v31, %v2433_v30 }
  0x2e   :  { %1671 = vmatpush.bf16.msrb.mxu2 %v3451_v33  ;;  %v2435_v33 = vld [vmem:[%s4955_s0 + $0x2c] sm:$0xf0] }
  0x2f   :  { %1760 = vmatpush.bf16.msrb.mxu3 %v3459_v34  ;;  %v2441_v34 = vld [vmem:[%s4955_s0 + $0x10] sm:$0xf]  ;;  %v2438_v38 = vor.u32 %v3288_v32, %v2435_v33 }
  0x30   :  { %1582 = vmatpush.bf16.msrb.mxu1 %v3443_v42  ;;  %1849 = vmatpush.bf16.msrb.mxu0 %v3467_v43  ;;  %v2442_v39 = vor.u32 %v3293_v35, %v2441_v34  ;;  %v3477_v42 = vld [vmem:[%s4953_s1 + $0x170] sm:$0xff] }
  0x31   :  { %1523 = vmatmul.bf16.gmra.mxu1 %v2606_v46  ;;  %1543 = vmatmul.bf16.gmra.mxu2 %v2750_v47  ;;  %v3501_v43 = vld [vmem:[%s4953_s1 + $0x230] sm:$0xff] }
  0x32   :  { %1672 = vmatpush.bf16.msrb.mxu2 %v3450_v44  ;;  %1563 = vmatmul.bf16.gmra.mxu3 %v2894_v48  ;;  %v3296_v44 = vld [vmem:[%s4955_s0 + $0x4c] sm:$0xf]  ;;  %v2469_v46 = vld [vmem:[%s4955_s0 + $0x50] sm:$0xf]  ;;  %v3301_v47 = vld [vmem:[%s4955_s0 + $0x70] sm:$0xf0] }
  0x33   :  { %1761 = vmatpush.bf16.msrb.mxu3 %v3458_v45  ;;  %1503 = vmatmul.bf16.gmra.mxu0 %v2462_v49  ;;  %v2463_v45 = vld [vmem:[%s4955_s0 + $0x6c] sm:$0xf0]  ;;  %v3297_v48 = vld [vmem:[%s4955_s0 + $0x54] sm:$0xf]  ;;  %v2471_v49 = vld [vmem:[%s4955_s0 + $0x74] sm:$0xf0] }
  0x34   :  { %1583 = vmatpush.bf16.msrb.mxu1 %v3442_v50  ;;  %1850 = vmatpush.bf16.msrb.mxu0 %v3466_v51  ;;  %v2477_v50 = vld [vmem:[%s4955_s0 + $0x58] sm:$0xf]  ;;  %v3302_v51 = vld [vmem:[%s4955_s0 + $0x78] sm:$0xf0] }
  0x36   :  { %1673 = vmatpush.bf16.msrb.mxu2 %v3449_v52  ;;  %v2466_v52 = vor.u32 %v3296_v44, %v2463_v45 }
  0x37   :  { %1762 = vmatpush.bf16.msrb.mxu3 %v3457_v53  ;;  %v2470_v53 = vor.u32 %v3301_v47, %v2469_v46  ;;  %v3499_v46 = vld [vmem:[%s4953_s1 + $0x220] sm:$0xff]  ;;  %v3332_v47 = vld [vmem:[%s4955_s0 + $0x16c] sm:$0xf] }
  0x38   :  { %1584 = vmatpush.bf16.msrb.mxu1 %v3441_v54  ;;  %1851 = vmatpush.bf16.msrb.mxu0 %v3465_v55  ;;  %v2474_v54 = vor.u32 %v3297_v48, %v2471_v49  ;;  %v2478_v55 = vor.u32 %v3302_v51, %v2477_v50  ;;  %v2607_v48 = vld [vmem:[%s4955_s0 + $0x18c] sm:$0xf0]  ;;  %v3337_v50 = vld [vmem:[%s4955_s0 + $0x190] sm:$0xf0] }
  0x39   :  { %v2613_v49 = vld [vmem:[%s4955_s0 + $0x170] sm:$0xf]  ;;  %v3333_v51 = vld [vmem:[%s4955_s0 + $0x174] sm:$0xf] }
  0x3a   :  { %1674 = vmatpush.bf16.msrb.mxu2 %v3448_v56  ;;  %v3305_v56 = vld [vmem:[%s4955_s0 + $0x94] sm:$0xf] }
  0x3b   :  { %1763 = vmatpush.bf16.msrb.mxu3 %v3456_v57  ;;  %v2499_v57 = vld [vmem:[%s4955_s0 + $0xb4] sm:$0xf0] }
  0x3c   :  { %1585 = vmatpush.bf16.msrb.mxu1 %v3440_v58  ;;  %1852 = vmatpush.bf16.msrb.mxu0 %v3464_v59  ;;  %v2505_v58 = vld [vmem:[%s4955_s0 + $0x98] sm:$0xf]  ;;  %v3310_v59 = vld [vmem:[%s4955_s0 + $0xb8] sm:$0xf0]  ;;  %v2502_v0 = vor.u32 %v3305_v56, %v2499_v57 }
  0x3d   :  { %v2506_v1 = vor.u32 %v3310_v59, %v2505_v58  ;;  %v2610_v58 = vor.u32 %v3332_v47, %v2607_v48  ;;  %v2614_v59 = vor.u32 %v3337_v50, %v2613_v49  ;;  %v2679_v47 = vld [vmem:[%s4955_s0 + $0x21c] sm:$0xf0]  ;;  %v3355_v49 = vld [vmem:[%s4955_s0 + $0x220] sm:$0xf0] }
  0x3e   :  { %1675 = vmatpush.bf16.msrb.mxu2 %v3447_v61  ;;  %v2507_v61 = vld [vmem:[%s4955_s0 + $0xbc] sm:$0xf0]  ;;  %v3351_v50 = vld [vmem:[%s4955_s0 + $0x204] sm:$0xf] }
  0x3f   :  { %1764 = vmatpush.bf16.msrb.mxu3 %v3455_v62  ;;  %v2513_v62 = vld [vmem:[%s4955_s0 + $0xa0] sm:$0xf]  ;;  %v2510_v2 = vor.u32 %v3306_v60, %v2507_v61 }
  0x40   :  { %1586 = vmatpush.bf16.msrb.mxu1 %v3439_v6  ;;  %1853 = vmatpush.bf16.msrb.mxu0 %v3463_v7  ;;  %v2514_v3 = vor.u32 %v3311_v63, %v2513_v62  ;;  %v3476_v6 = vld [vmem:[%s4953_s1 + $0x168] sm:$0xff]  ;;  %v2685_v48 = vld [vmem:[%s4955_s0 + $0x200] sm:$0xf] }
  0x41   :  { %1528 = vmatmul.bf16.gmra.mxu1 %v2642_v8  ;;  %1548 = vmatmul.bf16.gmra.mxu2 %v2786_v9  ;;  %v3500_v7 = vld [vmem:[%s4953_s1 + $0x228] sm:$0xff]  ;;  %v3314_v8 = vld [vmem:[%s4955_s0 + $0xdc] sm:$0xf]  ;;  %v2535_v9 = vld [vmem:[%s4955_s0 + $0xfc] sm:$0xf0] }
  0x42   :  { %1568 = vmatmul.bf16.gmra.mxu3 %v2930_v10  ;;  %2024 = vmatpush.bf16.msra.mxu2 %v3486_v12  ;;  %v2541_v10 = vld [vmem:[%s4955_s0 + $0xe0] sm:$0xf]  ;;  %v3315_v12 = vld [vmem:[%s4955_s0 + $0xe4] sm:$0xf]  ;;  %v2538_v16 = vor.u32 %v3314_v8, %v2535_v9  ;;  %v3341_v9 = vld [vmem:[%s4955_s0 + $0x1b4] sm:$0xf] }
  0x43   :  { %1508 = vmatmul.bf16.gmra.mxu0 %v2498_v11  ;;  %2113 = vmatpush.bf16.msra.mxu3 %v3494_v13  ;;  %v3319_v11 = vld [vmem:[%s4955_s0 + $0x100] sm:$0xf0]  ;;  %v2543_v13 = vld [vmem:[%s4955_s0 + $0x104] sm:$0xf0] }
  0x44   :  { %1935 = vmatpush.bf16.msra.mxu1 %v3478_v14  ;;  %2202 = vmatpush.bf16.msra.mxu0 %v3502_v15  ;;  %v2549_v14 = vld [vmem:[%s4955_s0 + $0xe8] sm:$0xf]  ;;  %v3320_v15 = vld [vmem:[%s4955_s0 + $0x108] sm:$0xf0]  ;;  %v2542_v17 = vor.u32 %v3319_v11, %v2541_v10  ;;  %v2546_v18 = vor.u32 %v3315_v12, %v2543_v13  ;;  %v2643_v10 = vld [vmem:[%s4955_s0 + $0x1d4] sm:$0xf0] }
  0x45   :  { %v2550_v19 = vor.u32 %v3320_v15, %v2549_v14  ;;  %v2649_v11 = vld [vmem:[%s4955_s0 + $0x1b8] sm:$0xf]  ;;  %v3346_v12 = vld [vmem:[%s4955_s0 + $0x1d8] sm:$0xf0]  ;;  %v2651_v14 = vld [vmem:[%s4955_s0 + $0x1dc] sm:$0xf0]  ;;  %v2646_v21 = vor.u32 %v3341_v9, %v2643_v10 }
  0x46   :  { %2025 = vmatpush.bf16.msra.mxu2 %v3485_v40  ;;  %v3342_v13 = vld [vmem:[%s4955_s0 + $0x1bc] sm:$0xf]  ;;  %v2657_v15 = vld [vmem:[%s4955_s0 + $0x1c0] sm:$0xf]  ;;  %v2650_v22 = vor.u32 %v3346_v12, %v2649_v11 }
  0x47   :  { %2114 = vmatpush.bf16.msra.mxu3 %v3493_v41 }
  0x48   :  { %1936 = vmatpush.bf16.msra.mxu1 %v3477_v42  ;;  %2203 = vmatpush.bf16.msra.mxu0 %v3501_v43  ;;  %v3475_v43 = vld [vmem:[%s4953_s1 + $0x160] sm:$0xff] }
  0x4a   :  { %2026 = vmatpush.bf16.msra.mxu2 %v3484_v4 }
  0x4b   :  { %2115 = vmatpush.bf16.msra.mxu3 %v3492_v5 }
  0x4c   :  { %1937 = vmatpush.bf16.msra.mxu1 %v3476_v6  ;;  %2204 = vmatpush.bf16.msra.mxu0 %v3500_v7 }
  0x50   :  { %1938 = vmatpush.bf16.msra.mxu1 %v3475_v43  ;;  %2205 = vmatpush.bf16.msra.mxu0 %v3499_v46  ;;  %v3498_v43 = vld [vmem:[%s4953_s1 + $0x218] sm:$0xff] }
  0x51   :  { %1533 = vmatmul.bf16.gmra.mxu1 %v2678_v24  ;;  %1553 = vmatmul.bf16.gmra.mxu2 %v2822_v25  ;;  %v3328_v24 = vld [vmem:[%s4955_s0 + $0x148] sm:$0xf0]  ;;  %v3350_v46 = vld [vmem:[%s4955_s0 + $0x1fc] sm:$0xf] }
  0x52   :  { %1573 = vmatmul.bf16.gmra.mxu3 %v2966_v26  ;;  %v3324_v25 = vld [vmem:[%s4955_s0 + $0x12c] sm:$0xf]  ;;  %v2579_v26 = vld [vmem:[%s4955_s0 + $0x14c] sm:$0xf0]  ;;  %v2578_v30 = vor.u32 %v3328_v24, %v2577_v23 }
  0x53   :  { %1513 = vmatmul.bf16.gmra.mxu0 %v2534_v27  ;;  %v2585_v27 = vld [vmem:[%s4955_s0 + $0x130] sm:$0xf]  ;;  %v2582_v32 = vor.u32 %v3324_v25, %v2579_v26  ;;  %v2654_v25 = vor.u32 %v3342_v13, %v2651_v14 }
  0x54   :  { %v2586_v33 = vor.u32 %v3329_v28, %v2585_v27  ;;  %2206 = vmatpush.bf16.msra.mxu0 %v3498_v43 }
  0x61   :  { %1587 = vmatmul.bf16.vlgmr.msrb.gmra.mxu1 %v2430_v36  ;;  %1676 = vmatmul.bf16.vlgmr.msrb.gmra.mxu2 %v2434_v37  ;;  %v3483_v36 = vld [vmem:[%s4953_s1 + $0x1a0] sm:$0xff] }
  0x62   :  { %1765 = vmatmul.bf16.vlgmr.msrb.gmra.mxu3 %v2438_v38  ;;  %v3491_v37 = vld [vmem:[%s4953_s1 + $0x1e0] sm:$0xff]  ;;  %2027 = vmatpush.bf16.msra.mxu2 %v3483_v36 }
  0x63   :  { %1854 = vmatmul.bf16.vlgmr.msrb.gmra.mxu0 %v2442_v39  ;;  %2116 = vmatpush.bf16.msra.mxu3 %v3491_v37 }
  0x71   :  { %1592 = vmatmul.bf16.gmra.mxu1 %v2466_v52  ;;  %1681 = vmatmul.bf16.gmra.mxu2 %v2470_v53  ;;  %v2615_v52 = vld [vmem:[%s4955_s0 + $0x194] sm:$0xf0] }
  0x72   :  { %1770 = vmatmul.bf16.gmra.mxu3 %v2474_v54  ;;  %v2621_v53 = vld [vmem:[%s4955_s0 + $0x178] sm:$0xf]  ;;  %v3338_v54 = vld [vmem:[%s4955_s0 + $0x198] sm:$0xf0]  ;;  %v2618_v62 = vor.u32 %v3333_v51, %v2615_v52  ;;  %v2687_v51 = vld [vmem:[%s4955_s0 + $0x224] sm:$0xf0] }
  0x73   :  { %1859 = vmatmul.bf16.gmra.mxu0 %v2478_v55  ;;  %v2622_v63 = vor.u32 %v3338_v54, %v2621_v53  ;;  %v2693_v52 = vld [vmem:[%s4955_s0 + $0x208] sm:$0xf]  ;;  %v3356_v53 = vld [vmem:[%s4955_s0 + $0x228] sm:$0xf0] }
  0x81   :  { %1597 = vmatmul.bf16.gmra.mxu1 %v2502_v0  ;;  %1686 = vmatmul.bf16.gmra.mxu2 %v2506_v1 }
  0x82   :  { %1775 = vmatmul.bf16.gmra.mxu3 %v2510_v2 }
  0x83   :  { %1864 = vmatmul.bf16.gmra.mxu0 %v2514_v3 }
  0x91   :  { %1602 = vmatmul.bf16.gmra.mxu1 %v2538_v16  ;;  %1691 = vmatmul.bf16.gmra.mxu2 %v2542_v17  ;;  %v3347_v16 = vld [vmem:[%s4955_s0 + $0x1e0] sm:$0xf0] }
  0x92   :  { %1780 = vmatmul.bf16.gmra.mxu3 %v2546_v18  ;;  %v2658_v26 = vor.u32 %v3347_v16, %v2657_v15  ;;  %v3359_v16 = vld [vmem:[%s4955_s0 + $0x244] sm:$0xf] }
  0x93   :  { %1869 = vmatmul.bf16.gmra.mxu0 %v2550_v19 }
  0x9e   :  { %v1519_v31 = vpop.f32.mrf.mxu1 }
  0x9f   :  { %v3926_v34 = vadd.f32 %v3899_v20, %v1519_v31 }
  0xa0   :  { %v3928_v35 = vpop.f32.mrf.mxu0 }
  0xa1   :  { %1607 = vmatmul.bf16.gmra.mxu1 %v2574_v29  ;;  %1696 = vmatmul.bf16.gmra.mxu2 %v2578_v30  ;;  %v3482_v29 = vld [vmem:[%s4953_s1 + $0x198] sm:$0xff] }
  0xa2   :  { %1785 = vmatmul.bf16.gmra.mxu3 %v2582_v32  ;;  %v3490_v30 = vld [vmem:[%s4953_s1 + $0x1d8] sm:$0xff]  ;;  %2028 = vmatpush.bf16.msra.mxu2 %v3482_v29 }
  0xa3   :  { %1874 = vmatmul.bf16.gmra.mxu0 %v2586_v33  ;;  %2117 = vmatpush.bf16.msra.mxu3 %v3490_v30  ;;  %v1500_v30 = vadd.f32 %v3899_v20, %v3928_v35  ;;  %v3481_v35 = vld [vmem:[%s4953_s1 + $0x190] sm:$0xff] }
  0xa4   :  { %v1539_v38 = vpop.f32.mrf.mxu2 }
  0xa5   :  { %v3937_v39 = vadd.f32 %v3899_v20, %v1539_v38  ;;  %v1559_v40 = vpop.f32.mrf.mxu3 }
  0xa6   :  { %v3940_v41 = vadd.f32 %v3899_v20, %v1559_v40  ;;  %v1521_v42 = vpop.f32.mrf.mxu1  ;;  %2029 = vmatpush.bf16.msra.mxu2 %v3481_v35 }
  0xa7   :  { %v3946_v44 = vadd.f32 %v3899_v20, %v1521_v42  ;;  %v3474_v42 = vld [vmem:[%s4953_s1 + $0x158] sm:$0xff] }
  0xa8   :  { %v3948_v45 = vpop.f32.mrf.mxu0  ;;  %1939 = vmatpush.bf16.msra.mxu1 %v3474_v42 }
  0xac   :  { %v1541_v55 = vpop.f32.mrf.mxu2 }
  0xad   :  { %v3978_v56 = vadd.f32 %v3899_v20, %v1541_v55  ;;  %v1561_v57 = vpop.f32.mrf.mxu3 }
  0xae   :  { %v3981_v60 = vadd.f32 %v3899_v20, %v1561_v57  ;;  %v1524_v61 = vpop.f32.mrf.mxu1 }
  0xaf   :  { %v3984_v0 = vadd.f32 %v3899_v20, %v1524_v61 }
  0xb0   :  { %v3986_v1 = vpop.f32.mrf.mxu0 }
  0xb1   :  { %1612 = vmatmul.bf16.gmra.mxu1 %v2610_v58  ;;  %1701 = vmatmul.bf16.gmra.mxu2 %v2614_v59  ;;  %v2682_v58 = vor.u32 %v3350_v46, %v2679_v47  ;;  %v2686_v59 = vor.u32 %v3355_v49, %v2685_v48 }
  0xb2   :  { %1790 = vmatmul.bf16.gmra.mxu3 %v2618_v62 }
  0xb3   :  { %1879 = vmatmul.bf16.gmra.mxu0 %v2622_v63  ;;  %v2690_v63 = vor.u32 %v3351_v50, %v2687_v51  ;;  %v3489_v51 = vld [vmem:[%s4953_s1 + $0x1d0] sm:$0xff] }
  0xb4   :  { %v1544_v2 = vpop.f32.mrf.mxu2  ;;  %2118 = vmatpush.bf16.msra.mxu3 %v3489_v51 }
  0xb5   :  { %v3989_v3 = vadd.f32 %v3899_v20, %v1544_v2  ;;  %v1564_v4 = vpop.f32.mrf.mxu3  ;;  %v2694_v2 = vor.u32 %v3356_v53, %v2693_v52  ;;  %v1502_v53 = vadd.f32 %v3899_v20, %v3948_v45  ;;  %v2751_v45 = vld [vmem:[%s4955_s0 + $0x2ac] sm:$0xf0] }
  0xb6   :  { %v3992_v5 = vadd.f32 %v3899_v20, %v1564_v4  ;;  %v1526_v6 = vpop.f32.mrf.mxu1 }
  0xb7   :  { %v3995_v7 = vadd.f32 %v3899_v20, %v1526_v6 }
  0xb8   :  { %v3997_v8 = vpop.f32.mrf.mxu0 }
  0xbc   :  { %v1546_v17 = vpop.f32.mrf.mxu2 }
  0xbd   :  { %v4024_v18 = vadd.f32 %v3899_v20, %v1546_v17  ;;  %v1566_v19 = vpop.f32.mrf.mxu3  ;;  %v2715_v17 = vld [vmem:[%s4955_s0 + $0x264] sm:$0xf0] }
  0xbe   :  { %v4027_v23 = vadd.f32 %v3899_v20, %v1566_v19  ;;  %v1529_v24 = vpop.f32.mrf.mxu1  ;;  %v2721_v19 = vld [vmem:[%s4955_s0 + $0x248] sm:$0xf] }
  0xbf   :  { %v4030_v27 = vadd.f32 %v3899_v20, %v1529_v24  ;;  %v2723_v24 = vld [vmem:[%s4955_s0 + $0x26c] sm:$0xf0] }
  0xc0   :  { %v4032_v28 = vpop.f32.mrf.mxu0 }
  0xc1   :  { %1617 = vmatmul.bf16.gmra.mxu1 %v2646_v21  ;;  %1706 = vmatmul.bf16.gmra.mxu2 %v2650_v22  ;;  %v3364_v21 = vld [vmem:[%s4955_s0 + $0x268] sm:$0xf0] }
  0xc2   :  { %1795 = vmatmul.bf16.gmra.mxu3 %v2654_v25  ;;  %v3360_v22 = vld [vmem:[%s4955_s0 + $0x24c] sm:$0xf]  ;;  %v2729_v25 = vld [vmem:[%s4955_s0 + $0x250] sm:$0xf]  ;;  %v2722_v42 = vor.u32 %v3364_v21, %v2721_v19  ;;  %v3369_v19 = vld [vmem:[%s4955_s0 + $0x294] sm:$0xf] }
  0xc3   :  { %1884 = vmatmul.bf16.gmra.mxu0 %v2658_v26  ;;  %v3365_v26 = vld [vmem:[%s4955_s0 + $0x270] sm:$0xf0]  ;;  %v2726_v47 = vor.u32 %v3360_v22, %v2723_v24  ;;  %v2759_v21 = vld [vmem:[%s4955_s0 + $0x2b4] sm:$0xf0]  ;;  %v3374_v24 = vld [vmem:[%s4955_s0 + $0x2b8] sm:$0xf0] }
  0xc4   :  { %v1549_v31 = vpop.f32.mrf.mxu2  ;;  %v2730_v48 = vor.u32 %v3365_v26, %v2729_v25  ;;  %v2765_v22 = vld [vmem:[%s4955_s0 + $0x298] sm:$0xf]  ;;  %v1505_v26 = vadd.f32 %v3899_v20, %v3986_v1  ;;  %v1507_v1 = vadd.f32 %v3899_v20, %v3997_v8 }
  0xc5   :  { %v4041_v32 = vadd.f32 %v3899_v20, %v1549_v31  ;;  %v1569_v33 = vpop.f32.mrf.mxu3  ;;  %v2793_v8 = vld [vmem:[%s4955_s0 + $0x2d8] sm:$0xf] }
  0xc6   :  { %v4044_v36 = vadd.f32 %v3899_v20, %v1569_v33  ;;  %v1531_v37 = vpop.f32.mrf.mxu1 }
  0xc7   :  { %v4047_v38 = vadd.f32 %v3899_v20, %v1531_v37  ;;  %v2718_v37 = vor.u32 %v3359_v16, %v2715_v17  ;;  %v2757_v16 = vld [vmem:[%s4955_s0 + $0x290] sm:$0xf]  ;;  %v3373_v17 = vld [vmem:[%s4955_s0 + $0x2b0] sm:$0xf0] }
  0xc8   :  { %v4049_v40 = vpop.f32.mrf.mxu0 }
  0xcc   :  { %v1551_v54 = vpop.f32.mrf.mxu2 }
  0xcd   :  { %v4082_v55 = vadd.f32 %v3899_v20, %v1551_v54  ;;  %v1571_v57 = vpop.f32.mrf.mxu3 }
  0xce   :  { %v4085_v61 = vadd.f32 %v3899_v20, %v1571_v57  ;;  %v1534_v62 = vpop.f32.mrf.mxu1 }
  0xcf   :  { %v4088_v4 = vadd.f32 %v3899_v20, %v1534_v62 }
  0xd0   :  { %v4090_v6 = vpop.f32.mrf.mxu0 }
  0xd1   :  { %1622 = vmatmul.bf16.gmra.mxu1 %v2682_v58  ;;  %1711 = vmatmul.bf16.gmra.mxu2 %v2686_v59 }
  0xd2   :  { %1800 = vmatmul.bf16.gmra.mxu3 %v2690_v63 }
  0xd3   :  { %1889 = vmatmul.bf16.gmra.mxu0 %v2694_v2  ;;  %v3473_v2 = vld [vmem:[%s4953_s1 + $0x150] sm:$0xff] }
  0xd4   :  { %v1554_v9 = vpop.f32.mrf.mxu2  ;;  %1940 = vmatpush.bf16.msra.mxu1 %v3473_v2 }
  0xd5   :  { %v4093_v10 = vadd.f32 %v3899_v20, %v1554_v9  ;;  %v1574_v11 = vpop.f32.mrf.mxu3  ;;  %v3497_v9 = vld [vmem:[%s4953_s1 + $0x210] sm:$0xff] }
  0xd6   :  { %v4096_v12 = vadd.f32 %v3899_v20, %v1574_v11  ;;  %v1536_v13 = vpop.f32.mrf.mxu1  ;;  %v3368_v11 = vld [vmem:[%s4955_s0 + $0x28c] sm:$0xf]  ;;  %2207 = vmatpush.bf16.msra.mxu0 %v3497_v9  ;;  %v3382_v9 = vld [vmem:[%s4955_s0 + $0x2f8] sm:$0xf0] }
  0xd7   :  { %v4099_v14 = vadd.f32 %v3899_v20, %v1536_v13 }
  0xd8   :  { %v4101_v15 = vpop.f32.mrf.mxu0 }
  0xdc   :  { %v1556_v29 = vpop.f32.mrf.mxu2 }
  0xdd   :  { %v4130_v31 = vadd.f32 %v3899_v20, %v1556_v29  ;;  %v1576_v33 = vpop.f32.mrf.mxu3 }
  0xde   :  { %v4133_v43 = vadd.f32 %v3899_v20, %v1576_v33  ;;  %v1588_v46 = vpop.f32.mrf.mxu1  ;;  %v2754_v33 = vor.u32 %v3368_v11, %v2751_v45  ;;  %v3378_v11 = vld [vmem:[%s4955_s0 + $0x2dc] sm:$0xf]  ;;  %v2795_v45 = vld [vmem:[%s4955_s0 + $0x2fc] sm:$0xf0] }
  0xdf   :  { %v1589_v49 = vadd.f32 %v1588_v46, %v1500_v30  ;;  %v2762_v46 = vor.u32 %v3369_v19, %v2759_v21  ;;  %v1510_v21 = vadd.f32 %v3899_v20, %v4032_v28  ;;  %v3480_v28 = vld [vmem:[%s4953_s1 + $0x188] sm:$0xff] }
  0xe0   :  { %v1855_v50 = vpop.f32.mrf.mxu0  ;;  %2030 = vmatpush.bf16.msra.mxu2 %v3480_v28 }
  0xe1   :  { %1627 = vmatmul.bf16.gmra.mxu1 %v2718_v37  ;;  %1716 = vmatmul.bf16.gmra.mxu2 %v2722_v42  ;;  %v2758_v37 = vor.u32 %v3373_v17, %v2757_v16  ;;  %v2801_v16 = vld [vmem:[%s4955_s0 + $0x2e0] sm:$0xf]  ;;  %v3383_v17 = vld [vmem:[%s4955_s0 + $0x300] sm:$0xf0] }
  0xe2   :  { %1805 = vmatmul.bf16.gmra.mxu3 %v2726_v47  ;;  %v2766_v47 = vor.u32 %v3374_v24, %v2765_v22 }
  0xe3   :  { %1894 = vmatmul.bf16.gmra.mxu0 %v2730_v48 }
  0xe4   :  { %v1677_v52 = vpop.f32.mrf.mxu2 }
  0xe5   :  { %v1678_v54 = vadd.f32 %v1677_v52, %v1589_v49  ;;  %v1766_v57 = vpop.f32.mrf.mxu3 }
  0xe6   :  { %v1590_v58 = vpop.f32.mrf.mxu1 }
  0xe7   :  { %v1767_v59 = vadd.f32 %v1766_v57, %v1678_v54  ;;  %v1591_v62 = vadd.f32 %v1590_v58, %v1502_v53 }
  0xe8   :  { %v1857_v63 = vpop.f32.mrf.mxu0 }
  0xe9   :  { %v4155_v13 = vadd.f32 %v1855_v50, %v1767_v59 }
  0xec   :  { %v1679_v25 = vpop.f32.mrf.mxu2 }
  0xed   :  { %v1680_v29 = vadd.f32 %v1679_v25, %v1591_v62  ;;  %v1768_v30 = vpop.f32.mrf.mxu3  ;;  %v3377_v62 = vld [vmem:[%s4955_s0 + $0x2d4] sm:$0xf] }
  0xee   :  { %v1593_v42 = vpop.f32.mrf.mxu1 }
  0xef   :  { %v1769_v48 = vadd.f32 %v1768_v30, %v1680_v29  ;;  %v1594_v49 = vadd.f32 %v1593_v42, %v1505_v26  ;;  %v2794_v26 = vor.u32 %v3382_v9, %v2793_v8  ;;  %v2798_v30 = vor.u32 %v3378_v11, %v2795_v45  ;;  %v2829_v8 = vld [vmem:[%s4955_s0 + $0x320] sm:$0xf]  ;;  %v3391_v9 = vld [vmem:[%s4955_s0 + $0x340] sm:$0xf0]  ;;  %v2831_v45 = vld [vmem:[%s4955_s0 + $0x344] sm:$0xf0] }
  0xf0   :  { %v1860_v50 = vpop.f32.mrf.mxu0  ;;  %v3387_v11 = vld [vmem:[%s4955_s0 + $0x324] sm:$0xf] }
  0xf1   :  { %1632 = vmatmul.bf16.gmra.mxu1 %v2754_v33  ;;  %1721 = vmatmul.bf16.gmra.mxu2 %v2758_v37  ;;  %v4177_v35 = vadd.f32 %v1857_v63, %v1769_v48  ;;  %v2787_v63 = vld [vmem:[%s4955_s0 + $0x2f4] sm:$0xf0]  ;;  %v2802_v33 = vor.u32 %v3383_v17, %v2801_v16  ;;  %v3488_v48 = vld [vmem:[%s4953_s1 + $0x1c8] sm:$0xff] }
  0xf2   :  { %1810 = vmatmul.bf16.gmra.mxu3 %v2762_v46  ;;  %v2790_v25 = vor.u32 %v3377_v62, %v2787_v63  ;;  %v3386_v62 = vld [vmem:[%s4955_s0 + $0x31c] sm:$0xf]  ;;  %v2837_v16 = vld [vmem:[%s4955_s0 + $0x328] sm:$0xf]  ;;  %v3392_v17 = vld [vmem:[%s4955_s0 + $0x348] sm:$0xf0] }
  0xf3   :  { %1899 = vmatmul.bf16.gmra.mxu0 %v2766_v47  ;;  %2119 = vmatpush.bf16.msra.mxu3 %v3488_v48 }
  0xf4   :  { %v1682_v51 = vpop.f32.mrf.mxu2 }
  0xf5   :  { %v1683_v52 = vadd.f32 %v1682_v51, %v1594_v49  ;;  %v1771_v53 = vpop.f32.mrf.mxu3 }
  0xf6   :  { %v1595_v54 = vpop.f32.mrf.mxu1 }
  0xf7   :  { %v1772_v57 = vadd.f32 %v1771_v53, %v1683_v52  ;;  %v1596_v58 = vadd.f32 %v1595_v54, %v1507_v1 }
  0xf8   :  { %v1862_v59 = vpop.f32.mrf.mxu0 }
  0xf9   :  { %v4187_v2 = vadd.f32 %v1860_v50, %v1772_v57  ;;  %v1512_v50 = vadd.f32 %v3899_v20, %v4049_v40  ;;  %v2823_v40 = vld [vmem:[%s4955_s0 + $0x33c] sm:$0xf0] }
  0xfc   :  { %v1684_v19 = vpop.f32.mrf.mxu2 }
  0xfd   :  { %v1685_v22 = vadd.f32 %v1684_v19, %v1596_v58  ;;  %v1773_v24 = vpop.f32.mrf.mxu3  ;;  %v3472_v58 = vld [vmem:[%s4953_s1 + $0x148] sm:$0xff] }
  0xfe   :  { %v1598_v29 = vpop.f32.mrf.mxu1  ;;  %1941 = vmatpush.bf16.msra.mxu1 %v3472_v58 }
  0xff   :  { %v1774_v37 = vadd.f32 %v1773_v24, %v1685_v22  ;;  %v1599_v42 = vadd.f32 %v1598_v29, %v1510_v21  ;;  %v1515_v21 = vadd.f32 %v3899_v20, %v4090_v6  ;;  %v1517_v6 = vadd.f32 %v3899_v20, %v4101_v15  ;;  %v2865_v20 = vld [vmem:[%s4955_s0 + $0x368] sm:$0xf]  ;;  %v3400_v15 = vld [vmem:[%s4955_s0 + $0x388] sm:$0xf0] }
 0x100   :  { %v1865_v46 = vpop.f32.mrf.mxu0 }
 0x101   :  { %1637 = vmatmul.bf16.gmra.mxu1 %v2790_v25  ;;  %1726 = vmatmul.bf16.gmra.mxu2 %v2794_v26  ;;  %v4209_v47 = vadd.f32 %v1862_v59, %v1774_v37  ;;  %v3496_v59 = vld [vmem:[%s4953_s1 + $0x208] sm:$0xff]  ;;  %v2826_v25 = vor.u32 %v3386_v62, %v2823_v40  ;;  %v2830_v26 = vor.u32 %v3391_v9, %v2829_v8  ;;  %v2867_v62 = vld [vmem:[%s4955_s0 + $0x38c] sm:$0xf0]  ;;  %v3401_v8 = vld [vmem:[%s4955_s0 + $0x390] sm:$0xf0] }
 0x102   :  { %1815 = vmatmul.bf16.gmra.mxu3 %v2798_v30  ;;  %2208 = vmatpush.bf16.msra.mxu0 %v3496_v59  ;;  %v2834_v30 = vor.u32 %v3387_v11, %v2831_v45  ;;  %v3396_v59 = vld [vmem:[%s4955_s0 + $0x36c] sm:$0xf]  ;;  %v2873_v40 = vld [vmem:[%s4955_s0 + $0x370] sm:$0xf] }
 0x103   :  { %1904 = vmatmul.bf16.gmra.mxu0 %v2802_v33  ;;  %v2838_v33 = vor.u32 %v3392_v17, %v2837_v16  ;;  %v2866_v17 = vor.u32 %v3400_v15, %v2865_v20  ;;  %v2903_v20 = vld [vmem:[%s4955_s0 + $0x3d4] sm:$0xf0] }
 0x104   :  { %v1687_v49 = vpop.f32.mrf.mxu2  ;;  %v2909_v15 = vld [vmem:[%s4955_s0 + $0x3b8] sm:$0xf] }
 0x105   :  { %v1688_v51 = vadd.f32 %v1687_v49, %v1599_v42  ;;  %v1776_v1 = vpop.f32.mrf.mxu3 }
 0x106   :  { %v1600_v52 = vpop.f32.mrf.mxu1 }
 0x107   :  { %v1777_v53 = vadd.f32 %v1776_v1, %v1688_v51  ;;  %v1601_v54 = vadd.f32 %v1600_v52, %v1512_v50 }
 0x108   :  { %v1867_v57 = vpop.f32.mrf.mxu0 }
 0x109   :  { %v4231_v63 = vadd.f32 %v1865_v46, %v1777_v53 }
 0x10c   :  { %v1689_v19 = vpop.f32.mrf.mxu2 }
 0x10d   :  { %v1690_v22 = vadd.f32 %v1689_v19, %v1601_v54  ;;  %v1778_v24 = vpop.f32.mrf.mxu3  ;;  %v3395_v54 = vld [vmem:[%s4955_s0 + $0x364] sm:$0xf] }
 0x10e   :  { %v1603_v29 = vpop.f32.mrf.mxu1 }
 0x10f   :  { %v1779_v37 = vadd.f32 %v1778_v24, %v1690_v22  ;;  %v1604_v42 = vadd.f32 %v1603_v29, %v1515_v21  ;;  %v2870_v21 = vor.u32 %v3396_v59, %v2867_v62  ;;  %v2874_v22 = vor.u32 %v3401_v8, %v2873_v40  ;;  %v3410_v59 = vld [vmem:[%s4955_s0 + $0x3d8] sm:$0xf0] }
 0x110   :  { %v1870_v46 = vpop.f32.mrf.mxu0 }
 0x111   :  { %1642 = vmatmul.bf16.gmra.mxu1 %v2826_v25  ;;  %1731 = vmatmul.bf16.gmra.mxu2 %v2830_v26  ;;  %v4253_v28 = vadd.f32 %v1867_v57, %v1779_v37  ;;  %v2859_v57 = vld [vmem:[%s4955_s0 + $0x384] sm:$0xf0] }
 0x112   :  { %1820 = vmatmul.bf16.gmra.mxu3 %v2834_v30  ;;  %v2862_v16 = vor.u32 %v3395_v54, %v2859_v57  ;;  %v3479_v30 = vld [vmem:[%s4953_s1 + $0x180] sm:$0xff]  ;;  %v3409_v54 = vld [vmem:[%s4955_s0 + $0x3d0] sm:$0xf0] }
 0x113   :  { %1909 = vmatmul.bf16.gmra.mxu0 %v2838_v33  ;;  %v3487_v33 = vld [vmem:[%s4953_s1 + $0x1c0] sm:$0xff]  ;;  %2031 = vmatpush.bf16.msra.mxu2 %v3479_v30  ;;  %v3405_v57 = vld [vmem:[%s4955_s0 + $0x3b4] sm:$0xf] }
 0x114   :  { %v1692_v48 = vpop.f32.mrf.mxu2  ;;  %2120 = vmatpush.bf16.msra.mxu3 %v3487_v33 }
 0x115   :  { %v1693_v49 = vadd.f32 %v1692_v48, %v1604_v42  ;;  %v1781_v50 = vpop.f32.mrf.mxu3 }
 0x116   :  { %v1605_v51 = vpop.f32.mrf.mxu1 }
 0x117   :  { %v1782_v1 = vadd.f32 %v1781_v50, %v1693_v49  ;;  %v1606_v52 = vadd.f32 %v1605_v51, %v1517_v6  ;;  %v3471_v50 = vld [vmem:[%s4953_s1 + $0x140] sm:$0xff] }
 0x118   :  { %v1872_v53 = vpop.f32.mrf.mxu0  ;;  %v3495_v51 = vld [vmem:[%s4953_s1 + $0x200] sm:$0xff]  ;;  %1942 = vmatpush.bf16.msra.mxu1 %v3471_v50 }
 0x119   :  { %v4263_v58 = vadd.f32 %v1870_v46, %v1782_v1  ;;  %v3404_v1 = vld [vmem:[%s4955_s0 + $0x3ac] sm:$0xf]  ;;  %2209 = vmatpush.bf16.msra.mxu0 %v3495_v51  ;;  %v2939_v50 = vld [vmem:[%s4955_s0 + $0x41c] sm:$0xf0] }
 0x11a   :  { %v2945_v51 = vld [vmem:[%s4955_s0 + $0x400] sm:$0xf] }
 0x11c   :  { %v1694_v9 = vpop.f32.mrf.mxu2 }
 0x11d   :  { %v1695_v11 = vadd.f32 %v1694_v9, %v1606_v52  ;;  %v1783_v45 = vpop.f32.mrf.mxu3  ;;  %v2895_v52 = vld [vmem:[%s4955_s0 + $0x3cc] sm:$0xf0] }
 0x11e   :  { %v1608_v19 = vpop.f32.mrf.mxu1  ;;  %v2898_v9 = vor.u32 %v3404_v1, %v2895_v52  ;;  %v3419_v1 = vld [vmem:[%s4955_s0 + $0x420] sm:$0xf0] }
 0x11f   :  { %v1784_v24 = vadd.f32 %v1783_v45, %v1695_v11  ;;  %v1609_v25 = vadd.f32 %v1608_v19, %v3926_v34 }
 0x120   :  { %v1875_v26 = vpop.f32.mrf.mxu0 }
 0x121   :  { %1647 = vmatmul.bf16.gmra.mxu1 %v2862_v16  ;;  %1736 = vmatmul.bf16.gmra.mxu2 %v2866_v17  ;;  %v4284_v29 = vadd.f32 %v1872_v53, %v1784_v24  ;;  %v2901_v53 = vld [vmem:[%s4955_s0 + $0x3b0] sm:$0xf]  ;;  %v2906_v16 = vor.u32 %v3405_v57, %v2903_v20  ;;  %v2910_v17 = vor.u32 %v3410_v59, %v2909_v15 }
 0x122   :  { %1825 = vmatmul.bf16.gmra.mxu3 %v2870_v21  ;;  %v2902_v11 = vor.u32 %v3409_v54, %v2901_v53 }
 0x123   :  { %1914 = vmatmul.bf16.gmra.mxu0 %v2874_v22 }
 0x124   :  { %v1697_v37 = vpop.f32.mrf.mxu2 }
 0x125   :  { %v1698_v42 = vadd.f32 %v1697_v37, %v1609_v25  ;;  %v1786_v34 = vpop.f32.mrf.mxu3 }
 0x126   :  { %v1610_v46 = vpop.f32.mrf.mxu1 }
 0x127   :  { %v1787_v48 = vadd.f32 %v1786_v34, %v1698_v42  ;;  %v1611_v6 = vadd.f32 %v1610_v46, %v3946_v44  ;;  %v3413_v46 = vld [vmem:[%s4955_s0 + $0x3f4] sm:$0xf] }
 0x128   :  { %v1877_v49 = vpop.f32.mrf.mxu0 }
 0x129   :  { %v4305_v44 = vadd.f32 %v1875_v26, %v1787_v48 }
 0x12c   :  { %v1699_v62 = vpop.f32.mrf.mxu2 }
 0x12d   :  { %v1700_v40 = vadd.f32 %v1699_v62, %v1611_v6  ;;  %v1788_v8 = vpop.f32.mrf.mxu3  ;;  %v2937_v6 = vld [vmem:[%s4955_s0 + $0x3f8] sm:$0xf]  ;;  %v2946_v62 = vor.u32 %v3419_v1, %v2945_v51 }
 0x12e   :  { %v1613_v45 = vpop.f32.mrf.mxu1 }
 0x12f   :  { %v1789_v19 = vadd.f32 %v1788_v8, %v1700_v40  ;;  %v1614_v21 = vadd.f32 %v1613_v45, %v3984_v0  ;;  %v2931_v0 = vld [vmem:[%s4955_s0 + $0x414] sm:$0xf0] }
 0x130   :  { %v1880_v22 = vpop.f32.mrf.mxu0  ;;  %v2934_v57 = vor.u32 %v3413_v46, %v2931_v0  ;;  %v3428_v46 = vld [vmem:[%s4955_s0 + $0x468] sm:$0xf0] }
 0x131   :  { %1652 = vmatmul.bf16.gmra.mxu1 %v2898_v9  ;;  %1741 = vmatmul.bf16.gmra.mxu2 %v2902_v11  ;;  %v4326_v24 = vadd.f32 %v1877_v49, %v1789_v19  ;;  %v3418_v49 = vld [vmem:[%s4955_s0 + $0x418] sm:$0xf0] }
 0x132   :  { %1830 = vmatmul.bf16.gmra.mxu3 %v2906_v16  ;;  %v2938_v20 = vor.u32 %v3418_v49, %v2937_v6 }
 0x133   :  { %1919 = vmatmul.bf16.gmra.mxu0 %v2910_v17 }
 0x134   :  { %v1702_v25 = vpop.f32.mrf.mxu2 }
 0x135   :  { %v1703_v26 = vadd.f32 %v1702_v25, %v1614_v21  ;;  %v1791_v30 = vpop.f32.mrf.mxu3 }
 0x136   :  { %v1615_v33 = vpop.f32.mrf.mxu1 }
 0x137   :  { %v1792_v37 = vadd.f32 %v1791_v30, %v1703_v26  ;;  %v1616_v42 = vadd.f32 %v1615_v33, %v3995_v7  ;;  %v3414_v7 = vld [vmem:[%s4955_s0 + $0x3fc] sm:$0xf]  ;;  %v2973_v33 = vld [vmem:[%s4955_s0 + $0x440] sm:$0xf] }
 0x138   :  { %v1882_v34 = vpop.f32.mrf.mxu0  ;;  %v2942_v59 = vor.u32 %v3414_v7, %v2939_v50  ;;  %v3422_v26 = vld [vmem:[%s4955_s0 + $0x43c] sm:$0xf] }
 0x139   :  { %v4335_v48 = vadd.f32 %v1880_v22, %v1792_v37  ;;  %v3427_v37 = vld [vmem:[%s4955_s0 + $0x460] sm:$0xf0] }
 0x13a   :  { %v2974_v50 = vor.u32 %v3427_v37, %v2973_v33 }
 0x13c   :  { %v1704_v52 = vpop.f32.mrf.mxu2 }
 0x13d   :  { %v1705_v53 = vadd.f32 %v1704_v52, %v1616_v42  ;;  %v1793_v54 = vpop.f32.mrf.mxu3  ;;  %v2975_v42 = vld [vmem:[%s4955_s0 + $0x464] sm:$0xf0] }
 0x13e   :  { %v1618_v15 = vpop.f32.mrf.mxu1 }
 0x13f   :  { %v1794_v40 = vadd.f32 %v1793_v54, %v1705_v53  ;;  %v1619_v8 = vadd.f32 %v1618_v15, %v4030_v27  ;;  %v2967_v27 = vld [vmem:[%s4955_s0 + $0x45c] sm:$0xf0] }
 0x140   :  { %v1885_v9 = vpop.f32.mrf.mxu0  ;;  %v2970_v7 = vor.u32 %v3422_v26, %v2967_v27  ;;  %v3295_v26 = vld [vmem:[%s4955_s0 + $0x40] sm:$0xf0] }
 0x141   :  { %1657 = vmatmul.bf16.gmra.mxu1 %v2934_v57  ;;  %1746 = vmatmul.bf16.gmra.mxu2 %v2938_v20  ;;  %v4356_v11 = vadd.f32 %v1882_v34, %v1794_v40  ;;  %v2981_v34 = vld [vmem:[%s4955_s0 + $0x448] sm:$0xf] }
 0x142   :  { %1835 = vmatmul.bf16.gmra.mxu3 %v2942_v59  ;;  %v2982_v52 = vor.u32 %v3428_v46, %v2981_v34 }
 0x143   :  { %1924 = vmatmul.bf16.gmra.mxu0 %v2946_v62 }
 0x144   :  { %v1707_v45 = vpop.f32.mrf.mxu2 }
 0x145   :  { %v1708_v16 = vadd.f32 %v1707_v45, %v1619_v8  ;;  %v1796_v17 = vpop.f32.mrf.mxu3 }
 0x146   :  { %v1620_v19 = vpop.f32.mrf.mxu1 }
 0x147   :  { %v1797_v21 = vadd.f32 %v1796_v17, %v1708_v16  ;;  %v1621_v22 = vadd.f32 %v1620_v19, %v4047_v38  ;;  %v3423_v38 = vld [vmem:[%s4955_s0 + $0x444] sm:$0xf]  ;;  %v3289_v16 = vld [vmem:[%s4955_s0 + $0x14] sm:$0xf]  ;;  %v2449_v19 = vld [vmem:[%s4955_s0 + $0x18] sm:$0xf] }
 0x148   :  { %v1887_v25 = vpop.f32.mrf.mxu0  ;;  %v2978_v1 = vor.u32 %v3423_v38, %v2975_v42 }
 0x149   :  { %v4365_v30 = vadd.f32 %v1885_v9, %v1797_v21  ;;  %v3294_v21 = vld [vmem:[%s4955_s0 + $0x38] sm:$0xf0] }
 0x14a   :  { %v2450_v42 = vor.u32 %v3294_v21, %v2449_v19 }
 0x14c   :  { %v1709_v0 = vpop.f32.mrf.mxu2 }
 0x14d   :  { %v1710_v6 = vadd.f32 %v1709_v0, %v1621_v22  ;;  %v1798_v49 = vpop.f32.mrf.mxu3  ;;  %v2451_v22 = vld [vmem:[%s4955_s0 + $0x3c] sm:$0xf0] }
 0x14e   :  { %v1623_v51 = vpop.f32.mrf.mxu1 }
 0x14f   :  { %v1799_v53 = vadd.f32 %v1798_v49, %v1710_v6  ;;  %v1624_v54 = vadd.f32 %v1623_v51, %v4088_v4  ;;  %v2443_v4 = vld [vmem:[%s4955_s0 + $0x34] sm:$0xf0] }
 0x150   :  { %v1890_v57 = vpop.f32.mrf.mxu0  ;;  %v2446_v38 = vor.u32 %v3289_v16, %v2443_v4  ;;  %v3304_v16 = vld [vmem:[%s4955_s0 + $0x88] sm:$0xf0] }
 0x151   :  { %1662 = vmatmul.bf16.gmra.mxu1 %v2970_v7  ;;  %1751 = vmatmul.bf16.gmra.mxu2 %v2974_v50  ;;  %v4386_v20 = vadd.f32 %v1887_v25, %v1799_v53  ;;  %v2457_v25 = vld [vmem:[%s4955_s0 + $0x20] sm:$0xf] }
 0x152   :  { %1840 = vmatmul.bf16.gmra.mxu3 %v2978_v1  ;;  %v2458_v0 = vor.u32 %v3295_v26, %v2457_v25 }
 0x153   :  { %1929 = vmatmul.bf16.gmra.mxu0 %v2982_v52 }
 0x154   :  { %v1712_v15 = vpop.f32.mrf.mxu2 }
 0x155   :  { %v1713_v59 = vadd.f32 %v1712_v15, %v1624_v54  ;;  %v1801_v62 = vpop.f32.mrf.mxu3 }
 0x156   :  { %v1625_v40 = vpop.f32.mrf.mxu1 }
 0x157   :  { %v1802_v8 = vadd.f32 %v1801_v62, %v1713_v59  ;;  %v1626_v9 = vadd.f32 %v1625_v40, %v4099_v14  ;;  %v3290_v14 = vld [vmem:[%s4955_s0 + $0x1c] sm:$0xf]  ;;  %v2485_v40 = vld [vmem:[%s4955_s0 + $0x60] sm:$0xf] }
 0x158   :  { %v1892_v45 = vpop.f32.mrf.mxu0  ;;  %v2454_v46 = vor.u32 %v3290_v14, %v2451_v22  ;;  %v3298_v59 = vld [vmem:[%s4955_s0 + $0x5c] sm:$0xf] }
 0x159   :  { %v4395_v17 = vadd.f32 %v1890_v57, %v1802_v8  ;;  %v3303_v8 = vld [vmem:[%s4955_s0 + $0x80] sm:$0xf0] }
 0x15a   :  { %v2486_v22 = vor.u32 %v3303_v8, %v2485_v40 }
 0x15c   :  { %v1714_v27 = vpop.f32.mrf.mxu2 }
 0x15d   :  { %v1715_v33 = vadd.f32 %v1714_v27, %v1626_v9  ;;  %v1803_v37 = vpop.f32.mrf.mxu3  ;;  %v2487_v9 = vld [vmem:[%s4955_s0 + $0x84] sm:$0xf0] }
 0x15e   :  { %v1628_v34 = vpop.f32.mrf.mxu1 }
 0x15f   :  { %v1804_v6 = vadd.f32 %v1803_v37, %v1715_v33  ;;  %v1629_v49 = vadd.f32 %v1628_v34, %v3937_v39  ;;  %v2479_v39 = vld [vmem:[%s4955_s0 + $0x7c] sm:$0xf0] }
 0x160   :  { %v1895_v7 = vpop.f32.mrf.mxu0  ;;  %v2482_v14 = vor.u32 %v3298_v59, %v2479_v39  ;;  %v3313_v59 = vld [vmem:[%s4955_s0 + $0xd0] sm:$0xf0] }
 0x161   :  { %1943 = vmatmul.bf16.vlgmr.msra.gmra.mxu1 %v2446_v38  ;;  %2032 = vmatmul.bf16.vlgmr.msra.gmra.mxu2 %v2450_v42  ;;  %v4416_v50 = vadd.f32 %v1892_v45, %v1804_v6  ;;  %v2493_v45 = vld [vmem:[%s4955_s0 + $0x68] sm:$0xf] }
 0x162   :  { %2121 = vmatmul.bf16.vlgmr.msra.gmra.mxu3 %v2454_v46  ;;  %v2494_v27 = vor.u32 %v3304_v16, %v2493_v45 }
 0x163   :  { %2210 = vmatmul.bf16.vlgmr.msra.gmra.mxu0 %v2458_v0 }
 0x164   :  { %v1717_v51 = vpop.f32.mrf.mxu2 }
 0x165   :  { %v1718_v1 = vadd.f32 %v1717_v51, %v1629_v49  ;;  %v1806_v52 = vpop.f32.mrf.mxu3 }
 0x166   :  { %v1630_v53 = vpop.f32.mrf.mxu1 }
 0x167   :  { %v1807_v54 = vadd.f32 %v1806_v52, %v1718_v1  ;;  %v1631_v57 = vadd.f32 %v1630_v53, %v3978_v56  ;;  %v3299_v56 = vld [vmem:[%s4955_s0 + $0x64] sm:$0xf]  ;;  %v2521_v53 = vld [vmem:[%s4955_s0 + $0xa8] sm:$0xf] }
 0x168   :  { %v1897_v15 = vpop.f32.mrf.mxu0  ;;  %v2490_v26 = vor.u32 %v3299_v56, %v2487_v9  ;;  %v3307_v1 = vld [vmem:[%s4955_s0 + $0xa4] sm:$0xf] }
 0x169   :  { %v4425_v62 = vadd.f32 %v1895_v7, %v1807_v54  ;;  %v3312_v54 = vld [vmem:[%s4955_s0 + $0xc8] sm:$0xf0] }
 0x16a   :  { %v2522_v9 = vor.u32 %v3312_v54, %v2521_v53 }
 0x16c   :  { %v1719_v4 = vpop.f32.mrf.mxu2 }
 0x16d   :  { %v1720_v19 = vadd.f32 %v1719_v4, %v1631_v57  ;;  %v1808_v21 = vpop.f32.mrf.mxu3  ;;  %v2523_v57 = vld [vmem:[%s4955_s0 + $0xcc] sm:$0xf0] }
 0x16e   :  { %v1633_v25 = vpop.f32.mrf.mxu1 }
 0x16f   :  { %v1809_v33 = vadd.f32 %v1808_v21, %v1720_v19  ;;  %v1634_v37 = vadd.f32 %v1633_v25, %v3989_v3  ;;  %v2515_v3 = vld [vmem:[%s4955_s0 + $0xc4] sm:$0xf0] }
 0x170   :  { %v1900_v38 = vpop.f32.mrf.mxu0  ;;  %v2518_v56 = vor.u32 %v3307_v1, %v2515_v3  ;;  %v3322_v1 = vld [vmem:[%s4955_s0 + $0x118] sm:$0xf0] }
 0x171   :  { %1948 = vmatmul.bf16.gmra.mxu1 %v2482_v14  ;;  %2037 = vmatmul.bf16.gmra.mxu2 %v2486_v22  ;;  %v4446_v42 = vadd.f32 %v1897_v15, %v1809_v33  ;;  %v2529_v15 = vld [vmem:[%s4955_s0 + $0xb0] sm:$0xf] }
 0x172   :  { %2126 = vmatmul.bf16.gmra.mxu3 %v2490_v26  ;;  %v2530_v4 = vor.u32 %v3313_v59, %v2529_v15 }
 0x173   :  { %2215 = vmatmul.bf16.gmra.mxu0 %v2494_v27 }
 0x174   :  { %v1722_v34 = vpop.f32.mrf.mxu2 }
 0x175   :  { %v1723_v46 = vadd.f32 %v1722_v34, %v1634_v37  ;;  %v1811_v0 = vpop.f32.mrf.mxu3 }
 0x176   :  { %v1635_v6 = vpop.f32.mrf.mxu1 }
 0x177   :  { %v1812_v49 = vadd.f32 %v1811_v0, %v1723_v46  ;;  %v1636_v7 = vadd.f32 %v1635_v6, %v4024_v18  ;;  %v3308_v18 = vld [vmem:[%s4955_s0 + $0xac] sm:$0xf]  ;;  %v2557_v6 = vld [vmem:[%s4955_s0 + $0xf0] sm:$0xf] }
 0x178   :  { %v1902_v51 = vpop.f32.mrf.mxu0  ;;  %v2526_v16 = vor.u32 %v3308_v18, %v2523_v57  ;;  %v3316_v46 = vld [vmem:[%s4955_s0 + $0xec] sm:$0xf] }
 0x179   :  { %v4455_v52 = vadd.f32 %v1900_v38, %v1812_v49  ;;  %v3321_v49 = vld [vmem:[%s4955_s0 + $0x110] sm:$0xf0] }
 0x17a   :  { %v2558_v57 = vor.u32 %v3321_v49, %v2557_v6 }
 0x17c   :  { %v1724_v39 = vpop.f32.mrf.mxu2 }
 0x17d   :  { %v1725_v40 = vadd.f32 %v1724_v39, %v1636_v7  ;;  %v1813_v8 = vpop.f32.mrf.mxu3  ;;  %v2559_v7 = vld [vmem:[%s4955_s0 + $0x114] sm:$0xf0] }
 0x17e   :  { %v1638_v45 = vpop.f32.mrf.mxu1 }
 0x17f   :  { %v1814_v19 = vadd.f32 %v1813_v8, %v1725_v40  ;;  %v1639_v21 = vadd.f32 %v1638_v45, %v4041_v32  ;;  %v2551_v32 = vld [vmem:[%s4955_s0 + $0x10c] sm:$0xf0] }
 0x180   :  { %v1905_v14 = vpop.f32.mrf.mxu0  ;;  %v2554_v18 = vor.u32 %v3316_v46, %v2551_v32  ;;  %v3331_v46 = vld [vmem:[%s4955_s0 + $0x160] sm:$0xf0] }
 0x181   :  { %1953 = vmatmul.bf16.gmra.mxu1 %v2518_v56  ;;  %2042 = vmatmul.bf16.gmra.mxu2 %v2522_v9  ;;  %v4476_v22 = vadd.f32 %v1902_v51, %v1814_v19  ;;  %v2565_v51 = vld [vmem:[%s4955_s0 + $0xf8] sm:$0xf] }
 0x182   :  { %2131 = vmatmul.bf16.gmra.mxu3 %v2526_v16  ;;  %v2566_v39 = vor.u32 %v3322_v1, %v2565_v51 }
 0x183   :  { %2220 = vmatmul.bf16.gmra.mxu0 %v2530_v4 }
 0x184   :  { %v1727_v25 = vpop.f32.mrf.mxu2 }
 0x185   :  { %v1728_v26 = vadd.f32 %v1727_v25, %v1639_v21  ;;  %v1816_v27 = vpop.f32.mrf.mxu3 }
 0x186   :  { %v1640_v33 = vpop.f32.mrf.mxu1 }
 0x187   :  { %v1817_v37 = vadd.f32 %v1816_v27, %v1728_v26  ;;  %v1641_v38 = vadd.f32 %v1640_v33, %v4082_v55  ;;  %v3317_v55 = vld [vmem:[%s4955_s0 + $0xf4] sm:$0xf]  ;;  %v2593_v33 = vld [vmem:[%s4955_s0 + $0x138] sm:$0xf] }
 0x188   :  { %v1907_v34 = vpop.f32.mrf.mxu0  ;;  %v2562_v59 = vor.u32 %v3317_v55, %v2559_v7  ;;  %v3325_v26 = vld [vmem:[%s4955_s0 + $0x134] sm:$0xf] }
 0x189   :  { %v4485_v0 = vadd.f32 %v1905_v14, %v1817_v37  ;;  %v3330_v37 = vld [vmem:[%s4955_s0 + $0x158] sm:$0xf0] }
 0x18a   :  { %v2594_v7 = vor.u32 %v3330_v37, %v2593_v33 }
 0x18c   :  { %v1729_v3 = vpop.f32.mrf.mxu2 }
 0x18d   :  { %v1730_v53 = vadd.f32 %v1729_v3, %v1641_v38  ;;  %v1818_v54 = vpop.f32.mrf.mxu3  ;;  %v2595_v38 = vld [vmem:[%s4955_s0 + $0x15c] sm:$0xf0] }
 0x18e   :  { %v1643_v15 = vpop.f32.mrf.mxu1 }
 0x18f   :  { %v1819_v40 = vadd.f32 %v1818_v54, %v1730_v53  ;;  %v1644_v8 = vadd.f32 %v1643_v15, %v4093_v10  ;;  %v2587_v10 = vld [vmem:[%s4955_s0 + $0x154] sm:$0xf0] }
 0x190   :  { %v1910_v56 = vpop.f32.mrf.mxu0  ;;  %v2590_v55 = vor.u32 %v3325_v26, %v2587_v10  ;;  %v3340_v26 = vld [vmem:[%s4955_s0 + $0x1a8] sm:$0xf0] }
 0x191   :  { %1958 = vmatmul.bf16.gmra.mxu1 %v2554_v18  ;;  %2047 = vmatmul.bf16.gmra.mxu2 %v2558_v57  ;;  %v4506_v9 = vadd.f32 %v1907_v34, %v1819_v40  ;;  %v2601_v34 = vld [vmem:[%s4955_s0 + $0x140] sm:$0xf] }
 0x192   :  { %2136 = vmatmul.bf16.gmra.mxu3 %v2562_v59  ;;  %v2602_v3 = vor.u32 %v3331_v46, %v2601_v34 }
 0x193   :  { %2225 = vmatmul.bf16.gmra.mxu0 %v2566_v39 }
 0x194   :  { %v1732_v45 = vpop.f32.mrf.mxu2 }
 0x195   :  { %v1733_v16 = vadd.f32 %v1732_v45, %v1644_v8  ;;  %v1821_v4 = vpop.f32.mrf.mxu3 }
 0x196   :  { %v1645_v19 = vpop.f32.mrf.mxu1 }
 0x197   :  { %v1822_v21 = vadd.f32 %v1821_v4, %v1733_v16  ;;  %v1646_v14 = vadd.f32 %v1645_v19, %v4130_v31  ;;  %v3326_v31 = vld [vmem:[%s4955_s0 + $0x13c] sm:$0xf]  ;;  %v2629_v19 = vld [vmem:[%s4955_s0 + $0x180] sm:$0xf] }
 0x198   :  { %v1912_v25 = vpop.f32.mrf.mxu0  ;;  %v2598_v1 = vor.u32 %v3326_v31, %v2595_v38  ;;  %v3334_v16 = vld [vmem:[%s4955_s0 + $0x17c] sm:$0xf] }
 0x199   :  { %v4515_v27 = vadd.f32 %v1910_v56, %v1822_v21  ;;  %v3339_v21 = vld [vmem:[%s4955_s0 + $0x1a0] sm:$0xf0] }
 0x19a   :  { %v2630_v38 = vor.u32 %v3339_v21, %v2629_v19 }
 0x19c   :  { %v1734_v32 = vpop.f32.mrf.mxu2 }
 0x19d   :  { %v1735_v6 = vadd.f32 %v1734_v32, %v1646_v14  ;;  %v1823_v49 = vpop.f32.mrf.mxu3  ;;  %v2631_v14 = vld [vmem:[%s4955_s0 + $0x1a4] sm:$0xf0] }
 0x19e   :  { %v1648_v51 = vpop.f32.mrf.mxu1 }
 0x19f   :  { %v1824_v53 = vadd.f32 %v1823_v49, %v1735_v6  ;;  %v1649_v54 = vadd.f32 %v1648_v51, %v3940_v41  ;;  %v2623_v41 = vld [vmem:[%s4955_s0 + $0x19c] sm:$0xf0] }
 0x1a0   :  { %v1915_v18 = vpop.f32.mrf.mxu0  ;;  %v2626_v31 = vor.u32 %v3334_v16, %v2623_v41  ;;  %v3349_v16 = vld [vmem:[%s4955_s0 + $0x1f0] sm:$0xf0] }
 0x1a1   :  { %1963 = vmatmul.bf16.gmra.mxu1 %v2590_v55  ;;  %2052 = vmatmul.bf16.gmra.mxu2 %v2594_v7  ;;  %v4536_v57 = vadd.f32 %v1912_v25, %v1824_v53  ;;  %v2637_v25 = vld [vmem:[%s4955_s0 + $0x188] sm:$0xf] }
 0x1a2   :  { %2141 = vmatmul.bf16.gmra.mxu3 %v2598_v1  ;;  %v2638_v32 = vor.u32 %v3340_v26, %v2637_v25 }
 0x1a3   :  { %2230 = vmatmul.bf16.gmra.mxu0 %v2602_v3 }
 0x1a4   :  { %v1737_v15 = vpop.f32.mrf.mxu2 }
 0x1a5   :  { %v1738_v59 = vadd.f32 %v1737_v15, %v1649_v54  ;;  %v1826_v39 = vpop.f32.mrf.mxu3 }
 0x1a6   :  { %v1650_v40 = vpop.f32.mrf.mxu1 }
 0x1a7   :  { %v1827_v8 = vadd.f32 %v1826_v39, %v1738_v59  ;;  %v1651_v56 = vadd.f32 %v1650_v40, %v3981_v60  ;;  %v3335_v60 = vld [vmem:[%s4955_s0 + $0x184] sm:$0xf]  ;;  %v2665_v40 = vld [vmem:[%s4955_s0 + $0x1c8] sm:$0xf] }
 0x1a8   :  { %v1917_v45 = vpop.f32.mrf.mxu0  ;;  %v2634_v46 = vor.u32 %v3335_v60, %v2631_v14  ;;  %v3343_v59 = vld [vmem:[%s4955_s0 + $0x1c4] sm:$0xf] }
 0x1a9   :  { %v4545_v4 = vadd.f32 %v1915_v18, %v1827_v8  ;;  %v3348_v8 = vld [vmem:[%s4955_s0 + $0x1e8] sm:$0xf0] }
 0x1aa   :  { %v2666_v14 = vor.u32 %v3348_v8, %v2665_v40 }
 0x1ac   :  { %v1739_v10 = vpop.f32.mrf.mxu2 }
 0x1ad   :  { %v1740_v33 = vadd.f32 %v1739_v10, %v1651_v56  ;;  %v1828_v37 = vpop.f32.mrf.mxu3  ;;  %v2667_v56 = vld [vmem:[%s4955_s0 + $0x1ec] sm:$0xf0] }
 0x1ae   :  { %v1653_v34 = vpop.f32.mrf.mxu1 }
 0x1af   :  { %v1829_v6 = vadd.f32 %v1828_v37, %v1740_v33  ;;  %v1654_v49 = vadd.f32 %v1653_v34, %v3992_v5  ;;  %v2659_v5 = vld [vmem:[%s4955_s0 + $0x1e4] sm:$0xf0] }
 0x1b0   :  { %v1920_v55 = vpop.f32.mrf.mxu0  ;;  %v2662_v60 = vor.u32 %v3343_v59, %v2659_v5  ;;  %v3358_v59 = vld [vmem:[%s4955_s0 + $0x238] sm:$0xf0] }
 0x1b1   :  { %1968 = vmatmul.bf16.gmra.mxu1 %v2626_v31  ;;  %2057 = vmatmul.bf16.gmra.mxu2 %v2630_v38  ;;  %v4566_v7 = vadd.f32 %v1917_v45, %v1829_v6  ;;  %v2673_v45 = vld [vmem:[%s4955_s0 + $0x1d0] sm:$0xf] }
 0x1b2   :  { %2146 = vmatmul.bf16.gmra.mxu3 %v2634_v46  ;;  %v2674_v10 = vor.u32 %v3349_v16, %v2673_v45 }
 0x1b3   :  { %2235 = vmatmul.bf16.gmra.mxu0 %v2638_v32 }
 0x1b4   :  { %v1742_v51 = vpop.f32.mrf.mxu2 }
 0x1b5   :  { %v1743_v1 = vadd.f32 %v1742_v51, %v1654_v49  ;;  %v1831_v3 = vpop.f32.mrf.mxu3 }
 0x1b6   :  { %v1655_v53 = vpop.f32.mrf.mxu1 }
 0x1b7   :  { %v1832_v54 = vadd.f32 %v1831_v3, %v1743_v1  ;;  %v1656_v18 = vadd.f32 %v1655_v53, %v4027_v23  ;;  %v3344_v23 = vld [vmem:[%s4955_s0 + $0x1cc] sm:$0xf]  ;;  %v2701_v53 = vld [vmem:[%s4955_s0 + $0x210] sm:$0xf] }
 0x1b8   :  { %v1922_v15 = vpop.f32.mrf.mxu0  ;;  %v2670_v26 = vor.u32 %v3344_v23, %v2667_v56  ;;  %v3352_v1 = vld [vmem:[%s4955_s0 + $0x20c] sm:$0xf] }
 0x1b9   :  { %v4575_v39 = vadd.f32 %v1920_v55, %v1832_v54  ;;  %v3357_v54 = vld [vmem:[%s4955_s0 + $0x230] sm:$0xf0] }
 0x1ba   :  { %v2702_v56 = vor.u32 %v3357_v54, %v2701_v53 }
 0x1bc   :  { %v1744_v41 = vpop.f32.mrf.mxu2 }
 0x1bd   :  { %v1745_v19 = vadd.f32 %v1744_v41, %v1656_v18  ;;  %v1833_v21 = vpop.f32.mrf.mxu3  ;;  %v2703_v18 = vld [vmem:[%s4955_s0 + $0x234] sm:$0xf0] }
 0x1be   :  { %v1658_v25 = vpop.f32.mrf.mxu1 }
 0x1bf   :  { %v1834_v33 = vadd.f32 %v1833_v21, %v1745_v19  ;;  %v1659_v37 = vadd.f32 %v1658_v25, %v4044_v36  ;;  %v2695_v36 = vld [vmem:[%s4955_s0 + $0x22c] sm:$0xf0] }
 0x1c0   :  { %v1925_v31 = vpop.f32.mrf.mxu0  ;;  %v2698_v23 = vor.u32 %v3352_v1, %v2695_v36  ;;  %v3367_v1 = vld [vmem:[%s4955_s0 + $0x280] sm:$0xf0] }
 0x1c1   :  { %1973 = vmatmul.bf16.gmra.mxu1 %v2662_v60  ;;  %2062 = vmatmul.bf16.gmra.mxu2 %v2666_v14  ;;  %v4596_v38 = vadd.f32 %v1922_v15, %v1834_v33  ;;  %v2709_v15 = vld [vmem:[%s4955_s0 + $0x218] sm:$0xf] }
 0x1c2   :  { %2151 = vmatmul.bf16.gmra.mxu3 %v2670_v26  ;;  %v2710_v41 = vor.u32 %v3358_v59, %v2709_v15 }
 0x1c3   :  { %2240 = vmatmul.bf16.gmra.mxu0 %v2674_v10 }
 0x1c4   :  { %v1747_v34 = vpop.f32.mrf.mxu2 }
 0x1c5   :  { %v1748_v46 = vadd.f32 %v1747_v34, %v1659_v37  ;;  %v1836_v32 = vpop.f32.mrf.mxu3 }
 0x1c6   :  { %v1660_v6 = vpop.f32.mrf.mxu1 }
 0x1c7   :  { %v1837_v49 = vadd.f32 %v1836_v32, %v1748_v46  ;;  %v1661_v55 = vadd.f32 %v1660_v6, %v4085_v61  ;;  %v3353_v61 = vld [vmem:[%s4955_s0 + $0x214] sm:$0xf]  ;;  %v2737_v6 = vld [vmem:[%s4955_s0 + $0x258] sm:$0xf] }
 0x1c8   :  { %v1927_v51 = vpop.f32.mrf.mxu0  ;;  %v2706_v16 = vor.u32 %v3353_v61, %v2703_v18  ;;  %v3361_v46 = vld [vmem:[%s4955_s0 + $0x254] sm:$0xf] }
 0x1c9   :  { %v4605_v3 = vadd.f32 %v1925_v31, %v1837_v49  ;;  %v3366_v49 = vld [vmem:[%s4955_s0 + $0x278] sm:$0xf0] }
 0x1ca   :  { %v2738_v18 = vor.u32 %v3366_v49, %v2737_v6  ;;  %v3376_v6 = vld [vmem:[%s4955_s0 + $0x2c8] sm:$0xf0] }
 0x1cc   :  { %v1749_v5 = vpop.f32.mrf.mxu2 }
 0x1cd   :  { %v1750_v40 = vadd.f32 %v1749_v5, %v1661_v55  ;;  %v1838_v8 = vpop.f32.mrf.mxu3  ;;  %v2739_v55 = vld [vmem:[%s4955_s0 + $0x27c] sm:$0xf0] }
 0x1ce   :  { %v1663_v45 = vpop.f32.mrf.mxu1 }
 0x1cf   :  { %v1839_v19 = vadd.f32 %v1838_v8, %v1750_v40  ;;  %v1664_v21 = vadd.f32 %v1663_v45, %v4096_v12  ;;  %v2731_v12 = vld [vmem:[%s4955_s0 + $0x274] sm:$0xf0] }
 0x1d0   :  { %v1930_v60 = vpop.f32.mrf.mxu0  ;;  %v2734_v61 = vor.u32 %v3361_v46, %v2731_v12 }
 0x1d1   :  { %1978 = vmatmul.bf16.gmra.mxu1 %v2698_v23  ;;  %2067 = vmatmul.bf16.gmra.mxu2 %v2702_v56  ;;  %v4626_v14 = vadd.f32 %v1927_v51, %v1839_v19  ;;  %v2745_v51 = vld [vmem:[%s4955_s0 + $0x260] sm:$0xf] }
 0x1d2   :  { %2156 = vmatmul.bf16.gmra.mxu3 %v2706_v16  ;;  %v2746_v5 = vor.u32 %v3367_v1, %v2745_v51 }
 0x1d3   :  { %2245 = vmatmul.bf16.gmra.mxu0 %v2710_v41 }
 0x1d4   :  { %v1752_v25 = vpop.f32.mrf.mxu2 }
 0x1d5   :  { %v1753_v26 = vadd.f32 %v1752_v25, %v1664_v21  ;;  %v1841_v10 = vpop.f32.mrf.mxu3  ;;  %v3370_v25 = vld [vmem:[%s4955_s0 + $0x29c] sm:$0xf] }
 0x1d6   :  { %v1665_v33 = vpop.f32.mrf.mxu1 }
 0x1d7   :  { %v1842_v37 = vadd.f32 %v1841_v10, %v1753_v26  ;;  %v1666_v31 = vadd.f32 %v1665_v33, %v4133_v43  ;;  %v3362_v43 = vld [vmem:[%s4955_s0 + $0x25c] sm:$0xf]  ;;  %v2767_v10 = vld [vmem:[%s4955_s0 + $0x2bc] sm:$0xf0] }
 0x1d8   :  { %v1932_v34 = vpop.f32.mrf.mxu0  ;;  %v2742_v59 = vor.u32 %v3362_v43, %v2739_v55  ;;  %v2773_v33 = vld [vmem:[%s4955_s0 + $0x2a0] sm:$0xf]  ;;  %v2770_v1 = vor.u32 %v3370_v25, %v2767_v10  ;;  %v2809_v25 = vld [vmem:[%s4955_s0 + $0x2e8] sm:$0xf]  ;;  %v3380_v10 = vld [vmem:[%s4955_s0 + $0x2ec] sm:$0xf] }
 0x1d9   :  { %v4635_v32 = vadd.f32 %v1930_v60, %v1842_v37  ;;  %v3371_v37 = vld [vmem:[%s4955_s0 + $0x2a4] sm:$0xf] }
 0x1dc   :  { %v1754_v36 = vpop.f32.mrf.mxu2 }
 0x1dd   :  { %v1755_v53 = vadd.f32 %v1754_v36, %v1666_v31  ;;  %v1843_v54 = vpop.f32.mrf.mxu3  ;;  %v2775_v31 = vld [vmem:[%s4955_s0 + $0x2c4] sm:$0xf0] }
 0x1de   :  { %v1944_v15 = vpop.f32.mrf.mxu1 }
 0x1df   :  { %v1844_v40 = vadd.f32 %v1843_v54, %v1755_v53  ;;  %v1945_v56 = vadd.f32 %v1944_v15, %v4155_v13  ;;  %v3375_v13 = vld [vmem:[%s4955_s0 + $0x2c0] sm:$0xf0]  ;;  %v2778_v54 = vor.u32 %v3371_v37, %v2775_v31 }
 0x1e0   :  { %v2211_v8 = vpop.f32.mrf.mxu0  ;;  %v2774_v36 = vor.u32 %v3375_v13, %v2773_v33  ;;  %v2811_v33 = vld [vmem:[%s4955_s0 + $0x30c] sm:$0xf0] }
 0x1e1   :  { %1983 = vmatmul.bf16.gmra.mxu1 %v2734_v61  ;;  %2072 = vmatmul.bf16.gmra.mxu2 %v2738_v18  ;;  %v4655_v23 = vadd.f32 %v1932_v34, %v1844_v40  ;;  %v2781_v34 = vld [vmem:[%s4955_s0 + $0x2a8] sm:$0xf]  ;;  %v2817_v13 = vld [vmem:[%s4955_s0 + $0x2f0] sm:$0xf] }
 0x1e2   :  { %2161 = vmatmul.bf16.gmra.mxu3 %v2742_v59  ;;  %v2782_v61 = vor.u32 %v3376_v6, %v2781_v34  ;;  %v3385_v34 = vld [vmem:[%s4955_s0 + $0x310] sm:$0xf0] }
 0x1e3   :  { %2250 = vmatmul.bf16.gmra.mxu0 %v2746_v5 }
 0x1e4   :  { %v2033_v45 = vpop.f32.mrf.mxu2 }
 0x1e5   :  { %v2034_v16 = vadd.f32 %v2033_v45, %v1945_v56  ;;  %v2122_v41 = vpop.f32.mrf.mxu3 }
 0x1e6   :  { %v1946_v19 = vpop.f32.mrf.mxu1 }
 0x1e7   :  { %v2123_v21 = vadd.f32 %v2122_v41, %v2034_v16  ;;  %v1947_v12 = vadd.f32 %v1946_v19, %v4177_v35 }
 0x1e8   :  { %v2213_v60 = vpop.f32.mrf.mxu0 }
 0x1e9   :  { %v2212_v26 = vadd.f32 %v2211_v8, %v2123_v21  ;;  %v3379_v21 = vld [vmem:[%s4955_s0 + $0x2e4] sm:$0xf] }
 0x1eb   :  { %vm2291_vm0 = vcmp.ge.f32.partialorder %v2212_v26, 0.0  ;;  %v2323_v46 = vmul.f32 0.01, %v2212_v26 }
 0x1ec   :  { %v2035_v49 = vpop.f32.mrf.mxu2 }
 0x1ed   :  { %v2355_v43 = vsel %vm2291_vm0, %v2212_v26, %v2323_v46  ;;  %v2036_v55 = vadd.f32 %v2035_v49, %v1947_v12  ;;  %v2124_v51 = vpop.f32.mrf.mxu3  ;;  %v3384_v26 = vld [vmem:[%s4955_s0 + $0x308] sm:$0xf0] }
 0x1ee   :  { %2387 = vst [vmem:[%s4956_s3] sm:$0xff] %v2355_v43  ;;  %v1949_v53 = vpop.f32.mrf.mxu1 }
 0x1ef   :  { %v2125_v18 = vadd.f32 %v2124_v51, %v2036_v55  ;;  %v1950_v5 = vadd.f32 %v1949_v53, %v4187_v2  ;;  %v2803_v2 = vld [vmem:[%s4955_s0 + $0x304] sm:$0xf0]  ;;  %v2810_v55 = vor.u32 %v3384_v26, %v2809_v25 }
 0x1f0   :  { %v2216_v15 = vpop.f32.mrf.mxu0  ;;  %v2806_v43 = vor.u32 %v3379_v21, %v2803_v2  ;;  %v3389_v21 = vld [vmem:[%s4955_s0 + $0x334] sm:$0xf]  ;;  %v2853_v2 = vld [vmem:[%s4955_s0 + $0x338] sm:$0xf] }
 0x1f1   :  { %v2214_v35 = vadd.f32 %v2213_v60, %v2125_v18  ;;  %1988 = vmatmul.bf16.gmra.mxu1 %v2770_v1  ;;  %2077 = vmatmul.bf16.gmra.mxu2 %v2774_v36  ;;  %v2814_v1 = vor.u32 %v3380_v10, %v2811_v33  ;;  %v2818_v36 = vor.u32 %v3385_v34, %v2817_v13  ;;  %v3394_v10 = vld [vmem:[%s4955_s0 + $0x358] sm:$0xf0] }
 0x1f2   :  { %2166 = vmatmul.bf16.gmra.mxu3 %v2778_v54 }
 0x1f3   :  { %2255 = vmatmul.bf16.gmra.mxu0 %v2782_v61  ;;  %vm2292_vm1 = vcmp.ge.f32.partialorder %v2214_v35, 0.0  ;;  %v2324_v59 = vmul.f32 0.01, %v2214_v35 }
 0x1f4   :  { %v2038_v40 = vpop.f32.mrf.mxu2 }
 0x1f5   :  { %v2356_v8 = vsel %vm2292_vm1, %v2214_v35, %v2324_v59  ;;  %v2039_v56 = vadd.f32 %v2038_v40, %v1950_v5  ;;  %v2127_v45 = vpop.f32.mrf.mxu3 }
 0x1f6   :  { %2388 = vst [vmem:[%s4956_s3 + $0x8] sm:$0xff] %v2356_v8  ;;  %v1951_v16 = vpop.f32.mrf.mxu1 }
 0x1f7   :  { %v2128_v41 = vadd.f32 %v2127_v45, %v2039_v56  ;;  %v1952_v31 = vadd.f32 %v1951_v16, %v4209_v47  ;;  %v3388_v45 = vld [vmem:[%s4955_s0 + $0x32c] sm:$0xf] }
 0x1f8   :  { %v2218_v19 = vpop.f32.mrf.mxu0 }
 0x1f9   :  { %v2217_v60 = vadd.f32 %v2216_v15, %v2128_v41  ;;  %v2845_v41 = vld [vmem:[%s4955_s0 + $0x330] sm:$0xf] }
 0x1fb   :  { %vm2293_vm2 = vcmp.ge.f32.partialorder %v2217_v60, 0.0  ;;  %v2325_v37 = vmul.f32 0.01, %v2217_v60 }
 0x1fc   :  { %v2040_v46 = vpop.f32.mrf.mxu2 }
 0x1fd   :  { %v2357_v12 = vsel %vm2293_vm2, %v2217_v60, %v2325_v37  ;;  %v2041_v6 = vadd.f32 %v2040_v46, %v1952_v31  ;;  %v2129_v49 = vpop.f32.mrf.mxu3  ;;  %v2847_v60 = vld [vmem:[%s4955_s0 + $0x354] sm:$0xf0] }
 0x1fe   :  { %2389 = vst [vmem:[%s4956_s3 + $0x10] sm:$0xff] %v2357_v12  ;;  %v1954_v51 = vpop.f32.mrf.mxu1 }
 0x1ff   :  { %v2130_v53 = vadd.f32 %v2129_v49, %v2041_v6  ;;  %v1955_v18 = vadd.f32 %v1954_v51, %v4231_v63  ;;  %v2839_v63 = vld [vmem:[%s4955_s0 + $0x34c] sm:$0xf0]  ;;  %v2850_v6 = vor.u32 %v3389_v21, %v2847_v60  ;;  %v2854_v49 = vor.u32 %v3394_v10, %v2853_v2 }
 0x200   :  { %v2221_v54 = vpop.f32.mrf.mxu0  ;;  %v2842_v34 = vor.u32 %v3388_v45, %v2839_v63  ;;  %v2889_v45 = vld [vmem:[%s4955_s0 + $0x380] sm:$0xf] }
 0x201   :  { %v2219_v47 = vadd.f32 %v2218_v19, %v2130_v53  ;;  %1993 = vmatmul.bf16.gmra.mxu1 %v2806_v43  ;;  %2082 = vmatmul.bf16.gmra.mxu2 %v2810_v55  ;;  %v3393_v19 = vld [vmem:[%s4955_s0 + $0x350] sm:$0xf0] }
 0x202   :  { %2171 = vmatmul.bf16.gmra.mxu3 %v2814_v1  ;;  %v2846_v46 = vor.u32 %v3393_v19, %v2845_v41  ;;  %v3403_v41 = vld [vmem:[%s4955_s0 + $0x3a0] sm:$0xf0] }
 0x203   :  { %2260 = vmatmul.bf16.gmra.mxu0 %v2818_v36  ;;  %vm2294_vm3 = vcmp.ge.f32.partialorder %v2219_v47, 0.0  ;;  %v2326_v61 = vmul.f32 0.01, %v2219_v47 }
 0x204   :  { %v2043_v15 = vpop.f32.mrf.mxu2 }
 0x205   :  { %v2358_v35 = vsel %vm2294_vm3, %v2219_v47, %v2326_v61  ;;  %v2044_v59 = vadd.f32 %v2043_v15, %v1955_v18  ;;  %v2132_v5 = vpop.f32.mrf.mxu3 }
 0x206   :  { %2390 = vst [vmem:[%s4956_s3 + $0x18] sm:$0xff] %v2358_v35  ;;  %v1956_v40 = vpop.f32.mrf.mxu1  ;;  %v3397_v35 = vld [vmem:[%s4955_s0 + $0x374] sm:$0xf] }
 0x207   :  { %v2133_v8 = vadd.f32 %v2132_v5, %v2044_v59  ;;  %v1957_v26 = vadd.f32 %v1956_v40, %v4253_v28  ;;  %v2881_v5 = vld [vmem:[%s4955_s0 + $0x378] sm:$0xf]  ;;  %v3402_v40 = vld [vmem:[%s4955_s0 + $0x398] sm:$0xf0] }
 0x208   :  { %v2223_v56 = vpop.f32.mrf.mxu0 }
 0x209   :  { %v2222_v16 = vadd.f32 %v2221_v54, %v2133_v8  ;;  %v3398_v8 = vld [vmem:[%s4955_s0 + $0x37c] sm:$0xf] }
 0x20b   :  { %vm2295_vm4 = vcmp.ge.f32.partialorder %v2222_v16, 0.0  ;;  %v2327_v25 = vmul.f32 0.01, %v2222_v16 }
 0x20c   :  { %v2045_v33 = vpop.f32.mrf.mxu2 }
 0x20d   :  { %v2359_v13 = vsel %vm2295_vm4, %v2222_v16, %v2327_v25  ;;  %v2046_v37 = vadd.f32 %v2045_v33, %v1957_v26  ;;  %v2134_v31 = vpop.f32.mrf.mxu3  ;;  %v2882_v26 = vor.u32 %v3402_v40, %v2881_v5 }
 0x20e   :  { %2391 = vst [vmem:[%s4956_s3 + $0x20] sm:$0xff] %v2359_v13  ;;  %v1959_v12 = vpop.f32.mrf.mxu1  ;;  %v2890_v13 = vor.u32 %v3403_v41, %v2889_v45 }
 0x20f   :  { %v2135_v43 = vadd.f32 %v2134_v31, %v2046_v37  ;;  %v1960_v1 = vadd.f32 %v1959_v12, %v4263_v58  ;;  %v2875_v58 = vld [vmem:[%s4955_s0 + $0x394] sm:$0xf0] }
 0x210   :  { %v2226_v55 = vpop.f32.mrf.mxu0  ;;  %v2878_v25 = vor.u32 %v3397_v35, %v2875_v58 }
 0x211   :  { %v2224_v28 = vadd.f32 %v2223_v56, %v2135_v43  ;;  %1998 = vmatmul.bf16.gmra.mxu1 %v2842_v34  ;;  %2087 = vmatmul.bf16.gmra.mxu2 %v2846_v46  ;;  %v2883_v56 = vld [vmem:[%s4955_s0 + $0x39c] sm:$0xf0] }
 0x212   :  { %2176 = vmatmul.bf16.gmra.mxu3 %v2850_v6  ;;  %v2886_v33 = vor.u32 %v3398_v8, %v2883_v56 }
 0x213   :  { %2265 = vmatmul.bf16.gmra.mxu0 %v2854_v49  ;;  %vm2296_vm5 = vcmp.ge.f32.partialorder %v2224_v28, 0.0  ;;  %v2328_v51 = vmul.f32 0.01, %v2224_v28 }
 0x214   :  { %v2048_v36 = vpop.f32.mrf.mxu2 }
 0x215   :  { %v2360_v53 = vsel %vm2296_vm5, %v2224_v28, %v2328_v51  ;;  %v2049_v54 = vadd.f32 %v2048_v36, %v1960_v1  ;;  %v2137_v47 = vpop.f32.mrf.mxu3  ;;  %v3406_v1 = vld [vmem:[%s4955_s0 + $0x3bc] sm:$0xf] }
 0x216   :  { %2392 = vst [vmem:[%s4956_s3 + $0x28] sm:$0xff] %v2360_v53  ;;  %v1961_v61 = vpop.f32.mrf.mxu1  ;;  %v2917_v53 = vld [vmem:[%s4955_s0 + $0x3c0] sm:$0xf] }
 0x217   :  { %v2138_v18 = vadd.f32 %v2137_v47, %v2049_v54  ;;  %v1962_v63 = vadd.f32 %v1961_v61, %v4284_v29  ;;  %v3411_v54 = vld [vmem:[%s4955_s0 + $0x3e0] sm:$0xf0]  ;;  %v2919_v61 = vld [vmem:[%s4955_s0 + $0x3e4] sm:$0xf0] }
 0x218   :  { %v2228_v15 = vpop.f32.mrf.mxu0  ;;  %v3407_v47 = vld [vmem:[%s4955_s0 + $0x3c4] sm:$0xf]  ;;  %v2918_v45 = vor.u32 %v3411_v54, %v2917_v53 }
 0x219   :  { %v2227_v59 = vadd.f32 %v2226_v55, %v2138_v18  ;;  %v2925_v18 = vld [vmem:[%s4955_s0 + $0x3c8] sm:$0xf] }
 0x21b   :  { %vm2297_vm6 = vcmp.ge.f32.partialorder %v2227_v59, 0.0  ;;  %v2329_v16 = vmul.f32 0.01, %v2227_v59 }
 0x21c   :  { %v2050_v19 = vpop.f32.mrf.mxu2 }
 0x21d   :  { %v2361_v21 = vsel %vm2297_vm6, %v2227_v59, %v2329_v16  ;;  %v2051_v60 = vadd.f32 %v2050_v19, %v1962_v63  ;;  %v2139_v2 = vpop.f32.mrf.mxu3  ;;  %v3412_v59 = vld [vmem:[%s4955_s0 + $0x3e8] sm:$0xf0]  ;;  %v2922_v63 = vor.u32 %v3407_v47, %v2919_v61 }
 0x21e   :  { %2393 = vst [vmem:[%s4956_s3 + $0x30] sm:$0xff] %v2361_v21  ;;  %v1964_v10 = vpop.f32.mrf.mxu1  ;;  %v2926_v41 = vor.u32 %v3412_v59, %v2925_v18 }
 0x21f   :  { %v2140_v37 = vadd.f32 %v2139_v2, %v2051_v60  ;;  %v1965_v46 = vadd.f32 %v1964_v10, %v4305_v44  ;;  %v2911_v44 = vld [vmem:[%s4955_s0 + $0x3dc] sm:$0xf0] }
 0x220   :  { %v2231_v31 = vpop.f32.mrf.mxu0  ;;  %v2914_v56 = vor.u32 %v3406_v1, %v2911_v44 }
 0x221   :  { %v2229_v29 = vadd.f32 %v2228_v15, %v2140_v37  ;;  %2003 = vmatmul.bf16.gmra.mxu1 %v2878_v25  ;;  %2092 = vmatmul.bf16.gmra.mxu2 %v2882_v26 }
 0x222   :  { %2181 = vmatmul.bf16.gmra.mxu3 %v2886_v33 }
 0x223   :  { %2270 = vmatmul.bf16.gmra.mxu0 %v2890_v13  ;;  %vm2298_vm7 = vcmp.ge.f32.partialorder %v2229_v29, 0.0  ;;  %v2330_v34 = vmul.f32 0.01, %v2229_v29 }
 0x224   :  { %v2053_v12 = vpop.f32.mrf.mxu2 }
 0x225   :  { %v2362_v6 = vsel %vm2298_vm7, %v2229_v29, %v2330_v34  ;;  %v2054_v49 = vadd.f32 %v2053_v12, %v1965_v46  ;;  %v2142_v43 = vpop.f32.mrf.mxu3  ;;  %v3415_v29 = vld [vmem:[%s4955_s0 + $0x404] sm:$0xf]  ;;  %v2953_v46 = vld [vmem:[%s4955_s0 + $0x408] sm:$0xf]  ;;  %v3420_v12 = vld [vmem:[%s4955_s0 + $0x428] sm:$0xf0] }
 0x226   :  { %2394 = vst [vmem:[%s4956_s3 + $0x38] sm:$0xff] %v2362_v6  ;;  %v1966_v55 = vpop.f32.mrf.mxu1  ;;  %v3416_v6 = vld [vmem:[%s4955_s0 + $0x40c] sm:$0xf]  ;;  %v2954_v47 = vor.u32 %v3420_v12, %v2953_v46 }
 0x227   :  { %v2143_v28 = vadd.f32 %v2142_v43, %v2054_v49  ;;  %v1967_v35 = vadd.f32 %v1966_v55, %v4326_v24  ;;  %v2955_v49 = vld [vmem:[%s4955_s0 + $0x42c] sm:$0xf0] }
 0x228   :  { %v2233_v51 = vpop.f32.mrf.mxu0  ;;  %v2961_v43 = vld [vmem:[%s4955_s0 + $0x410] sm:$0xf]  ;;  %v2958_v18 = vor.u32 %v3416_v6, %v2955_v49 }
 0x229   :  { %v2232_v36 = vadd.f32 %v2231_v31, %v2143_v28 }
 0x22b   :  { %vm2299_vm8 = vcmp.ge.f32.partialorder %v2232_v36, 0.0  ;;  %v2331_v15 = vmul.f32 0.01, %v2232_v36 }
 0x22c   :  { %v2055_v58 = vpop.f32.mrf.mxu2 }
 0x22d   :  { %v2363_v5 = vsel %vm2299_vm8, %v2232_v36, %v2331_v15  ;;  %v2056_v40 = vadd.f32 %v2055_v58, %v1967_v35  ;;  %v2144_v8 = vpop.f32.mrf.mxu3 }
 0x22e   :  { %2395 = vst [vmem:[%s4956_s3 + $0x40] sm:$0xff] %v2363_v5  ;;  %v1969_v16 = vpop.f32.mrf.mxu1 }
 0x22f   :  { %v2145_v19 = vadd.f32 %v2144_v8, %v2056_v40  ;;  %v1970_v2 = vadd.f32 %v1969_v16, %v4335_v48  ;;  %v2947_v48 = vld [vmem:[%s4955_s0 + $0x424] sm:$0xf0] }
 0x230   :  { %v2236_v21 = vpop.f32.mrf.mxu0  ;;  %v2950_v54 = vor.u32 %v3415_v29, %v2947_v48 }
 0x231   :  { %v2234_v24 = vadd.f32 %v2233_v51, %v2145_v19  ;;  %2008 = vmatmul.bf16.gmra.mxu1 %v2914_v56  ;;  %2097 = vmatmul.bf16.gmra.mxu2 %v2918_v45  ;;  %v3421_v51 = vld [vmem:[%s4955_s0 + $0x430] sm:$0xf0]  ;;  %v3424_v19 = vld [vmem:[%s4955_s0 + $0x44c] sm:$0xf] }
 0x232   :  { %2186 = vmatmul.bf16.gmra.mxu3 %v2922_v63  ;;  %v2962_v15 = vor.u32 %v3421_v51, %v2961_v43 }
 0x233   :  { %2275 = vmatmul.bf16.gmra.mxu0 %v2926_v41  ;;  %vm2300_vm9 = vcmp.ge.f32.partialorder %v2234_v24, 0.0  ;;  %v2332_v60 = vmul.f32 0.01, %v2234_v24 }
 0x234   :  { %v2058_v25 = vpop.f32.mrf.mxu2 }
 0x235   :  { %v2364_v26 = vsel %vm2300_vm9, %v2234_v24, %v2332_v60  ;;  %v2059_v10 = vadd.f32 %v2058_v25, %v1970_v2  ;;  %v2147_v33 = vpop.f32.mrf.mxu3  ;;  %v2989_v24 = vld [vmem:[%s4955_s0 + $0x450] sm:$0xf]  ;;  %v3429_v60 = vld [vmem:[%s4955_s0 + $0x470] sm:$0xf0]  ;;  %v2991_v25 = vld [vmem:[%s4955_s0 + $0x474] sm:$0xf0] }
 0x236   :  { %2396 = vst [vmem:[%s4956_s3 + $0x48] sm:$0xff] %v2364_v26  ;;  %v1971_v13 = vpop.f32.mrf.mxu1  ;;  %v3425_v2 = vld [vmem:[%s4955_s0 + $0x454] sm:$0xf]  ;;  %v2997_v26 = vld [vmem:[%s4955_s0 + $0x458] sm:$0xf]  ;;  %v2990_v46 = vor.u32 %v3429_v60, %v2989_v24 }
 0x237   :  { %v2148_v37 = vadd.f32 %v2147_v33, %v2059_v10  ;;  %v1972_v28 = vadd.f32 %v1971_v13, %v4356_v11  ;;  %v3430_v13 = vld [vmem:[%s4955_s0 + $0x478] sm:$0xf0]  ;;  %v2994_v6 = vor.u32 %v3425_v2, %v2991_v25 }
 0x238   :  { %v2238_v31 = vpop.f32.mrf.mxu0  ;;  %v2998_v49 = vor.u32 %v3430_v13, %v2997_v26 }
 0x239   :  { %v2237_v34 = vadd.f32 %v2236_v21, %v2148_v37 }
 0x23b   :  { %vm2301_vm10 = vcmp.ge.f32.partialorder %v2237_v34, 0.0  ;;  %v2333_v55 = vmul.f32 0.01, %v2237_v34 }
 0x23c   :  { %v2060_v1 = vpop.f32.mrf.mxu2 }
 0x23d   :  { %v2365_v36 = vsel %vm2301_vm10, %v2237_v34, %v2333_v55  ;;  %v2061_v44 = vadd.f32 %v2060_v1, %v1972_v28  ;;  %v2149_v53 = vpop.f32.mrf.mxu3 }
 0x23e   :  { %2397 = vst [vmem:[%s4956_s3 + $0x50] sm:$0xff] %v2365_v36  ;;  %v1974_v61 = vpop.f32.mrf.mxu1 }
 0x23f   :  { %v2150_v35 = vadd.f32 %v2149_v53, %v2061_v44  ;;  %v1975_v5 = vadd.f32 %v1974_v61, %v4365_v30  ;;  %v2983_v30 = vld [vmem:[%s4955_s0 + $0x46c] sm:$0xf0] }
 0x240   :  { %v2241_v59 = vpop.f32.mrf.mxu0  ;;  %v2986_v48 = vor.u32 %v3424_v19, %v2983_v30 }
 0x241   :  { %v2239_v11 = vadd.f32 %v2238_v31, %v2150_v35  ;;  %2013 = vmatmul.bf16.gmra.mxu1 %v2950_v54  ;;  %2102 = vmatmul.bf16.gmra.mxu2 %v2954_v47 }
 0x242   :  { %2191 = vmatmul.bf16.gmra.mxu3 %v2958_v18 }
 0x243   :  { %2280 = vmatmul.bf16.gmra.mxu0 %v2962_v15  ;;  %vm2302_vm11 = vcmp.ge.f32.partialorder %v2239_v11, 0.0  ;;  %v2334_v58 = vmul.f32 0.01, %v2239_v11 }
 0x244   :  { %v2063_v40 = vpop.f32.mrf.mxu2 }
 0x245   :  { %v2366_v8 = vsel %vm2302_vm11, %v2239_v11, %v2334_v58  ;;  %v2064_v56 = vadd.f32 %v2063_v40, %v1975_v5  ;;  %v2152_v45 = vpop.f32.mrf.mxu3 }
 0x246   :  { %2398 = vst [vmem:[%s4956_s3 + $0x58] sm:$0xff] %v2366_v8  ;;  %v1976_v16 = vpop.f32.mrf.mxu1 }
 0x247   :  { %v2153_v63 = vadd.f32 %v2152_v45, %v2064_v56  ;;  %v1977_v33 = vadd.f32 %v1976_v16, %v4386_v20 }
 0x248   :  { %v2243_v41 = vpop.f32.mrf.mxu0 }
 0x249   :  { %v2242_v21 = vadd.f32 %v2241_v59, %v2153_v63 }
 0x24b   :  { %vm2303_vm12 = vcmp.ge.f32.partialorder %v2242_v21, 0.0  ;;  %v2335_v10 = vmul.f32 0.01, %v2242_v21 }
 0x24c   :  { %v2065_v37 = vpop.f32.mrf.mxu2 }
 0x24d   :  { %v2367_v31 = vsel %vm2303_vm12, %v2242_v21, %v2335_v10  ;;  %v2066_v29 = vadd.f32 %v2065_v37, %v1977_v33  ;;  %v2154_v34 = vpop.f32.mrf.mxu3 }
 0x24e   :  { %2399 = vst [vmem:[%s4956_s3 + $0x60] sm:$0xff] %v2367_v31  ;;  %v1979_v12 = vpop.f32.mrf.mxu1 }
 0x24f   :  { %v2155_v43 = vadd.f32 %v2154_v34, %v2066_v29  ;;  %v1980_v51 = vadd.f32 %v1979_v12, %v4395_v17 }
 0x250   :  { %v2246_v55 = vpop.f32.mrf.mxu0 }
 0x251   :  { %v2244_v20 = vadd.f32 %v2243_v41, %v2155_v43  ;;  %2018 = vmatmul.bf16.gmra.mxu1 %v2986_v48  ;;  %2107 = vmatmul.bf16.gmra.mxu2 %v2990_v46 }
 0x252   :  { %2196 = vmatmul.bf16.gmra.mxu3 %v2994_v6 }
 0x253   :  { %2285 = vmatmul.bf16.gmra.mxu0 %v2998_v49  ;;  %vm2304_vm13 = vcmp.ge.f32.partialorder %v2244_v20, 0.0  ;;  %v2336_v28 = vmul.f32 0.01, %v2244_v20 }
 0x254   :  { %v2068_v1 = vpop.f32.mrf.mxu2 }
 0x255   :  { %v2368_v36 = vsel %vm2304_vm13, %v2244_v20, %v2336_v28  ;;  %v2069_v44 = vadd.f32 %v2068_v1, %v1980_v51  ;;  %v2157_v53 = vpop.f32.mrf.mxu3 }
 0x256   :  { %2400 = vst [vmem:[%s4956_s3 + $0x68] sm:$0xff] %v2368_v36  ;;  %v1981_v54 = vpop.f32.mrf.mxu1 }
 0x257   :  { %v2158_v47 = vadd.f32 %v2157_v53, %v2069_v44  ;;  %v1982_v35 = vadd.f32 %v1981_v54, %v4416_v50 }
 0x258   :  { %v2248_v61 = vpop.f32.mrf.mxu0 }
 0x259   :  { %v2247_v18 = vadd.f32 %v2246_v55, %v2158_v47 }
 0x25b   :  { %vm2305_vm14 = vcmp.ge.f32.partialorder %v2247_v18, 0.0  ;;  %v2337_v15 = vmul.f32 0.01, %v2247_v18 }
 0x25c   :  { %v2070_v59 = vpop.f32.mrf.mxu2 }
 0x25d   :  { %v2369_v11 = vsel %vm2305_vm14, %v2247_v18, %v2337_v15  ;;  %v2071_v58 = vadd.f32 %v2070_v59, %v1982_v35  ;;  %v2159_v17 = vpop.f32.mrf.mxu3 }
 0x25e   :  { %2401 = vst [vmem:[%s4956_s3 + $0x70] sm:$0xff] %v2369_v11  ;;  %v1984_v5 = vpop.f32.mrf.mxu1 }
 0x25f   :  { %v2160_v40 = vadd.f32 %v2159_v17, %v2071_v58  ;;  %v1985_v16 = vadd.f32 %v1984_v5, %v4425_v62 }
 0x260   :  { %v2251_v8 = vpop.f32.mrf.mxu0 }
 0x261   :  { %v2249_v56 = vadd.f32 %v2248_v61, %v2160_v40 }
 0x263   :  { %vm2306_vm15 = vcmp.ge.f32.partialorder %v2249_v56, 0.0  ;;  %v2338_v45 = vmul.f32 0.01, %v2249_v56 }
 0x264   :  { %v2073_v63 = vpop.f32.mrf.mxu2 }
 0x265   :  { %v2370_v41 = vsel %vm2306_vm15, %v2249_v56, %v2338_v45  ;;  %v2074_v19 = vadd.f32 %v2073_v63, %v1985_v16  ;;  %v2162_v50 = vpop.f32.mrf.mxu3 }
 0x266   :  { %2402 = vst [vmem:[%s4956_s3 + $0x78] sm:$0xff] %v2370_v41  ;;  %v1986_v21 = vpop.f32.mrf.mxu1 }
 0x267   :  { %v2163_v30 = vadd.f32 %v2162_v50, %v2074_v19  ;;  %v1987_v25 = vadd.f32 %v1986_v21, %v4446_v42 }
 0x268   :  { %v2253_v24 = vpop.f32.mrf.mxu0 }
 0x269   :  { %v2252_v60 = vadd.f32 %v2251_v8, %v2163_v30 }
 0x26b   :  { %vm2307_vm0 = vcmp.ge.f32.partialorder %v2252_v60, 0.0  ;;  %v2339_v2 = vmul.f32 0.01, %v2252_v60 }
 0x26c   :  { %v2075_v26 = vpop.f32.mrf.mxu2 }
 0x26d   :  { %v2371_v10 = vsel %vm2307_vm0, %v2252_v60, %v2339_v2  ;;  %v2076_v33 = vadd.f32 %v2075_v26, %v1987_v25  ;;  %v2164_v62 = vpop.f32.mrf.mxu3 }
 0x26e   :  { %2403 = vst [vmem:[%s4956_s3 + $0x80] sm:$0xff] %v2371_v10  ;;  %v1989_v13 = vpop.f32.mrf.mxu1 }
 0x26f   :  { %v2165_v37 = vadd.f32 %v2164_v62, %v2076_v33  ;;  %v1990_v48 = vadd.f32 %v1989_v13, %v4455_v52 }
 0x270   :  { %v2256_v31 = vpop.f32.mrf.mxu0 }
 0x271   :  { %v2254_v29 = vadd.f32 %v2253_v24, %v2165_v37 }
 0x273   :  { %vm2308_vm1 = vcmp.ge.f32.partialorder %v2254_v29, 0.0  ;;  %v2340_v34 = vmul.f32 0.01, %v2254_v29 }
 0x274   :  { %v2078_v46 = vpop.f32.mrf.mxu2 }
 0x275   :  { %v2372_v12 = vsel %vm2308_vm1, %v2254_v29, %v2340_v34  ;;  %v2079_v6 = vadd.f32 %v2078_v46, %v1990_v48  ;;  %v2167_v42 = vpop.f32.mrf.mxu3 }
 0x276   :  { %2404 = vst [vmem:[%s4956_s3 + $0x88] sm:$0xff] %v2372_v12  ;;  %v1991_v49 = vpop.f32.mrf.mxu1 }
 0x277   :  { %v2168_v43 = vadd.f32 %v2167_v42, %v2079_v6  ;;  %v1992_v51 = vadd.f32 %v1991_v49, %v4476_v22 }
 0x278   :  { %v2258_v55 = vpop.f32.mrf.mxu0 }
 0x279   :  { %v2257_v20 = vadd.f32 %v2256_v31, %v2168_v43 }
 0x27b   :  { %vm2309_vm2 = vcmp.ge.f32.partialorder %v2257_v20, 0.0  ;;  %v2341_v28 = vmul.f32 0.01, %v2257_v20 }
 0x27c   :  { %v2080_v1 = vpop.f32.mrf.mxu2 }
 0x27d   :  { %v2373_v36 = vsel %vm2309_vm2, %v2257_v20, %v2341_v28  ;;  %v2081_v44 = vadd.f32 %v2080_v1, %v1992_v51  ;;  %v2169_v52 = vpop.f32.mrf.mxu3 }
 0x27e   :  { %2405 = vst [vmem:[%s4956_s3 + $0x90] sm:$0xff] %v2373_v36  ;;  %v1994_v53 = vpop.f32.mrf.mxu1 }
 0x27f   :  { %v2170_v54 = vadd.f32 %v2169_v52, %v2081_v44  ;;  %v1995_v15 = vadd.f32 %v1994_v53, %v4485_v0 }
 0x280   :  { %v2261_v47 = vpop.f32.mrf.mxu0 }
 0x281   :  { %v2259_v61 = vadd.f32 %v2258_v55, %v2170_v54 }
 0x283   :  { %vm2310_vm3 = vcmp.ge.f32.partialorder %v2259_v61, 0.0  ;;  %v2342_v18 = vmul.f32 0.01, %v2259_v61 }
 0x284   :  { %v2083_v35 = vpop.f32.mrf.mxu2 }
 0x285   :  { %v2374_v59 = vsel %vm2310_vm3, %v2259_v61, %v2342_v18  ;;  %v2084_v11 = vadd.f32 %v2083_v35, %v1995_v15  ;;  %v2172_v22 = vpop.f32.mrf.mxu3 }
 0x286   :  { %2406 = vst [vmem:[%s4956_s3 + $0x98] sm:$0xff] %v2374_v59  ;;  %v1996_v58 = vpop.f32.mrf.mxu1 }
 0x287   :  { %v2173_v17 = vadd.f32 %v2172_v22, %v2084_v11  ;;  %v1997_v56 = vadd.f32 %v1996_v58, %v4506_v9 }
 0x288   :  { %v2263_v5 = vpop.f32.mrf.mxu0 }
 0x289   :  { %v2262_v40 = vadd.f32 %v2261_v47, %v2173_v17 }
 0x28b   :  { %vm2311_vm4 = vcmp.ge.f32.partialorder %v2262_v40, 0.0  ;;  %v2343_v8 = vmul.f32 0.01, %v2262_v40 }
 0x28c   :  { %v2085_v45 = vpop.f32.mrf.mxu2 }
 0x28d   :  { %v2375_v16 = vsel %vm2311_vm4, %v2262_v40, %v2343_v8  ;;  %v2086_v63 = vadd.f32 %v2085_v45, %v1997_v56  ;;  %v2174_v0 = vpop.f32.mrf.mxu3 }
 0x28e   :  { %2407 = vst [vmem:[%s4956_s3 + $0xa0] sm:$0xff] %v2375_v16  ;;  %v1999_v41 = vpop.f32.mrf.mxu1 }
 0x28f   :  { %v2175_v19 = vadd.f32 %v2174_v0, %v2086_v63  ;;  %v2000_v24 = vadd.f32 %v1999_v41, %v4515_v27 }
 0x290   :  { %v2266_v50 = vpop.f32.mrf.mxu0 }
 0x291   :  { %v2264_v21 = vadd.f32 %v2263_v5, %v2175_v19 }
 0x293   :  { %vm2312_vm5 = vcmp.ge.f32.partialorder %v2264_v21, 0.0  ;;  %v2344_v30 = vmul.f32 0.01, %v2264_v21 }
 0x294   :  { %v2088_v60 = vpop.f32.mrf.mxu2 }
 0x295   :  { %v2376_v2 = vsel %vm2312_vm5, %v2264_v21, %v2344_v30  ;;  %v2089_v25 = vadd.f32 %v2088_v60, %v2000_v24  ;;  %v2177_v9 = vpop.f32.mrf.mxu3 }
 0x296   :  { %2408 = vst [vmem:[%s4956_s3 + $0xa8] sm:$0xff] %v2376_v2  ;;  %v2001_v26 = vpop.f32.mrf.mxu1 }
 0x297   :  { %v2178_v10 = vadd.f32 %v2177_v9, %v2089_v25  ;;  %v2002_v37 = vadd.f32 %v2001_v26, %v4536_v57 }
 0x298   :  { %v2268_v33 = vpop.f32.mrf.mxu0 }
 0x299   :  { %v2267_v62 = vadd.f32 %v2266_v50, %v2178_v10 }
 0x29b   :  { %vm2313_vm6 = vcmp.ge.f32.partialorder %v2267_v62, 0.0  ;;  %v2345_v13 = vmul.f32 0.01, %v2267_v62 }
 0x29c   :  { %v2090_v31 = vpop.f32.mrf.mxu2 }
 0x29d   :  { %v2377_v29 = vsel %vm2313_vm6, %v2267_v62, %v2345_v13  ;;  %v2091_v34 = vadd.f32 %v2090_v31, %v2002_v37  ;;  %v2179_v27 = vpop.f32.mrf.mxu3 }
 0x29e   :  { %2409 = vst [vmem:[%s4956_s3 + $0xb0] sm:$0xff] %v2377_v29  ;;  %v2004_v48 = vpop.f32.mrf.mxu1 }
 0x29f   :  { %v2180_v46 = vadd.f32 %v2179_v27, %v2091_v34  ;;  %v2005_v49 = vadd.f32 %v2004_v48, %v4545_v4 }
 0x2a0   :  { %v2271_v12 = vpop.f32.mrf.mxu0 }
 0x2a1   :  { %v2269_v6 = vadd.f32 %v2268_v33, %v2180_v46 }
 0x2a3   :  { %vm2314_vm7 = vcmp.ge.f32.partialorder %v2269_v6, 0.0  ;;  %v2346_v42 = vmul.f32 0.01, %v2269_v6 }
 0x2a4   :  { %v2093_v43 = vpop.f32.mrf.mxu2 }
 0x2a5   :  { %v2378_v55 = vsel %vm2314_vm7, %v2269_v6, %v2346_v42  ;;  %v2094_v20 = vadd.f32 %v2093_v43, %v2005_v49  ;;  %v2182_v57 = vpop.f32.mrf.mxu3 }
 0x2a6   :  { %2410 = vst [vmem:[%s4956_s3 + $0xb8] sm:$0xff] %v2378_v55  ;;  %v2006_v28 = vpop.f32.mrf.mxu1 }
 0x2a7   :  { %v2183_v51 = vadd.f32 %v2182_v57, %v2094_v20  ;;  %v2007_v52 = vadd.f32 %v2006_v28, %v4566_v7 }
 0x2a8   :  { %v2273_v1 = vpop.f32.mrf.mxu0 }
 0x2a9   :  { %v2272_v36 = vadd.f32 %v2271_v12, %v2183_v51 }
 0x2ab   :  { %vm2315_vm8 = vcmp.ge.f32.partialorder %v2272_v36, 0.0  ;;  %v2347_v44 = vmul.f32 0.01, %v2272_v36 }
 0x2ac   :  { %v2095_v53 = vpop.f32.mrf.mxu2 }
 0x2ad   :  { %v2379_v54 = vsel %vm2315_vm8, %v2272_v36, %v2347_v44  ;;  %v2096_v47 = vadd.f32 %v2095_v53, %v2007_v52  ;;  %v2184_v4 = vpop.f32.mrf.mxu3 }
 0x2ae   :  { %2411 = vst [vmem:[%s4956_s3 + $0xc0] sm:$0xff] %v2379_v54  ;;  %v2009_v61 = vpop.f32.mrf.mxu1 }
 0x2af   :  { %v2185_v18 = vadd.f32 %v2184_v4, %v2096_v47  ;;  %v2010_v11 = vadd.f32 %v2009_v61, %v4575_v39 }
 0x2b0   :  { %v2276_v15 = vpop.f32.mrf.mxu0 }
 0x2b1   :  { %v2274_v35 = vadd.f32 %v2273_v1, %v2185_v18 }
 0x2b3   :  { %vm2316_vm9 = vcmp.ge.f32.partialorder %v2274_v35, 0.0  ;;  %v2348_v59 = vmul.f32 0.01, %v2274_v35 }
 0x2b4   :  { %v2098_v22 = vpop.f32.mrf.mxu2 }
 0x2b5   :  { %v2380_v58 = vsel %vm2316_vm9, %v2274_v35, %v2348_v59  ;;  %v2099_v17 = vadd.f32 %v2098_v22, %v2010_v11  ;;  %v2187_v7 = vpop.f32.mrf.mxu3 }
 0x2b6   :  { %2412 = vst [vmem:[%s4956_s3 + $0xc8] sm:$0xff] %v2380_v58  ;;  %v2011_v5 = vpop.f32.mrf.mxu1 }
 0x2b7   :  { %v2188_v40 = vadd.f32 %v2187_v7, %v2099_v17  ;;  %v2012_v16 = vadd.f32 %v2011_v5, %v4596_v38 }
 0x2b8   :  { %v2278_v8 = vpop.f32.mrf.mxu0 }
 0x2b9   :  { %v2277_v56 = vadd.f32 %v2276_v15, %v2188_v40 }
 0x2bb   :  { %vm2317_vm10 = vcmp.ge.f32.partialorder %v2277_v56, 0.0  ;;  %v2349_v45 = vmul.f32 0.01, %v2277_v56 }
 0x2bc   :  { %v2100_v63 = vpop.f32.mrf.mxu2 }
 0x2bd   :  { %v2381_v0 = vsel %vm2317_vm10, %v2277_v56, %v2349_v45  ;;  %v2101_v41 = vadd.f32 %v2100_v63, %v2012_v16  ;;  %v2189_v39 = vpop.f32.mrf.mxu3 }
 0x2be   :  { %2413 = vst [vmem:[%s4956_s3 + $0xd0] sm:$0xff] %v2381_v0  ;;  %v2014_v19 = vpop.f32.mrf.mxu1 }
 0x2bf   :  { %v2190_v50 = vadd.f32 %v2189_v39, %v2101_v41  ;;  %v2015_v60 = vadd.f32 %v2014_v19, %v4605_v3 }
 0x2c0   :  { %v2281_v30 = vpop.f32.mrf.mxu0 }
 0x2c1   :  { %v2279_v21 = vadd.f32 %v2278_v8, %v2190_v50 }
 0x2c3   :  { %vm2318_vm11 = vcmp.ge.f32.partialorder %v2279_v21, 0.0  ;;  %v2350_v24 = vmul.f32 0.01, %v2279_v21 }
 0x2c4   :  { %v2103_v2 = vpop.f32.mrf.mxu2 }
 0x2c5   :  { %v2382_v25 = vsel %vm2318_vm11, %v2279_v21, %v2350_v24  ;;  %v2104_v9 = vadd.f32 %v2103_v2, %v2015_v60  ;;  %v2192_v38 = vpop.f32.mrf.mxu3 }
 0x2c6   :  { %2414 = vst [vmem:[%s4956_s3 + $0xd8] sm:$0xff] %v2382_v25  ;;  %v2016_v26 = vpop.f32.mrf.mxu1 }
 0x2c7   :  { %v2193_v10 = vadd.f32 %v2192_v38, %v2104_v9  ;;  %v2017_v13 = vadd.f32 %v2016_v26, %v4626_v14 }
 0x2c8   :  { %v2283_v37 = vpop.f32.mrf.mxu0 }
 0x2c9   :  { %v2282_v33 = vadd.f32 %v2281_v30, %v2193_v10 }
 0x2cb   :  { %vm2319_vm12 = vcmp.ge.f32.partialorder %v2282_v33, 0.0  ;;  %v2351_v62 = vmul.f32 0.01, %v2282_v33 }
 0x2cc   :  { %v2105_v31 = vpop.f32.mrf.mxu2 }
 0x2cd   :  { %v2383_v29 = vsel %vm2319_vm12, %v2282_v33, %v2351_v62  ;;  %v2106_v34 = vadd.f32 %v2105_v31, %v2017_v13  ;;  %v2194_v3 = vpop.f32.mrf.mxu3 }
 0x2ce   :  { %2415 = vst [vmem:[%s4956_s3 + $0xe0] sm:$0xff] %v2383_v29  ;;  %v2019_v27 = vpop.f32.mrf.mxu1 }
 0x2cf   :  { %v2195_v48 = vadd.f32 %v2194_v3, %v2106_v34  ;;  %v2020_v6 = vadd.f32 %v2019_v27, %v4635_v32 }
 0x2d0   :  { %v2286_v55 = vpop.f32.mrf.mxu0 }
 0x2d1   :  { %v2284_v46 = vadd.f32 %v2283_v37, %v2195_v48 }
 0x2d3   :  { %vm2320_vm13 = vcmp.ge.f32.partialorder %v2284_v46, 0.0  ;;  %v2352_v12 = vmul.f32 0.01, %v2284_v46 }
 0x2d4   :  { %v2108_v42 = vpop.f32.mrf.mxu2 }
 0x2d5   :  { %v2384_v49 = vsel %vm2320_vm13, %v2284_v46, %v2352_v12  ;;  %v2109_v43 = vadd.f32 %v2108_v42, %v2020_v6  ;;  %v2197_v14 = vpop.f32.mrf.mxu3 }
 0x2d6   :  { %2416 = vst [vmem:[%s4956_s3 + $0xe8] sm:$0xff] %v2384_v49  ;;  %v2021_v57 = vpop.f32.mrf.mxu1 }
 0x2d7   :  { %v2198_v20 = vadd.f32 %v2197_v14, %v2109_v43  ;;  %v2022_v1 = vadd.f32 %v2021_v57, %v4655_v23 }
 0x2d8   :  { %v2288_v54 = vpop.f32.mrf.mxu0 }
 0x2d9   :  { %v2287_v28 = vadd.f32 %v2286_v55, %v2198_v20 }
 0x2db   :  { %vm2321_vm14 = vcmp.ge.f32.partialorder %v2287_v28, 0.0  ;;  %v2353_v51 = vmul.f32 0.01, %v2287_v28 }
 0x2dc   :  { %v2110_v36 = vpop.f32.mrf.mxu2 }
 0x2dd   :  { %v2385_v44 = vsel %vm2321_vm14, %v2287_v28, %v2353_v51  ;;  %v2111_v52 = vadd.f32 %v2110_v36, %v2022_v1  ;;  %v2199_v32 = vpop.f32.mrf.mxu3 }
 0x2de   :  { %2417 = vst [vmem:[%s4956_s3 + $0xf0] sm:$0xff] %v2385_v44 }
 0x2df   :  { %v2200_v53 = vadd.f32 %v2199_v32, %v2111_v52 }
 0x2e1   :  { %v2289_v47 = vadd.f32 %v2288_v54, %v2200_v53 }
 0x2e3   :  { %vm2322_vm15 = vcmp.ge.f32.partialorder %v2289_v47, 0.0  ;;  %v2354_v4 = vmul.f32 0.01, %v2289_v47 }
 0x2e5   :  { %v2386_v61 = vsel %vm2322_vm15, %v2289_v47, %v2354_v4 }
 0x2e6   :  { %2418 = vst [vmem:[%s4956_s3 + $0xf8] sm:$0xff] %v2386_v61 }

// kernel: aesfa_forward.26
= control target key start
LH: loop header
LB: loop body
LE: loop exit
PB: predicated region body
PF: predicated region fallthrough
CT: control target
= control target key end

     0   :  { %s2805_s1 = inlined_call_operand.vmem [shape: bf16[640,128], index: 1, kind: input, shape index: {}]   ;;  %s2806_s2 = inlined_call_operand.vmem [shape: f32[1,128], index: 2, kind: input, shape index: {}]   ;;  %s2807_s0 = inlined_call_operand.vmem [shape: bf16[256,640], index: 0, kind: input, shape index: {}]   ;;  %s2808_s3 = inlined_call_operand.vmem [shape: f32[256,128], index: 3, kind: output, shape index: {}]  }
   0x1   :  { %v1898_v0 = vld [vmem:[%s2805_s1 + $0x38] sm:$0xff]  ;;  %v1897_v1 = vld [vmem:[%s2805_s1 + $0x30] sm:$0xff]  ;;  %v1896_v2 = vld [vmem:[%s2805_s1 + $0x28] sm:$0xff] }
   0x2   :  { %1931 = vmatpush.bf16.msra.mxu1 %v1898_v0  ;;  %1932 = vmatpush.bf16.msra.mxu2 %v1898_v0  ;;  %v1895_v3 = vld [vmem:[%s2805_s1 + $0x20] sm:$0xff]  ;;  %v1894_v4 = vld [vmem:[%s2805_s1 + $0x18] sm:$0xff]  ;;  %v1893_v5 = vld [vmem:[%s2805_s1 + $0x10] sm:$0xff] }
   0x3   :  { %1933 = vmatpush.bf16.msra.mxu3 %v1898_v0  ;;  %850 = vmatpush.bf16.msra.mxu0 %v1898_v0  ;;  %v1892_v6 = vld [vmem:[%s2805_s1 + $0x8] sm:$0xff]  ;;  %v1891_v7 = vld [vmem:[%s2805_s1] sm:$0xff]  ;;  %v1833_v9 = vld [vmem:[%s2807_s0 + $0xb0] sm:$0xf0] }
   0x4   :  { %v1413_v8 = vld [vmem:[%s2807_s0 + $0xa0] sm:$0xf]  ;;  %v1853_v11 = vld [vmem:[%s2807_s0 + $0x150] sm:$0xf0]  ;;  %v1914_v16 = vld [vmem:[%s2805_s1 + $0xb8] sm:$0xff] }
   0x5   :  { %v1493_v10 = vld [vmem:[%s2807_s0 + $0x140] sm:$0xf]  ;;  %v1873_v13 = vld [vmem:[%s2807_s0 + $0x1f0] sm:$0xf0]  ;;  %v1922_v17 = vld [vmem:[%s2805_s1 + $0xf8] sm:$0xff]  ;;  %v1414_v18 = vor.u32 %v1833_v9, %v1413_v8 }
   0x6   :  { %1934 = vmatpush.bf16.msra.mxu1 %v1897_v1  ;;  %1935 = vmatpush.bf16.msra.mxu2 %v1897_v1  ;;  %v1573_v12 = vld [vmem:[%s2807_s0 + $0x1e0] sm:$0xf]  ;;  %v1813_v15 = vld [vmem:[%s2807_s0 + $0x10] sm:$0xf0]  ;;  %v1494_v19 = vor.u32 %v1853_v11, %v1493_v10  ;;  %v1906_v22 = vld [vmem:[%s2805_s1 + $0x78] sm:$0xff] }
   0x7   :  { %1936 = vmatpush.bf16.msra.mxu3 %v1897_v1  ;;  %851 = vmatpush.bf16.msra.mxu0 %v1897_v1  ;;  %v1333_v14 = vld [vmem:[%s2807_s0] sm:$0xf]  ;;  %v1574_v20 = vor.u32 %v1873_v13, %v1573_v12  ;;  %v1930_v23 = vld [vmem:[%s2805_s1 + $0x138] sm:$0xff]  ;;  %v1913_v24 = vld [vmem:[%s2805_s1 + $0xb0] sm:$0xff] }
   0x8   :  { %v1334_v21 = vor.u32 %v1813_v15, %v1333_v14  ;;  %v1921_v25 = vld [vmem:[%s2805_s1 + $0xf0] sm:$0xff]  ;;  %v1912_v28 = vld [vmem:[%s2805_s1 + $0xa8] sm:$0xff]  ;;  %v1911_v33 = vld [vmem:[%s2805_s1 + $0xa0] sm:$0xff] }
   0x9   :  { %v1905_v26 = vld [vmem:[%s2805_s1 + $0x70] sm:$0xff]  ;;  %v1920_v29 = vld [vmem:[%s2805_s1 + $0xe8] sm:$0xff]  ;;  %v1919_v34 = vld [vmem:[%s2805_s1 + $0xe0] sm:$0xff] }
   0xa   :  { %1937 = vmatpush.bf16.msra.mxu1 %v1896_v2  ;;  %1938 = vmatpush.bf16.msra.mxu2 %v1896_v2  ;;  %v1929_v27 = vld [vmem:[%s2805_s1 + $0x130] sm:$0xff]  ;;  %v1904_v30 = vld [vmem:[%s2805_s1 + $0x68] sm:$0xff]  ;;  %v1838_v35 = vld [vmem:[%s2807_s0 + $0xd8] sm:$0xf0] }
   0xb   :  { %1939 = vmatpush.bf16.msra.mxu3 %v1896_v2  ;;  %852 = vmatpush.bf16.msra.mxu0 %v1896_v2  ;;  %v1928_v31 = vld [vmem:[%s2805_s1 + $0x128] sm:$0xff]  ;;  %v1858_v37 = vld [vmem:[%s2807_s0 + $0x178] sm:$0xf0]  ;;  %v1903_v42 = vld [vmem:[%s2805_s1 + $0x60] sm:$0xff] }
   0xc   :  { %v1433_v32 = vld [vmem:[%s2807_s0 + $0xc8] sm:$0xf]  ;;  %v1878_v39 = vld [vmem:[%s2807_s0 + $0x218] sm:$0xf0]  ;;  %v1927_v43 = vld [vmem:[%s2805_s1 + $0x120] sm:$0xff] }
   0xd   :  { %v1513_v36 = vld [vmem:[%s2807_s0 + $0x168] sm:$0xf]  ;;  %v1818_v41 = vld [vmem:[%s2807_s0 + $0x38] sm:$0xf0]  ;;  %v1434_v46 = vor.u32 %v1838_v35, %v1433_v32  ;;  %v1909_v52 = vld [vmem:[%s2805_s1 + $0x90] sm:$0xff] }
   0xe   :  { %1940 = vmatpush.bf16.msra.mxu1 %v1895_v3  ;;  %1941 = vmatpush.bf16.msra.mxu2 %v1895_v3  ;;  %v1593_v38 = vld [vmem:[%s2807_s0 + $0x208] sm:$0xf]  ;;  %v1910_v44 = vld [vmem:[%s2805_s1 + $0x98] sm:$0xff]  ;;  %v1514_v47 = vor.u32 %v1858_v37, %v1513_v36  ;;  %v1917_v53 = vld [vmem:[%s2805_s1 + $0xd0] sm:$0xff] }
   0xf   :  { %1942 = vmatpush.bf16.msra.mxu3 %v1895_v3  ;;  %853 = vmatpush.bf16.msra.mxu0 %v1895_v3  ;;  %v1353_v40 = vld [vmem:[%s2807_s0 + $0x28] sm:$0xf]  ;;  %v1918_v45 = vld [vmem:[%s2805_s1 + $0xd8] sm:$0xff]  ;;  %v1594_v48 = vor.u32 %v1878_v39, %v1593_v38  ;;  %v1901_v54 = vld [vmem:[%s2805_s1 + $0x50] sm:$0xff] }
  0x10   :  { %v1354_v49 = vor.u32 %v1818_v41, %v1353_v40  ;;  %v1902_v50 = vld [vmem:[%s2805_s1 + $0x58] sm:$0xff]  ;;  %v1925_v55 = vld [vmem:[%s2805_s1 + $0x110] sm:$0xff]  ;;  %v1908_v56 = vld [vmem:[%s2805_s1 + $0x88] sm:$0xff] }
  0x11   :  { %v1926_v51 = vld [vmem:[%s2805_s1 + $0x118] sm:$0xff]  ;;  %v1916_v57 = vld [vmem:[%s2805_s1 + $0xc8] sm:$0xff]  ;;  %v1453_v60 = vld [vmem:[%s2807_s0 + $0xf0] sm:$0xf] }
  0x12   :  { %1943 = vmatpush.bf16.msra.mxu1 %v1894_v4  ;;  %1944 = vmatpush.bf16.msra.mxu2 %v1894_v4  ;;  %v1900_v58 = vld [vmem:[%s2805_s1 + $0x48] sm:$0xff]  ;;  %v1907_v61 = vld [vmem:[%s2805_s1 + $0x80] sm:$0xff]  ;;  %v1533_v0 = vld [vmem:[%s2807_s0 + $0x190] sm:$0xf] }
  0x13   :  { %1945 = vmatpush.bf16.msra.mxu3 %v1894_v4  ;;  %854 = vmatpush.bf16.msra.mxu0 %v1894_v4  ;;  %v1924_v59 = vld [vmem:[%s2805_s1 + $0x108] sm:$0xff]  ;;  %v1915_v62 = vld [vmem:[%s2805_s1 + $0xc0] sm:$0xff]  ;;  %v1613_v2 = vld [vmem:[%s2807_s0 + $0x230] sm:$0xf] }
  0x14   :  { %v1843_v63 = vld [vmem:[%s2807_s0 + $0x100] sm:$0xf0]  ;;  %v1373_v4 = vld [vmem:[%s2807_s0 + $0x50] sm:$0xf]  ;;  %v1473_v12 = vld [vmem:[%s2807_s0 + $0x118] sm:$0xf] }
  0x15   :  { %v1863_v1 = vld [vmem:[%s2807_s0 + $0x1a0] sm:$0xf0]  ;;  %v1454_v8 = vor.u32 %v1843_v63, %v1453_v60  ;;  %v1848_v13 = vld [vmem:[%s2807_s0 + $0x128] sm:$0xf0]  ;;  %v1553_v14 = vld [vmem:[%s2807_s0 + $0x1b8] sm:$0xf] }
  0x16   :  { %1946 = vmatpush.bf16.msra.mxu1 %v1893_v5  ;;  %1947 = vmatpush.bf16.msra.mxu2 %v1893_v5  ;;  %v1883_v3 = vld [vmem:[%s2807_s0 + $0x240] sm:$0xf0]  ;;  %v1534_v9 = vor.u32 %v1863_v1, %v1533_v0  ;;  %v1868_v15 = vld [vmem:[%s2807_s0 + $0x1c8] sm:$0xf0]  ;;  %v1355_v37 = vld [vmem:[%s2807_s0 + $0x3c] sm:$0xf0] }
  0x17   :  { %1948 = vmatpush.bf16.msra.mxu3 %v1893_v5  ;;  %855 = vmatpush.bf16.msra.mxu0 %v1893_v5  ;;  %v1823_v5 = vld [vmem:[%s2807_s0 + $0x60] sm:$0xf0]  ;;  %v1614_v10 = vor.u32 %v1883_v3, %v1613_v2  ;;  %v1816_v36 = vld [vmem:[%s2807_s0 + $0x2c] sm:$0xf]  ;;  %v1361_v38 = vld [vmem:[%s2807_s0 + $0x30] sm:$0xf] }
  0x18   :  { %v1374_v11 = vor.u32 %v1823_v5, %v1373_v4  ;;  %v1819_v39 = vld [vmem:[%s2807_s0 + $0x40] sm:$0xf0]  ;;  %v1817_v40 = vld [vmem:[%s2807_s0 + $0x34] sm:$0xf]  ;;  %v1363_v41 = vld [vmem:[%s2807_s0 + $0x44] sm:$0xf0] }
  0x19   :  { %v1826_v60 = vld [vmem:[%s2807_s0 + $0x7c] sm:$0xf]  ;;  %v1829_v63 = vld [vmem:[%s2807_s0 + $0x90] sm:$0xf0]  ;;  %v1827_v0 = vld [vmem:[%s2807_s0 + $0x84] sm:$0xf] }
  0x1a   :  { %1949 = vmatpush.bf16.msra.mxu1 %v1892_v6  ;;  %1950 = vmatpush.bf16.msra.mxu2 %v1892_v6  ;;  %v1403_v1 = vld [vmem:[%s2807_s0 + $0x94] sm:$0xf0]  ;;  %v1409_v2 = vld [vmem:[%s2807_s0 + $0x88] sm:$0xf]  ;;  %v1830_v3 = vld [vmem:[%s2807_s0 + $0x98] sm:$0xf0] }
  0x1b   :  { %1951 = vmatpush.bf16.msra.mxu3 %v1892_v6  ;;  %856 = vmatpush.bf16.msra.mxu0 %v1892_v6  ;;  %v1899_v6 = vld [vmem:[%s2805_s1 + $0x40] sm:$0xff] }
  0x1e   :  { %1952 = vmatpush.bf16.msra.mxu1 %v1891_v7  ;;  %1953 = vmatpush.bf16.msra.mxu2 %v1891_v7 }
  0x1f   :  { %1954 = vmatpush.bf16.msra.mxu3 %v1891_v7  ;;  %857 = vmatpush.bf16.msra.mxu0 %v1891_v7  ;;  %v1923_v7 = vld [vmem:[%s2805_s1 + $0x100] sm:$0xff] }
  0x21   :  { %878 = vmatmul.bf16.vlgmr.msra.gmra.mxu1 %v1414_v18  ;;  %898 = vmatmul.bf16.vlgmr.msra.gmra.mxu2 %v1494_v19  ;;  %v1393_v18 = vld [vmem:[%s2807_s0 + $0x78] sm:$0xf]  ;;  %v1828_v19 = vld [vmem:[%s2807_s0 + $0x88] sm:$0xf0] }
  0x22   :  { %1028 = vmatpush.bf16.msrb.mxu2 %v1914_v16  ;;  %918 = vmatmul.bf16.vlgmr.msra.gmra.mxu3 %v1574_v20  ;;  %v1633_v16 = vld [vmem:[%s2807_s0 + $0x258] sm:$0xf]  ;;  %v1474_v20 = vor.u32 %v1848_v13, %v1473_v12  ;;  %v1834_v12 = vld [vmem:[%s2807_s0 + $0xb8] sm:$0xf0]  ;;  %v1832_v13 = vld [vmem:[%s2807_s0 + $0xac] sm:$0xf] }
  0x23   :  { %1117 = vmatpush.bf16.msrb.mxu3 %v1922_v17  ;;  %858 = vmatmul.bf16.vlgmr.msra.gmra.mxu0 %v1334_v21  ;;  %v1888_v17 = vld [vmem:[%s2807_s0 + $0x268] sm:$0xf0]  ;;  %v1554_v21 = vor.u32 %v1868_v15, %v1553_v14  ;;  %v1423_v14 = vld [vmem:[%s2807_s0 + $0xbc] sm:$0xf0]  ;;  %v1429_v15 = vld [vmem:[%s2807_s0 + $0xb0] sm:$0xf] }
  0x24   :  { %939 = vmatpush.bf16.msrb.mxu1 %v1906_v22  ;;  %1206 = vmatpush.bf16.msrb.mxu0 %v1930_v23  ;;  %v1634_v22 = vor.u32 %v1888_v17, %v1633_v16  ;;  %v1394_v23 = vor.u32 %v1828_v19, %v1393_v18  ;;  %v1835_v16 = vld [vmem:[%s2807_s0 + $0xc0] sm:$0xf0] }
  0x26   :  { %1029 = vmatpush.bf16.msrb.mxu2 %v1913_v24  ;;  %v1811_v24 = vld [vmem:[%s2807_s0 + $0x4] sm:$0xf] }
  0x27   :  { %1118 = vmatpush.bf16.msrb.mxu3 %v1921_v25  ;;  %v1335_v25 = vld [vmem:[%s2807_s0 + $0x14] sm:$0xf0] }
  0x28   :  { %940 = vmatpush.bf16.msrb.mxu1 %v1905_v26  ;;  %1207 = vmatpush.bf16.msrb.mxu0 %v1929_v27  ;;  %v1341_v26 = vld [vmem:[%s2807_s0 + $0x8] sm:$0xf]  ;;  %v1814_v27 = vld [vmem:[%s2807_s0 + $0x18] sm:$0xf0]  ;;  %v1338_v32 = vor.u32 %v1811_v24, %v1335_v25 }
  0x2a   :  { %1030 = vmatpush.bf16.msrb.mxu2 %v1912_v28  ;;  %v1812_v28 = vld [vmem:[%s2807_s0 + $0xc] sm:$0xf] }
  0x2b   :  { %1119 = vmatpush.bf16.msrb.mxu3 %v1920_v29  ;;  %v1343_v29 = vld [vmem:[%s2807_s0 + $0x1c] sm:$0xf0] }
  0x2c   :  { %941 = vmatpush.bf16.msrb.mxu1 %v1904_v30  ;;  %1208 = vmatpush.bf16.msrb.mxu0 %v1928_v31  ;;  %v1349_v30 = vld [vmem:[%s2807_s0 + $0x10] sm:$0xf]  ;;  %v1815_v31 = vld [vmem:[%s2807_s0 + $0x20] sm:$0xf0] }
  0x2d   :  { %v1350_v35 = vor.u32 %v1815_v31, %v1349_v30  ;;  %v1836_v31 = vld [vmem:[%s2807_s0 + $0xcc] sm:$0xf] }
  0x2e   :  { %1031 = vmatpush.bf16.msrb.mxu2 %v1911_v33  ;;  %v1342_v33 = vor.u32 %v1814_v27, %v1341_v26 }
  0x2f   :  { %1120 = vmatpush.bf16.msrb.mxu3 %v1919_v34  ;;  %v1346_v34 = vor.u32 %v1812_v28, %v1343_v29 }
  0x30   :  { %942 = vmatpush.bf16.msrb.mxu1 %v1903_v42  ;;  %1209 = vmatpush.bf16.msrb.mxu0 %v1927_v43  ;;  %v1369_v42 = vld [vmem:[%s2807_s0 + $0x38] sm:$0xf]  ;;  %v1820_v43 = vld [vmem:[%s2807_s0 + $0x48] sm:$0xf0] }
  0x31   :  { %883 = vmatmul.bf16.gmra.mxu1 %v1434_v46  ;;  %903 = vmatmul.bf16.gmra.mxu2 %v1514_v47  ;;  %v1366_v46 = vor.u32 %v1817_v40, %v1363_v41  ;;  %v1370_v47 = vor.u32 %v1820_v43, %v1369_v42 }
  0x32   :  { %1032 = vmatpush.bf16.msrb.mxu2 %v1910_v44  ;;  %923 = vmatmul.bf16.gmra.mxu3 %v1594_v48  ;;  %v1358_v44 = vor.u32 %v1816_v36, %v1355_v37  ;;  %v1821_v48 = vld [vmem:[%s2807_s0 + $0x54] sm:$0xf]  ;;  %v1443_v36 = vld [vmem:[%s2807_s0 + $0xe4] sm:$0xf0]  ;;  %v1449_v37 = vld [vmem:[%s2807_s0 + $0xd8] sm:$0xf] }
  0x33   :  { %1121 = vmatpush.bf16.msrb.mxu3 %v1918_v45  ;;  %863 = vmatmul.bf16.gmra.mxu0 %v1354_v49  ;;  %v1362_v45 = vor.u32 %v1819_v39, %v1361_v38  ;;  %v1375_v49 = vld [vmem:[%s2807_s0 + $0x64] sm:$0xf0]  ;;  %v1840_v38 = vld [vmem:[%s2807_s0 + $0xe8] sm:$0xf0] }
  0x34   :  { %943 = vmatpush.bf16.msrb.mxu1 %v1902_v50  ;;  %1210 = vmatpush.bf16.msrb.mxu0 %v1926_v51  ;;  %v1381_v50 = vld [vmem:[%s2807_s0 + $0x58] sm:$0xf]  ;;  %v1824_v51 = vld [vmem:[%s2807_s0 + $0x68] sm:$0xf0] }
  0x36   :  { %1033 = vmatpush.bf16.msrb.mxu2 %v1909_v52  ;;  %v1822_v52 = vld [vmem:[%s2807_s0 + $0x5c] sm:$0xf] }
  0x37   :  { %1122 = vmatpush.bf16.msrb.mxu3 %v1917_v53  ;;  %v1383_v53 = vld [vmem:[%s2807_s0 + $0x6c] sm:$0xf0] }
  0x38   :  { %944 = vmatpush.bf16.msrb.mxu1 %v1901_v54  ;;  %1211 = vmatpush.bf16.msrb.mxu0 %v1925_v55  ;;  %v1389_v54 = vld [vmem:[%s2807_s0 + $0x60] sm:$0xf]  ;;  %v1825_v55 = vld [vmem:[%s2807_s0 + $0x70] sm:$0xf0] }
  0x3a   :  { %1034 = vmatpush.bf16.msrb.mxu2 %v1908_v56  ;;  %v1378_v56 = vor.u32 %v1821_v48, %v1375_v49 }
  0x3b   :  { %1123 = vmatpush.bf16.msrb.mxu3 %v1916_v57  ;;  %v1382_v57 = vor.u32 %v1824_v51, %v1381_v50 }
  0x3c   :  { %945 = vmatpush.bf16.msrb.mxu1 %v1900_v58  ;;  %1212 = vmatpush.bf16.msrb.mxu0 %v1924_v59  ;;  %v1386_v58 = vor.u32 %v1822_v52, %v1383_v53  ;;  %v1390_v59 = vor.u32 %v1825_v55, %v1389_v54 }
  0x3e   :  { %1035 = vmatpush.bf16.msrb.mxu2 %v1907_v61  ;;  %v1395_v61 = vld [vmem:[%s2807_s0 + $0x8c] sm:$0xf0] }
  0x3f   :  { %1124 = vmatpush.bf16.msrb.mxu3 %v1915_v62  ;;  %v1401_v62 = vld [vmem:[%s2807_s0 + $0x80] sm:$0xf]  ;;  %v1398_v4 = vor.u32 %v1826_v60, %v1395_v61  ;;  %v1844_v60 = vld [vmem:[%s2807_s0 + $0x108] sm:$0xf0]  ;;  %v1842_v61 = vld [vmem:[%s2807_s0 + $0xfc] sm:$0xf] }
  0x40   :  { %946 = vmatpush.bf16.msrb.mxu1 %v1899_v6  ;;  %1213 = vmatpush.bf16.msrb.mxu0 %v1923_v7  ;;  %v1402_v5 = vor.u32 %v1829_v63, %v1401_v62  ;;  %v1406_v6 = vor.u32 %v1827_v0, %v1403_v1  ;;  %v1410_v7 = vor.u32 %v1830_v3, %v1409_v2  ;;  %v1463_v62 = vld [vmem:[%s2807_s0 + $0x10c] sm:$0xf0]  ;;  %v1469_v63 = vld [vmem:[%s2807_s0 + $0x100] sm:$0xf]  ;;  %v1845_v0 = vld [vmem:[%s2807_s0 + $0x110] sm:$0xf0] }
  0x41   :  { %888 = vmatmul.bf16.gmra.mxu1 %v1454_v8  ;;  %908 = vmatmul.bf16.gmra.mxu2 %v1534_v9  ;;  %v2291_v8 = vld [vmem:[%s2806_s2] ss:$0 sm:$0xff]  ;;  %v1831_v9 = vld [vmem:[%s2807_s0 + $0xa4] sm:$0xf] }
  0x42   :  { %928 = vmatmul.bf16.gmra.mxu3 %v1614_v10  ;;  %v1415_v10 = vld [vmem:[%s2807_s0 + $0xb4] sm:$0xf0] }
  0x43   :  { %868 = vmatmul.bf16.gmra.mxu0 %v1374_v11  ;;  %v1421_v11 = vld [vmem:[%s2807_s0 + $0xa8] sm:$0xf]  ;;  %v1418_v17 = vor.u32 %v1831_v9, %v1415_v10  ;;  %v1466_v9 = vor.u32 %v1842_v61, %v1463_v62  ;;  %v1470_v10 = vor.u32 %v1845_v0, %v1469_v63  ;;  %v1495_v61 = vld [vmem:[%s2807_s0 + $0x154] sm:$0xf0]  ;;  %v1854_v63 = vld [vmem:[%s2807_s0 + $0x158] sm:$0xf0] }
  0x44   :  { %v1422_v18 = vor.u32 %v1834_v12, %v1421_v11  ;;  %v1501_v62 = vld [vmem:[%s2807_s0 + $0x148] sm:$0xf]  ;;  %v1852_v0 = vld [vmem:[%s2807_s0 + $0x14c] sm:$0xf] }
  0x51   :  { %893 = vmatmul.bf16.gmra.mxu1 %v1474_v20  ;;  %913 = vmatmul.bf16.gmra.mxu2 %v1554_v21  ;;  %v1426_v20 = vor.u32 %v1832_v13, %v1423_v14  ;;  %v1430_v21 = vor.u32 %v1835_v16, %v1429_v15 }
  0x52   :  { %933 = vmatmul.bf16.gmra.mxu3 %v1634_v22 }
  0x53   :  { %873 = vmatmul.bf16.gmra.mxu0 %v1394_v23 }
  0x61   :  { %947 = vmatmul.bf16.vlgmr.msrb.gmra.mxu1 %v1338_v32  ;;  %1036 = vmatmul.bf16.vlgmr.msrb.gmra.mxu2 %v1342_v33  ;;  %v1435_v32 = vld [vmem:[%s2807_s0 + $0xdc] sm:$0xf0]  ;;  %v1441_v33 = vld [vmem:[%s2807_s0 + $0xd0] sm:$0xf] }
  0x62   :  { %1125 = vmatmul.bf16.vlgmr.msrb.gmra.mxu3 %v1346_v34  ;;  %v1839_v34 = vld [vmem:[%s2807_s0 + $0xe0] sm:$0xf0]  ;;  %v1438_v42 = vor.u32 %v1836_v31, %v1435_v32  ;;  %v1483_v31 = vld [vmem:[%s2807_s0 + $0x134] sm:$0xf0]  ;;  %v1489_v32 = vld [vmem:[%s2807_s0 + $0x128] sm:$0xf] }
  0x63   :  { %1214 = vmatmul.bf16.vlgmr.msrb.gmra.mxu0 %v1350_v35  ;;  %v1837_v35 = vld [vmem:[%s2807_s0 + $0xd4] sm:$0xf]  ;;  %v1442_v43 = vor.u32 %v1839_v34, %v1441_v33  ;;  %v1850_v33 = vld [vmem:[%s2807_s0 + $0x138] sm:$0xf0] }
  0x71   :  { %952 = vmatmul.bf16.gmra.mxu1 %v1358_v44  ;;  %1041 = vmatmul.bf16.gmra.mxu2 %v1362_v45 }
  0x72   :  { %1130 = vmatmul.bf16.gmra.mxu3 %v1366_v46  ;;  %v1446_v46 = vor.u32 %v1837_v35, %v1443_v36 }
  0x73   :  { %1219 = vmatmul.bf16.gmra.mxu0 %v1370_v47  ;;  %v1450_v47 = vor.u32 %v1840_v38, %v1449_v37 }
  0x81   :  { %957 = vmatmul.bf16.gmra.mxu1 %v1378_v56  ;;  %1046 = vmatmul.bf16.gmra.mxu2 %v1382_v57  ;;  %v1841_v57 = vld [vmem:[%s2807_s0 + $0xf4] sm:$0xf] }
  0x82   :  { %1135 = vmatmul.bf16.gmra.mxu3 %v1386_v58  ;;  %v1455_v58 = vld [vmem:[%s2807_s0 + $0x104] sm:$0xf0] }
  0x83   :  { %1224 = vmatmul.bf16.gmra.mxu0 %v1390_v59  ;;  %v1461_v59 = vld [vmem:[%s2807_s0 + $0xf8] sm:$0xf] }
  0x91   :  { %962 = vmatmul.bf16.gmra.mxu1 %v1398_v4  ;;  %1051 = vmatmul.bf16.gmra.mxu2 %v1402_v5  ;;  %v1458_v4 = vor.u32 %v1841_v57, %v1455_v58  ;;  %v1462_v5 = vor.u32 %v1844_v60, %v1461_v59  ;;  %v1851_v60 = vld [vmem:[%s2807_s0 + $0x144] sm:$0xf] }
  0x92   :  { %1140 = vmatmul.bf16.gmra.mxu3 %v1406_v6 }
  0x93   :  { %1229 = vmatmul.bf16.gmra.mxu0 %v1410_v7 }
  0x9e   :  { %v879_v19 = vpop.f32.mrf.mxu1 }
  0x9f   :  { %v2318_v22 = vadd.f32 %v2291_v8, %v879_v19 }
  0xa0   :  { %v2320_v23 = vpop.f32.mrf.mxu0 }
  0xa1   :  { %967 = vmatmul.bf16.gmra.mxu1 %v1418_v17  ;;  %1056 = vmatmul.bf16.gmra.mxu2 %v1422_v18 }
  0xa2   :  { %1145 = vmatmul.bf16.gmra.mxu3 %v1426_v20  ;;  %v1846_v20 = vld [vmem:[%s2807_s0 + $0x11c] sm:$0xf] }
  0xa3   :  { %1234 = vmatmul.bf16.gmra.mxu0 %v1430_v21  ;;  %v1475_v21 = vld [vmem:[%s2807_s0 + $0x12c] sm:$0xf0] }
  0xa4   :  { %v899_v24 = vpop.f32.mrf.mxu2  ;;  %v1478_v37 = vor.u32 %v1846_v20, %v1475_v21 }
  0xa5   :  { %v2323_v25 = vadd.f32 %v2291_v8, %v899_v24  ;;  %v919_v26 = vpop.f32.mrf.mxu3  ;;  %v1481_v24 = vld [vmem:[%s2807_s0 + $0x120] sm:$0xf] }
  0xa6   :  { %v2326_v27 = vadd.f32 %v2291_v8, %v919_v26  ;;  %v881_v28 = vpop.f32.mrf.mxu1  ;;  %v1849_v26 = vld [vmem:[%s2807_s0 + $0x130] sm:$0xf0] }
  0xa7   :  { %v2329_v29 = vadd.f32 %v2291_v8, %v881_v28  ;;  %v1847_v28 = vld [vmem:[%s2807_s0 + $0x124] sm:$0xf]  ;;  %v1482_v38 = vor.u32 %v1849_v26, %v1481_v24  ;;  %v860_v26 = vadd.f32 %v2291_v8, %v2320_v23  ;;  %v1515_v23 = vld [vmem:[%s2807_s0 + $0x17c] sm:$0xf0] }
  0xa8   :  { %v2331_v30 = vpop.f32.mrf.mxu0 }
  0xac   :  { %v901_v39 = vpop.f32.mrf.mxu2 }
  0xad   :  { %v2358_v40 = vadd.f32 %v2291_v8, %v901_v39  ;;  %v921_v41 = vpop.f32.mrf.mxu3 }
  0xae   :  { %v2361_v44 = vadd.f32 %v2291_v8, %v921_v41  ;;  %v884_v45 = vpop.f32.mrf.mxu1 }
  0xaf   :  { %v2364_v48 = vadd.f32 %v2291_v8, %v884_v45 }
  0xb0   :  { %v2366_v49 = vpop.f32.mrf.mxu0 }
  0xb1   :  { %972 = vmatmul.bf16.gmra.mxu1 %v1438_v42  ;;  %1061 = vmatmul.bf16.gmra.mxu2 %v1442_v43  ;;  %v1486_v42 = vor.u32 %v1847_v28, %v1483_v31  ;;  %v1490_v43 = vor.u32 %v1850_v33, %v1489_v32 }
  0xb2   :  { %1150 = vmatmul.bf16.gmra.mxu3 %v1446_v46 }
  0xb3   :  { %1239 = vmatmul.bf16.gmra.mxu0 %v1450_v47 }
  0xb4   :  { %v904_v50 = vpop.f32.mrf.mxu2 }
  0xb5   :  { %v2369_v51 = vadd.f32 %v2291_v8, %v904_v50  ;;  %v924_v52 = vpop.f32.mrf.mxu3 }
  0xb6   :  { %v2372_v53 = vadd.f32 %v2291_v8, %v924_v52  ;;  %v886_v54 = vpop.f32.mrf.mxu1 }
  0xb7   :  { %v2375_v55 = vadd.f32 %v2291_v8, %v886_v54 }
  0xb8   :  { %v2377_v56 = vpop.f32.mrf.mxu0 }
  0xbc   :  { %v906_v1 = vpop.f32.mrf.mxu2 }
  0xbd   :  { %v2404_v2 = vadd.f32 %v2291_v8, %v906_v1  ;;  %v926_v3 = vpop.f32.mrf.mxu3  ;;  %v1503_v1 = vld [vmem:[%s2807_s0 + $0x15c] sm:$0xf0] }
  0xbe   :  { %v2407_v6 = vadd.f32 %v2291_v8, %v926_v3  ;;  %v889_v7 = vpop.f32.mrf.mxu1  ;;  %v1509_v3 = vld [vmem:[%s2807_s0 + $0x150] sm:$0xf]  ;;  %v1506_v20 = vor.u32 %v1852_v0, %v1503_v1 }
  0xbf   :  { %v2410_v11 = vadd.f32 %v2291_v8, %v889_v7 }
  0xc0   :  { %v2412_v12 = vpop.f32.mrf.mxu0 }
  0xc1   :  { %977 = vmatmul.bf16.gmra.mxu1 %v1458_v4  ;;  %1066 = vmatmul.bf16.gmra.mxu2 %v1462_v5  ;;  %v1855_v4 = vld [vmem:[%s2807_s0 + $0x160] sm:$0xf0] }
  0xc2   :  { %1155 = vmatmul.bf16.gmra.mxu3 %v1466_v9  ;;  %v1510_v21 = vor.u32 %v1855_v4, %v1509_v3 }
  0xc3   :  { %1244 = vmatmul.bf16.gmra.mxu0 %v1470_v10  ;;  %v1498_v10 = vor.u32 %v1851_v60, %v1495_v61  ;;  %v1529_v60 = vld [vmem:[%s2807_s0 + $0x178] sm:$0xf]  ;;  %v1860_v61 = vld [vmem:[%s2807_s0 + $0x188] sm:$0xf0] }
  0xc4   :  { %v909_v13 = vpop.f32.mrf.mxu2 }
  0xc5   :  { %v2415_v14 = vadd.f32 %v2291_v8, %v909_v13  ;;  %v929_v15 = vpop.f32.mrf.mxu3  ;;  %v1502_v13 = vor.u32 %v1854_v63, %v1501_v62 }
  0xc6   :  { %v2418_v16 = vadd.f32 %v2291_v8, %v929_v15  ;;  %v891_v17 = vpop.f32.mrf.mxu1 }
  0xc7   :  { %v2421_v18 = vadd.f32 %v2291_v8, %v891_v17 }
  0xc8   :  { %v2423_v19 = vpop.f32.mrf.mxu0 }
  0xcc   :  { %v911_v34 = vpop.f32.mrf.mxu2 }
  0xcd   :  { %v2450_v35 = vadd.f32 %v2291_v8, %v911_v34  ;;  %v931_v36 = vpop.f32.mrf.mxu3 }
  0xce   :  { %v2453_v39 = vadd.f32 %v2291_v8, %v931_v36  ;;  %v894_v41 = vpop.f32.mrf.mxu1 }
  0xcf   :  { %v2456_v45 = vadd.f32 %v2291_v8, %v894_v41 }
  0xd0   :  { %v2458_v46 = vpop.f32.mrf.mxu0 }
  0xd1   :  { %982 = vmatmul.bf16.gmra.mxu1 %v1478_v37  ;;  %1071 = vmatmul.bf16.gmra.mxu2 %v1482_v38  ;;  %v862_v38 = vadd.f32 %v2291_v8, %v2331_v30  ;;  %v1857_v30 = vld [vmem:[%s2807_s0 + $0x174] sm:$0xf] }
  0xd2   :  { %1160 = vmatmul.bf16.gmra.mxu3 %v1486_v42  ;;  %v1856_v42 = vld [vmem:[%s2807_s0 + $0x16c] sm:$0xf] }
  0xd3   :  { %1249 = vmatmul.bf16.gmra.mxu0 %v1490_v43  ;;  %v1521_v43 = vld [vmem:[%s2807_s0 + $0x170] sm:$0xf]  ;;  %v1518_v1 = vor.u32 %v1856_v42, %v1515_v23 }
  0xd4   :  { %v914_v47 = vpop.f32.mrf.mxu2  ;;  %v1543_v42 = vld [vmem:[%s2807_s0 + $0x1ac] sm:$0xf0] }
  0xd5   :  { %v2461_v50 = vadd.f32 %v2291_v8, %v914_v47  ;;  %v934_v52 = vpop.f32.mrf.mxu3  ;;  %v1859_v47 = vld [vmem:[%s2807_s0 + $0x180] sm:$0xf0] }
  0xd6   :  { %v2464_v54 = vadd.f32 %v2291_v8, %v934_v52  ;;  %v896_v57 = vpop.f32.mrf.mxu1  ;;  %v1522_v3 = vor.u32 %v1859_v47, %v1521_v43  ;;  %v1549_v43 = vld [vmem:[%s2807_s0 + $0x1a0] sm:$0xf]  ;;  %v1865_v47 = vld [vmem:[%s2807_s0 + $0x1b0] sm:$0xf0] }
  0xd7   :  { %v2467_v58 = vadd.f32 %v2291_v8, %v896_v57  ;;  %v1523_v57 = vld [vmem:[%s2807_s0 + $0x184] sm:$0xf0] }
  0xd8   :  { %v2469_v59 = vpop.f32.mrf.mxu0 }
  0xdc   :  { %v916_v5 = vpop.f32.mrf.mxu2 }
  0xdd   :  { %v2496_v7 = vadd.f32 %v2291_v8, %v916_v5  ;;  %v936_v9 = vpop.f32.mrf.mxu3  ;;  %v1526_v5 = vor.u32 %v1857_v30, %v1523_v57 }
  0xde   :  { %v2499_v15 = vadd.f32 %v2291_v8, %v936_v9  ;;  %v948_v17 = vpop.f32.mrf.mxu1  ;;  %v1530_v9 = vor.u32 %v1860_v61, %v1529_v60 }
  0xdf   :  { %v949_v28 = vadd.f32 %v948_v17, %v860_v26  ;;  %v865_v17 = vadd.f32 %v2291_v8, %v2366_v49 }
  0xe0   :  { %v1215_v24 = vpop.f32.mrf.mxu0 }
  0xe1   :  { %987 = vmatmul.bf16.gmra.mxu1 %v1498_v10  ;;  %1076 = vmatmul.bf16.gmra.mxu2 %v1502_v13 }
  0xe2   :  { %1165 = vmatmul.bf16.gmra.mxu3 %v1506_v20 }
  0xe3   :  { %1254 = vmatmul.bf16.gmra.mxu0 %v1510_v21 }
  0xe4   :  { %v1037_v31 = vpop.f32.mrf.mxu2 }
  0xe5   :  { %v1038_v32 = vadd.f32 %v1037_v31, %v949_v28  ;;  %v1126_v33 = vpop.f32.mrf.mxu3 }
  0xe6   :  { %v950_v34 = vpop.f32.mrf.mxu1 }
  0xe7   :  { %v1127_v36 = vadd.f32 %v1126_v33, %v1038_v32  ;;  %v951_v52 = vadd.f32 %v950_v34, %v862_v38  ;;  %v867_v34 = vadd.f32 %v2291_v8, %v2377_v56  ;;  %v1541_v38 = vld [vmem:[%s2807_s0 + $0x198] sm:$0xf]  ;;  %v1862_v56 = vld [vmem:[%s2807_s0 + $0x19c] sm:$0xf] }
  0xe8   :  { %v1217_v37 = vpop.f32.mrf.mxu0 }
  0xe9   :  { %v1216_v41 = vadd.f32 %v1215_v24, %v1127_v36  ;;  %v1861_v36 = vld [vmem:[%s2807_s0 + $0x194] sm:$0xf] }
  0xeb   :  { %1295 = vst [vmem:[%s2808_s3] sm:$0xff] %v1216_v41  ;;  %v1864_v41 = vld [vmem:[%s2807_s0 + $0x1a8] sm:$0xf0] }
  0xec   :  { %v1039_v62 = vpop.f32.mrf.mxu2  ;;  %v1542_v61 = vor.u32 %v1864_v41, %v1541_v38 }
  0xed   :  { %v1040_v63 = vadd.f32 %v1039_v62, %v951_v52  ;;  %v1128_v0 = vpop.f32.mrf.mxu3 }
  0xee   :  { %v953_v4 = vpop.f32.mrf.mxu1 }
  0xef   :  { %v1129_v10 = vadd.f32 %v1128_v0, %v1040_v63  ;;  %v954_v21 = vadd.f32 %v953_v4, %v865_v17  ;;  %v1546_v63 = vor.u32 %v1862_v56, %v1543_v42  ;;  %v1550_v0 = vor.u32 %v1865_v47, %v1549_v43 }
  0xf0   :  { %v1220_v13 = vpop.f32.mrf.mxu0  ;;  %v870_v4 = vadd.f32 %v2291_v8, %v2412_v12 }
  0xf1   :  { %v1218_v20 = vadd.f32 %v1217_v37, %v1129_v10  ;;  %992 = vmatmul.bf16.gmra.mxu1 %v1518_v1  ;;  %1081 = vmatmul.bf16.gmra.mxu2 %v1522_v3  ;;  %v1535_v37 = vld [vmem:[%s2807_s0 + $0x1a4] sm:$0xf0] }
  0xf2   :  { %1170 = vmatmul.bf16.gmra.mxu3 %v1526_v5  ;;  %v1538_v60 = vor.u32 %v1861_v36, %v1535_v37  ;;  %v1569_v36 = vld [vmem:[%s2807_s0 + $0x1c8] sm:$0xf]  ;;  %v1870_v37 = vld [vmem:[%s2807_s0 + $0x1d8] sm:$0xf0] }
  0xf3   :  { %1259 = vmatmul.bf16.gmra.mxu0 %v1530_v9  ;;  %1296 = vst [vmem:[%s2808_s3 + $0x8] sm:$0xff] %v1218_v20 }
  0xf4   :  { %v1042_v24 = vpop.f32.mrf.mxu2 }
  0xf5   :  { %v1043_v26 = vadd.f32 %v1042_v24, %v954_v21  ;;  %v1131_v28 = vpop.f32.mrf.mxu3 }
  0xf6   :  { %v955_v31 = vpop.f32.mrf.mxu1 }
  0xf7   :  { %v1132_v32 = vadd.f32 %v1131_v28, %v1043_v26  ;;  %v956_v23 = vadd.f32 %v955_v31, %v867_v34  ;;  %v872_v26 = vadd.f32 %v2291_v8, %v2423_v19  ;;  %v1866_v28 = vld [vmem:[%s2807_s0 + $0x1bc] sm:$0xf]  ;;  %v1555_v31 = vld [vmem:[%s2807_s0 + $0x1cc] sm:$0xf0]  ;;  %v1867_v19 = vld [vmem:[%s2807_s0 + $0x1c4] sm:$0xf] }
  0xf8   :  { %v1222_v33 = vpop.f32.mrf.mxu0  ;;  %v1563_v34 = vld [vmem:[%s2807_s0 + $0x1d4] sm:$0xf0]  ;;  %v1558_v42 = vor.u32 %v1866_v28, %v1555_v31 }
  0xf9   :  { %v1221_v49 = vadd.f32 %v1220_v13, %v1132_v32  ;;  %v1561_v32 = vld [vmem:[%s2807_s0 + $0x1c0] sm:$0xf]  ;;  %v1566_v47 = vor.u32 %v1867_v19, %v1563_v34 }
  0xfb   :  { %1297 = vst [vmem:[%s2808_s3 + $0x10] sm:$0xff] %v1221_v49 }
  0xfc   :  { %v1044_v30 = vpop.f32.mrf.mxu2 }
  0xfd   :  { %v1045_v52 = vadd.f32 %v1044_v30, %v956_v23  ;;  %v1133_v57 = vpop.f32.mrf.mxu3  ;;  %v1570_v30 = vor.u32 %v1870_v37, %v1569_v36 }
  0xfe   :  { %v958_v62 = vpop.f32.mrf.mxu1 }
  0xff   :  { %v1134_v1 = vadd.f32 %v1133_v57, %v1045_v52  ;;  %v959_v9 = vadd.f32 %v958_v62, %v870_v4 }
 0x100   :  { %v1225_v3 = vpop.f32.mrf.mxu0 }
 0x101   :  { %v1223_v5 = vadd.f32 %v1222_v33, %v1134_v1  ;;  %997 = vmatmul.bf16.gmra.mxu1 %v1538_v60  ;;  %1086 = vmatmul.bf16.gmra.mxu2 %v1542_v61  ;;  %v1869_v33 = vld [vmem:[%s2807_s0 + $0x1d0] sm:$0xf0]  ;;  %v875_v60 = vadd.f32 %v2291_v8, %v2458_v46 }
 0x102   :  { %1175 = vmatmul.bf16.gmra.mxu3 %v1546_v63  ;;  %v1562_v23 = vor.u32 %v1869_v33, %v1561_v32 }
 0x103   :  { %1264 = vmatmul.bf16.gmra.mxu0 %v1550_v0  ;;  %1298 = vst [vmem:[%s2808_s3 + $0x18] sm:$0xff] %v1223_v5 }
 0x104   :  { %v1047_v10 = vpop.f32.mrf.mxu2 }
 0x105   :  { %v1048_v13 = vadd.f32 %v1047_v10, %v959_v9  ;;  %v1136_v17 = vpop.f32.mrf.mxu3  ;;  %v877_v9 = vadd.f32 %v2291_v8, %v2469_v59  ;;  %v1871_v10 = vld [vmem:[%s2807_s0 + $0x1e4] sm:$0xf]  ;;  %v1872_v8 = vld [vmem:[%s2807_s0 + $0x1ec] sm:$0xf]  ;;  %v1583_v59 = vld [vmem:[%s2807_s0 + $0x1fc] sm:$0xf0] }
 0x106   :  { %v960_v20 = vpop.f32.mrf.mxu1  ;;  %v1586_v34 = vor.u32 %v1872_v8, %v1583_v59 }
 0x107   :  { %v1137_v21 = vadd.f32 %v1136_v17, %v1048_v13  ;;  %v961_v49 = vadd.f32 %v960_v20, %v872_v26  ;;  %v1575_v13 = vld [vmem:[%s2807_s0 + $0x1f4] sm:$0xf0]  ;;  %v1581_v17 = vld [vmem:[%s2807_s0 + $0x1e8] sm:$0xf]  ;;  %v1874_v20 = vld [vmem:[%s2807_s0 + $0x1f8] sm:$0xf0] }
 0x108   :  { %v1227_v24 = vpop.f32.mrf.mxu0  ;;  %v1875_v26 = vld [vmem:[%s2807_s0 + $0x200] sm:$0xf0]  ;;  %v1578_v32 = vor.u32 %v1871_v10, %v1575_v13  ;;  %v1582_v33 = vor.u32 %v1874_v20, %v1581_v17 }
 0x109   :  { %v1226_v12 = vadd.f32 %v1225_v3, %v1137_v21 }
 0x10b   :  { %1299 = vst [vmem:[%s2808_s3 + $0x20] sm:$0xff] %v1226_v12 }
 0x10c   :  { %v1049_v38 = vpop.f32.mrf.mxu2 }
 0x10d   :  { %v1050_v41 = vadd.f32 %v1049_v38, %v961_v49  ;;  %v1138_v56 = vpop.f32.mrf.mxu3 }
 0x10e   :  { %v963_v43 = vpop.f32.mrf.mxu1 }
 0x10f   :  { %v1139_v52 = vadd.f32 %v1138_v56, %v1050_v41  ;;  %v964_v62 = vadd.f32 %v963_v43, %v875_v60  ;;  %v1595_v60 = vld [vmem:[%s2807_s0 + $0x21c] sm:$0xf0] }
 0x110   :  { %v1230_v57 = vpop.f32.mrf.mxu0 }
 0x111   :  { %v1228_v61 = vadd.f32 %v1227_v24, %v1139_v52  ;;  %1002 = vmatmul.bf16.gmra.mxu1 %v1558_v42  ;;  %1091 = vmatmul.bf16.gmra.mxu2 %v1562_v23  ;;  %v1589_v24 = vld [vmem:[%s2807_s0 + $0x1f0] sm:$0xf] }
 0x112   :  { %1180 = vmatmul.bf16.gmra.mxu3 %v1566_v47  ;;  %v1590_v49 = vor.u32 %v1875_v26, %v1589_v24 }
 0x113   :  { %1269 = vmatmul.bf16.gmra.mxu0 %v1570_v30  ;;  %1300 = vst [vmem:[%s2808_s3 + $0x28] sm:$0xff] %v1228_v61  ;;  %v1601_v61 = vld [vmem:[%s2807_s0 + $0x210] sm:$0xf] }
 0x114   :  { %v1052_v63 = vpop.f32.mrf.mxu2 }
 0x115   :  { %v1053_v0 = vadd.f32 %v1052_v63, %v964_v62  ;;  %v1141_v1 = vpop.f32.mrf.mxu3  ;;  %v1877_v62 = vld [vmem:[%s2807_s0 + $0x214] sm:$0xf]  ;;  %v1603_v63 = vld [vmem:[%s2807_s0 + $0x224] sm:$0xf0] }
 0x116   :  { %v965_v3 = vpop.f32.mrf.mxu1  ;;  %v1606_v17 = vor.u32 %v1877_v62, %v1603_v63 }
 0x117   :  { %v1142_v4 = vadd.f32 %v1141_v1, %v1053_v0  ;;  %v966_v21 = vadd.f32 %v965_v3, %v877_v9  ;;  %v1609_v1 = vld [vmem:[%s2807_s0 + $0x218] sm:$0xf]  ;;  %v1880_v3 = vld [vmem:[%s2807_s0 + $0x228] sm:$0xf0] }
 0x118   :  { %v1232_v5 = vpop.f32.mrf.mxu0  ;;  %v1610_v20 = vor.u32 %v1880_v3, %v1609_v1 }
 0x119   :  { %v1231_v46 = vadd.f32 %v1230_v57, %v1142_v4  ;;  %v1876_v57 = vld [vmem:[%s2807_s0 + $0x20c] sm:$0xf] }
 0x11b   :  { %1301 = vst [vmem:[%s2808_s3 + $0x30] sm:$0xff] %v1231_v46  ;;  %v1598_v46 = vor.u32 %v1876_v57, %v1595_v60 }
 0x11c   :  { %v1054_v12 = vpop.f32.mrf.mxu2 }
 0x11d   :  { %v1055_v28 = vadd.f32 %v1054_v12, %v966_v21  ;;  %v1143_v31 = vpop.f32.mrf.mxu3 }
 0x11e   :  { %v968_v19 = vpop.f32.mrf.mxu1 }
 0x11f   :  { %v1144_v36 = vadd.f32 %v1143_v31, %v1055_v28  ;;  %v969_v41 = vadd.f32 %v968_v19, %v2318_v22  ;;  %v1879_v22 = vld [vmem:[%s2807_s0 + $0x220] sm:$0xf0]  ;;  %v1881_v19 = vld [vmem:[%s2807_s0 + $0x234] sm:$0xf] }
 0x120   :  { %v1235_v37 = vpop.f32.mrf.mxu0  ;;  %v1602_v10 = vor.u32 %v1879_v22, %v1601_v61 }
 0x121   :  { %v1233_v38 = vadd.f32 %v1232_v5, %v1144_v36  ;;  %1007 = vmatmul.bf16.gmra.mxu1 %v1578_v32  ;;  %1096 = vmatmul.bf16.gmra.mxu2 %v1582_v33  ;;  %v1882_v36 = vld [vmem:[%s2807_s0 + $0x23c] sm:$0xf] }
 0x122   :  { %1185 = vmatmul.bf16.gmra.mxu3 %v1586_v34  ;;  %v1615_v34 = vld [vmem:[%s2807_s0 + $0x244] sm:$0xf0] }
 0x123   :  { %1274 = vmatmul.bf16.gmra.mxu0 %v1590_v49  ;;  %1302 = vst [vmem:[%s2808_s3 + $0x38] sm:$0xff] %v1233_v38  ;;  %v1621_v49 = vld [vmem:[%s2807_s0 + $0x238] sm:$0xf] }
 0x124   :  { %v1057_v56 = vpop.f32.mrf.mxu2 }
 0x125   :  { %v1058_v42 = vadd.f32 %v1057_v56, %v969_v41  ;;  %v1146_v23 = vpop.f32.mrf.mxu3  ;;  %v1629_v41 = vld [vmem:[%s2807_s0 + $0x240] sm:$0xf]  ;;  %v1885_v56 = vld [vmem:[%s2807_s0 + $0x250] sm:$0xf0] }
 0x126   :  { %v970_v43 = vpop.f32.mrf.mxu1  ;;  %v1630_v60 = vor.u32 %v1885_v56, %v1629_v41 }
 0x127   :  { %v1147_v47 = vadd.f32 %v1146_v23, %v1058_v42  ;;  %v971_v0 = vadd.f32 %v970_v43, %v2329_v29 }
 0x128   :  { %v1237_v30 = vpop.f32.mrf.mxu0 }
 0x129   :  { %v1236_v52 = vadd.f32 %v1235_v37, %v1147_v47  ;;  %v1623_v37 = vld [vmem:[%s2807_s0 + $0x24c] sm:$0xf0]  ;;  %v1618_v47 = vor.u32 %v1881_v19, %v1615_v34 }
 0x12a   :  { %v1626_v57 = vor.u32 %v1882_v36, %v1623_v37 }
 0x12b   :  { %1303 = vst [vmem:[%s2808_s3 + $0x40] sm:$0xff] %v1236_v52 }
 0x12c   :  { %v1059_v4 = vpop.f32.mrf.mxu2 }
 0x12d   :  { %v1060_v5 = vadd.f32 %v1059_v4, %v971_v0  ;;  %v1148_v9 = vpop.f32.mrf.mxu3 }
 0x12e   :  { %v973_v13 = vpop.f32.mrf.mxu1 }
 0x12f   :  { %v1149_v8 = vadd.f32 %v1148_v9, %v1060_v5  ;;  %v974_v29 = vadd.f32 %v973_v13, %v2364_v48  ;;  %v1884_v48 = vld [vmem:[%s2807_s0 + $0x248] sm:$0xf0]  ;;  %v1641_v13 = vld [vmem:[%s2807_s0 + $0x260] sm:$0xf] }
 0x130   :  { %v1240_v59 = vpop.f32.mrf.mxu0 }
 0x131   :  { %v1238_v21 = vadd.f32 %v1237_v30, %v1149_v8  ;;  %1012 = vmatmul.bf16.gmra.mxu1 %v1598_v46  ;;  %1101 = vmatmul.bf16.gmra.mxu2 %v1602_v10  ;;  %v1622_v30 = vor.u32 %v1884_v48, %v1621_v49  ;;  %v1886_v46 = vld [vmem:[%s2807_s0 + $0x25c] sm:$0xf]  ;;  %v1635_v10 = vld [vmem:[%s2807_s0 + $0x26c] sm:$0xf0] }
 0x132   :  { %1190 = vmatmul.bf16.gmra.mxu3 %v1606_v17  ;;  %v1887_v17 = vld [vmem:[%s2807_s0 + $0x264] sm:$0xf] }
 0x133   :  { %1279 = vmatmul.bf16.gmra.mxu0 %v1610_v20  ;;  %1304 = vst [vmem:[%s2808_s3 + $0x48] sm:$0xff] %v1238_v21  ;;  %v1643_v20 = vld [vmem:[%s2807_s0 + $0x274] sm:$0xf0]  ;;  %v1890_v21 = vld [vmem:[%s2807_s0 + $0x278] sm:$0xf0] }
 0x134   :  { %v1062_v24 = vpop.f32.mrf.mxu2 }
 0x135   :  { %v1063_v26 = vadd.f32 %v1062_v24, %v974_v29  ;;  %v1151_v12 = vpop.f32.mrf.mxu3 }
 0x136   :  { %v975_v28 = vpop.f32.mrf.mxu1 }
 0x137   :  { %v1152_v31 = vadd.f32 %v1151_v12, %v1063_v26  ;;  %v976_v38 = vadd.f32 %v975_v28, %v2375_v55  ;;  %v1638_v12 = vor.u32 %v1886_v46, %v1635_v10 }
 0x138   :  { %v1242_v32 = vpop.f32.mrf.mxu0 }
 0x139   :  { %v1241_v33 = vadd.f32 %v1240_v59, %v1152_v31  ;;  %v1649_v59 = vld [vmem:[%s2807_s0 + $0x268] sm:$0xf] }
 0x13b   :  { %1305 = vst [vmem:[%s2808_s3 + $0x50] sm:$0xff] %v1241_v33  ;;  %v1650_v33 = vor.u32 %v1890_v21, %v1649_v59 }
 0x13c   :  { %v1064_v42 = vpop.f32.mrf.mxu2 }
 0x13d   :  { %v1065_v23 = vadd.f32 %v1064_v42, %v976_v38  ;;  %v1153_v43 = vpop.f32.mrf.mxu3 }
 0x13e   :  { %v978_v52 = vpop.f32.mrf.mxu1 }
 0x13f   :  { %v1154_v61 = vadd.f32 %v1153_v43, %v1065_v23  ;;  %v979_v55 = vadd.f32 %v978_v52, %v2410_v11  ;;  %v1889_v11 = vld [vmem:[%s2807_s0 + $0x270] sm:$0xf0] }
 0x140   :  { %v1245_v22 = vpop.f32.mrf.mxu0  ;;  %v1642_v28 = vor.u32 %v1889_v11, %v1641_v13 }
 0x141   :  { %v1243_v62 = vadd.f32 %v1242_v32, %v1154_v61  ;;  %1017 = vmatmul.bf16.gmra.mxu1 %v1618_v47  ;;  %1106 = vmatmul.bf16.gmra.mxu2 %v1622_v30  ;;  %v1646_v32 = vor.u32 %v1887_v17, %v1643_v20 }
 0x142   :  { %1195 = vmatmul.bf16.gmra.mxu3 %v1626_v57 }
 0x143   :  { %1284 = vmatmul.bf16.gmra.mxu0 %v1630_v60  ;;  %1306 = vst [vmem:[%s2808_s3 + $0x58] sm:$0xff] %v1243_v62 }
 0x144   :  { %v1067_v63 = vpop.f32.mrf.mxu2 }
 0x145   :  { %v1068_v0 = vadd.f32 %v1067_v63, %v979_v55  ;;  %v1156_v1 = vpop.f32.mrf.mxu3 }
 0x146   :  { %v980_v3 = vpop.f32.mrf.mxu1 }
 0x147   :  { %v1157_v4 = vadd.f32 %v1156_v1, %v1068_v0  ;;  %v981_v8 = vadd.f32 %v980_v3, %v2421_v18 }
 0x148   :  { %v1247_v5 = vpop.f32.mrf.mxu0 }
 0x149   :  { %v1246_v9 = vadd.f32 %v1245_v22, %v1157_v4 }
 0x14b   :  { %1307 = vst [vmem:[%s2808_s3 + $0x60] sm:$0xff] %v1246_v9 }
 0x14c   :  { %v1069_v29 = vpop.f32.mrf.mxu2 }
 0x14d   :  { %v1070_v24 = vadd.f32 %v1069_v29, %v981_v8  ;;  %v1158_v26 = vpop.f32.mrf.mxu3 }
 0x14e   :  { %v983_v31 = vpop.f32.mrf.mxu1 }
 0x14f   :  { %v1159_v19 = vadd.f32 %v1158_v26, %v1070_v24  ;;  %v984_v18 = vadd.f32 %v983_v31, %v2456_v45 }
 0x150   :  { %v1250_v34 = vpop.f32.mrf.mxu0 }
 0x151   :  { %v1248_v49 = vadd.f32 %v1247_v5, %v1159_v19  ;;  %1022 = vmatmul.bf16.gmra.mxu1 %v1638_v12  ;;  %1111 = vmatmul.bf16.gmra.mxu2 %v1642_v28 }
 0x152   :  { %1200 = vmatmul.bf16.gmra.mxu3 %v1646_v32 }
 0x153   :  { %1289 = vmatmul.bf16.gmra.mxu0 %v1650_v33  ;;  %1308 = vst [vmem:[%s2808_s3 + $0x68] sm:$0xff] %v1248_v49 }
 0x154   :  { %v1072_v48 = vpop.f32.mrf.mxu2 }
 0x155   :  { %v1073_v36 = vadd.f32 %v1072_v48, %v984_v18  ;;  %v1161_v37 = vpop.f32.mrf.mxu3 }
 0x156   :  { %v985_v38 = vpop.f32.mrf.mxu1 }
 0x157   :  { %v1162_v41 = vadd.f32 %v1161_v37, %v1073_v36  ;;  %v986_v23 = vadd.f32 %v985_v38, %v2467_v58 }
 0x158   :  { %v1252_v56 = vpop.f32.mrf.mxu0 }
 0x159   :  { %v1251_v42 = vadd.f32 %v1250_v34, %v1162_v41 }
 0x15b   :  { %1309 = vst [vmem:[%s2808_s3 + $0x70] sm:$0xff] %v1251_v42 }
 0x15c   :  { %v1074_v43 = vpop.f32.mrf.mxu2 }
 0x15d   :  { %v1075_v47 = vadd.f32 %v1074_v43, %v986_v23  ;;  %v1163_v30 = vpop.f32.mrf.mxu3 }
 0x15e   :  { %v988_v52 = vpop.f32.mrf.mxu1 }
 0x15f   :  { %v1164_v57 = vadd.f32 %v1163_v30, %v1075_v47  ;;  %v989_v61 = vadd.f32 %v988_v52, %v2323_v25 }
 0x160   :  { %v1255_v60 = vpop.f32.mrf.mxu0 }
 0x161   :  { %v1253_v45 = vadd.f32 %v1252_v56, %v1164_v57 }
 0x163   :  { %1310 = vst [vmem:[%s2808_s3 + $0x78] sm:$0xff] %v1253_v45 }
 0x164   :  { %v1077_v22 = vpop.f32.mrf.mxu2 }
 0x165   :  { %v1078_v62 = vadd.f32 %v1077_v22, %v989_v61  ;;  %v1166_v55 = vpop.f32.mrf.mxu3 }
 0x166   :  { %v990_v63 = vpop.f32.mrf.mxu1 }
 0x167   :  { %v1167_v0 = vadd.f32 %v1166_v55, %v1078_v62  ;;  %v991_v3 = vadd.f32 %v990_v63, %v2358_v40 }
 0x168   :  { %v1257_v1 = vpop.f32.mrf.mxu0 }
 0x169   :  { %v1256_v58 = vadd.f32 %v1255_v60, %v1167_v0 }
 0x16b   :  { %1311 = vst [vmem:[%s2808_s3 + $0x80] sm:$0xff] %v1256_v58 }
 0x16c   :  { %v1079_v4 = vpop.f32.mrf.mxu2 }
 0x16d   :  { %v1080_v5 = vadd.f32 %v1079_v4, %v991_v3  ;;  %v1168_v9 = vpop.f32.mrf.mxu3 }
 0x16e   :  { %v993_v46 = vpop.f32.mrf.mxu1 }
 0x16f   :  { %v1169_v10 = vadd.f32 %v1168_v9, %v1080_v5  ;;  %v994_v11 = vadd.f32 %v993_v46, %v2369_v51 }
 0x170   :  { %v1260_v13 = vpop.f32.mrf.mxu0 }
 0x171   :  { %v1258_v25 = vadd.f32 %v1257_v1, %v1169_v10 }
 0x173   :  { %1312 = vst [vmem:[%s2808_s3 + $0x88] sm:$0xff] %v1258_v25 }
 0x174   :  { %v1082_v17 = vpop.f32.mrf.mxu2 }
 0x175   :  { %v1083_v20 = vadd.f32 %v1082_v17, %v994_v11  ;;  %v1171_v8 = vpop.f32.mrf.mxu3 }
 0x176   :  { %v995_v59 = vpop.f32.mrf.mxu1 }
 0x177   :  { %v1172_v21 = vadd.f32 %v1171_v8, %v1083_v20  ;;  %v996_v24 = vadd.f32 %v995_v59, %v2404_v2 }
 0x178   :  { %v1262_v29 = vpop.f32.mrf.mxu0 }
 0x179   :  { %v1261_v40 = vadd.f32 %v1260_v13, %v1172_v21 }
 0x17b   :  { %1313 = vst [vmem:[%s2808_s3 + $0x90] sm:$0xff] %v1261_v40 }
 0x17c   :  { %v1084_v26 = vpop.f32.mrf.mxu2 }
 0x17d   :  { %v1085_v12 = vadd.f32 %v1084_v26, %v996_v24  ;;  %v1173_v28 = vpop.f32.mrf.mxu3 }
 0x17e   :  { %v998_v31 = vpop.f32.mrf.mxu1 }
 0x17f   :  { %v1174_v32 = vadd.f32 %v1173_v28, %v1085_v12  ;;  %v999_v19 = vadd.f32 %v998_v31, %v2415_v14 }
 0x180   :  { %v1265_v33 = vpop.f32.mrf.mxu0 }
 0x181   :  { %v1263_v51 = vadd.f32 %v1262_v29, %v1174_v32 }
 0x183   :  { %1314 = vst [vmem:[%s2808_s3 + $0x98] sm:$0xff] %v1263_v51 }
 0x184   :  { %v1087_v34 = vpop.f32.mrf.mxu2 }
 0x185   :  { %v1088_v49 = vadd.f32 %v1087_v34, %v999_v19  ;;  %v1176_v18 = vpop.f32.mrf.mxu3 }
 0x186   :  { %v1000_v48 = vpop.f32.mrf.mxu1 }
 0x187   :  { %v1177_v36 = vadd.f32 %v1176_v18, %v1088_v49  ;;  %v1001_v38 = vadd.f32 %v1000_v48, %v2450_v35 }
 0x188   :  { %v1267_v37 = vpop.f32.mrf.mxu0 }
 0x189   :  { %v1266_v2 = vadd.f32 %v1265_v33, %v1177_v36 }
 0x18b   :  { %1315 = vst [vmem:[%s2808_s3 + $0xa0] sm:$0xff] %v1266_v2 }
 0x18c   :  { %v1089_v41 = vpop.f32.mrf.mxu2 }
 0x18d   :  { %v1090_v56 = vadd.f32 %v1089_v41, %v1001_v38  ;;  %v1178_v42 = vpop.f32.mrf.mxu3 }
 0x18e   :  { %v1003_v23 = vpop.f32.mrf.mxu1 }
 0x18f   :  { %v1179_v43 = vadd.f32 %v1178_v42, %v1090_v56  ;;  %v1004_v30 = vadd.f32 %v1003_v23, %v2461_v50 }
 0x190   :  { %v1270_v47 = vpop.f32.mrf.mxu0 }
 0x191   :  { %v1268_v14 = vadd.f32 %v1267_v37, %v1179_v43 }
 0x193   :  { %1316 = vst [vmem:[%s2808_s3 + $0xa8] sm:$0xff] %v1268_v14 }
 0x194   :  { %v1092_v52 = vpop.f32.mrf.mxu2 }
 0x195   :  { %v1093_v57 = vadd.f32 %v1092_v52, %v1004_v30  ;;  %v1181_v60 = vpop.f32.mrf.mxu3 }
 0x196   :  { %v1005_v45 = vpop.f32.mrf.mxu1 }
 0x197   :  { %v1182_v61 = vadd.f32 %v1181_v60, %v1093_v57  ;;  %v1006_v62 = vadd.f32 %v1005_v45, %v2496_v7 }
 0x198   :  { %v1272_v22 = vpop.f32.mrf.mxu0 }
 0x199   :  { %v1271_v35 = vadd.f32 %v1270_v47, %v1182_v61 }
 0x19b   :  { %1317 = vst [vmem:[%s2808_s3 + $0xb0] sm:$0xff] %v1271_v35 }
 0x19c   :  { %v1094_v55 = vpop.f32.mrf.mxu2 }
 0x19d   :  { %v1095_v63 = vadd.f32 %v1094_v55, %v1006_v62  ;;  %v1183_v0 = vpop.f32.mrf.mxu3 }
 0x19e   :  { %v1008_v1 = vpop.f32.mrf.mxu1 }
 0x19f   :  { %v1184_v58 = vadd.f32 %v1183_v0, %v1095_v63  ;;  %v1009_v4 = vadd.f32 %v1008_v1, %v2326_v27 }
 0x1a0   :  { %v1275_v3 = vpop.f32.mrf.mxu0 }
 0x1a1   :  { %v1273_v50 = vadd.f32 %v1272_v22, %v1184_v58 }
 0x1a3   :  { %1318 = vst [vmem:[%s2808_s3 + $0xb8] sm:$0xff] %v1273_v50 }
 0x1a4   :  { %v1097_v5 = vpop.f32.mrf.mxu2 }
 0x1a5   :  { %v1098_v9 = vadd.f32 %v1097_v5, %v1009_v4  ;;  %v1186_v46 = vpop.f32.mrf.mxu3 }
 0x1a6   :  { %v1010_v10 = vpop.f32.mrf.mxu1 }
 0x1a7   :  { %v1187_v13 = vadd.f32 %v1186_v46, %v1098_v9  ;;  %v1011_v11 = vadd.f32 %v1010_v10, %v2361_v44 }
 0x1a8   :  { %v1277_v25 = vpop.f32.mrf.mxu0 }
 0x1a9   :  { %v1276_v7 = vadd.f32 %v1275_v3, %v1187_v13 }
 0x1ab   :  { %1319 = vst [vmem:[%s2808_s3 + $0xc0] sm:$0xff] %v1276_v7 }
 0x1ac   :  { %v1099_v17 = vpop.f32.mrf.mxu2 }
 0x1ad   :  { %v1100_v20 = vadd.f32 %v1099_v17, %v1011_v11  ;;  %v1188_v8 = vpop.f32.mrf.mxu3 }
 0x1ae   :  { %v1013_v59 = vpop.f32.mrf.mxu1 }
 0x1af   :  { %v1189_v21 = vadd.f32 %v1188_v8, %v1100_v20  ;;  %v1014_v40 = vadd.f32 %v1013_v59, %v2372_v53 }
 0x1b0   :  { %v1280_v29 = vpop.f32.mrf.mxu0 }
 0x1b1   :  { %v1278_v27 = vadd.f32 %v1277_v25, %v1189_v21 }
 0x1b3   :  { %1320 = vst [vmem:[%s2808_s3 + $0xc8] sm:$0xff] %v1278_v27 }
 0x1b4   :  { %v1102_v24 = vpop.f32.mrf.mxu2 }
 0x1b5   :  { %v1103_v26 = vadd.f32 %v1102_v24, %v1014_v40  ;;  %v1191_v12 = vpop.f32.mrf.mxu3 }
 0x1b6   :  { %v1015_v28 = vpop.f32.mrf.mxu1 }
 0x1b7   :  { %v1192_v31 = vadd.f32 %v1191_v12, %v1103_v26  ;;  %v1016_v33 = vadd.f32 %v1015_v28, %v2407_v6 }
 0x1b8   :  { %v1282_v32 = vpop.f32.mrf.mxu0 }
 0x1b9   :  { %v1281_v44 = vadd.f32 %v1280_v29, %v1192_v31 }
 0x1bb   :  { %1321 = vst [vmem:[%s2808_s3 + $0xd0] sm:$0xff] %v1281_v44 }
 0x1bc   :  { %v1104_v51 = vpop.f32.mrf.mxu2 }
 0x1bd   :  { %v1105_v19 = vadd.f32 %v1104_v51, %v1016_v33  ;;  %v1193_v34 = vpop.f32.mrf.mxu3 }
 0x1be   :  { %v1018_v49 = vpop.f32.mrf.mxu1 }
 0x1bf   :  { %v1194_v18 = vadd.f32 %v1193_v34, %v1105_v19  ;;  %v1019_v36 = vadd.f32 %v1018_v49, %v2418_v16 }
 0x1c0   :  { %v1285_v53 = vpop.f32.mrf.mxu0 }
 0x1c1   :  { %v1283_v48 = vadd.f32 %v1282_v32, %v1194_v18 }
 0x1c3   :  { %1322 = vst [vmem:[%s2808_s3 + $0xd8] sm:$0xff] %v1283_v48 }
 0x1c4   :  { %v1107_v37 = vpop.f32.mrf.mxu2 }
 0x1c5   :  { %v1108_v2 = vadd.f32 %v1107_v37, %v1019_v36  ;;  %v1196_v38 = vpop.f32.mrf.mxu3 }
 0x1c6   :  { %v1020_v41 = vpop.f32.mrf.mxu1 }
 0x1c7   :  { %v1197_v56 = vadd.f32 %v1196_v38, %v1108_v2  ;;  %v1021_v6 = vadd.f32 %v1020_v41, %v2453_v39 }
 0x1c8   :  { %v1287_v23 = vpop.f32.mrf.mxu0 }
 0x1c9   :  { %v1286_v42 = vadd.f32 %v1285_v53, %v1197_v56 }
 0x1cb   :  { %1323 = vst [vmem:[%s2808_s3 + $0xe0] sm:$0xff] %v1286_v42 }
 0x1cc   :  { %v1109_v43 = vpop.f32.mrf.mxu2 }
 0x1cd   :  { %v1110_v47 = vadd.f32 %v1109_v43, %v1021_v6  ;;  %v1198_v14 = vpop.f32.mrf.mxu3 }
 0x1ce   :  { %v1023_v30 = vpop.f32.mrf.mxu1 }
 0x1cf   :  { %v1199_v52 = vadd.f32 %v1198_v14, %v1110_v47  ;;  %v1024_v16 = vadd.f32 %v1023_v30, %v2464_v54 }
 0x1d0   :  { %v1290_v22 = vpop.f32.mrf.mxu0 }
 0x1d1   :  { %v1288_v57 = vadd.f32 %v1287_v23, %v1199_v52 }
 0x1d3   :  { %1324 = vst [vmem:[%s2808_s3 + $0xe8] sm:$0xff] %v1288_v57 }
 0x1d4   :  { %v1112_v60 = vpop.f32.mrf.mxu2 }
 0x1d5   :  { %v1113_v45 = vadd.f32 %v1112_v60, %v1024_v16  ;;  %v1201_v61 = vpop.f32.mrf.mxu3 }
 0x1d6   :  { %v1025_v62 = vpop.f32.mrf.mxu1 }
 0x1d7   :  { %v1202_v35 = vadd.f32 %v1201_v61, %v1113_v45  ;;  %v1026_v55 = vadd.f32 %v1025_v62, %v2499_v15 }
 0x1d8   :  { %v1292_v3 = vpop.f32.mrf.mxu0 }
 0x1d9   :  { %v1291_v39 = vadd.f32 %v1290_v22, %v1202_v35 }
 0x1db   :  { %1325 = vst [vmem:[%s2808_s3 + $0xf0] sm:$0xff] %v1291_v39 }
 0x1dc   :  { %v1114_v63 = vpop.f32.mrf.mxu2 }
 0x1dd   :  { %v1115_v0 = vadd.f32 %v1114_v63, %v1026_v55  ;;  %v1203_v1 = vpop.f32.mrf.mxu3 }
 0x1df   :  { %v1204_v58 = vadd.f32 %v1203_v1, %v1115_v0 }
 0x1e1   :  { %v1293_v50 = vadd.f32 %v1292_v3, %v1204_v58 }
 0x1e3   :  { %1326 = vst [vmem:[%s2808_s3 + $0xf8] sm:$0xff] %v1293_v50 }

// kernel: aesfa_forward.28
= control target key start
LH: loop header
LB: loop body
LE: loop exit
PB: predicated region body
PF: predicated region fallthrough
CT: control target
= control target key end

     0   :  { %s705_s1 = inlined_call_operand.vmem [shape: bf16[128,128], index: 1, kind: input, shape index: {}]   ;;  %s706_s2 = inlined_call_operand.vmem [shape: f32[1,128], index: 2, kind: input, shape index: {}]   ;;  %s707_s0 = inlined_call_operand.vmem [shape: bf16[256,128], index: 0, kind: input, shape index: {}]   ;;  %s708_s3 = inlined_call_operand.vmem [shape: f32[256,128], index: 3, kind: output, shape index: {}]  }
   0x1   :  { %v454_v0 = vld [vmem:[%s705_s1 + $0x38] sm:$0xff]  ;;  %v453_v1 = vld [vmem:[%s705_s1 + $0x30] sm:$0xff]  ;;  %v452_v2 = vld [vmem:[%s705_s1 + $0x28] sm:$0xff] }
   0x2   :  { %210 = vmatpush.bf16.msra.mxu0 %v454_v0  ;;  %455 = vmatpush.bf16.msra.mxu1 %v454_v0  ;;  %v451_v3 = vld [vmem:[%s705_s1 + $0x20] sm:$0xff]  ;;  %v450_v4 = vld [vmem:[%s705_s1 + $0x18] sm:$0xff]  ;;  %v449_v5 = vld [vmem:[%s705_s1 + $0x10] sm:$0xff] }
   0x3   :  { %456 = vmatpush.bf16.msra.mxu2 %v454_v0  ;;  %457 = vmatpush.bf16.msra.mxu3 %v454_v0  ;;  %v448_v6 = vld [vmem:[%s705_s1 + $0x8] sm:$0xff]  ;;  %v447_v7 = vld [vmem:[%s705_s1] sm:$0xff]  ;;  %v433_v16 = vld [vmem:[%s707_s0 + $0x10] sm:$0xff] }
   0x4   :  { %v431_v8 = vld [vmem:[%s707_s0] sm:$0xff]  ;;  %v432_v12 = vld [vmem:[%s707_s0 + $0x8] sm:$0xff]  ;;  %v437_v17 = vld [vmem:[%s707_s0 + $0x30] sm:$0xff] }
   0x5   :  { %v435_v9 = vld [vmem:[%s707_s0 + $0x20] sm:$0xff]  ;;  %v436_v13 = vld [vmem:[%s707_s0 + $0x28] sm:$0xff]  ;;  %v441_v18 = vld [vmem:[%s707_s0 + $0x50] sm:$0xff] }
   0x6   :  { %211 = vmatpush.bf16.msra.mxu0 %v453_v1  ;;  %458 = vmatpush.bf16.msra.mxu1 %v453_v1  ;;  %v439_v10 = vld [vmem:[%s707_s0 + $0x40] sm:$0xff]  ;;  %v440_v14 = vld [vmem:[%s707_s0 + $0x48] sm:$0xff]  ;;  %v445_v19 = vld [vmem:[%s707_s0 + $0x70] sm:$0xff] }
   0x7   :  { %459 = vmatpush.bf16.msra.mxu2 %v453_v1  ;;  %460 = vmatpush.bf16.msra.mxu3 %v453_v1  ;;  %v443_v11 = vld [vmem:[%s707_s0 + $0x60] sm:$0xff]  ;;  %v444_v15 = vld [vmem:[%s707_s0 + $0x68] sm:$0xff]  ;;  %v434_v20 = vld [vmem:[%s707_s0 + $0x18] sm:$0xff] }
   0x8   :  { %v438_v21 = vld [vmem:[%s707_s0 + $0x38] sm:$0xff]  ;;  %v575_v24 = vld [vmem:[%s706_s2] ss:$0 sm:$0xff] }
   0x9   :  { %v442_v22 = vld [vmem:[%s707_s0 + $0x58] sm:$0xff] }
   0xa   :  { %212 = vmatpush.bf16.msra.mxu0 %v452_v2  ;;  %461 = vmatpush.bf16.msra.mxu1 %v452_v2  ;;  %v446_v23 = vld [vmem:[%s707_s0 + $0x78] sm:$0xff] }
   0xb   :  { %462 = vmatpush.bf16.msra.mxu2 %v452_v2  ;;  %463 = vmatpush.bf16.msra.mxu3 %v452_v2 }
   0xe   :  { %213 = vmatpush.bf16.msra.mxu0 %v451_v3  ;;  %464 = vmatpush.bf16.msra.mxu1 %v451_v3 }
   0xf   :  { %465 = vmatpush.bf16.msra.mxu2 %v451_v3  ;;  %466 = vmatpush.bf16.msra.mxu3 %v451_v3 }
  0x12   :  { %214 = vmatpush.bf16.msra.mxu0 %v450_v4  ;;  %467 = vmatpush.bf16.msra.mxu1 %v450_v4 }
  0x13   :  { %468 = vmatpush.bf16.msra.mxu2 %v450_v4  ;;  %469 = vmatpush.bf16.msra.mxu3 %v450_v4 }
  0x16   :  { %215 = vmatpush.bf16.msra.mxu0 %v449_v5  ;;  %470 = vmatpush.bf16.msra.mxu1 %v449_v5 }
  0x17   :  { %471 = vmatpush.bf16.msra.mxu2 %v449_v5  ;;  %472 = vmatpush.bf16.msra.mxu3 %v449_v5 }
  0x1a   :  { %216 = vmatpush.bf16.msra.mxu0 %v448_v6  ;;  %473 = vmatpush.bf16.msra.mxu1 %v448_v6 }
  0x1b   :  { %474 = vmatpush.bf16.msra.mxu2 %v448_v6  ;;  %475 = vmatpush.bf16.msra.mxu3 %v448_v6 }
  0x1e   :  { %217 = vmatpush.bf16.msra.mxu0 %v447_v7  ;;  %476 = vmatpush.bf16.msra.mxu1 %v447_v7 }
  0x1f   :  { %477 = vmatpush.bf16.msra.mxu2 %v447_v7  ;;  %478 = vmatpush.bf16.msra.mxu3 %v447_v7 }
  0x21   :  { %218 = vmatmul.bf16.vlgmr.msra.gmra.mxu0 %v431_v8  ;;  %238 = vmatmul.bf16.vlgmr.msra.gmra.mxu1 %v435_v9 }
  0x22   :  { %258 = vmatmul.bf16.vlgmr.msra.gmra.mxu2 %v439_v10  ;;  %278 = vmatmul.bf16.vlgmr.msra.gmra.mxu3 %v443_v11 }
  0x31   :  { %223 = vmatmul.bf16.gmra.mxu0 %v432_v12  ;;  %243 = vmatmul.bf16.gmra.mxu1 %v436_v13 }
  0x32   :  { %263 = vmatmul.bf16.gmra.mxu2 %v440_v14  ;;  %283 = vmatmul.bf16.gmra.mxu3 %v444_v15 }
  0x41   :  { %228 = vmatmul.bf16.gmra.mxu0 %v433_v16  ;;  %248 = vmatmul.bf16.gmra.mxu1 %v437_v17 }
  0x42   :  { %268 = vmatmul.bf16.gmra.mxu2 %v441_v18  ;;  %288 = vmatmul.bf16.gmra.mxu3 %v445_v19 }
  0x51   :  { %233 = vmatmul.bf16.gmra.mxu0 %v434_v20  ;;  %253 = vmatmul.bf16.gmra.mxu1 %v438_v21 }
  0x52   :  { %273 = vmatmul.bf16.gmra.mxu2 %v442_v22  ;;  %293 = vmatmul.bf16.gmra.mxu3 %v446_v23 }
  0x9e   :  { %v219_v25 = vpop.f32.mrf.mxu0  ;;  %v239_v26 = vpop.f32.mrf.mxu1 }
  0x9f   :  { %v220_v27 = vadd.f32 %v575_v24, %v219_v25  ;;  %v240_v28 = vadd.f32 %v575_v24, %v239_v26 }
  0xa1   :  { %299 = vst [vmem:[%s708_s3] sm:$0xff] %v220_v27 }
  0xa2   :  { %307 = vst [vmem:[%s708_s3 + $0x40] sm:$0xff] %v240_v28 }
  0xa5   :  { %v259_v29 = vpop.f32.mrf.mxu2  ;;  %v279_v30 = vpop.f32.mrf.mxu3 }
  0xa6   :  { %v260_v31 = vadd.f32 %v575_v24, %v259_v29  ;;  %v280_v32 = vadd.f32 %v575_v24, %v279_v30  ;;  %v221_v33 = vpop.f32.mrf.mxu0  ;;  %v241_v34 = vpop.f32.mrf.mxu1 }
  0xa7   :  { %v222_v35 = vadd.f32 %v575_v24, %v221_v33  ;;  %v242_v36 = vadd.f32 %v575_v24, %v241_v34 }
  0xa8   :  { %315 = vst [vmem:[%s708_s3 + $0x80] sm:$0xff] %v260_v31 }
  0xa9   :  { %323 = vst [vmem:[%s708_s3 + $0xc0] sm:$0xff] %v280_v32 }
  0xaa   :  { %300 = vst [vmem:[%s708_s3 + $0x8] sm:$0xff] %v222_v35 }
  0xab   :  { %308 = vst [vmem:[%s708_s3 + $0x48] sm:$0xff] %v242_v36 }
  0xad   :  { %v261_v37 = vpop.f32.mrf.mxu2  ;;  %v281_v38 = vpop.f32.mrf.mxu3 }
  0xae   :  { %v262_v39 = vadd.f32 %v575_v24, %v261_v37  ;;  %v282_v40 = vadd.f32 %v575_v24, %v281_v38  ;;  %v224_v41 = vpop.f32.mrf.mxu0  ;;  %v244_v42 = vpop.f32.mrf.mxu1 }
  0xaf   :  { %v225_v43 = vadd.f32 %v575_v24, %v224_v41  ;;  %v245_v44 = vadd.f32 %v575_v24, %v244_v42 }
  0xb0   :  { %316 = vst [vmem:[%s708_s3 + $0x88] sm:$0xff] %v262_v39 }
  0xb1   :  { %324 = vst [vmem:[%s708_s3 + $0xc8] sm:$0xff] %v282_v40 }
  0xb2   :  { %301 = vst [vmem:[%s708_s3 + $0x10] sm:$0xff] %v225_v43 }
  0xb3   :  { %309 = vst [vmem:[%s708_s3 + $0x50] sm:$0xff] %v245_v44 }
  0xb5   :  { %v264_v45 = vpop.f32.mrf.mxu2  ;;  %v284_v46 = vpop.f32.mrf.mxu3 }
  0xb6   :  { %v265_v47 = vadd.f32 %v575_v24, %v264_v45  ;;  %v285_v48 = vadd.f32 %v575_v24, %v284_v46  ;;  %v226_v49 = vpop.f32.mrf.mxu0  ;;  %v246_v50 = vpop.f32.mrf.mxu1 }
  0xb7   :  { %v227_v51 = vadd.f32 %v575_v24, %v226_v49  ;;  %v247_v52 = vadd.f32 %v575_v24, %v246_v50 }
  0xb8   :  { %317 = vst [vmem:[%s708_s3 + $0x90] sm:$0xff] %v265_v47 }
  0xb9   :  { %325 = vst [vmem:[%s708_s3 + $0xd0] sm:$0xff] %v285_v48 }
  0xba   :  { %302 = vst [vmem:[%s708_s3 + $0x18] sm:$0xff] %v227_v51 }
  0xbb   :  { %310 = vst [vmem:[%s708_s3 + $0x58] sm:$0xff] %v247_v52 }
  0xbd   :  { %v266_v53 = vpop.f32.mrf.mxu2  ;;  %v286_v54 = vpop.f32.mrf.mxu3 }
  0xbe   :  { %v267_v55 = vadd.f32 %v575_v24, %v266_v53  ;;  %v287_v56 = vadd.f32 %v575_v24, %v286_v54  ;;  %v229_v57 = vpop.f32.mrf.mxu0  ;;  %v249_v58 = vpop.f32.mrf.mxu1 }
  0xbf   :  { %v230_v59 = vadd.f32 %v575_v24, %v229_v57  ;;  %v250_v60 = vadd.f32 %v575_v24, %v249_v58 }
  0xc0   :  { %318 = vst [vmem:[%s708_s3 + $0x98] sm:$0xff] %v267_v55 }
  0xc1   :  { %326 = vst [vmem:[%s708_s3 + $0xd8] sm:$0xff] %v287_v56 }
  0xc2   :  { %303 = vst [vmem:[%s708_s3 + $0x20] sm:$0xff] %v230_v59 }
  0xc3   :  { %311 = vst [vmem:[%s708_s3 + $0x60] sm:$0xff] %v250_v60 }
  0xc5   :  { %v269_v61 = vpop.f32.mrf.mxu2  ;;  %v289_v62 = vpop.f32.mrf.mxu3 }
  0xc6   :  { %v270_v63 = vadd.f32 %v575_v24, %v269_v61  ;;  %v290_v0 = vadd.f32 %v575_v24, %v289_v62  ;;  %v231_v1 = vpop.f32.mrf.mxu0  ;;  %v251_v2 = vpop.f32.mrf.mxu1 }
  0xc7   :  { %v232_v3 = vadd.f32 %v575_v24, %v231_v1  ;;  %v252_v4 = vadd.f32 %v575_v24, %v251_v2 }
  0xc8   :  { %319 = vst [vmem:[%s708_s3 + $0xa0] sm:$0xff] %v270_v63 }
  0xc9   :  { %327 = vst [vmem:[%s708_s3 + $0xe0] sm:$0xff] %v290_v0 }
  0xca   :  { %304 = vst [vmem:[%s708_s3 + $0x28] sm:$0xff] %v232_v3 }
  0xcb   :  { %312 = vst [vmem:[%s708_s3 + $0x68] sm:$0xff] %v252_v4 }
  0xcd   :  { %v271_v5 = vpop.f32.mrf.mxu2  ;;  %v291_v6 = vpop.f32.mrf.mxu3 }
  0xce   :  { %v272_v7 = vadd.f32 %v575_v24, %v271_v5  ;;  %v292_v8 = vadd.f32 %v575_v24, %v291_v6  ;;  %v234_v9 = vpop.f32.mrf.mxu0  ;;  %v254_v10 = vpop.f32.mrf.mxu1 }
  0xcf   :  { %v235_v11 = vadd.f32 %v575_v24, %v234_v9  ;;  %v255_v12 = vadd.f32 %v575_v24, %v254_v10 }
  0xd0   :  { %320 = vst [vmem:[%s708_s3 + $0xa8] sm:$0xff] %v272_v7 }
  0xd1   :  { %328 = vst [vmem:[%s708_s3 + $0xe8] sm:$0xff] %v292_v8 }
  0xd2   :  { %305 = vst [vmem:[%s708_s3 + $0x30] sm:$0xff] %v235_v11 }
  0xd3   :  { %313 = vst [vmem:[%s708_s3 + $0x70] sm:$0xff] %v255_v12 }
  0xd5   :  { %v274_v13 = vpop.f32.mrf.mxu2  ;;  %v294_v14 = vpop.f32.mrf.mxu3 }
  0xd6   :  { %v275_v15 = vadd.f32 %v575_v24, %v274_v13  ;;  %v295_v16 = vadd.f32 %v575_v24, %v294_v14  ;;  %v236_v17 = vpop.f32.mrf.mxu0  ;;  %v256_v18 = vpop.f32.mrf.mxu1 }
  0xd7   :  { %v237_v19 = vadd.f32 %v575_v24, %v236_v17  ;;  %v257_v20 = vadd.f32 %v575_v24, %v256_v18 }
  0xd8   :  { %321 = vst [vmem:[%s708_s3 + $0xb0] sm:$0xff] %v275_v15 }
  0xd9   :  { %329 = vst [vmem:[%s708_s3 + $0xf0] sm:$0xff] %v295_v16 }
  0xda   :  { %306 = vst [vmem:[%s708_s3 + $0x38] sm:$0xff] %v237_v19 }
  0xdb   :  { %314 = vst [vmem:[%s708_s3 + $0x78] sm:$0xff] %v257_v20 }
  0xdd   :  { %v276_v21 = vpop.f32.mrf.mxu2  ;;  %v296_v22 = vpop.f32.mrf.mxu3 }
  0xde   :  { %v277_v23 = vadd.f32 %v575_v24, %v276_v21  ;;  %v297_v25 = vadd.f32 %v575_v24, %v296_v22 }
  0xe0   :  { %322 = vst [vmem:[%s708_s3 + $0xb8] sm:$0xff] %v277_v23 }
  0xe1   :  { %330 = vst [vmem:[%s708_s3 + $0xf8] sm:$0xff] %v297_v25 }

// kernel: aesfa_forward.30
= control target key start
LH: loop header
LB: loop body
LE: loop exit
PB: predicated region body
PF: predicated region fallthrough
CT: control target
= control target key end

     0   :  { %s1819_s1 = inlined_call_operand.vmem [shape: bf16[384,128], index: 1, kind: input, shape index: {}]   ;;  %s1820_s2 = inlined_call_operand.vmem [shape: f32[1,128], index: 2, kind: input, shape index: {}]   ;;  %s1821_s0 = inlined_call_operand.vmem [shape: bf16[256,384], index: 0, kind: input, shape index: {}]   ;;  %s1822_s3 = inlined_call_operand.vmem [shape: f32[256,128], index: 3, kind: output, shape index: {}]  }
   0x1   :  { %v1176_v0 = vld [vmem:[%s1819_s1 + $0x38] sm:$0xff]  ;;  %v1175_v3 = vld [vmem:[%s1819_s1 + $0x30] sm:$0xff]  ;;  %v1174_v6 = vld [vmem:[%s1819_s1 + $0x28] sm:$0xff] }
   0x2   :  { %v1244_v1 = vld [vmem:[%s1819_s1 + $0x78] sm:$0xff]  ;;  %530 = vmatpush.bf16.msra.mxu0 %v1176_v0  ;;  %1193 = vmatpush.bf16.msra.mxu3 %v1176_v0  ;;  %v1259_v4 = vld [vmem:[%s1819_s1 + $0x70] sm:$0xff]  ;;  %v1182_v7 = vld [vmem:[%s1819_s1 + $0x68] sm:$0xff] }
   0x3   :  { %v1249_v2 = vld [vmem:[%s1819_s1 + $0xb8] sm:$0xff]  ;;  %619 = vmatpush.bf16.msra.mxu1 %v1244_v1  ;;  %v1264_v5 = vld [vmem:[%s1819_s1 + $0xb0] sm:$0xff]  ;;  %v1277_v8 = vld [vmem:[%s1819_s1 + $0xa8] sm:$0xff] }
   0x4   :  { %708 = vmatpush.bf16.msra.mxu2 %v1249_v2  ;;  %v1173_v9 = vld [vmem:[%s1819_s1 + $0x20] sm:$0xff]  ;;  %v1172_v12 = vld [vmem:[%s1819_s1 + $0x18] sm:$0xff]  ;;  %v1171_v15 = vld [vmem:[%s1819_s1 + $0x10] sm:$0xff] }
   0x5   :  { %v1181_v10 = vld [vmem:[%s1819_s1 + $0x60] sm:$0xff]  ;;  %v1180_v13 = vld [vmem:[%s1819_s1 + $0x58] sm:$0xff]  ;;  %v1179_v16 = vld [vmem:[%s1819_s1 + $0x50] sm:$0xff] }
   0x6   :  { %531 = vmatpush.bf16.msra.mxu0 %v1175_v3  ;;  %1194 = vmatpush.bf16.msra.mxu3 %v1175_v3  ;;  %v1289_v11 = vld [vmem:[%s1819_s1 + $0xa0] sm:$0xff]  ;;  %v1301_v14 = vld [vmem:[%s1819_s1 + $0x98] sm:$0xff]  ;;  %v1313_v17 = vld [vmem:[%s1819_s1 + $0x90] sm:$0xff] }
   0x7   :  { %620 = vmatpush.bf16.msra.mxu1 %v1259_v4  ;;  %v1170_v18 = vld [vmem:[%s1819_s1 + $0x8] sm:$0xff]  ;;  %v1169_v21 = vld [vmem:[%s1819_s1] sm:$0xff]  ;;  %v837_v29 = vld [vmem:[%s1821_s0 + $0xc] sm:$0xf0] }
   0x8   :  { %709 = vmatpush.bf16.msra.mxu2 %v1264_v5  ;;  %v1178_v19 = vld [vmem:[%s1819_s1 + $0x48] sm:$0xff]  ;;  %v1177_v22 = vld [vmem:[%s1819_s1 + $0x40] sm:$0xff]  ;;  %v1123_v31 = vld [vmem:[%s1821_s0 + $0x10] sm:$0xf0] }
   0x9   :  { %v1325_v20 = vld [vmem:[%s1819_s1 + $0x88] sm:$0xff]  ;;  %v1336_v23 = vld [vmem:[%s1819_s1 + $0x80] sm:$0xff]  ;;  %v847_v36 = vld [vmem:[%s1821_s0 + $0x18] sm:$0xf] }
   0xa   :  { %532 = vmatpush.bf16.msra.mxu0 %v1174_v6  ;;  %1195 = vmatpush.bf16.msra.mxu3 %v1174_v6  ;;  %v835_v24 = vld [vmem:[%s1821_s0] sm:$0xf]  ;;  %v1122_v25 = vld [vmem:[%s1821_s0 + $0x8] sm:$0xf0]  ;;  %v1121_v28 = vld [vmem:[%s1821_s0 + $0x4] sm:$0xf] }
   0xb   :  { %621 = vmatpush.bf16.msra.mxu1 %v1182_v7  ;;  %v979_v26 = vld [vmem:[%s1821_s0 + $0x120] sm:$0xf]  ;;  %v1158_v27 = vld [vmem:[%s1821_s0 + $0x128] sm:$0xf0]  ;;  %v843_v30 = vld [vmem:[%s1821_s0 + $0x8] sm:$0xf]  ;;  %v836_v32 = vor.u32 %v1122_v25, %v835_v24  ;;  %v840_v34 = vor.u32 %v1121_v28, %v837_v29 }
   0xc   :  { %710 = vmatpush.bf16.msra.mxu2 %v1277_v8  ;;  %v980_v33 = vor.u32 %v1158_v27, %v979_v26  ;;  %v844_v35 = vor.u32 %v1123_v31, %v843_v30  ;;  %v1125_v37 = vld [vmem:[%s1821_s0 + $0x20] sm:$0xf0]  ;;  %v991_v38 = vld [vmem:[%s1821_s0 + $0x138] sm:$0xf]  ;;  %v1124_v40 = vld [vmem:[%s1821_s0 + $0x1c] sm:$0xf] }
   0xd   :  { %v1161_v39 = vld [vmem:[%s1821_s0 + $0x140] sm:$0xf0]  ;;  %v849_v41 = vld [vmem:[%s1821_s0 + $0x24] sm:$0xf0]  ;;  %v855_v42 = vld [vmem:[%s1821_s0 + $0x20] sm:$0xf]  ;;  %v848_v44 = vor.u32 %v1125_v37, %v847_v36 }
   0xe   :  { %533 = vmatpush.bf16.msra.mxu0 %v1173_v9  ;;  %1196 = vmatpush.bf16.msra.mxu3 %v1173_v9  ;;  %v1126_v43 = vld [vmem:[%s1821_s0 + $0x28] sm:$0xf0]  ;;  %v992_v45 = vor.u32 %v1161_v39, %v991_v38  ;;  %v852_v46 = vor.u32 %v1124_v40, %v849_v41  ;;  %v859_v48 = vld [vmem:[%s1821_s0 + $0x30] sm:$0xf]  ;;  %v1128_v49 = vld [vmem:[%s1821_s0 + $0x38] sm:$0xf0] }
   0xf   :  { %622 = vmatpush.bf16.msra.mxu1 %v1181_v10  ;;  %v856_v47 = vor.u32 %v1126_v43, %v855_v42  ;;  %v1003_v50 = vld [vmem:[%s1821_s0 + $0x150] sm:$0xf]  ;;  %v1164_v51 = vld [vmem:[%s1821_s0 + $0x158] sm:$0xf0]  ;;  %v1127_v52 = vld [vmem:[%s1821_s0 + $0x34] sm:$0xf]  ;;  %v860_v56 = vor.u32 %v1128_v49, %v859_v48 }
  0x10   :  { %711 = vmatpush.bf16.msra.mxu2 %v1289_v11  ;;  %v861_v53 = vld [vmem:[%s1821_s0 + $0x3c] sm:$0xf0]  ;;  %v867_v54 = vld [vmem:[%s1821_s0 + $0x38] sm:$0xf]  ;;  %v1129_v55 = vld [vmem:[%s1821_s0 + $0x40] sm:$0xf0]  ;;  %v1004_v57 = vor.u32 %v1164_v51, %v1003_v50 }
  0x11   :  { %v864_v58 = vor.u32 %v1127_v52, %v861_v53  ;;  %v868_v59 = vor.u32 %v1129_v55, %v867_v54  ;;  %v871_v60 = vld [vmem:[%s1821_s0 + $0x48] sm:$0xf]  ;;  %v1131_v61 = vld [vmem:[%s1821_s0 + $0x50] sm:$0xf0]  ;;  %v1130_v0 = vld [vmem:[%s1821_s0 + $0x4c] sm:$0xf] }
  0x12   :  { %534 = vmatpush.bf16.msra.mxu0 %v1172_v12  ;;  %1197 = vmatpush.bf16.msra.mxu3 %v1172_v12  ;;  %v1015_v62 = vld [vmem:[%s1821_s0 + $0x168] sm:$0xf]  ;;  %v1167_v63 = vld [vmem:[%s1821_s0 + $0x170] sm:$0xf0]  ;;  %v1132_v3 = vld [vmem:[%s1821_s0 + $0x58] sm:$0xf0] }
  0x13   :  { %623 = vmatpush.bf16.msra.mxu1 %v1180_v13  ;;  %v1134_v9 = vld [vmem:[%s1821_s0 + $0x68] sm:$0xf0]  ;;  %v981_v12 = vld [vmem:[%s1821_s0 + $0x12c] sm:$0xf0]  ;;  %v993_v24 = vld [vmem:[%s1821_s0 + $0x144] sm:$0xf0] }
  0x14   :  { %712 = vmatpush.bf16.msra.mxu2 %v1301_v14  ;;  %v897_v25 = vld [vmem:[%s1821_s0 + $0x84] sm:$0xf0]  ;;  %v903_v26 = vld [vmem:[%s1821_s0 + $0x80] sm:$0xf]  ;;  %v1138_v27 = vld [vmem:[%s1821_s0 + $0x88] sm:$0xf0] }
  0x15   :  { %v904_v31 = vor.u32 %v1138_v27, %v903_v26  ;;  %v1005_v36 = vld [vmem:[%s1821_s0 + $0x15c] sm:$0xf0]  ;;  %v915_v38 = vld [vmem:[%s1821_s0 + $0x98] sm:$0xf]  ;;  %v1141_v39 = vld [vmem:[%s1821_s0 + $0xa0] sm:$0xf0] }
  0x16   :  { %535 = vmatpush.bf16.msra.mxu0 %v1171_v15  ;;  %1198 = vmatpush.bf16.msra.mxu3 %v1171_v15  ;;  %v1135_v15 = vld [vmem:[%s1821_s0 + $0x70] sm:$0xf0]  ;;  %v909_v37 = vld [vmem:[%s1821_s0 + $0x9c] sm:$0xf0]  ;;  %v916_v43 = vor.u32 %v1141_v39, %v915_v38  ;;  %v1017_v48 = vld [vmem:[%s1821_s0 + $0x174] sm:$0xf0] }
  0x17   :  { %624 = vmatpush.bf16.msra.mxu1 %v1179_v16  ;;  %v921_v49 = vld [vmem:[%s1821_s0 + $0xb4] sm:$0xf0]  ;;  %v927_v50 = vld [vmem:[%s1821_s0 + $0xb0] sm:$0xf]  ;;  %v1144_v51 = vld [vmem:[%s1821_s0 + $0xb8] sm:$0xf0] }
  0x18   :  { %713 = vmatpush.bf16.msra.mxu2 %v1313_v17  ;;  %v928_v55 = vor.u32 %v1144_v51, %v927_v50 }
  0x1a   :  { %536 = vmatpush.bf16.msra.mxu0 %v1170_v18  ;;  %1199 = vmatpush.bf16.msra.mxu3 %v1170_v18 }
  0x1b   :  { %625 = vmatpush.bf16.msra.mxu1 %v1178_v19 }
  0x1c   :  { %714 = vmatpush.bf16.msra.mxu2 %v1325_v20 }
  0x1e   :  { %537 = vmatpush.bf16.msra.mxu0 %v1169_v21  ;;  %1200 = vmatpush.bf16.msra.mxu3 %v1169_v21  ;;  %v1137_v21 = vld [vmem:[%s1821_s0 + $0x80] sm:$0xf0] }
  0x1f   :  { %626 = vmatpush.bf16.msra.mxu1 %v1177_v22 }
  0x20   :  { %715 = vmatpush.bf16.msra.mxu2 %v1336_v23 }
  0x21   :  { %538 = vmatmul.bf16.vlgmr.msra.gmra.mxu0 %v836_v32  ;;  %598 = vmatmul.bf16.vlgmr.msra.gmra.mxu3 %v980_v33  ;;  %v907_v32 = vld [vmem:[%s1821_s0 + $0x90] sm:$0xf]  ;;  %v1140_v33 = vld [vmem:[%s1821_s0 + $0x98] sm:$0xf0] }
  0x22   :  { %1201 = vmatpush.bf16.msrb.mxu3 %v1244_v1  ;;  %627 = vmatmul.bf16.vlgmr.msra.gmra.mxu1 %v840_v34  ;;  %v873_v1 = vld [vmem:[%s1821_s0 + $0x54] sm:$0xf0]  ;;  %v1139_v34 = vld [vmem:[%s1821_s0 + $0x94] sm:$0xf]  ;;  %v908_v40 = vor.u32 %v1140_v33, %v907_v32 }
  0x23   :  { %716 = vmatmul.bf16.vlgmr.msra.gmra.mxu2 %v844_v35  ;;  %v876_v6 = vor.u32 %v1130_v0, %v873_v1  ;;  %v1163_v35 = vld [vmem:[%s1821_s0 + $0x154] sm:$0xf]  ;;  %v912_v42 = vor.u32 %v1139_v34, %v909_v37 }
  0x24   :  { %v1008_v41 = vor.u32 %v1163_v35, %v1005_v36  ;;  %v1147_v0 = vld [vmem:[%s1821_s0 + $0xd0] sm:$0xf0] }
  0x26   :  { %1202 = vmatpush.bf16.msrb.mxu3 %v1259_v4  ;;  %v872_v4 = vor.u32 %v1131_v61, %v871_v60  ;;  %v987_v60 = vld [vmem:[%s1821_s0 + $0x128] sm:$0xf]  ;;  %v1159_v61 = vld [vmem:[%s1821_s0 + $0x130] sm:$0xf0] }
  0x2a   :  { %1203 = vmatpush.bf16.msrb.mxu3 %v1182_v7 }
  0x2e   :  { %1204 = vmatpush.bf16.msrb.mxu3 %v1181_v10  ;;  %v1133_v10 = vld [vmem:[%s1821_s0 + $0x64] sm:$0xf] }
  0x31   :  { %543 = vmatmul.bf16.gmra.mxu0 %v848_v44  ;;  %603 = vmatmul.bf16.gmra.mxu3 %v992_v45  ;;  %v919_v44 = vld [vmem:[%s1821_s0 + $0xa8] sm:$0xf]  ;;  %v1143_v45 = vld [vmem:[%s1821_s0 + $0xb0] sm:$0xf0] }
  0x32   :  { %1205 = vmatpush.bf16.msrb.mxu3 %v1180_v13  ;;  %632 = vmatmul.bf16.gmra.mxu1 %v852_v46  ;;  %v885_v13 = vld [vmem:[%s1821_s0 + $0x6c] sm:$0xf0]  ;;  %v1142_v46 = vld [vmem:[%s1821_s0 + $0xac] sm:$0xf]  ;;  %v920_v52 = vor.u32 %v1143_v45, %v919_v44  ;;  %v1011_v44 = vld [vmem:[%s1821_s0 + $0x158] sm:$0xf] }
  0x33   :  { %721 = vmatmul.bf16.gmra.mxu2 %v856_v47  ;;  %v888_v18 = vor.u32 %v1133_v10, %v885_v13  ;;  %v1166_v47 = vld [vmem:[%s1821_s0 + $0x16c] sm:$0xf]  ;;  %v924_v54 = vor.u32 %v1142_v46, %v921_v49  ;;  %v1165_v45 = vld [vmem:[%s1821_s0 + $0x160] sm:$0xf0]  ;;  %v957_v46 = vld [vmem:[%s1821_s0 + $0xfc] sm:$0xf0] }
  0x34   :  { %v1020_v53 = vor.u32 %v1166_v47, %v1017_v48  ;;  %v963_v47 = vld [vmem:[%s1821_s0 + $0xf8] sm:$0xf]  ;;  %v1153_v48 = vld [vmem:[%s1821_s0 + $0x100] sm:$0xf0] }
  0x36   :  { %1206 = vmatpush.bf16.msrb.mxu3 %v1179_v16 }
  0x3a   :  { %1207 = vmatpush.bf16.msrb.mxu3 %v1178_v19 }
  0x3e   :  { %1208 = vmatpush.bf16.msrb.mxu3 %v1177_v22  ;;  %v1136_v22 = vld [vmem:[%s1821_s0 + $0x7c] sm:$0xf] }
  0x3f   :  { %v900_v30 = vor.u32 %v1136_v22, %v897_v25  ;;  %v1150_v22 = vld [vmem:[%s1821_s0 + $0xe8] sm:$0xf0] }
  0x41   :  { %548 = vmatmul.bf16.gmra.mxu0 %v860_v56  ;;  %608 = vmatmul.bf16.gmra.mxu3 %v1004_v57  ;;  %v1545_v56 = vld [vmem:[%s1820_s2] ss:$0 sm:$0xff] }
  0x42   :  { %1209 = vmatpush.bf16.msra.mxu3 %v1249_v2  ;;  %637 = vmatmul.bf16.gmra.mxu1 %v864_v58  ;;  %v879_v2 = vld [vmem:[%s1821_s0 + $0x50] sm:$0xf]  ;;  %v931_v57 = vld [vmem:[%s1821_s0 + $0xc0] sm:$0xf]  ;;  %v1146_v58 = vld [vmem:[%s1821_s0 + $0xc8] sm:$0xf0] }
  0x43   :  { %726 = vmatmul.bf16.gmra.mxu2 %v868_v59  ;;  %v880_v7 = vor.u32 %v1132_v3, %v879_v2  ;;  %v1145_v59 = vld [vmem:[%s1821_s0 + $0xc4] sm:$0xf]  ;;  %v932_v1 = vor.u32 %v1146_v58, %v931_v57  ;;  %v988_v2 = vor.u32 %v1159_v61, %v987_v60  ;;  %v964_v58 = vor.u32 %v1153_v48, %v963_v47 }
  0x46   :  { %1210 = vmatpush.bf16.msra.mxu3 %v1264_v5  ;;  %v1016_v5 = vor.u32 %v1167_v63, %v1015_v62  ;;  %v933_v62 = vld [vmem:[%s1821_s0 + $0xcc] sm:$0xf0]  ;;  %v939_v63 = vld [vmem:[%s1821_s0 + $0xc8] sm:$0xf] }
  0x4a   :  { %1211 = vmatpush.bf16.msra.mxu3 %v1277_v8  ;;  %v883_v8 = vld [vmem:[%s1821_s0 + $0x60] sm:$0xf] }
  0x4b   :  { %v884_v16 = vor.u32 %v1134_v9, %v883_v8 }
  0x4e   :  { %1212 = vmatpush.bf16.msra.mxu3 %v1289_v11  ;;  %v1157_v11 = vld [vmem:[%s1821_s0 + $0x124] sm:$0xf] }
  0x51   :  { %553 = vmatmul.bf16.gmra.mxu0 %v872_v4  ;;  %613 = vmatmul.bf16.gmra.mxu3 %v1016_v5  ;;  %v936_v4 = vor.u32 %v1145_v59, %v933_v62  ;;  %v940_v5 = vor.u32 %v1147_v0, %v939_v63 }
  0x52   :  { %1213 = vmatpush.bf16.msra.mxu3 %v1301_v14  ;;  %642 = vmatmul.bf16.gmra.mxu1 %v876_v6  ;;  %v891_v14 = vld [vmem:[%s1821_s0 + $0x68] sm:$0xf] }
  0x53   :  { %731 = vmatmul.bf16.gmra.mxu2 %v880_v7  ;;  %v892_v19 = vor.u32 %v1135_v15, %v891_v14  ;;  %v943_v15 = vld [vmem:[%s1821_s0 + $0xd8] sm:$0xf] }
  0x56   :  { %1214 = vmatpush.bf16.msra.mxu3 %v1313_v17  ;;  %v984_v17 = vor.u32 %v1157_v11, %v981_v12 }
  0x5a   :  { %1215 = vmatpush.bf16.msra.mxu3 %v1325_v20  ;;  %v895_v20 = vld [vmem:[%s1821_s0 + $0x78] sm:$0xf] }
  0x5b   :  { %v896_v28 = vor.u32 %v1137_v21, %v895_v20  ;;  %v945_v20 = vld [vmem:[%s1821_s0 + $0xe4] sm:$0xf0]  ;;  %v951_v21 = vld [vmem:[%s1821_s0 + $0xe0] sm:$0xf] }
  0x5e   :  { %1216 = vmatpush.bf16.msra.mxu3 %v1336_v23  ;;  %v1160_v23 = vld [vmem:[%s1821_s0 + $0x13c] sm:$0xf] }
  0x5f   :  { %v996_v29 = vor.u32 %v1160_v23, %v993_v24 }
  0x61   :  { %558 = vmatmul.bf16.gmra.mxu0 %v884_v16  ;;  %687 = vmatmul.bf16.vlgmr.msrb.gmra.mxu3 %v984_v17  ;;  %v1149_v16 = vld [vmem:[%s1821_s0 + $0xe0] sm:$0xf0]  ;;  %v1148_v17 = vld [vmem:[%s1821_s0 + $0xdc] sm:$0xf] }
  0x62   :  { %647 = vmatmul.bf16.gmra.mxu1 %v888_v18  ;;  %v999_v18 = vld [vmem:[%s1821_s0 + $0x140] sm:$0xf]  ;;  %v944_v26 = vor.u32 %v1149_v16, %v943_v15 }
  0x63   :  { %736 = vmatmul.bf16.gmra.mxu2 %v892_v19  ;;  %v1162_v19 = vld [vmem:[%s1821_s0 + $0x148] sm:$0xf0] }
  0x64   :  { %v1000_v27 = vor.u32 %v1162_v19, %v999_v18 }
  0x71   :  { %563 = vmatmul.bf16.gmra.mxu0 %v896_v28  ;;  %692 = vmatmul.bf16.gmra.mxu3 %v996_v29 }
  0x72   :  { %652 = vmatmul.bf16.gmra.mxu1 %v900_v30  ;;  %v948_v30 = vor.u32 %v1148_v17, %v945_v20 }
  0x73   :  { %741 = vmatmul.bf16.gmra.mxu2 %v904_v31  ;;  %v952_v31 = vor.u32 %v1150_v22, %v951_v21 }
  0x81   :  { %568 = vmatmul.bf16.gmra.mxu0 %v908_v40  ;;  %697 = vmatmul.bf16.gmra.mxu3 %v1008_v41  ;;  %v955_v41 = vld [vmem:[%s1821_s0 + $0xf0] sm:$0xf] }
  0x82   :  { %657 = vmatmul.bf16.gmra.mxu1 %v912_v42  ;;  %v1152_v42 = vld [vmem:[%s1821_s0 + $0xf8] sm:$0xf0] }
  0x83   :  { %746 = vmatmul.bf16.gmra.mxu2 %v916_v43  ;;  %v1151_v43 = vld [vmem:[%s1821_s0 + $0xf4] sm:$0xf] }
  0x84   :  { %v960_v57 = vor.u32 %v1151_v43, %v957_v46 }
  0x91   :  { %573 = vmatmul.bf16.gmra.mxu0 %v920_v52  ;;  %702 = vmatmul.bf16.gmra.mxu3 %v1020_v53  ;;  %v956_v52 = vor.u32 %v1152_v42, %v955_v41  ;;  %v1012_v53 = vor.u32 %v1165_v45, %v1011_v44 }
  0x92   :  { %662 = vmatmul.bf16.gmra.mxu1 %v924_v54 }
  0x93   :  { %751 = vmatmul.bf16.gmra.mxu2 %v928_v55 }
  0x9e   :  { %v539_v3 = vpop.f32.mrf.mxu0 }
  0x9f   :  { %v540_v6 = vadd.f32 %v1545_v56, %v539_v3  ;;  %v628_v7 = vpop.f32.mrf.mxu1 }
  0xa1   :  { %578 = vmatmul.bf16.gmra.mxu0 %v932_v1  ;;  %776 = vmatmul.bf16.vlgmr.msra.gmra.mxu3 %v988_v2  ;;  %v629_v8 = vadd.f32 %v628_v7, %v540_v6  ;;  %v1154_v6 = vld [vmem:[%s1821_s0 + $0x10c] sm:$0xf]  ;;  %v1023_v7 = vld [vmem:[%s1821_s0 + $0x170] sm:$0xf] }
  0xa2   :  { %667 = vmatmul.bf16.gmra.mxu1 %v936_v4  ;;  %v967_v4 = vld [vmem:[%s1821_s0 + $0x108] sm:$0xf] }
  0xa3   :  { %756 = vmatmul.bf16.gmra.mxu2 %v940_v5  ;;  %v1155_v5 = vld [vmem:[%s1821_s0 + $0x110] sm:$0xf0] }
  0xa4   :  { %v1572_v9 = vpop.f32.mrf.mxu3  ;;  %v968_v16 = vor.u32 %v1155_v5, %v967_v4 }
  0xa6   :  { %v717_v10 = vpop.f32.mrf.mxu2  ;;  %v541_v12 = vpop.f32.mrf.mxu0 }
  0xa7   :  { %v718_v11 = vadd.f32 %v717_v10, %v629_v8  ;;  %v630_v13 = vpop.f32.mrf.mxu1  ;;  %v542_v14 = vadd.f32 %v1545_v56, %v541_v12  ;;  %v1168_v8 = vld [vmem:[%s1821_s0 + $0x178] sm:$0xf0]  ;;  %v969_v10 = vld [vmem:[%s1821_s0 + $0x114] sm:$0xf0] }
  0xa8   :  { %v1156_v12 = vld [vmem:[%s1821_s0 + $0x118] sm:$0xf0]  ;;  %v1024_v17 = vor.u32 %v1168_v8, %v1023_v7  ;;  %v972_v20 = vor.u32 %v1154_v6, %v969_v10 }
  0xa9   :  { %797 = vst [vmem:[%s1822_s3] sm:$0xff] %v718_v11  ;;  %v631_v23 = vadd.f32 %v630_v13, %v542_v14  ;;  %v975_v11 = vld [vmem:[%s1821_s0 + $0x110] sm:$0xf] }
  0xaa   :  { %v976_v21 = vor.u32 %v1156_v12, %v975_v11 }
  0xac   :  { %v1602_v24 = vpop.f32.mrf.mxu3 }
  0xae   :  { %v719_v25 = vpop.f32.mrf.mxu2  ;;  %v544_v29 = vpop.f32.mrf.mxu0 }
  0xaf   :  { %v720_v28 = vadd.f32 %v719_v25, %v631_v23  ;;  %v545_v32 = vadd.f32 %v1545_v56, %v544_v29  ;;  %v633_v33 = vpop.f32.mrf.mxu1 }
  0xb1   :  { %798 = vst [vmem:[%s1822_s3 + $0x8] sm:$0xff] %v720_v28  ;;  %583 = vmatmul.bf16.gmra.mxu0 %v944_v26  ;;  %781 = vmatmul.bf16.gmra.mxu3 %v1000_v27  ;;  %v634_v34 = vadd.f32 %v633_v33, %v545_v32 }
  0xb2   :  { %672 = vmatmul.bf16.gmra.mxu1 %v948_v30 }
  0xb3   :  { %761 = vmatmul.bf16.gmra.mxu2 %v952_v31 }
  0xb4   :  { %v1608_v35 = vpop.f32.mrf.mxu3 }
  0xb6   :  { %v722_v36 = vpop.f32.mrf.mxu2  ;;  %v546_v38 = vpop.f32.mrf.mxu0 }
  0xb7   :  { %v723_v37 = vadd.f32 %v722_v36, %v634_v34  ;;  %v635_v39 = vpop.f32.mrf.mxu1  ;;  %v547_v40 = vadd.f32 %v1545_v56, %v546_v38 }
  0xb9   :  { %799 = vst [vmem:[%s1822_s3 + $0x10] sm:$0xff] %v723_v37  ;;  %v636_v49 = vadd.f32 %v635_v39, %v547_v40 }
  0xbc   :  { %v1638_v50 = vpop.f32.mrf.mxu3 }
  0xbe   :  { %v724_v51 = vpop.f32.mrf.mxu2  ;;  %v549_v55 = vpop.f32.mrf.mxu0 }
  0xbf   :  { %v725_v54 = vadd.f32 %v724_v51, %v636_v49  ;;  %v550_v59 = vadd.f32 %v1545_v56, %v549_v55  ;;  %v638_v60 = vpop.f32.mrf.mxu1 }
  0xc1   :  { %800 = vst [vmem:[%s1822_s3 + $0x18] sm:$0xff] %v725_v54  ;;  %588 = vmatmul.bf16.gmra.mxu0 %v956_v52  ;;  %786 = vmatmul.bf16.gmra.mxu3 %v1012_v53  ;;  %v639_v61 = vadd.f32 %v638_v60, %v550_v59 }
  0xc2   :  { %677 = vmatmul.bf16.gmra.mxu1 %v960_v57 }
  0xc3   :  { %766 = vmatmul.bf16.gmra.mxu2 %v964_v58 }
  0xc4   :  { %v1644_v62 = vpop.f32.mrf.mxu3 }
  0xc6   :  { %v727_v63 = vpop.f32.mrf.mxu2  ;;  %v551_v1 = vpop.f32.mrf.mxu0 }
  0xc7   :  { %v728_v0 = vadd.f32 %v727_v63, %v639_v61  ;;  %v640_v2 = vpop.f32.mrf.mxu1  ;;  %v552_v3 = vadd.f32 %v1545_v56, %v551_v1 }
  0xc9   :  { %801 = vst [vmem:[%s1822_s3 + $0x20] sm:$0xff] %v728_v0  ;;  %v641_v13 = vadd.f32 %v640_v2, %v552_v3 }
  0xcc   :  { %v1674_v14 = vpop.f32.mrf.mxu3 }
  0xce   :  { %v729_v15 = vpop.f32.mrf.mxu2  ;;  %v554_v19 = vpop.f32.mrf.mxu0 }
  0xcf   :  { %v730_v18 = vadd.f32 %v729_v15, %v641_v13  ;;  %v555_v22 = vadd.f32 %v1545_v56, %v554_v19  ;;  %v643_v23 = vpop.f32.mrf.mxu1 }
  0xd1   :  { %802 = vst [vmem:[%s1822_s3 + $0x28] sm:$0xff] %v730_v18  ;;  %593 = vmatmul.bf16.gmra.mxu0 %v968_v16  ;;  %791 = vmatmul.bf16.gmra.mxu3 %v1024_v17  ;;  %v644_v25 = vadd.f32 %v643_v23, %v555_v22 }
  0xd2   :  { %682 = vmatmul.bf16.gmra.mxu1 %v972_v20 }
  0xd3   :  { %771 = vmatmul.bf16.gmra.mxu2 %v976_v21 }
  0xd4   :  { %v1680_v26 = vpop.f32.mrf.mxu3 }
  0xd6   :  { %v732_v27 = vpop.f32.mrf.mxu2  ;;  %v556_v29 = vpop.f32.mrf.mxu0 }
  0xd7   :  { %v733_v28 = vadd.f32 %v732_v27, %v644_v25  ;;  %v645_v30 = vpop.f32.mrf.mxu1  ;;  %v557_v31 = vadd.f32 %v1545_v56, %v556_v29 }
  0xd9   :  { %803 = vst [vmem:[%s1822_s3 + $0x30] sm:$0xff] %v733_v28  ;;  %v646_v32 = vadd.f32 %v645_v30, %v557_v31 }
  0xdc   :  { %v1686_v33 = vpop.f32.mrf.mxu3 }
  0xde   :  { %v734_v34 = vpop.f32.mrf.mxu2  ;;  %v559_v37 = vpop.f32.mrf.mxu0 }
  0xdf   :  { %v735_v36 = vadd.f32 %v734_v34, %v646_v32  ;;  %v560_v38 = vadd.f32 %v1545_v56, %v559_v37  ;;  %v648_v39 = vpop.f32.mrf.mxu1 }
  0xe1   :  { %804 = vst [vmem:[%s1822_s3 + $0x38] sm:$0xff] %v735_v36  ;;  %v649_v40 = vadd.f32 %v648_v39, %v560_v38 }
  0xe4   :  { %v1692_v41 = vpop.f32.mrf.mxu3 }
  0xe6   :  { %v737_v42 = vpop.f32.mrf.mxu2  ;;  %v561_v44 = vpop.f32.mrf.mxu0 }
  0xe7   :  { %v738_v43 = vadd.f32 %v737_v42, %v649_v40  ;;  %v650_v45 = vpop.f32.mrf.mxu1  ;;  %v562_v46 = vadd.f32 %v1545_v56, %v561_v44  ;;  %v600_v42 = vadd.f32 %v1545_v56, %v1572_v9  ;;  %v602_v9 = vadd.f32 %v1545_v56, %v1602_v24 }
  0xe8   :  { %v605_v24 = vadd.f32 %v1545_v56, %v1608_v35  ;;  %v607_v35 = vadd.f32 %v1545_v56, %v1638_v50  ;;  %v610_v50 = vadd.f32 %v1545_v56, %v1644_v62  ;;  %v612_v62 = vadd.f32 %v1545_v56, %v1674_v14 }
  0xe9   :  { %805 = vst [vmem:[%s1822_s3 + $0x40] sm:$0xff] %v738_v43  ;;  %v651_v47 = vadd.f32 %v650_v45, %v562_v46  ;;  %v689_v44 = vadd.f32 %v1692_v41, %v600_v42  ;;  %v615_v14 = vadd.f32 %v1545_v56, %v1680_v26  ;;  %v617_v26 = vadd.f32 %v1545_v56, %v1686_v33 }
  0xec   :  { %v1698_v48 = vpop.f32.mrf.mxu3 }
  0xed   :  { %v691_v41 = vadd.f32 %v1698_v48, %v602_v9 }
  0xee   :  { %v739_v49 = vpop.f32.mrf.mxu2  ;;  %v564_v52 = vpop.f32.mrf.mxu0 }
  0xef   :  { %v740_v51 = vadd.f32 %v739_v49, %v651_v47  ;;  %v565_v53 = vadd.f32 %v1545_v56, %v564_v52  ;;  %v653_v54 = vpop.f32.mrf.mxu1 }
  0xf1   :  { %806 = vst [vmem:[%s1822_s3 + $0x48] sm:$0xff] %v740_v51  ;;  %v654_v55 = vadd.f32 %v653_v54, %v565_v53 }
  0xf4   :  { %v1704_v57 = vpop.f32.mrf.mxu3 }
  0xf6   :  { %v742_v58 = vpop.f32.mrf.mxu2  ;;  %v566_v60 = vpop.f32.mrf.mxu0 }
  0xf7   :  { %v743_v59 = vadd.f32 %v742_v58, %v654_v55  ;;  %v655_v61 = vpop.f32.mrf.mxu1  ;;  %v567_v63 = vadd.f32 %v1545_v56, %v566_v60 }
  0xf9   :  { %807 = vst [vmem:[%s1822_s3 + $0x50] sm:$0xff] %v743_v59  ;;  %v656_v0 = vadd.f32 %v655_v61, %v567_v63 }
  0xfc   :  { %v1710_v1 = vpop.f32.mrf.mxu3 }
  0xfe   :  { %v744_v2 = vpop.f32.mrf.mxu2  ;;  %v569_v4 = vpop.f32.mrf.mxu0 }
  0xff   :  { %v745_v3 = vadd.f32 %v744_v2, %v656_v0  ;;  %v570_v5 = vadd.f32 %v1545_v56, %v569_v4  ;;  %v658_v6 = vpop.f32.mrf.mxu1  ;;  %v694_v2 = vadd.f32 %v1704_v57, %v605_v24  ;;  %v696_v57 = vadd.f32 %v1710_v1, %v607_v35 }
 0x101   :  { %808 = vst [vmem:[%s1822_s3 + $0x58] sm:$0xff] %v745_v3  ;;  %v659_v7 = vadd.f32 %v658_v6, %v570_v5 }
 0x104   :  { %v1716_v8 = vpop.f32.mrf.mxu3 }
 0x106   :  { %v747_v10 = vpop.f32.mrf.mxu2  ;;  %v571_v12 = vpop.f32.mrf.mxu0 }
 0x107   :  { %v748_v11 = vadd.f32 %v747_v10, %v659_v7  ;;  %v660_v13 = vpop.f32.mrf.mxu1  ;;  %v572_v15 = vadd.f32 %v1545_v56, %v571_v12 }
 0x109   :  { %809 = vst [vmem:[%s1822_s3 + $0x60] sm:$0xff] %v748_v11  ;;  %v661_v16 = vadd.f32 %v660_v13, %v572_v15 }
 0x10c   :  { %v1722_v17 = vpop.f32.mrf.mxu3 }
 0x10e   :  { %v749_v18 = vpop.f32.mrf.mxu2  ;;  %v574_v20 = vpop.f32.mrf.mxu0 }
 0x10f   :  { %v750_v19 = vadd.f32 %v749_v18, %v661_v16  ;;  %v575_v21 = vadd.f32 %v1545_v56, %v574_v20  ;;  %v663_v22 = vpop.f32.mrf.mxu1 }
 0x111   :  { %810 = vst [vmem:[%s1822_s3 + $0x68] sm:$0xff] %v750_v19  ;;  %v664_v23 = vadd.f32 %v663_v22, %v575_v21  ;;  %v699_v22 = vadd.f32 %v1716_v8, %v610_v50  ;;  %v701_v8 = vadd.f32 %v1722_v17, %v612_v62 }
 0x114   :  { %v1728_v25 = vpop.f32.mrf.mxu3 }
 0x116   :  { %v752_v27 = vpop.f32.mrf.mxu2  ;;  %v576_v29 = vpop.f32.mrf.mxu0 }
 0x117   :  { %v753_v28 = vadd.f32 %v752_v27, %v664_v23  ;;  %v665_v30 = vpop.f32.mrf.mxu1  ;;  %v577_v31 = vadd.f32 %v1545_v56, %v576_v29 }
 0x119   :  { %811 = vst [vmem:[%s1822_s3 + $0x70] sm:$0xff] %v753_v28  ;;  %v666_v32 = vadd.f32 %v665_v30, %v577_v31 }
 0x11c   :  { %v1734_v34 = vpop.f32.mrf.mxu3 }
 0x11e   :  { %v754_v36 = vpop.f32.mrf.mxu2  ;;  %v579_v38 = vpop.f32.mrf.mxu0 }
 0x11f   :  { %v755_v37 = vadd.f32 %v754_v36, %v666_v32  ;;  %v580_v39 = vadd.f32 %v1545_v56, %v579_v38  ;;  %v668_v40 = vpop.f32.mrf.mxu1 }
 0x121   :  { %812 = vst [vmem:[%s1822_s3 + $0x78] sm:$0xff] %v755_v37  ;;  %v669_v43 = vadd.f32 %v668_v40, %v580_v39 }
 0x124   :  { %v777_v45 = vpop.f32.mrf.mxu3 }
 0x125   :  { %v778_v47 = vadd.f32 %v777_v45, %v689_v44  ;;  %v704_v45 = vadd.f32 %v1728_v25, %v615_v14  ;;  %v706_v25 = vadd.f32 %v1734_v34, %v617_v26 }
 0x126   :  { %v757_v46 = vpop.f32.mrf.mxu2  ;;  %v581_v51 = vpop.f32.mrf.mxu0 }
 0x127   :  { %v758_v49 = vadd.f32 %v757_v46, %v669_v43  ;;  %821 = vst [vmem:[%s1822_s3 + $0xc0] sm:$0xff] %v778_v47  ;;  %v670_v52 = vpop.f32.mrf.mxu1  ;;  %v582_v53 = vadd.f32 %v1545_v56, %v581_v51 }
 0x129   :  { %813 = vst [vmem:[%s1822_s3 + $0x80] sm:$0xff] %v758_v49  ;;  %v671_v54 = vadd.f32 %v670_v52, %v582_v53 }
 0x12c   :  { %v779_v55 = vpop.f32.mrf.mxu3 }
 0x12d   :  { %v780_v59 = vadd.f32 %v779_v55, %v691_v41 }
 0x12e   :  { %v759_v58 = vpop.f32.mrf.mxu2  ;;  %v584_v61 = vpop.f32.mrf.mxu0 }
 0x12f   :  { %v760_v60 = vadd.f32 %v759_v58, %v671_v54  ;;  %822 = vst [vmem:[%s1822_s3 + $0xc8] sm:$0xff] %v780_v59  ;;  %v585_v63 = vadd.f32 %v1545_v56, %v584_v61  ;;  %v673_v0 = vpop.f32.mrf.mxu1 }
 0x131   :  { %814 = vst [vmem:[%s1822_s3 + $0x88] sm:$0xff] %v760_v60  ;;  %v674_v48 = vadd.f32 %v673_v0, %v585_v63 }
 0x134   :  { %v782_v3 = vpop.f32.mrf.mxu3 }
 0x135   :  { %v783_v5 = vadd.f32 %v782_v3, %v694_v2 }
 0x136   :  { %v762_v4 = vpop.f32.mrf.mxu2  ;;  %v586_v7 = vpop.f32.mrf.mxu0 }
 0x137   :  { %v763_v6 = vadd.f32 %v762_v4, %v674_v48  ;;  %823 = vst [vmem:[%s1822_s3 + $0xd0] sm:$0xff] %v783_v5  ;;  %v675_v10 = vpop.f32.mrf.mxu1  ;;  %v587_v11 = vadd.f32 %v1545_v56, %v586_v7 }
 0x139   :  { %815 = vst [vmem:[%s1822_s3 + $0x90] sm:$0xff] %v763_v6  ;;  %v676_v12 = vadd.f32 %v675_v10, %v587_v11 }
 0x13c   :  { %v784_v13 = vpop.f32.mrf.mxu3 }
 0x13d   :  { %v785_v16 = vadd.f32 %v784_v13, %v696_v57 }
 0x13e   :  { %v764_v15 = vpop.f32.mrf.mxu2  ;;  %v589_v19 = vpop.f32.mrf.mxu0 }
 0x13f   :  { %v765_v18 = vadd.f32 %v764_v15, %v676_v12  ;;  %824 = vst [vmem:[%s1822_s3 + $0xd8] sm:$0xff] %v785_v16  ;;  %v590_v20 = vadd.f32 %v1545_v56, %v589_v19  ;;  %v678_v21 = vpop.f32.mrf.mxu1 }
 0x141   :  { %816 = vst [vmem:[%s1822_s3 + $0x98] sm:$0xff] %v765_v18  ;;  %v679_v1 = vadd.f32 %v678_v21, %v590_v20 }
 0x144   :  { %v787_v23 = vpop.f32.mrf.mxu3 }
 0x145   :  { %v788_v28 = vadd.f32 %v787_v23, %v699_v22 }
 0x146   :  { %v767_v27 = vpop.f32.mrf.mxu2  ;;  %v591_v30 = vpop.f32.mrf.mxu0 }
 0x147   :  { %v768_v29 = vadd.f32 %v767_v27, %v679_v1  ;;  %825 = vst [vmem:[%s1822_s3 + $0xe0] sm:$0xff] %v788_v28  ;;  %v680_v31 = vpop.f32.mrf.mxu1  ;;  %v592_v32 = vadd.f32 %v1545_v56, %v591_v30 }
 0x149   :  { %817 = vst [vmem:[%s1822_s3 + $0xa0] sm:$0xff] %v768_v29  ;;  %v681_v36 = vadd.f32 %v680_v31, %v592_v32 }
 0x14c   :  { %v789_v37 = vpop.f32.mrf.mxu3 }
 0x14d   :  { %v790_v39 = vadd.f32 %v789_v37, %v701_v8 }
 0x14e   :  { %v769_v38 = vpop.f32.mrf.mxu2  ;;  %v594_v42 = vpop.f32.mrf.mxu0 }
 0x14f   :  { %v770_v40 = vadd.f32 %v769_v38, %v681_v36  ;;  %826 = vst [vmem:[%s1822_s3 + $0xe8] sm:$0xff] %v790_v39  ;;  %v595_v43 = vadd.f32 %v1545_v56, %v594_v42  ;;  %v683_v17 = vpop.f32.mrf.mxu1 }
 0x151   :  { %818 = vst [vmem:[%s1822_s3 + $0xa8] sm:$0xff] %v770_v40  ;;  %v684_v44 = vadd.f32 %v683_v17, %v595_v43 }
 0x154   :  { %v792_v46 = vpop.f32.mrf.mxu3 }
 0x155   :  { %v793_v49 = vadd.f32 %v792_v46, %v704_v45 }
 0x156   :  { %v772_v47 = vpop.f32.mrf.mxu2  ;;  %v596_v52 = vpop.f32.mrf.mxu0 }
 0x157   :  { %v773_v51 = vadd.f32 %v772_v47, %v684_v44  ;;  %827 = vst [vmem:[%s1822_s3 + $0xf0] sm:$0xff] %v793_v49  ;;  %v597_v53 = vadd.f32 %v1545_v56, %v596_v52  ;;  %v685_v9 = vpop.f32.mrf.mxu1 }
 0x159   :  { %819 = vst [vmem:[%s1822_s3 + $0xb0] sm:$0xff] %v773_v51  ;;  %v686_v41 = vadd.f32 %v685_v9, %v597_v53 }
 0x15c   :  { %v794_v54 = vpop.f32.mrf.mxu3 }
 0x15d   :  { %v795_v58 = vadd.f32 %v794_v54, %v706_v25 }
 0x15e   :  { %v774_v55 = vpop.f32.mrf.mxu2 }
 0x15f   :  { %v775_v59 = vadd.f32 %v774_v55, %v686_v41  ;;  %828 = vst [vmem:[%s1822_s3 + $0xf8] sm:$0xff] %v795_v58 }
 0x161   :  { %820 = vst [vmem:[%s1822_s3 + $0xb8] sm:$0xff] %v775_v59 }

// kernel: aesfa_forward.32
= control target key start
LH: loop header
LB: loop body
LE: loop exit
PB: predicated region body
PF: predicated region fallthrough
CT: control target
= control target key end

     0   :  { %s1915_s1 = inlined_call_operand.vmem [shape: bf16[384,128], index: 1, kind: input, shape index: {}]   ;;  %s1916_s2 = inlined_call_operand.vmem [shape: f32[1,128], index: 2, kind: input, shape index: {}]   ;;  %s1917_s0 = inlined_call_operand.vmem [shape: bf16[256,384], index: 0, kind: input, shape index: {}]   ;;  %s1918_s3 = inlined_call_operand.vmem [shape: f32[256,128], index: 3, kind: output, shape index: {}]  }
   0x1   :  { %v1272_v0 = vld [vmem:[%s1915_s1 + $0x38] sm:$0xff]  ;;  %v1271_v3 = vld [vmem:[%s1915_s1 + $0x30] sm:$0xff]  ;;  %v1270_v6 = vld [vmem:[%s1915_s1 + $0x28] sm:$0xff] }
   0x2   :  { %v1340_v1 = vld [vmem:[%s1915_s1 + $0x78] sm:$0xff]  ;;  %530 = vmatpush.bf16.msra.mxu0 %v1272_v0  ;;  %1289 = vmatpush.bf16.msra.mxu3 %v1272_v0  ;;  %v1355_v4 = vld [vmem:[%s1915_s1 + $0x70] sm:$0xff]  ;;  %v1278_v7 = vld [vmem:[%s1915_s1 + $0x68] sm:$0xff] }
   0x3   :  { %v1345_v2 = vld [vmem:[%s1915_s1 + $0xb8] sm:$0xff]  ;;  %619 = vmatpush.bf16.msra.mxu1 %v1340_v1  ;;  %v1360_v5 = vld [vmem:[%s1915_s1 + $0xb0] sm:$0xff]  ;;  %v1373_v8 = vld [vmem:[%s1915_s1 + $0xa8] sm:$0xff] }
   0x4   :  { %708 = vmatpush.bf16.msra.mxu2 %v1345_v2  ;;  %v1269_v9 = vld [vmem:[%s1915_s1 + $0x20] sm:$0xff]  ;;  %v1268_v12 = vld [vmem:[%s1915_s1 + $0x18] sm:$0xff]  ;;  %v1267_v15 = vld [vmem:[%s1915_s1 + $0x10] sm:$0xff] }
   0x5   :  { %v1277_v10 = vld [vmem:[%s1915_s1 + $0x60] sm:$0xff]  ;;  %v1276_v13 = vld [vmem:[%s1915_s1 + $0x58] sm:$0xff]  ;;  %v1275_v16 = vld [vmem:[%s1915_s1 + $0x50] sm:$0xff] }
   0x6   :  { %531 = vmatpush.bf16.msra.mxu0 %v1271_v3  ;;  %1290 = vmatpush.bf16.msra.mxu3 %v1271_v3  ;;  %v1385_v11 = vld [vmem:[%s1915_s1 + $0xa0] sm:$0xff]  ;;  %v1397_v14 = vld [vmem:[%s1915_s1 + $0x98] sm:$0xff]  ;;  %v1409_v17 = vld [vmem:[%s1915_s1 + $0x90] sm:$0xff] }
   0x7   :  { %620 = vmatpush.bf16.msra.mxu1 %v1355_v4  ;;  %v1266_v18 = vld [vmem:[%s1915_s1 + $0x8] sm:$0xff]  ;;  %v1265_v21 = vld [vmem:[%s1915_s1] sm:$0xff]  ;;  %v933_v29 = vld [vmem:[%s1917_s0 + $0xc] sm:$0xf0] }
   0x8   :  { %709 = vmatpush.bf16.msra.mxu2 %v1360_v5  ;;  %v1274_v19 = vld [vmem:[%s1915_s1 + $0x48] sm:$0xff]  ;;  %v1273_v22 = vld [vmem:[%s1915_s1 + $0x40] sm:$0xff]  ;;  %v1219_v31 = vld [vmem:[%s1917_s0 + $0x10] sm:$0xf0] }
   0x9   :  { %v1421_v20 = vld [vmem:[%s1915_s1 + $0x88] sm:$0xff]  ;;  %v1432_v23 = vld [vmem:[%s1915_s1 + $0x80] sm:$0xff]  ;;  %v943_v36 = vld [vmem:[%s1917_s0 + $0x18] sm:$0xf] }
   0xa   :  { %532 = vmatpush.bf16.msra.mxu0 %v1270_v6  ;;  %1291 = vmatpush.bf16.msra.mxu3 %v1270_v6  ;;  %v931_v24 = vld [vmem:[%s1917_s0] sm:$0xf]  ;;  %v1218_v25 = vld [vmem:[%s1917_s0 + $0x8] sm:$0xf0]  ;;  %v1217_v28 = vld [vmem:[%s1917_s0 + $0x4] sm:$0xf] }
   0xb   :  { %621 = vmatpush.bf16.msra.mxu1 %v1278_v7  ;;  %v1075_v26 = vld [vmem:[%s1917_s0 + $0x120] sm:$0xf]  ;;  %v1254_v27 = vld [vmem:[%s1917_s0 + $0x128] sm:$0xf0]  ;;  %v939_v30 = vld [vmem:[%s1917_s0 + $0x8] sm:$0xf]  ;;  %v932_v32 = vor.u32 %v1218_v25, %v931_v24  ;;  %v936_v34 = vor.u32 %v1217_v28, %v933_v29 }
   0xc   :  { %710 = vmatpush.bf16.msra.mxu2 %v1373_v8  ;;  %v1076_v33 = vor.u32 %v1254_v27, %v1075_v26  ;;  %v940_v35 = vor.u32 %v1219_v31, %v939_v30  ;;  %v1221_v37 = vld [vmem:[%s1917_s0 + $0x20] sm:$0xf0]  ;;  %v1087_v38 = vld [vmem:[%s1917_s0 + $0x138] sm:$0xf]  ;;  %v1220_v40 = vld [vmem:[%s1917_s0 + $0x1c] sm:$0xf] }
   0xd   :  { %v1257_v39 = vld [vmem:[%s1917_s0 + $0x140] sm:$0xf0]  ;;  %v945_v41 = vld [vmem:[%s1917_s0 + $0x24] sm:$0xf0]  ;;  %v951_v42 = vld [vmem:[%s1917_s0 + $0x20] sm:$0xf]  ;;  %v944_v44 = vor.u32 %v1221_v37, %v943_v36 }
   0xe   :  { %533 = vmatpush.bf16.msra.mxu0 %v1269_v9  ;;  %1292 = vmatpush.bf16.msra.mxu3 %v1269_v9  ;;  %v1222_v43 = vld [vmem:[%s1917_s0 + $0x28] sm:$0xf0]  ;;  %v1088_v45 = vor.u32 %v1257_v39, %v1087_v38  ;;  %v948_v46 = vor.u32 %v1220_v40, %v945_v41  ;;  %v955_v48 = vld [vmem:[%s1917_s0 + $0x30] sm:$0xf]  ;;  %v1224_v49 = vld [vmem:[%s1917_s0 + $0x38] sm:$0xf0] }
   0xf   :  { %622 = vmatpush.bf16.msra.mxu1 %v1277_v10  ;;  %v952_v47 = vor.u32 %v1222_v43, %v951_v42  ;;  %v1099_v50 = vld [vmem:[%s1917_s0 + $0x150] sm:$0xf]  ;;  %v1260_v51 = vld [vmem:[%s1917_s0 + $0x158] sm:$0xf0]  ;;  %v1223_v52 = vld [vmem:[%s1917_s0 + $0x34] sm:$0xf]  ;;  %v956_v56 = vor.u32 %v1224_v49, %v955_v48 }
  0x10   :  { %711 = vmatpush.bf16.msra.mxu2 %v1385_v11  ;;  %v957_v53 = vld [vmem:[%s1917_s0 + $0x3c] sm:$0xf0]  ;;  %v963_v54 = vld [vmem:[%s1917_s0 + $0x38] sm:$0xf]  ;;  %v1225_v55 = vld [vmem:[%s1917_s0 + $0x40] sm:$0xf0]  ;;  %v1100_v57 = vor.u32 %v1260_v51, %v1099_v50 }
  0x11   :  { %v960_v58 = vor.u32 %v1223_v52, %v957_v53  ;;  %v964_v59 = vor.u32 %v1225_v55, %v963_v54  ;;  %v967_v60 = vld [vmem:[%s1917_s0 + $0x48] sm:$0xf]  ;;  %v1227_v61 = vld [vmem:[%s1917_s0 + $0x50] sm:$0xf0]  ;;  %v1226_v0 = vld [vmem:[%s1917_s0 + $0x4c] sm:$0xf] }
  0x12   :  { %534 = vmatpush.bf16.msra.mxu0 %v1268_v12  ;;  %1293 = vmatpush.bf16.msra.mxu3 %v1268_v12  ;;  %v1111_v62 = vld [vmem:[%s1917_s0 + $0x168] sm:$0xf]  ;;  %v1263_v63 = vld [vmem:[%s1917_s0 + $0x170] sm:$0xf0]  ;;  %v1228_v3 = vld [vmem:[%s1917_s0 + $0x58] sm:$0xf0] }
  0x13   :  { %623 = vmatpush.bf16.msra.mxu1 %v1276_v13  ;;  %v1230_v9 = vld [vmem:[%s1917_s0 + $0x68] sm:$0xf0]  ;;  %v1077_v12 = vld [vmem:[%s1917_s0 + $0x12c] sm:$0xf0]  ;;  %v1089_v24 = vld [vmem:[%s1917_s0 + $0x144] sm:$0xf0] }
  0x14   :  { %712 = vmatpush.bf16.msra.mxu2 %v1397_v14  ;;  %v993_v25 = vld [vmem:[%s1917_s0 + $0x84] sm:$0xf0]  ;;  %v999_v26 = vld [vmem:[%s1917_s0 + $0x80] sm:$0xf]  ;;  %v1234_v27 = vld [vmem:[%s1917_s0 + $0x88] sm:$0xf0] }
  0x15   :  { %v1000_v31 = vor.u32 %v1234_v27, %v999_v26  ;;  %v1101_v36 = vld [vmem:[%s1917_s0 + $0x15c] sm:$0xf0]  ;;  %v1011_v38 = vld [vmem:[%s1917_s0 + $0x98] sm:$0xf]  ;;  %v1237_v39 = vld [vmem:[%s1917_s0 + $0xa0] sm:$0xf0] }
  0x16   :  { %535 = vmatpush.bf16.msra.mxu0 %v1267_v15  ;;  %1294 = vmatpush.bf16.msra.mxu3 %v1267_v15  ;;  %v1231_v15 = vld [vmem:[%s1917_s0 + $0x70] sm:$0xf0]  ;;  %v1005_v37 = vld [vmem:[%s1917_s0 + $0x9c] sm:$0xf0]  ;;  %v1012_v43 = vor.u32 %v1237_v39, %v1011_v38  ;;  %v1113_v48 = vld [vmem:[%s1917_s0 + $0x174] sm:$0xf0] }
  0x17   :  { %624 = vmatpush.bf16.msra.mxu1 %v1275_v16  ;;  %v1017_v49 = vld [vmem:[%s1917_s0 + $0xb4] sm:$0xf0]  ;;  %v1023_v50 = vld [vmem:[%s1917_s0 + $0xb0] sm:$0xf]  ;;  %v1240_v51 = vld [vmem:[%s1917_s0 + $0xb8] sm:$0xf0] }
  0x18   :  { %713 = vmatpush.bf16.msra.mxu2 %v1409_v17  ;;  %v1024_v55 = vor.u32 %v1240_v51, %v1023_v50  ;;  %v1053_v50 = vld [vmem:[%s1917_s0 + $0xfc] sm:$0xf0]  ;;  %v1107_v51 = vld [vmem:[%s1917_s0 + $0x158] sm:$0xf] }
  0x1a   :  { %536 = vmatpush.bf16.msra.mxu0 %v1266_v18  ;;  %1295 = vmatpush.bf16.msra.mxu3 %v1266_v18 }
  0x1b   :  { %625 = vmatpush.bf16.msra.mxu1 %v1274_v19 }
  0x1c   :  { %714 = vmatpush.bf16.msra.mxu2 %v1421_v20 }
  0x1e   :  { %537 = vmatpush.bf16.msra.mxu0 %v1265_v21  ;;  %1296 = vmatpush.bf16.msra.mxu3 %v1265_v21  ;;  %v1233_v21 = vld [vmem:[%s1917_s0 + $0x80] sm:$0xf0] }
  0x1f   :  { %626 = vmatpush.bf16.msra.mxu1 %v1273_v22 }
  0x20   :  { %715 = vmatpush.bf16.msra.mxu2 %v1432_v23 }
  0x21   :  { %538 = vmatmul.bf16.vlgmr.msra.gmra.mxu0 %v932_v32  ;;  %598 = vmatmul.bf16.vlgmr.msra.gmra.mxu3 %v1076_v33  ;;  %v1003_v32 = vld [vmem:[%s1917_s0 + $0x90] sm:$0xf]  ;;  %v1236_v33 = vld [vmem:[%s1917_s0 + $0x98] sm:$0xf0] }
  0x22   :  { %1297 = vmatpush.bf16.msrb.mxu3 %v1340_v1  ;;  %627 = vmatmul.bf16.vlgmr.msra.gmra.mxu1 %v936_v34  ;;  %v969_v1 = vld [vmem:[%s1917_s0 + $0x54] sm:$0xf0]  ;;  %v1235_v34 = vld [vmem:[%s1917_s0 + $0x94] sm:$0xf]  ;;  %v1004_v40 = vor.u32 %v1236_v33, %v1003_v32 }
  0x23   :  { %716 = vmatmul.bf16.vlgmr.msra.gmra.mxu2 %v940_v35  ;;  %v972_v6 = vor.u32 %v1226_v0, %v969_v1  ;;  %v1259_v35 = vld [vmem:[%s1917_s0 + $0x154] sm:$0xf]  ;;  %v1008_v42 = vor.u32 %v1235_v34, %v1005_v37 }
  0x24   :  { %v1104_v41 = vor.u32 %v1259_v35, %v1101_v36  ;;  %v1243_v0 = vld [vmem:[%s1917_s0 + $0xd0] sm:$0xf0] }
  0x26   :  { %1298 = vmatpush.bf16.msrb.mxu3 %v1355_v4  ;;  %v968_v4 = vor.u32 %v1227_v61, %v967_v60  ;;  %v1083_v60 = vld [vmem:[%s1917_s0 + $0x128] sm:$0xf]  ;;  %v1255_v61 = vld [vmem:[%s1917_s0 + $0x130] sm:$0xf0] }
  0x2a   :  { %1299 = vmatpush.bf16.msrb.mxu3 %v1278_v7 }
  0x2e   :  { %1300 = vmatpush.bf16.msrb.mxu3 %v1277_v10  ;;  %v1229_v10 = vld [vmem:[%s1917_s0 + $0x64] sm:$0xf] }
  0x31   :  { %543 = vmatmul.bf16.gmra.mxu0 %v944_v44  ;;  %603 = vmatmul.bf16.gmra.mxu3 %v1088_v45  ;;  %v1015_v44 = vld [vmem:[%s1917_s0 + $0xa8] sm:$0xf]  ;;  %v1239_v45 = vld [vmem:[%s1917_s0 + $0xb0] sm:$0xf0] }
  0x32   :  { %1301 = vmatpush.bf16.msrb.mxu3 %v1276_v13  ;;  %632 = vmatmul.bf16.gmra.mxu1 %v948_v46  ;;  %v981_v13 = vld [vmem:[%s1917_s0 + $0x6c] sm:$0xf0]  ;;  %v1238_v46 = vld [vmem:[%s1917_s0 + $0xac] sm:$0xf]  ;;  %v1016_v52 = vor.u32 %v1239_v45, %v1015_v44 }
  0x33   :  { %721 = vmatmul.bf16.gmra.mxu2 %v952_v47  ;;  %v984_v18 = vor.u32 %v1229_v10, %v981_v13  ;;  %v1262_v47 = vld [vmem:[%s1917_s0 + $0x16c] sm:$0xf]  ;;  %v1020_v54 = vor.u32 %v1238_v46, %v1017_v49  ;;  %v1051_v46 = vld [vmem:[%s1917_s0 + $0xf0] sm:$0xf] }
  0x34   :  { %v1116_v53 = vor.u32 %v1262_v47, %v1113_v48  ;;  %v1248_v47 = vld [vmem:[%s1917_s0 + $0xf8] sm:$0xf0]  ;;  %v1247_v48 = vld [vmem:[%s1917_s0 + $0xf4] sm:$0xf] }
  0x36   :  { %1302 = vmatpush.bf16.msrb.mxu3 %v1275_v16 }
  0x3a   :  { %1303 = vmatpush.bf16.msrb.mxu3 %v1274_v19 }
  0x3e   :  { %1304 = vmatpush.bf16.msrb.mxu3 %v1273_v22  ;;  %v1232_v22 = vld [vmem:[%s1917_s0 + $0x7c] sm:$0xf] }
  0x3f   :  { %v996_v30 = vor.u32 %v1232_v22, %v993_v25  ;;  %v1041_v22 = vld [vmem:[%s1917_s0 + $0xe4] sm:$0xf0] }
  0x41   :  { %548 = vmatmul.bf16.gmra.mxu0 %v956_v56  ;;  %608 = vmatmul.bf16.gmra.mxu3 %v1100_v57  ;;  %v1641_v56 = vld [vmem:[%s1916_s2] ss:$0 sm:$0xff] }
  0x42   :  { %1305 = vmatpush.bf16.msra.mxu3 %v1345_v2  ;;  %637 = vmatmul.bf16.gmra.mxu1 %v960_v58  ;;  %v975_v2 = vld [vmem:[%s1917_s0 + $0x50] sm:$0xf]  ;;  %v1027_v57 = vld [vmem:[%s1917_s0 + $0xc0] sm:$0xf]  ;;  %v1242_v58 = vld [vmem:[%s1917_s0 + $0xc8] sm:$0xf0] }
  0x43   :  { %726 = vmatmul.bf16.gmra.mxu2 %v964_v59  ;;  %v976_v7 = vor.u32 %v1228_v3, %v975_v2  ;;  %v1241_v59 = vld [vmem:[%s1917_s0 + $0xc4] sm:$0xf]  ;;  %v1028_v1 = vor.u32 %v1242_v58, %v1027_v57  ;;  %v1084_v2 = vor.u32 %v1255_v61, %v1083_v60 }
  0x46   :  { %1306 = vmatpush.bf16.msra.mxu3 %v1360_v5  ;;  %v1112_v5 = vor.u32 %v1263_v63, %v1111_v62  ;;  %v1029_v62 = vld [vmem:[%s1917_s0 + $0xcc] sm:$0xf0]  ;;  %v1035_v63 = vld [vmem:[%s1917_s0 + $0xc8] sm:$0xf] }
  0x4a   :  { %1307 = vmatpush.bf16.msra.mxu3 %v1373_v8  ;;  %v979_v8 = vld [vmem:[%s1917_s0 + $0x60] sm:$0xf] }
  0x4b   :  { %v980_v16 = vor.u32 %v1230_v9, %v979_v8 }
  0x4e   :  { %1308 = vmatpush.bf16.msra.mxu3 %v1385_v11  ;;  %v1253_v11 = vld [vmem:[%s1917_s0 + $0x124] sm:$0xf] }
  0x51   :  { %553 = vmatmul.bf16.gmra.mxu0 %v968_v4  ;;  %613 = vmatmul.bf16.gmra.mxu3 %v1112_v5  ;;  %v1032_v4 = vor.u32 %v1241_v59, %v1029_v62  ;;  %v1036_v5 = vor.u32 %v1243_v0, %v1035_v63  ;;  %v1052_v59 = vor.u32 %v1248_v47, %v1051_v46 }
  0x52   :  { %1309 = vmatpush.bf16.msra.mxu3 %v1397_v14  ;;  %642 = vmatmul.bf16.gmra.mxu1 %v972_v6  ;;  %v987_v14 = vld [vmem:[%s1917_s0 + $0x68] sm:$0xf]  ;;  %v1056_v63 = vor.u32 %v1247_v48, %v1053_v50 }
  0x53   :  { %731 = vmatmul.bf16.gmra.mxu2 %v976_v7  ;;  %v988_v19 = vor.u32 %v1231_v15, %v987_v14 }
  0x56   :  { %1310 = vmatpush.bf16.msra.mxu3 %v1409_v17  ;;  %v1080_v17 = vor.u32 %v1253_v11, %v1077_v12 }
  0x5a   :  { %1311 = vmatpush.bf16.msra.mxu3 %v1421_v20  ;;  %v991_v20 = vld [vmem:[%s1917_s0 + $0x78] sm:$0xf] }
  0x5b   :  { %v992_v28 = vor.u32 %v1233_v21, %v991_v20  ;;  %v1095_v20 = vld [vmem:[%s1917_s0 + $0x140] sm:$0xf]  ;;  %v1258_v21 = vld [vmem:[%s1917_s0 + $0x148] sm:$0xf0] }
  0x5e   :  { %1312 = vmatpush.bf16.msra.mxu3 %v1432_v23  ;;  %v1256_v23 = vld [vmem:[%s1917_s0 + $0x13c] sm:$0xf] }
  0x5f   :  { %v1092_v29 = vor.u32 %v1256_v23, %v1089_v24  ;;  %v1047_v23 = vld [vmem:[%s1917_s0 + $0xe0] sm:$0xf]  ;;  %v1246_v24 = vld [vmem:[%s1917_s0 + $0xe8] sm:$0xf0] }
  0x60   :  { %v1048_v33 = vor.u32 %v1246_v24, %v1047_v23 }
  0x61   :  { %558 = vmatmul.bf16.gmra.mxu0 %v980_v16  ;;  %687 = vmatmul.bf16.vlgmr.msrb.gmra.mxu3 %v1080_v17  ;;  %v1039_v16 = vld [vmem:[%s1917_s0 + $0xd8] sm:$0xf]  ;;  %v1245_v17 = vld [vmem:[%s1917_s0 + $0xe0] sm:$0xf0] }
  0x62   :  { %647 = vmatmul.bf16.gmra.mxu1 %v984_v18 }
  0x63   :  { %736 = vmatmul.bf16.gmra.mxu2 %v988_v19  ;;  %v1244_v19 = vld [vmem:[%s1917_s0 + $0xdc] sm:$0xf] }
  0x64   :  { %v1044_v32 = vor.u32 %v1244_v19, %v1041_v22  ;;  %v1119_v19 = vld [vmem:[%s1917_s0 + $0x170] sm:$0xf]  ;;  %v1252_v22 = vld [vmem:[%s1917_s0 + $0x118] sm:$0xf0] }
  0x71   :  { %563 = vmatmul.bf16.gmra.mxu0 %v992_v28  ;;  %692 = vmatmul.bf16.gmra.mxu3 %v1092_v29  ;;  %v1040_v28 = vor.u32 %v1245_v17, %v1039_v16  ;;  %v1096_v29 = vor.u32 %v1258_v21, %v1095_v20  ;;  %v1250_v16 = vld [vmem:[%s1917_s0 + $0x10c] sm:$0xf]  ;;  %v1264_v20 = vld [vmem:[%s1917_s0 + $0x178] sm:$0xf0]  ;;  %v1071_v21 = vld [vmem:[%s1917_s0 + $0x110] sm:$0xf] }
  0x72   :  { %652 = vmatmul.bf16.gmra.mxu1 %v996_v30 }
  0x73   :  { %741 = vmatmul.bf16.gmra.mxu2 %v1000_v31 }
  0x81   :  { %568 = vmatmul.bf16.gmra.mxu0 %v1004_v40  ;;  %697 = vmatmul.bf16.gmra.mxu3 %v1104_v41 }
  0x82   :  { %657 = vmatmul.bf16.gmra.mxu1 %v1008_v42 }
  0x83   :  { %746 = vmatmul.bf16.gmra.mxu2 %v1012_v43 }
  0x91   :  { %573 = vmatmul.bf16.gmra.mxu0 %v1016_v52  ;;  %702 = vmatmul.bf16.gmra.mxu3 %v1116_v53  ;;  %v1261_v52 = vld [vmem:[%s1917_s0 + $0x160] sm:$0xf0]  ;;  %v1059_v53 = vld [vmem:[%s1917_s0 + $0xf8] sm:$0xf] }
  0x92   :  { %662 = vmatmul.bf16.gmra.mxu1 %v1020_v54  ;;  %v1249_v54 = vld [vmem:[%s1917_s0 + $0x100] sm:$0xf0]  ;;  %v1108_v60 = vor.u32 %v1261_v52, %v1107_v51 }
  0x93   :  { %751 = vmatmul.bf16.gmra.mxu2 %v1024_v55  ;;  %v1060_v0 = vor.u32 %v1249_v54, %v1059_v53 }
  0x9e   :  { %v539_v3 = vpop.f32.mrf.mxu0 }
  0x9f   :  { %v540_v6 = vadd.f32 %v1641_v56, %v539_v3  ;;  %v628_v7 = vpop.f32.mrf.mxu1 }
  0xa1   :  { %578 = vmatmul.bf16.gmra.mxu0 %v1028_v1  ;;  %776 = vmatmul.bf16.vlgmr.msra.gmra.mxu3 %v1084_v2  ;;  %v629_v8 = vadd.f32 %v628_v7, %v540_v6 }
  0xa2   :  { %667 = vmatmul.bf16.gmra.mxu1 %v1032_v4 }
  0xa3   :  { %756 = vmatmul.bf16.gmra.mxu2 %v1036_v5 }
  0xa4   :  { %v1668_v9 = vpop.f32.mrf.mxu3 }
  0xa6   :  { %v717_v10 = vpop.f32.mrf.mxu2  ;;  %v541_v12 = vpop.f32.mrf.mxu0 }
  0xa7   :  { %v718_v11 = vadd.f32 %v717_v10, %v629_v8  ;;  %v630_v13 = vpop.f32.mrf.mxu1  ;;  %v542_v15 = vadd.f32 %v1641_v56, %v541_v12 }
  0xa9   :  { %vm797_vm0 = vcmp.ge.f32.partialorder %v718_v11, 0.0  ;;  %v829_v14 = vmul.f32 0.01, %v718_v11  ;;  %v631_v25 = vadd.f32 %v630_v13, %v542_v15  ;;  %v1251_v15 = vld [vmem:[%s1917_s0 + $0x110] sm:$0xf0] }
  0xab   :  { %v861_v18 = vsel %vm797_vm0, %v718_v11, %v829_v14  ;;  %v1063_v14 = vld [vmem:[%s1917_s0 + $0x108] sm:$0xf] }
  0xac   :  { %893 = vst [vmem:[%s1918_s3] sm:$0xff] %v861_v18  ;;  %v1698_v26 = vpop.f32.mrf.mxu3  ;;  %v1065_v18 = vld [vmem:[%s1917_s0 + $0x114] sm:$0xf0] }
  0xae   :  { %v719_v27 = vpop.f32.mrf.mxu2  ;;  %v544_v31 = vpop.f32.mrf.mxu0 }
  0xaf   :  { %v720_v30 = vadd.f32 %v719_v27, %v631_v25  ;;  %v545_v34 = vadd.f32 %v1641_v56, %v544_v31  ;;  %v633_v35 = vpop.f32.mrf.mxu1  ;;  %v1064_v27 = vor.u32 %v1251_v15, %v1063_v14  ;;  %v1068_v31 = vor.u32 %v1250_v16, %v1065_v18 }
  0xb1   :  { %vm798_vm1 = vcmp.ge.f32.partialorder %v720_v30, 0.0  ;;  %v830_v36 = vmul.f32 0.01, %v720_v30  ;;  %583 = vmatmul.bf16.gmra.mxu0 %v1040_v28  ;;  %781 = vmatmul.bf16.gmra.mxu3 %v1096_v29  ;;  %v634_v38 = vadd.f32 %v633_v35, %v545_v34  ;;  %v1120_v28 = vor.u32 %v1264_v20, %v1119_v19 }
  0xb2   :  { %672 = vmatmul.bf16.gmra.mxu1 %v1044_v32  ;;  %v1072_v32 = vor.u32 %v1252_v22, %v1071_v21 }
  0xb3   :  { %v862_v37 = vsel %vm798_vm1, %v720_v30, %v830_v36  ;;  %761 = vmatmul.bf16.gmra.mxu2 %v1048_v33 }
  0xb4   :  { %894 = vst [vmem:[%s1918_s3 + $0x8] sm:$0xff] %v862_v37  ;;  %v1704_v39 = vpop.f32.mrf.mxu3 }
  0xb6   :  { %v722_v40 = vpop.f32.mrf.mxu2  ;;  %v546_v42 = vpop.f32.mrf.mxu0 }
  0xb7   :  { %v723_v41 = vadd.f32 %v722_v40, %v634_v38  ;;  %v635_v43 = vpop.f32.mrf.mxu1  ;;  %v547_v45 = vadd.f32 %v1641_v56, %v546_v42 }
  0xb9   :  { %vm799_vm2 = vcmp.ge.f32.partialorder %v723_v41, 0.0  ;;  %v831_v44 = vmul.f32 0.01, %v723_v41  ;;  %v636_v55 = vadd.f32 %v635_v43, %v547_v45 }
  0xbb   :  { %v863_v49 = vsel %vm799_vm2, %v723_v41, %v831_v44 }
  0xbc   :  { %895 = vst [vmem:[%s1918_s3 + $0x10] sm:$0xff] %v863_v49  ;;  %v1734_v57 = vpop.f32.mrf.mxu3 }
  0xbe   :  { %v724_v58 = vpop.f32.mrf.mxu2  ;;  %v549_v62 = vpop.f32.mrf.mxu0 }
  0xbf   :  { %v725_v61 = vadd.f32 %v724_v58, %v636_v55  ;;  %v550_v1 = vadd.f32 %v1641_v56, %v549_v62  ;;  %v638_v2 = vpop.f32.mrf.mxu1 }
  0xc1   :  { %vm800_vm3 = vcmp.ge.f32.partialorder %v725_v61, 0.0  ;;  %v832_v3 = vmul.f32 0.01, %v725_v61  ;;  %588 = vmatmul.bf16.gmra.mxu0 %v1052_v59  ;;  %786 = vmatmul.bf16.gmra.mxu3 %v1108_v60  ;;  %v639_v5 = vadd.f32 %v638_v2, %v550_v1 }
  0xc2   :  { %677 = vmatmul.bf16.gmra.mxu1 %v1056_v63 }
  0xc3   :  { %v864_v4 = vsel %vm800_vm3, %v725_v61, %v832_v3  ;;  %766 = vmatmul.bf16.gmra.mxu2 %v1060_v0 }
  0xc4   :  { %896 = vst [vmem:[%s1918_s3 + $0x18] sm:$0xff] %v864_v4  ;;  %v1740_v6 = vpop.f32.mrf.mxu3 }
  0xc6   :  { %v727_v7 = vpop.f32.mrf.mxu2  ;;  %v551_v10 = vpop.f32.mrf.mxu0 }
  0xc7   :  { %v728_v8 = vadd.f32 %v727_v7, %v639_v5  ;;  %v640_v11 = vpop.f32.mrf.mxu1  ;;  %v552_v13 = vadd.f32 %v1641_v56, %v551_v10 }
  0xc9   :  { %vm801_vm4 = vcmp.ge.f32.partialorder %v728_v8, 0.0  ;;  %v833_v12 = vmul.f32 0.01, %v728_v8  ;;  %v641_v23 = vadd.f32 %v640_v11, %v552_v13 }
  0xcb   :  { %v865_v17 = vsel %vm801_vm4, %v728_v8, %v833_v12 }
  0xcc   :  { %897 = vst [vmem:[%s1918_s3 + $0x20] sm:$0xff] %v865_v17  ;;  %v1770_v24 = vpop.f32.mrf.mxu3 }
  0xce   :  { %v729_v25 = vpop.f32.mrf.mxu2  ;;  %v554_v30 = vpop.f32.mrf.mxu0 }
  0xcf   :  { %v730_v29 = vadd.f32 %v729_v25, %v641_v23  ;;  %v555_v33 = vadd.f32 %v1641_v56, %v554_v30  ;;  %v643_v34 = vpop.f32.mrf.mxu1 }
  0xd1   :  { %vm802_vm5 = vcmp.ge.f32.partialorder %v730_v29, 0.0  ;;  %v834_v35 = vmul.f32 0.01, %v730_v29  ;;  %593 = vmatmul.bf16.gmra.mxu0 %v1064_v27  ;;  %791 = vmatmul.bf16.gmra.mxu3 %v1120_v28  ;;  %v644_v37 = vadd.f32 %v643_v34, %v555_v33 }
  0xd2   :  { %682 = vmatmul.bf16.gmra.mxu1 %v1068_v31 }
  0xd3   :  { %v866_v36 = vsel %vm802_vm5, %v730_v29, %v834_v35  ;;  %771 = vmatmul.bf16.gmra.mxu2 %v1072_v32 }
  0xd4   :  { %898 = vst [vmem:[%s1918_s3 + $0x28] sm:$0xff] %v866_v36  ;;  %v1776_v38 = vpop.f32.mrf.mxu3 }
  0xd6   :  { %v732_v40 = vpop.f32.mrf.mxu2  ;;  %v556_v42 = vpop.f32.mrf.mxu0 }
  0xd7   :  { %v733_v41 = vadd.f32 %v732_v40, %v644_v37  ;;  %v645_v43 = vpop.f32.mrf.mxu1  ;;  %v557_v45 = vadd.f32 %v1641_v56, %v556_v42 }
  0xd9   :  { %vm803_vm6 = vcmp.ge.f32.partialorder %v733_v41, 0.0  ;;  %v835_v44 = vmul.f32 0.01, %v733_v41  ;;  %v646_v47 = vadd.f32 %v645_v43, %v557_v45 }
  0xdb   :  { %v867_v46 = vsel %vm803_vm6, %v733_v41, %v835_v44 }
  0xdc   :  { %899 = vst [vmem:[%s1918_s3 + $0x30] sm:$0xff] %v867_v46  ;;  %v1782_v48 = vpop.f32.mrf.mxu3 }
  0xde   :  { %v734_v49 = vpop.f32.mrf.mxu2  ;;  %v559_v51 = vpop.f32.mrf.mxu0 }
  0xdf   :  { %v735_v50 = vadd.f32 %v734_v49, %v646_v47  ;;  %v560_v52 = vadd.f32 %v1641_v56, %v559_v51  ;;  %v648_v53 = vpop.f32.mrf.mxu1 }
  0xe1   :  { %vm804_vm7 = vcmp.ge.f32.partialorder %v735_v50, 0.0  ;;  %v836_v54 = vmul.f32 0.01, %v735_v50  ;;  %v649_v58 = vadd.f32 %v648_v53, %v560_v52 }
  0xe3   :  { %v868_v55 = vsel %vm804_vm7, %v735_v50, %v836_v54 }
  0xe4   :  { %900 = vst [vmem:[%s1918_s3 + $0x38] sm:$0xff] %v868_v55  ;;  %v1788_v59 = vpop.f32.mrf.mxu3 }
  0xe6   :  { %v737_v60 = vpop.f32.mrf.mxu2  ;;  %v561_v62 = vpop.f32.mrf.mxu0 }
  0xe7   :  { %v738_v61 = vadd.f32 %v737_v60, %v649_v58  ;;  %v650_v63 = vpop.f32.mrf.mxu1  ;;  %v562_v1 = vadd.f32 %v1641_v56, %v561_v62 }
  0xe9   :  { %vm805_vm8 = vcmp.ge.f32.partialorder %v738_v61, 0.0  ;;  %v837_v0 = vmul.f32 0.01, %v738_v61  ;;  %v651_v3 = vadd.f32 %v650_v63, %v562_v1 }
  0xeb   :  { %v869_v2 = vsel %vm805_vm8, %v738_v61, %v837_v0 }
  0xec   :  { %901 = vst [vmem:[%s1918_s3 + $0x40] sm:$0xff] %v869_v2  ;;  %v1794_v4 = vpop.f32.mrf.mxu3 }
  0xee   :  { %v739_v5 = vpop.f32.mrf.mxu2  ;;  %v564_v8 = vpop.f32.mrf.mxu0 }
  0xef   :  { %v740_v7 = vadd.f32 %v739_v5, %v651_v3  ;;  %v565_v10 = vadd.f32 %v1641_v56, %v564_v8  ;;  %v653_v11 = vpop.f32.mrf.mxu1 }
  0xf1   :  { %vm806_vm9 = vcmp.ge.f32.partialorder %v740_v7, 0.0  ;;  %v838_v12 = vmul.f32 0.01, %v740_v7  ;;  %v654_v14 = vadd.f32 %v653_v11, %v565_v10 }
  0xf3   :  { %v870_v13 = vsel %vm806_vm9, %v740_v7, %v838_v12 }
  0xf4   :  { %902 = vst [vmem:[%s1918_s3 + $0x48] sm:$0xff] %v870_v13  ;;  %v1800_v15 = vpop.f32.mrf.mxu3 }
  0xf6   :  { %v742_v16 = vpop.f32.mrf.mxu2  ;;  %v566_v18 = vpop.f32.mrf.mxu0 }
  0xf7   :  { %v743_v17 = vadd.f32 %v742_v16, %v654_v14  ;;  %v655_v19 = vpop.f32.mrf.mxu1  ;;  %v567_v21 = vadd.f32 %v1641_v56, %v566_v18  ;;  %v600_v14 = vadd.f32 %v1641_v56, %v1668_v9 }
  0xf9   :  { %vm807_vm10 = vcmp.ge.f32.partialorder %v743_v17, 0.0  ;;  %v839_v20 = vmul.f32 0.01, %v743_v17  ;;  %v656_v23 = vadd.f32 %v655_v19, %v567_v21  ;;  %v689_v18 = vadd.f32 %v1788_v59, %v600_v14 }
  0xfb   :  { %v871_v22 = vsel %vm807_vm10, %v743_v17, %v839_v20 }
  0xfc   :  { %903 = vst [vmem:[%s1918_s3 + $0x50] sm:$0xff] %v871_v22  ;;  %v1806_v25 = vpop.f32.mrf.mxu3 }
  0xfe   :  { %v744_v27 = vpop.f32.mrf.mxu2  ;;  %v569_v29 = vpop.f32.mrf.mxu0 }
  0xff   :  { %v745_v28 = vadd.f32 %v744_v27, %v656_v23  ;;  %v570_v30 = vadd.f32 %v1641_v56, %v569_v29  ;;  %v658_v31 = vpop.f32.mrf.mxu1 }
 0x101   :  { %vm808_vm11 = vcmp.ge.f32.partialorder %v745_v28, 0.0  ;;  %v840_v32 = vmul.f32 0.01, %v745_v28  ;;  %v659_v34 = vadd.f32 %v658_v31, %v570_v30  ;;  %v602_v30 = vadd.f32 %v1641_v56, %v1698_v26 }
 0x103   :  { %v872_v33 = vsel %vm808_vm11, %v745_v28, %v840_v32  ;;  %v691_v32 = vadd.f32 %v1794_v4, %v602_v30  ;;  %v605_v4 = vadd.f32 %v1641_v56, %v1704_v39  ;;  %v612_v30 = vadd.f32 %v1641_v56, %v1770_v24 }
 0x104   :  { %904 = vst [vmem:[%s1918_s3 + $0x58] sm:$0xff] %v872_v33  ;;  %v1812_v35 = vpop.f32.mrf.mxu3 }
 0x106   :  { %v747_v36 = vpop.f32.mrf.mxu2  ;;  %v571_v40 = vpop.f32.mrf.mxu0 }
 0x107   :  { %v748_v37 = vadd.f32 %v747_v36, %v659_v34  ;;  %v660_v41 = vpop.f32.mrf.mxu1  ;;  %v572_v43 = vadd.f32 %v1641_v56, %v571_v40 }
 0x109   :  { %vm809_vm12 = vcmp.ge.f32.partialorder %v748_v37, 0.0  ;;  %v841_v42 = vmul.f32 0.01, %v748_v37  ;;  %v661_v45 = vadd.f32 %v660_v41, %v572_v43 }
 0x10b   :  { %v873_v44 = vsel %vm809_vm12, %v748_v37, %v841_v42 }
 0x10c   :  { %905 = vst [vmem:[%s1918_s3 + $0x60] sm:$0xff] %v873_v44  ;;  %v1818_v46 = vpop.f32.mrf.mxu3 }
 0x10e   :  { %v749_v47 = vpop.f32.mrf.mxu2  ;;  %v574_v50 = vpop.f32.mrf.mxu0 }
 0x10f   :  { %v750_v49 = vadd.f32 %v749_v47, %v661_v45  ;;  %v575_v51 = vadd.f32 %v1641_v56, %v574_v50  ;;  %v663_v52 = vpop.f32.mrf.mxu1  ;;  %v694_v50 = vadd.f32 %v1800_v15, %v605_v4 }
 0x111   :  { %vm810_vm13 = vcmp.ge.f32.partialorder %v750_v49, 0.0  ;;  %v842_v53 = vmul.f32 0.01, %v750_v49  ;;  %v664_v55 = vadd.f32 %v663_v52, %v575_v51 }
 0x113   :  { %v874_v54 = vsel %vm810_vm13, %v750_v49, %v842_v53 }
 0x114   :  { %906 = vst [vmem:[%s1918_s3 + $0x68] sm:$0xff] %v874_v54  ;;  %v1824_v58 = vpop.f32.mrf.mxu3 }
 0x116   :  { %v752_v60 = vpop.f32.mrf.mxu2  ;;  %v576_v62 = vpop.f32.mrf.mxu0 }
 0x117   :  { %v753_v61 = vadd.f32 %v752_v60, %v664_v55  ;;  %v665_v63 = vpop.f32.mrf.mxu1  ;;  %v577_v1 = vadd.f32 %v1641_v56, %v576_v62 }
 0x119   :  { %vm811_vm14 = vcmp.ge.f32.partialorder %v753_v61, 0.0  ;;  %v843_v0 = vmul.f32 0.01, %v753_v61  ;;  %v666_v3 = vadd.f32 %v665_v63, %v577_v1  ;;  %v607_v63 = vadd.f32 %v1641_v56, %v1734_v57 }
 0x11b   :  { %v875_v2 = vsel %vm811_vm14, %v753_v61, %v843_v0  ;;  %v696_v1 = vadd.f32 %v1806_v25, %v607_v63  ;;  %v610_v25 = vadd.f32 %v1641_v56, %v1740_v6 }
 0x11c   :  { %907 = vst [vmem:[%s1918_s3 + $0x70] sm:$0xff] %v875_v2  ;;  %v1830_v5 = vpop.f32.mrf.mxu3 }
 0x11e   :  { %v754_v7 = vpop.f32.mrf.mxu2  ;;  %v579_v10 = vpop.f32.mrf.mxu0 }
 0x11f   :  { %v755_v8 = vadd.f32 %v754_v7, %v666_v3  ;;  %v580_v11 = vadd.f32 %v1641_v56, %v579_v10  ;;  %v668_v12 = vpop.f32.mrf.mxu1 }
 0x121   :  { %vm812_vm15 = vcmp.ge.f32.partialorder %v755_v8, 0.0  ;;  %v844_v13 = vmul.f32 0.01, %v755_v8  ;;  %v669_v17 = vadd.f32 %v668_v12, %v580_v11 }
 0x123   :  { %v876_v16 = vsel %vm812_vm15, %v755_v8, %v844_v13 }
 0x124   :  { %908 = vst [vmem:[%s1918_s3 + $0x78] sm:$0xff] %v876_v16  ;;  %v777_v19 = vpop.f32.mrf.mxu3 }
 0x125   :  { %v778_v21 = vadd.f32 %v777_v19, %v689_v18  ;;  %v699_v19 = vadd.f32 %v1812_v35, %v610_v25 }
 0x126   :  { %v757_v20 = vpop.f32.mrf.mxu2  ;;  %v581_v23 = vpop.f32.mrf.mxu0 }
 0x127   :  { %v758_v22 = vadd.f32 %v757_v20, %v669_v17  ;;  %vm821_vm0 = vcmp.ge.f32.partialorder %v778_v21, 0.0  ;;  %v853_v27 = vmul.f32 0.01, %v778_v21  ;;  %v670_v28 = vpop.f32.mrf.mxu1  ;;  %v582_v9 = vadd.f32 %v1641_v56, %v581_v23 }
 0x129   :  { %vm813_vm1 = vcmp.ge.f32.partialorder %v758_v22, 0.0  ;;  %v845_v29 = vmul.f32 0.01, %v758_v22  ;;  %v885_v59 = vsel %vm821_vm0, %v778_v21, %v853_v27  ;;  %v671_v33 = vadd.f32 %v670_v28, %v582_v9 }
 0x12a   :  { %917 = vst [vmem:[%s1918_s3 + $0xc0] sm:$0xff] %v885_v59 }
 0x12b   :  { %v877_v31 = vsel %vm813_vm1, %v758_v22, %v845_v29 }
 0x12c   :  { %909 = vst [vmem:[%s1918_s3 + $0x80] sm:$0xff] %v877_v31  ;;  %v779_v34 = vpop.f32.mrf.mxu3  ;;  %v701_v31 = vadd.f32 %v1818_v46, %v612_v30 }
 0x12d   :  { %v780_v37 = vadd.f32 %v779_v34, %v691_v32 }
 0x12e   :  { %v759_v36 = vpop.f32.mrf.mxu2  ;;  %v584_v41 = vpop.f32.mrf.mxu0 }
 0x12f   :  { %v760_v40 = vadd.f32 %v759_v36, %v671_v33  ;;  %vm822_vm2 = vcmp.ge.f32.partialorder %v780_v37, 0.0  ;;  %v854_v26 = vmul.f32 0.01, %v780_v37  ;;  %v585_v42 = vadd.f32 %v1641_v56, %v584_v41  ;;  %v673_v43 = vpop.f32.mrf.mxu1 }
 0x131   :  { %vm814_vm3 = vcmp.ge.f32.partialorder %v760_v40, 0.0  ;;  %v846_v44 = vmul.f32 0.01, %v760_v40  ;;  %v886_v45 = vsel %vm822_vm2, %v780_v37, %v854_v26  ;;  %v674_v49 = vadd.f32 %v673_v43, %v585_v42 }
 0x132   :  { %918 = vst [vmem:[%s1918_s3 + $0xc8] sm:$0xff] %v886_v45  ;;  %v615_v42 = vadd.f32 %v1641_v56, %v1776_v38 }
 0x133   :  { %v878_v47 = vsel %vm814_vm3, %v760_v40, %v846_v44 }
 0x134   :  { %910 = vst [vmem:[%s1918_s3 + $0x88] sm:$0xff] %v878_v47  ;;  %v782_v51 = vpop.f32.mrf.mxu3  ;;  %v704_v45 = vadd.f32 %v1824_v58, %v615_v42 }
 0x135   :  { %v783_v53 = vadd.f32 %v782_v51, %v694_v50 }
 0x136   :  { %v762_v52 = vpop.f32.mrf.mxu2  ;;  %v586_v55 = vpop.f32.mrf.mxu0 }
 0x137   :  { %v763_v54 = vadd.f32 %v762_v52, %v674_v49  ;;  %vm823_vm4 = vcmp.ge.f32.partialorder %v783_v53, 0.0  ;;  %v855_v39 = vmul.f32 0.01, %v783_v53  ;;  %v675_v60 = vpop.f32.mrf.mxu1  ;;  %v587_v62 = vadd.f32 %v1641_v56, %v586_v55 }
 0x138   :  { %v617_v55 = vadd.f32 %v1641_v56, %v1782_v48 }
 0x139   :  { %vm815_vm5 = vcmp.ge.f32.partialorder %v763_v54, 0.0  ;;  %v847_v61 = vmul.f32 0.01, %v763_v54  ;;  %v887_v15 = vsel %vm823_vm4, %v783_v53, %v855_v39  ;;  %v676_v2 = vadd.f32 %v675_v60, %v587_v62 }
 0x13a   :  { %919 = vst [vmem:[%s1918_s3 + $0xd0] sm:$0xff] %v887_v15  ;;  %v706_v60 = vadd.f32 %v1830_v5, %v617_v55 }
 0x13b   :  { %v879_v0 = vsel %vm815_vm5, %v763_v54, %v847_v61 }
 0x13c   :  { %911 = vst [vmem:[%s1918_s3 + $0x90] sm:$0xff] %v879_v0  ;;  %v784_v3 = vpop.f32.mrf.mxu3 }
 0x13d   :  { %v785_v8 = vadd.f32 %v784_v3, %v696_v1 }
 0x13e   :  { %v764_v7 = vpop.f32.mrf.mxu2  ;;  %v589_v11 = vpop.f32.mrf.mxu0 }
 0x13f   :  { %v765_v10 = vadd.f32 %v764_v7, %v676_v2  ;;  %vm824_vm6 = vcmp.ge.f32.partialorder %v785_v8, 0.0  ;;  %v856_v57 = vmul.f32 0.01, %v785_v8  ;;  %v590_v12 = vadd.f32 %v1641_v56, %v589_v11  ;;  %v678_v13 = vpop.f32.mrf.mxu1 }
 0x141   :  { %vm816_vm7 = vcmp.ge.f32.partialorder %v765_v10, 0.0  ;;  %v848_v14 = vmul.f32 0.01, %v765_v10  ;;  %v888_v16 = vsel %vm824_vm6, %v785_v8, %v856_v57  ;;  %v679_v18 = vadd.f32 %v678_v13, %v590_v12 }
 0x142   :  { %920 = vst [vmem:[%s1918_s3 + $0xd8] sm:$0xff] %v888_v16 }
 0x143   :  { %v880_v17 = vsel %vm816_vm7, %v765_v10, %v848_v14 }
 0x144   :  { %912 = vst [vmem:[%s1918_s3 + $0x98] sm:$0xff] %v880_v17  ;;  %v787_v20 = vpop.f32.mrf.mxu3 }
 0x145   :  { %v788_v22 = vadd.f32 %v787_v20, %v699_v19 }
 0x146   :  { %v767_v21 = vpop.f32.mrf.mxu2  ;;  %v591_v27 = vpop.f32.mrf.mxu0 }
 0x147   :  { %v768_v23 = vadd.f32 %v767_v21, %v679_v18  ;;  %vm825_vm8 = vcmp.ge.f32.partialorder %v788_v22, 0.0  ;;  %v857_v6 = vmul.f32 0.01, %v788_v22  ;;  %v680_v28 = vpop.f32.mrf.mxu1  ;;  %v592_v9 = vadd.f32 %v1641_v56, %v591_v27 }
 0x149   :  { %vm817_vm9 = vcmp.ge.f32.partialorder %v768_v23, 0.0  ;;  %v849_v29 = vmul.f32 0.01, %v768_v23  ;;  %v889_v35 = vsel %vm825_vm8, %v788_v22, %v857_v6  ;;  %v681_v32 = vadd.f32 %v680_v28, %v592_v9 }
 0x14a   :  { %921 = vst [vmem:[%s1918_s3 + $0xe0] sm:$0xff] %v889_v35 }
 0x14b   :  { %v881_v59 = vsel %vm817_vm9, %v768_v23, %v849_v29 }
 0x14c   :  { %913 = vst [vmem:[%s1918_s3 + $0xa0] sm:$0xff] %v881_v59  ;;  %v789_v33 = vpop.f32.mrf.mxu3 }
 0x14d   :  { %v790_v36 = vadd.f32 %v789_v33, %v701_v31 }
 0x14e   :  { %v769_v34 = vpop.f32.mrf.mxu2  ;;  %v594_v40 = vpop.f32.mrf.mxu0 }
 0x14f   :  { %v770_v37 = vadd.f32 %v769_v34, %v681_v32  ;;  %vm826_vm10 = vcmp.ge.f32.partialorder %v790_v36, 0.0  ;;  %v858_v24 = vmul.f32 0.01, %v790_v36  ;;  %v595_v41 = vadd.f32 %v1641_v56, %v594_v40  ;;  %v683_v43 = vpop.f32.mrf.mxu1 }
 0x151   :  { %vm818_vm11 = vcmp.ge.f32.partialorder %v770_v37, 0.0  ;;  %v850_v26 = vmul.f32 0.01, %v770_v37  ;;  %v890_v46 = vsel %vm826_vm10, %v790_v36, %v858_v24  ;;  %v684_v4 = vadd.f32 %v683_v43, %v595_v41 }
 0x152   :  { %922 = vst [vmem:[%s1918_s3 + $0xe8] sm:$0xff] %v890_v46 }
 0x153   :  { %v882_v44 = vsel %vm818_vm11, %v770_v37, %v850_v26 }
 0x154   :  { %914 = vst [vmem:[%s1918_s3 + $0xa8] sm:$0xff] %v882_v44  ;;  %v792_v47 = vpop.f32.mrf.mxu3 }
 0x155   :  { %v793_v50 = vadd.f32 %v792_v47, %v704_v45 }
 0x156   :  { %v772_v49 = vpop.f32.mrf.mxu2  ;;  %v596_v52 = vpop.f32.mrf.mxu0 }
 0x157   :  { %v773_v51 = vadd.f32 %v772_v49, %v684_v4  ;;  %vm827_vm12 = vcmp.ge.f32.partialorder %v793_v50, 0.0  ;;  %v859_v38 = vmul.f32 0.01, %v793_v50  ;;  %v597_v54 = vadd.f32 %v1641_v56, %v596_v52  ;;  %v685_v61 = vpop.f32.mrf.mxu1 }
 0x159   :  { %vm819_vm13 = vcmp.ge.f32.partialorder %v773_v51, 0.0  ;;  %v851_v53 = vmul.f32 0.01, %v773_v51  ;;  %v891_v39 = vsel %vm827_vm12, %v793_v50, %v859_v38  ;;  %v686_v62 = vadd.f32 %v685_v61, %v597_v54 }
 0x15a   :  { %923 = vst [vmem:[%s1918_s3 + $0xf0] sm:$0xff] %v891_v39 }
 0x15b   :  { %v883_v58 = vsel %vm819_vm13, %v773_v51, %v851_v53 }
 0x15c   :  { %915 = vst [vmem:[%s1918_s3 + $0xb0] sm:$0xff] %v883_v58  ;;  %v794_v63 = vpop.f32.mrf.mxu3 }
 0x15d   :  { %v795_v0 = vadd.f32 %v794_v63, %v706_v60 }
 0x15e   :  { %v774_v15 = vpop.f32.mrf.mxu2 }
 0x15f   :  { %v775_v1 = vadd.f32 %v774_v15, %v686_v62  ;;  %vm828_vm14 = vcmp.ge.f32.partialorder %v795_v0, 0.0  ;;  %v860_v56 = vmul.f32 0.01, %v795_v0 }
 0x161   :  { %vm820_vm15 = vcmp.ge.f32.partialorder %v775_v1, 0.0  ;;  %v852_v48 = vmul.f32 0.01, %v775_v1  ;;  %v892_v2 = vsel %vm828_vm14, %v795_v0, %v860_v56 }
 0x162   :  { %924 = vst [vmem:[%s1918_s3 + $0xf8] sm:$0xff] %v892_v2 }
 0x163   :  { %v884_v3 = vsel %vm820_vm15, %v775_v1, %v852_v48 }
 0x164   :  { %916 = vst [vmem:[%s1918_s3 + $0xb8] sm:$0xff] %v884_v3 }

// kernel: aesfa_forward.34
= control target key start
LH: loop header
LB: loop body
LE: loop exit
PB: predicated region body
PF: predicated region fallthrough
CT: control target
= control target key end

     0   :  { %s870_s12 = smov 0   ;;  %s872_s13 = smov 0   ;;  %s1023_s0 = inlined_call_operand.vmem [shape: bf16[1024,128], index: 0, kind: input, shape index: {}]   ;;  %s1024_s1 = inlined_call_operand.vmem [shape: bf16[128,128], index: 1, kind: input, shape index: {}]   ;;  %s1025_s2 = inlined_call_operand.vmem [shape: f32[1,128], index: 2, kind: input, shape index: {}]   ;;  %s1026_s3 = inlined_call_operand.vmem [shape: f32[1024,128], index: 3, kind: output, shape index: {}]  }
   0x1   :  { %s874_s14 = smov 0  }
   0x2 LB: > { %s25_s15 = sadd.s32 1, %s844_s13  ;;  %p650_p0 = scmp.ge.s32.totalorder %s848_s14, 1  ;;  %s848_s14 = sphi %s874_s14, %s13_s14   ;;  %s844_s13 = sphi %s872_s13, %s1028_s13   ;;  %s840_s12 = sphi %s870_s12, %s1027_s12  }
   0x3   : > { %p27_p1 = scmp.ge.s32.totalorder %s25_s15, 4  ;;  %p169_p2 = scmp.lt.s32.totalorder %s848_s14, 5 }
   0x5   : > { %s1030_s15 = smov (%p27_p1, %s25_s15), 0  ;;  %p170_p3 = pnand %p650_p0, %p169_p2 }
   0x6   : > { %s651_s24 = sshll.u32 (!%p170_p3), %s840_s12, 5 }
   0x7   : > { %173 = sbr.rel (%p170_p3) target bundleno = 237 (0xed), region = 32  ;;  %p204_p4 = scmp.lt.s32.totalorder (!%p170_p3), %s651_s24, 127 }
   0xc   : > { %v776_v0 = vld [vmem:[%s1024_s1 + $0x38] sm:$0xff]  ;;  %v775_v1 = vld [vmem:[%s1024_s1 + $0x30] sm:$0xff]  ;;  %v774_v2 = vld [vmem:[%s1024_s1 + $0x28] sm:$0xff]  ;;  %s1032_s24 = smov (!%p204_p4, %s651_s24), 127 }
   0xd   : > { %421 = vmatpush.bf16.msra.mxu0 %v776_v0  ;;  %777 = vmatpush.bf16.msra.mxu1 %v776_v0  ;;  %v773_v3 = vld [vmem:[%s1024_s1 + $0x20] sm:$0xff]  ;;  %v772_v4 = vld [vmem:[%s1024_s1 + $0x18] sm:$0xff]  ;;  %v771_v5 = vld [vmem:[%s1024_s1 + $0x10] sm:$0xff]  ;;  %s652_s4 = sshll.u32 %s1032_s24, 2  ;;  %s654_s10 = sshll.u32 %s1032_s24, 3 }
   0xe   : > { %778 = vmatpush.bf16.msra.mxu2 %v776_v0  ;;  %779 = vmatpush.bf16.msra.mxu3 %v776_v0  ;;  %v770_v6 = vld [vmem:[%s1024_s1 + $0x8] sm:$0xff]  ;;  %v769_v7 = vld [vmem:[%s1024_s1] sm:$0xff]  ;;  %s921_s9 = scalar_lea.vmem %s1023_s0, %s652_s4  ;;  %s948_s18 = scalar_lea.vmem %s1026_s3, %s654_s10 }
   0xf   : > { %v753_v8 = vld [vmem:[%s921_s9] sm:$0xff]  ;;  %v754_v12 = vld [vmem:[%s921_s9 + $0x8] sm:$0xff]  ;;  %v755_v16 = vld [vmem:[%s921_s9 + $0x10] sm:$0xff] }
  0x10   : > { %v757_v9 = vld [vmem:[%s921_s9 + $0x20] sm:$0xff]  ;;  %v758_v13 = vld [vmem:[%s921_s9 + $0x28] sm:$0xff]  ;;  %v759_v17 = vld [vmem:[%s921_s9 + $0x30] sm:$0xff] }
  0x11   : > { %422 = vmatpush.bf16.msra.mxu0 %v775_v1  ;;  %780 = vmatpush.bf16.msra.mxu1 %v775_v1  ;;  %v761_v10 = vld [vmem:[%s921_s9 + $0x40] sm:$0xff]  ;;  %v762_v14 = vld [vmem:[%s921_s9 + $0x48] sm:$0xff]  ;;  %v763_v18 = vld [vmem:[%s921_s9 + $0x50] sm:$0xff] }
  0x12   : > { %781 = vmatpush.bf16.msra.mxu2 %v775_v1  ;;  %782 = vmatpush.bf16.msra.mxu3 %v775_v1  ;;  %v765_v11 = vld [vmem:[%s921_s9 + $0x60] sm:$0xff]  ;;  %v766_v15 = vld [vmem:[%s921_s9 + $0x68] sm:$0xff]  ;;  %v767_v19 = vld [vmem:[%s921_s9 + $0x70] sm:$0xff] }
  0x13   : > { %v756_v20 = vld [vmem:[%s921_s9 + $0x18] sm:$0xff]  ;;  %v943_v24 = vld [vmem:[%s1025_s2] ss:$0 sm:$0xff] }
  0x14   : > { %v760_v21 = vld [vmem:[%s921_s9 + $0x38] sm:$0xff] }
  0x15   : > { %423 = vmatpush.bf16.msra.mxu0 %v774_v2  ;;  %783 = vmatpush.bf16.msra.mxu1 %v774_v2  ;;  %v764_v22 = vld [vmem:[%s921_s9 + $0x58] sm:$0xff] }
  0x16   : > { %784 = vmatpush.bf16.msra.mxu2 %v774_v2  ;;  %785 = vmatpush.bf16.msra.mxu3 %v774_v2  ;;  %v768_v23 = vld [vmem:[%s921_s9 + $0x78] sm:$0xff] }
  0x19   : > { %424 = vmatpush.bf16.msra.mxu0 %v773_v3  ;;  %786 = vmatpush.bf16.msra.mxu1 %v773_v3 }
  0x1a   : > { %787 = vmatpush.bf16.msra.mxu2 %v773_v3  ;;  %788 = vmatpush.bf16.msra.mxu3 %v773_v3 }
  0x1d   : > { %425 = vmatpush.bf16.msra.mxu0 %v772_v4  ;;  %789 = vmatpush.bf16.msra.mxu1 %v772_v4 }
  0x1e   : > { %790 = vmatpush.bf16.msra.mxu2 %v772_v4  ;;  %791 = vmatpush.bf16.msra.mxu3 %v772_v4 }
  0x21   : > { %426 = vmatpush.bf16.msra.mxu0 %v771_v5  ;;  %792 = vmatpush.bf16.msra.mxu1 %v771_v5 }
  0x22   : > { %793 = vmatpush.bf16.msra.mxu2 %v771_v5  ;;  %794 = vmatpush.bf16.msra.mxu3 %v771_v5 }
  0x25   : > { %427 = vmatpush.bf16.msra.mxu0 %v770_v6  ;;  %795 = vmatpush.bf16.msra.mxu1 %v770_v6 }
  0x26   : > { %796 = vmatpush.bf16.msra.mxu2 %v770_v6  ;;  %797 = vmatpush.bf16.msra.mxu3 %v770_v6 }
  0x29   : > { %428 = vmatpush.bf16.msra.mxu0 %v769_v7  ;;  %798 = vmatpush.bf16.msra.mxu1 %v769_v7 }
  0x2a   : > { %799 = vmatpush.bf16.msra.mxu2 %v769_v7  ;;  %800 = vmatpush.bf16.msra.mxu3 %v769_v7 }
  0x2c   : > { %429 = vmatmul.bf16.vlgmr.msra.gmra.mxu0 %v753_v8  ;;  %449 = vmatmul.bf16.vlgmr.msra.gmra.mxu1 %v757_v9 }
  0x2d   : > { %469 = vmatmul.bf16.vlgmr.msra.gmra.mxu2 %v761_v10  ;;  %489 = vmatmul.bf16.vlgmr.msra.gmra.mxu3 %v765_v11 }
  0x3c   : > { %434 = vmatmul.bf16.gmra.mxu0 %v754_v12  ;;  %454 = vmatmul.bf16.gmra.mxu1 %v758_v13 }
  0x3d   : > { %474 = vmatmul.bf16.gmra.mxu2 %v762_v14  ;;  %494 = vmatmul.bf16.gmra.mxu3 %v766_v15 }
  0x4c   : > { %439 = vmatmul.bf16.gmra.mxu0 %v755_v16  ;;  %459 = vmatmul.bf16.gmra.mxu1 %v759_v17 }
  0x4d   : > { %479 = vmatmul.bf16.gmra.mxu2 %v763_v18  ;;  %499 = vmatmul.bf16.gmra.mxu3 %v767_v19 }
  0x5c   : > { %444 = vmatmul.bf16.gmra.mxu0 %v756_v20  ;;  %464 = vmatmul.bf16.gmra.mxu1 %v760_v21 }
  0x5d   : > { %484 = vmatmul.bf16.gmra.mxu2 %v764_v22  ;;  %504 = vmatmul.bf16.gmra.mxu3 %v768_v23 }
  0xa9   : > { %v430_v25 = vpop.f32.mrf.mxu0  ;;  %v450_v26 = vpop.f32.mrf.mxu1 }
  0xaa   : > { %v431_v27 = vadd.f32 %v943_v24, %v430_v25  ;;  %v451_v28 = vadd.f32 %v943_v24, %v450_v26 }
  0xac   : > { %510 = vst [vmem:[%s948_s18] sm:$0xff] %v431_v27 }
  0xad   : > { %518 = vst [vmem:[%s948_s18 + $0x40] sm:$0xff] %v451_v28 }
  0xb0   : > { %v470_v29 = vpop.f32.mrf.mxu2  ;;  %v490_v30 = vpop.f32.mrf.mxu3 }
  0xb1   : > { %v471_v31 = vadd.f32 %v943_v24, %v470_v29  ;;  %v491_v32 = vadd.f32 %v943_v24, %v490_v30  ;;  %v432_v33 = vpop.f32.mrf.mxu0  ;;  %v452_v34 = vpop.f32.mrf.mxu1 }
  0xb2   : > { %v433_v35 = vadd.f32 %v943_v24, %v432_v33  ;;  %v453_v36 = vadd.f32 %v943_v24, %v452_v34 }
  0xb3   : > { %526 = vst [vmem:[%s948_s18 + $0x80] sm:$0xff] %v471_v31 }
  0xb4   : > { %534 = vst [vmem:[%s948_s18 + $0xc0] sm:$0xff] %v491_v32 }
  0xb5   : > { %511 = vst [vmem:[%s948_s18 + $0x8] sm:$0xff] %v433_v35 }
  0xb6   : > { %519 = vst [vmem:[%s948_s18 + $0x48] sm:$0xff] %v453_v36 }
  0xb8   : > { %v472_v37 = vpop.f32.mrf.mxu2  ;;  %v492_v38 = vpop.f32.mrf.mxu3 }
  0xb9   : > { %v473_v39 = vadd.f32 %v943_v24, %v472_v37  ;;  %v493_v40 = vadd.f32 %v943_v24, %v492_v38  ;;  %v435_v41 = vpop.f32.mrf.mxu0  ;;  %v455_v42 = vpop.f32.mrf.mxu1 }
  0xba   : > { %v436_v43 = vadd.f32 %v943_v24, %v435_v41  ;;  %v456_v44 = vadd.f32 %v943_v24, %v455_v42 }
  0xbb   : > { %527 = vst [vmem:[%s948_s18 + $0x88] sm:$0xff] %v473_v39 }
  0xbc   : > { %535 = vst [vmem:[%s948_s18 + $0xc8] sm:$0xff] %v493_v40 }
  0xbd   : > { %512 = vst [vmem:[%s948_s18 + $0x10] sm:$0xff] %v436_v43 }
  0xbe   : > { %520 = vst [vmem:[%s948_s18 + $0x50] sm:$0xff] %v456_v44 }
  0xc0   : > { %v475_v45 = vpop.f32.mrf.mxu2  ;;  %v495_v46 = vpop.f32.mrf.mxu3 }
  0xc1   : > { %v476_v47 = vadd.f32 %v943_v24, %v475_v45  ;;  %v496_v48 = vadd.f32 %v943_v24, %v495_v46  ;;  %v437_v49 = vpop.f32.mrf.mxu0  ;;  %v457_v50 = vpop.f32.mrf.mxu1 }
  0xc2   : > { %v438_v51 = vadd.f32 %v943_v24, %v437_v49  ;;  %v458_v52 = vadd.f32 %v943_v24, %v457_v50 }
  0xc3   : > { %528 = vst [vmem:[%s948_s18 + $0x90] sm:$0xff] %v476_v47 }
  0xc4   : > { %536 = vst [vmem:[%s948_s18 + $0xd0] sm:$0xff] %v496_v48 }
  0xc5   : > { %513 = vst [vmem:[%s948_s18 + $0x18] sm:$0xff] %v438_v51 }
  0xc6   : > { %521 = vst [vmem:[%s948_s18 + $0x58] sm:$0xff] %v458_v52 }
  0xc8   : > { %v477_v53 = vpop.f32.mrf.mxu2  ;;  %v497_v54 = vpop.f32.mrf.mxu3 }
  0xc9   : > { %v478_v55 = vadd.f32 %v943_v24, %v477_v53  ;;  %v498_v56 = vadd.f32 %v943_v24, %v497_v54  ;;  %v440_v57 = vpop.f32.mrf.mxu0  ;;  %v460_v58 = vpop.f32.mrf.mxu1 }
  0xca   : > { %v441_v59 = vadd.f32 %v943_v24, %v440_v57  ;;  %v461_v60 = vadd.f32 %v943_v24, %v460_v58 }
  0xcb   : > { %529 = vst [vmem:[%s948_s18 + $0x98] sm:$0xff] %v478_v55 }
  0xcc   : > { %537 = vst [vmem:[%s948_s18 + $0xd8] sm:$0xff] %v498_v56 }
  0xcd   : > { %514 = vst [vmem:[%s948_s18 + $0x20] sm:$0xff] %v441_v59 }
  0xce   : > { %522 = vst [vmem:[%s948_s18 + $0x60] sm:$0xff] %v461_v60 }
  0xd0   : > { %v480_v61 = vpop.f32.mrf.mxu2  ;;  %v500_v62 = vpop.f32.mrf.mxu3 }
  0xd1   : > { %v481_v63 = vadd.f32 %v943_v24, %v480_v61  ;;  %v501_v0 = vadd.f32 %v943_v24, %v500_v62  ;;  %v442_v1 = vpop.f32.mrf.mxu0  ;;  %v462_v2 = vpop.f32.mrf.mxu1 }
  0xd2   : > { %v443_v3 = vadd.f32 %v943_v24, %v442_v1  ;;  %v463_v4 = vadd.f32 %v943_v24, %v462_v2 }
  0xd3   : > { %530 = vst [vmem:[%s948_s18 + $0xa0] sm:$0xff] %v481_v63 }
  0xd4   : > { %538 = vst [vmem:[%s948_s18 + $0xe0] sm:$0xff] %v501_v0 }
  0xd5   : > { %515 = vst [vmem:[%s948_s18 + $0x28] sm:$0xff] %v443_v3 }
  0xd6   : > { %523 = vst [vmem:[%s948_s18 + $0x68] sm:$0xff] %v463_v4 }
  0xd8   : > { %v482_v5 = vpop.f32.mrf.mxu2  ;;  %v502_v6 = vpop.f32.mrf.mxu3 }
  0xd9   : > { %v483_v7 = vadd.f32 %v943_v24, %v482_v5  ;;  %v503_v8 = vadd.f32 %v943_v24, %v502_v6  ;;  %v445_v9 = vpop.f32.mrf.mxu0  ;;  %v465_v10 = vpop.f32.mrf.mxu1 }
  0xda   : > { %v446_v11 = vadd.f32 %v943_v24, %v445_v9  ;;  %v466_v12 = vadd.f32 %v943_v24, %v465_v10 }
  0xdb   : > { %531 = vst [vmem:[%s948_s18 + $0xa8] sm:$0xff] %v483_v7 }
  0xdc   : > { %539 = vst [vmem:[%s948_s18 + $0xe8] sm:$0xff] %v503_v8 }
  0xdd   : > { %516 = vst [vmem:[%s948_s18 + $0x30] sm:$0xff] %v446_v11 }
  0xde   : > { %524 = vst [vmem:[%s948_s18 + $0x70] sm:$0xff] %v466_v12 }
  0xe0   : > { %v485_v13 = vpop.f32.mrf.mxu2  ;;  %v505_v14 = vpop.f32.mrf.mxu3 }
  0xe1   : > { %v486_v15 = vadd.f32 %v943_v24, %v485_v13  ;;  %v506_v16 = vadd.f32 %v943_v24, %v505_v14  ;;  %v447_v17 = vpop.f32.mrf.mxu0  ;;  %v467_v18 = vpop.f32.mrf.mxu1 }
  0xe2   : > { %v448_v19 = vadd.f32 %v943_v24, %v447_v17  ;;  %v468_v20 = vadd.f32 %v943_v24, %v467_v18 }
  0xe3   : > { %532 = vst [vmem:[%s948_s18 + $0xb0] sm:$0xff] %v486_v15 }
  0xe4   : > { %540 = vst [vmem:[%s948_s18 + $0xf0] sm:$0xff] %v506_v16 }
  0xe5   : > { %517 = vst [vmem:[%s948_s18 + $0x38] sm:$0xff] %v448_v19 }
  0xe6   : > { %525 = vst [vmem:[%s948_s18 + $0x78] sm:$0xff] %v468_v20 }
  0xe8   : > { %v487_v21 = vpop.f32.mrf.mxu2  ;;  %v507_v22 = vpop.f32.mrf.mxu3 }
  0xe9   : > { %v488_v23 = vadd.f32 %v943_v24, %v487_v21  ;;  %v508_v25 = vadd.f32 %v943_v24, %v507_v22 }
  0xeb   : > { %533 = vst [vmem:[%s948_s18 + $0xb8] sm:$0xff] %v488_v23 }
  0xec   : > { %541 = vst [vmem:[%s948_s18 + $0xf8] sm:$0xff] %v508_v25 }
  0xed PF: > { %s13_s14 = sadd.s32 1, %s848_s14   ;;  %s1027_s12 = smov %s844_s13 }
  0xee   : > { %p10_p5 = scmp.ge.s32.totalorder %s13_s14, 6   ;;  %s1028_s13 = smov %s1030_s15 }
  0xf0   :  { %12 = sbr.rel (!%p10_p5) target bundleno = 2 (0x2), region = 68 }

// kernel: aesfa_forward.29
= control target key start
LH: loop header
LB: loop body
LE: loop exit
PB: predicated region body
PF: predicated region fallthrough
CT: control target
= control target key end

     0   :  { %s1612_s12 = smov 0   ;;  %s1614_s13 = smov 0   ;;  %s1989_s0 = inlined_call_operand.vmem [shape: bf16[1024,384], index: 0, kind: input, shape index: {}]   ;;  %s1990_s1 = inlined_call_operand.vmem [shape: bf16[384,128], index: 1, kind: input, shape index: {}]   ;;  %s1991_s2 = inlined_call_operand.vmem [shape: f32[1,128], index: 2, kind: input, shape index: {}]   ;;  %s1992_s3 = inlined_call_operand.vmem [shape: f32[1024,128], index: 3, kind: output, shape index: {}]  }
   0x1   :  { %s1616_s14 = smov 0  }
   0x2 LB: > { %s25_s15 = sadd.s32 1, %s1586_s13  ;;  %p1151_p0 = scmp.ge.s32.totalorder %s1590_s14, 1  ;;  %s1590_s14 = sphi %s1616_s14, %s13_s14   ;;  %s1586_s13 = sphi %s1614_s13, %s1994_s13   ;;  %s1582_s12 = sphi %s1612_s12, %s1993_s12  }
   0x3   : > { %p27_p1 = scmp.ge.s32.totalorder %s25_s15, 4  ;;  %p170_p2 = scmp.lt.s32.totalorder %s1590_s14, 5 }
   0x5   : > { %s1996_s15 = smov (%p27_p1, %s25_s15), 0  ;;  %p171_p3 = pnand %p1151_p0, %p170_p2 }
   0x6   : > { %s1152_s7 = sshll.u32 (!%p171_p3), %s1582_s12, 5 }
   0x7   : > { %174 = sbr.rel (%p171_p3) target bundleno = 365 (0x16d), region = 32  ;;  %p206_p4 = scmp.lt.s32.totalorder (!%p171_p3), %s1152_s7, 127 }
   0xc   : > { %v1501_v0 = vld [vmem:[%s1990_s1 + $0x38] sm:$0xff]  ;;  %v1500_v3 = vld [vmem:[%s1990_s1 + $0x30] sm:$0xff]  ;;  %v1499_v6 = vld [vmem:[%s1990_s1 + $0x28] sm:$0xff]  ;;  %s1998_s7 = smov (!%p206_p4, %s1152_s7), 127 }
   0xd   : > { %v1638_v1 = vld [vmem:[%s1990_s1 + $0x78] sm:$0xff]  ;;  %744 = vmatpush.bf16.msra.mxu0 %v1501_v0  ;;  %1518 = vmatpush.bf16.msra.mxu3 %v1501_v0  ;;  %v1653_v4 = vld [vmem:[%s1990_s1 + $0x70] sm:$0xff]  ;;  %v1668_v7 = vld [vmem:[%s1990_s1 + $0x68] sm:$0xff]  ;;  %s1542_s25 = smul.u32 12, %s1998_s7  ;;  %s1155_s24 = sshll.u32 %s1998_s7, 3 }
   0xe   : > { %v1643_v2 = vld [vmem:[%s1990_s1 + $0xb8] sm:$0xff]  ;;  %833 = vmatpush.bf16.msra.mxu1 %v1638_v1  ;;  %v1658_v5 = vld [vmem:[%s1990_s1 + $0xb0] sm:$0xff]  ;;  %v1673_v8 = vld [vmem:[%s1990_s1 + $0xa8] sm:$0xff]  ;;  %s1845_s27 = scalar_lea.vmem %s1992_s3, %s1155_s24 }
   0xf   : > { %922 = vmatpush.bf16.msra.mxu2 %v1643_v2  ;;  %v1498_v9 = vld [vmem:[%s1990_s1 + $0x20] sm:$0xff]  ;;  %v1497_v12 = vld [vmem:[%s1990_s1 + $0x18] sm:$0xff]  ;;  %v1496_v15 = vld [vmem:[%s1990_s1 + $0x10] sm:$0xff]  ;;  %s1725_s8 = scalar_lea.vmem %s1989_s0, %s1542_s25 }
  0x10   : > { %v1684_v10 = vld [vmem:[%s1990_s1 + $0x60] sm:$0xff]  ;;  %v1505_v13 = vld [vmem:[%s1990_s1 + $0x58] sm:$0xff]  ;;  %v1504_v16 = vld [vmem:[%s1990_s1 + $0x50] sm:$0xff] }
  0x11   : > { %745 = vmatpush.bf16.msra.mxu0 %v1500_v3  ;;  %1519 = vmatpush.bf16.msra.mxu3 %v1500_v3  ;;  %v1689_v11 = vld [vmem:[%s1990_s1 + $0xa0] sm:$0xff]  ;;  %v1704_v14 = vld [vmem:[%s1990_s1 + $0x98] sm:$0xff]  ;;  %v1717_v17 = vld [vmem:[%s1990_s1 + $0x90] sm:$0xff] }
  0x12   : > { %834 = vmatpush.bf16.msra.mxu1 %v1653_v4  ;;  %v1495_v18 = vld [vmem:[%s1990_s1 + $0x8] sm:$0xff]  ;;  %v1494_v21 = vld [vmem:[%s1990_s1] sm:$0xff]  ;;  %v1160_v29 = vld [vmem:[%s1725_s8 + $0xc] sm:$0xf0] }
  0x13   : > { %923 = vmatpush.bf16.msra.mxu2 %v1658_v5  ;;  %v1503_v19 = vld [vmem:[%s1990_s1 + $0x48] sm:$0xff]  ;;  %v1502_v22 = vld [vmem:[%s1990_s1 + $0x40] sm:$0xff]  ;;  %v1448_v31 = vld [vmem:[%s1725_s8 + $0x10] sm:$0xf0] }
  0x14   : > { %v1734_v20 = vld [vmem:[%s1990_s1 + $0x88] sm:$0xff]  ;;  %v1745_v23 = vld [vmem:[%s1990_s1 + $0x80] sm:$0xff]  ;;  %v1170_v36 = vld [vmem:[%s1725_s8 + $0x18] sm:$0xf] }
  0x15   : > { %746 = vmatpush.bf16.msra.mxu0 %v1499_v6  ;;  %1520 = vmatpush.bf16.msra.mxu3 %v1499_v6  ;;  %v1158_v24 = vld [vmem:[%s1725_s8] sm:$0xf]  ;;  %v1447_v25 = vld [vmem:[%s1725_s8 + $0x8] sm:$0xf0]  ;;  %v1446_v28 = vld [vmem:[%s1725_s8 + $0x4] sm:$0xf] }
  0x16   : > { %835 = vmatpush.bf16.msra.mxu1 %v1668_v7  ;;  %v1302_v26 = vld [vmem:[%s1725_s8 + $0x120] sm:$0xf]  ;;  %v1483_v27 = vld [vmem:[%s1725_s8 + $0x128] sm:$0xf0]  ;;  %v1166_v30 = vld [vmem:[%s1725_s8 + $0x8] sm:$0xf]  ;;  %v1159_v32 = vor.u32 %v1447_v25, %v1158_v24  ;;  %v1163_v34 = vor.u32 %v1446_v28, %v1160_v29 }
  0x17   : > { %924 = vmatpush.bf16.msra.mxu2 %v1673_v8  ;;  %v1303_v33 = vor.u32 %v1483_v27, %v1302_v26  ;;  %v1167_v35 = vor.u32 %v1448_v31, %v1166_v30  ;;  %v1450_v37 = vld [vmem:[%s1725_s8 + $0x20] sm:$0xf0]  ;;  %v1314_v38 = vld [vmem:[%s1725_s8 + $0x138] sm:$0xf]  ;;  %v1449_v40 = vld [vmem:[%s1725_s8 + $0x1c] sm:$0xf] }
  0x18   : > { %v1486_v39 = vld [vmem:[%s1725_s8 + $0x140] sm:$0xf0]  ;;  %v1172_v41 = vld [vmem:[%s1725_s8 + $0x24] sm:$0xf0]  ;;  %v1178_v42 = vld [vmem:[%s1725_s8 + $0x20] sm:$0xf]  ;;  %v1171_v44 = vor.u32 %v1450_v37, %v1170_v36 }
  0x19   : > { %747 = vmatpush.bf16.msra.mxu0 %v1498_v9  ;;  %1521 = vmatpush.bf16.msra.mxu3 %v1498_v9  ;;  %v1451_v43 = vld [vmem:[%s1725_s8 + $0x28] sm:$0xf0]  ;;  %v1315_v45 = vor.u32 %v1486_v39, %v1314_v38  ;;  %v1175_v46 = vor.u32 %v1449_v40, %v1172_v41  ;;  %v1182_v48 = vld [vmem:[%s1725_s8 + $0x30] sm:$0xf]  ;;  %v1453_v49 = vld [vmem:[%s1725_s8 + $0x38] sm:$0xf0] }
  0x1a   : > { %836 = vmatpush.bf16.msra.mxu1 %v1684_v10  ;;  %v1179_v47 = vor.u32 %v1451_v43, %v1178_v42  ;;  %v1326_v50 = vld [vmem:[%s1725_s8 + $0x150] sm:$0xf]  ;;  %v1489_v51 = vld [vmem:[%s1725_s8 + $0x158] sm:$0xf0]  ;;  %v1452_v52 = vld [vmem:[%s1725_s8 + $0x34] sm:$0xf]  ;;  %v1183_v56 = vor.u32 %v1453_v49, %v1182_v48 }
  0x1b   : > { %925 = vmatpush.bf16.msra.mxu2 %v1689_v11  ;;  %v1184_v53 = vld [vmem:[%s1725_s8 + $0x3c] sm:$0xf0]  ;;  %v1190_v54 = vld [vmem:[%s1725_s8 + $0x38] sm:$0xf]  ;;  %v1454_v55 = vld [vmem:[%s1725_s8 + $0x40] sm:$0xf0]  ;;  %v1327_v57 = vor.u32 %v1489_v51, %v1326_v50 }
  0x1c   : > { %v1187_v58 = vor.u32 %v1452_v52, %v1184_v53  ;;  %v1191_v59 = vor.u32 %v1454_v55, %v1190_v54  ;;  %v1194_v60 = vld [vmem:[%s1725_s8 + $0x48] sm:$0xf]  ;;  %v1456_v61 = vld [vmem:[%s1725_s8 + $0x50] sm:$0xf0]  ;;  %v1455_v0 = vld [vmem:[%s1725_s8 + $0x4c] sm:$0xf] }
  0x1d   : > { %748 = vmatpush.bf16.msra.mxu0 %v1497_v12  ;;  %1522 = vmatpush.bf16.msra.mxu3 %v1497_v12  ;;  %v1338_v62 = vld [vmem:[%s1725_s8 + $0x168] sm:$0xf]  ;;  %v1492_v63 = vld [vmem:[%s1725_s8 + $0x170] sm:$0xf0]  ;;  %v1457_v3 = vld [vmem:[%s1725_s8 + $0x58] sm:$0xf0] }
  0x1e   : > { %837 = vmatpush.bf16.msra.mxu1 %v1505_v13  ;;  %v1459_v9 = vld [vmem:[%s1725_s8 + $0x68] sm:$0xf0]  ;;  %v1304_v12 = vld [vmem:[%s1725_s8 + $0x12c] sm:$0xf0]  ;;  %v1485_v24 = vld [vmem:[%s1725_s8 + $0x13c] sm:$0xf] }
  0x1f   : > { %926 = vmatpush.bf16.msra.mxu2 %v1704_v14  ;;  %v1316_v25 = vld [vmem:[%s1725_s8 + $0x144] sm:$0xf0]  ;;  %v1226_v26 = vld [vmem:[%s1725_s8 + $0x80] sm:$0xf]  ;;  %v1463_v27 = vld [vmem:[%s1725_s8 + $0x88] sm:$0xf0] }
  0x20   : > { %v1319_v29 = vor.u32 %v1485_v24, %v1316_v25  ;;  %v1227_v31 = vor.u32 %v1463_v27, %v1226_v26  ;;  %v1328_v36 = vld [vmem:[%s1725_s8 + $0x15c] sm:$0xf0]  ;;  %v1238_v38 = vld [vmem:[%s1725_s8 + $0x98] sm:$0xf]  ;;  %v1466_v39 = vld [vmem:[%s1725_s8 + $0xa0] sm:$0xf0] }
  0x21   : > { %749 = vmatpush.bf16.msra.mxu0 %v1496_v15  ;;  %1523 = vmatpush.bf16.msra.mxu3 %v1496_v15  ;;  %v1460_v15 = vld [vmem:[%s1725_s8 + $0x70] sm:$0xf0]  ;;  %v1232_v37 = vld [vmem:[%s1725_s8 + $0x9c] sm:$0xf0]  ;;  %v1239_v43 = vor.u32 %v1466_v39, %v1238_v38  ;;  %v1340_v48 = vld [vmem:[%s1725_s8 + $0x174] sm:$0xf0] }
  0x22   : > { %838 = vmatpush.bf16.msra.mxu1 %v1504_v16  ;;  %v1244_v49 = vld [vmem:[%s1725_s8 + $0xb4] sm:$0xf0]  ;;  %v1250_v50 = vld [vmem:[%s1725_s8 + $0xb0] sm:$0xf]  ;;  %v1469_v51 = vld [vmem:[%s1725_s8 + $0xb8] sm:$0xf0] }
  0x23   : > { %927 = vmatpush.bf16.msra.mxu2 %v1717_v17  ;;  %v1251_v55 = vor.u32 %v1469_v51, %v1250_v50 }
  0x25   : > { %750 = vmatpush.bf16.msra.mxu0 %v1495_v18  ;;  %1524 = vmatpush.bf16.msra.mxu3 %v1495_v18 }
  0x26   : > { %839 = vmatpush.bf16.msra.mxu1 %v1503_v19 }
  0x27   : > { %928 = vmatpush.bf16.msra.mxu2 %v1734_v20 }
  0x29   : > { %751 = vmatpush.bf16.msra.mxu0 %v1494_v21  ;;  %1525 = vmatpush.bf16.msra.mxu3 %v1494_v21  ;;  %v1462_v21 = vld [vmem:[%s1725_s8 + $0x80] sm:$0xf0] }
  0x2a   : > { %840 = vmatpush.bf16.msra.mxu1 %v1502_v22 }
  0x2b   : > { %929 = vmatpush.bf16.msra.mxu2 %v1745_v23 }
  0x2c   : > { %752 = vmatmul.bf16.vlgmr.msra.gmra.mxu0 %v1159_v32  ;;  %812 = vmatmul.bf16.vlgmr.msra.gmra.mxu3 %v1303_v33  ;;  %v1230_v32 = vld [vmem:[%s1725_s8 + $0x90] sm:$0xf]  ;;  %v1465_v33 = vld [vmem:[%s1725_s8 + $0x98] sm:$0xf0] }
  0x2d   : > { %1526 = vmatpush.bf16.msrb.mxu3 %v1638_v1  ;;  %841 = vmatmul.bf16.vlgmr.msra.gmra.mxu1 %v1163_v34  ;;  %v1196_v1 = vld [vmem:[%s1725_s8 + $0x54] sm:$0xf0]  ;;  %v1464_v34 = vld [vmem:[%s1725_s8 + $0x94] sm:$0xf]  ;;  %v1231_v40 = vor.u32 %v1465_v33, %v1230_v32 }
  0x2e   : > { %930 = vmatmul.bf16.vlgmr.msra.gmra.mxu2 %v1167_v35  ;;  %v1199_v6 = vor.u32 %v1455_v0, %v1196_v1  ;;  %v1488_v35 = vld [vmem:[%s1725_s8 + $0x154] sm:$0xf]  ;;  %v1235_v42 = vor.u32 %v1464_v34, %v1232_v37 }
  0x2f   : > { %v1331_v41 = vor.u32 %v1488_v35, %v1328_v36  ;;  %v1472_v0 = vld [vmem:[%s1725_s8 + $0xd0] sm:$0xf0] }
  0x31   : > { %1527 = vmatpush.bf16.msrb.mxu3 %v1653_v4  ;;  %v1195_v4 = vor.u32 %v1456_v61, %v1194_v60  ;;  %v1310_v60 = vld [vmem:[%s1725_s8 + $0x128] sm:$0xf]  ;;  %v1484_v61 = vld [vmem:[%s1725_s8 + $0x130] sm:$0xf0] }
  0x35   : > { %1528 = vmatpush.bf16.msrb.mxu3 %v1668_v7 }
  0x39   : > { %1529 = vmatpush.bf16.msrb.mxu3 %v1684_v10  ;;  %v1458_v10 = vld [vmem:[%s1725_s8 + $0x64] sm:$0xf] }
  0x3c   : > { %757 = vmatmul.bf16.gmra.mxu0 %v1171_v44  ;;  %817 = vmatmul.bf16.gmra.mxu3 %v1315_v45  ;;  %v1242_v44 = vld [vmem:[%s1725_s8 + $0xa8] sm:$0xf]  ;;  %v1468_v45 = vld [vmem:[%s1725_s8 + $0xb0] sm:$0xf0] }
  0x3d   : > { %1530 = vmatpush.bf16.msrb.mxu3 %v1505_v13  ;;  %846 = vmatmul.bf16.gmra.mxu1 %v1175_v46  ;;  %v1208_v13 = vld [vmem:[%s1725_s8 + $0x6c] sm:$0xf0]  ;;  %v1467_v46 = vld [vmem:[%s1725_s8 + $0xac] sm:$0xf]  ;;  %v1243_v52 = vor.u32 %v1468_v45, %v1242_v44  ;;  %v1334_v44 = vld [vmem:[%s1725_s8 + $0x158] sm:$0xf] }
  0x3e   : > { %935 = vmatmul.bf16.gmra.mxu2 %v1179_v47  ;;  %v1211_v18 = vor.u32 %v1458_v10, %v1208_v13  ;;  %v1491_v47 = vld [vmem:[%s1725_s8 + $0x16c] sm:$0xf]  ;;  %v1247_v54 = vor.u32 %v1467_v46, %v1244_v49  ;;  %v1490_v45 = vld [vmem:[%s1725_s8 + $0x160] sm:$0xf0]  ;;  %v1280_v46 = vld [vmem:[%s1725_s8 + $0xfc] sm:$0xf0] }
  0x3f   : > { %v1343_v53 = vor.u32 %v1491_v47, %v1340_v48  ;;  %v1286_v47 = vld [vmem:[%s1725_s8 + $0xf8] sm:$0xf]  ;;  %v1478_v48 = vld [vmem:[%s1725_s8 + $0x100] sm:$0xf0] }
  0x41   : > { %1531 = vmatpush.bf16.msrb.mxu3 %v1504_v16 }
  0x45   : > { %1532 = vmatpush.bf16.msrb.mxu3 %v1503_v19 }
  0x49   : > { %1533 = vmatpush.bf16.msrb.mxu3 %v1502_v22  ;;  %v1461_v22 = vld [vmem:[%s1725_s8 + $0x7c] sm:$0xf] }
  0x4c   : > { %762 = vmatmul.bf16.gmra.mxu0 %v1183_v56  ;;  %822 = vmatmul.bf16.gmra.mxu3 %v1327_v57  ;;  %v1828_v56 = vld [vmem:[%s1991_s2] ss:$0 sm:$0xff] }
  0x4d   : > { %1534 = vmatpush.bf16.msra.mxu3 %v1643_v2  ;;  %851 = vmatmul.bf16.gmra.mxu1 %v1187_v58  ;;  %v1202_v2 = vld [vmem:[%s1725_s8 + $0x50] sm:$0xf]  ;;  %v1254_v57 = vld [vmem:[%s1725_s8 + $0xc0] sm:$0xf]  ;;  %v1471_v58 = vld [vmem:[%s1725_s8 + $0xc8] sm:$0xf0] }
  0x4e   : > { %940 = vmatmul.bf16.gmra.mxu2 %v1191_v59  ;;  %v1203_v7 = vor.u32 %v1457_v3, %v1202_v2  ;;  %v1470_v59 = vld [vmem:[%s1725_s8 + $0xc4] sm:$0xf]  ;;  %v1255_v1 = vor.u32 %v1471_v58, %v1254_v57  ;;  %v1311_v2 = vor.u32 %v1484_v61, %v1310_v60  ;;  %v1287_v58 = vor.u32 %v1478_v48, %v1286_v47 }
  0x51   : > { %1535 = vmatpush.bf16.msra.mxu3 %v1658_v5  ;;  %v1339_v5 = vor.u32 %v1492_v63, %v1338_v62  ;;  %v1256_v62 = vld [vmem:[%s1725_s8 + $0xcc] sm:$0xf0]  ;;  %v1262_v63 = vld [vmem:[%s1725_s8 + $0xc8] sm:$0xf] }
  0x55   : > { %1536 = vmatpush.bf16.msra.mxu3 %v1673_v8  ;;  %v1206_v8 = vld [vmem:[%s1725_s8 + $0x60] sm:$0xf] }
  0x56   : > { %v1207_v16 = vor.u32 %v1459_v9, %v1206_v8 }
  0x59   : > { %1537 = vmatpush.bf16.msra.mxu3 %v1689_v11  ;;  %v1482_v11 = vld [vmem:[%s1725_s8 + $0x124] sm:$0xf] }
  0x5c   : > { %767 = vmatmul.bf16.gmra.mxu0 %v1195_v4  ;;  %827 = vmatmul.bf16.gmra.mxu3 %v1339_v5  ;;  %v1259_v4 = vor.u32 %v1470_v59, %v1256_v62  ;;  %v1263_v5 = vor.u32 %v1472_v0, %v1262_v63 }
  0x5d   : > { %1538 = vmatpush.bf16.msra.mxu3 %v1704_v14  ;;  %856 = vmatmul.bf16.gmra.mxu1 %v1199_v6  ;;  %v1214_v14 = vld [vmem:[%s1725_s8 + $0x68] sm:$0xf] }
  0x5e   : > { %945 = vmatmul.bf16.gmra.mxu2 %v1203_v7  ;;  %v1215_v19 = vor.u32 %v1460_v15, %v1214_v14  ;;  %v1266_v15 = vld [vmem:[%s1725_s8 + $0xd8] sm:$0xf] }
  0x61   : > { %1539 = vmatpush.bf16.msra.mxu3 %v1717_v17  ;;  %v1307_v17 = vor.u32 %v1482_v11, %v1304_v12 }
  0x65   : > { %1540 = vmatpush.bf16.msra.mxu3 %v1734_v20  ;;  %v1218_v20 = vld [vmem:[%s1725_s8 + $0x78] sm:$0xf] }
  0x66   : > { %v1219_v28 = vor.u32 %v1462_v21, %v1218_v20  ;;  %v1268_v20 = vld [vmem:[%s1725_s8 + $0xe4] sm:$0xf0]  ;;  %v1274_v21 = vld [vmem:[%s1725_s8 + $0xe0] sm:$0xf] }
  0x69   : > { %1541 = vmatpush.bf16.msra.mxu3 %v1745_v23  ;;  %v1220_v23 = vld [vmem:[%s1725_s8 + $0x84] sm:$0xf0] }
  0x6a   : > { %v1223_v30 = vor.u32 %v1461_v22, %v1220_v23  ;;  %v1475_v22 = vld [vmem:[%s1725_s8 + $0xe8] sm:$0xf0] }
  0x6c   : > { %772 = vmatmul.bf16.gmra.mxu0 %v1207_v16  ;;  %901 = vmatmul.bf16.vlgmr.msrb.gmra.mxu3 %v1307_v17  ;;  %v1474_v16 = vld [vmem:[%s1725_s8 + $0xe0] sm:$0xf0]  ;;  %v1473_v17 = vld [vmem:[%s1725_s8 + $0xdc] sm:$0xf] }
  0x6d   : > { %861 = vmatmul.bf16.gmra.mxu1 %v1211_v18  ;;  %v1322_v18 = vld [vmem:[%s1725_s8 + $0x140] sm:$0xf]  ;;  %v1267_v26 = vor.u32 %v1474_v16, %v1266_v15 }
  0x6e   : > { %950 = vmatmul.bf16.gmra.mxu2 %v1215_v19  ;;  %v1487_v19 = vld [vmem:[%s1725_s8 + $0x148] sm:$0xf0] }
  0x6f   : > { %v1323_v27 = vor.u32 %v1487_v19, %v1322_v18 }
  0x7c   : > { %777 = vmatmul.bf16.gmra.mxu0 %v1219_v28  ;;  %906 = vmatmul.bf16.gmra.mxu3 %v1319_v29 }
  0x7d   : > { %866 = vmatmul.bf16.gmra.mxu1 %v1223_v30  ;;  %v1271_v30 = vor.u32 %v1473_v17, %v1268_v20 }
  0x7e   : > { %955 = vmatmul.bf16.gmra.mxu2 %v1227_v31  ;;  %v1275_v31 = vor.u32 %v1475_v22, %v1274_v21 }
  0x8c   : > { %782 = vmatmul.bf16.gmra.mxu0 %v1231_v40  ;;  %911 = vmatmul.bf16.gmra.mxu3 %v1331_v41  ;;  %v1278_v41 = vld [vmem:[%s1725_s8 + $0xf0] sm:$0xf] }
  0x8d   : > { %871 = vmatmul.bf16.gmra.mxu1 %v1235_v42  ;;  %v1477_v42 = vld [vmem:[%s1725_s8 + $0xf8] sm:$0xf0] }
  0x8e   : > { %960 = vmatmul.bf16.gmra.mxu2 %v1239_v43  ;;  %v1476_v43 = vld [vmem:[%s1725_s8 + $0xf4] sm:$0xf] }
  0x8f   : > { %v1283_v57 = vor.u32 %v1476_v43, %v1280_v46 }
  0x9c   : > { %787 = vmatmul.bf16.gmra.mxu0 %v1243_v52  ;;  %916 = vmatmul.bf16.gmra.mxu3 %v1343_v53  ;;  %v1279_v52 = vor.u32 %v1477_v42, %v1278_v41  ;;  %v1335_v53 = vor.u32 %v1490_v45, %v1334_v44 }
  0x9d   : > { %876 = vmatmul.bf16.gmra.mxu1 %v1247_v54 }
  0x9e   : > { %965 = vmatmul.bf16.gmra.mxu2 %v1251_v55 }
  0xa9   : > { %v753_v3 = vpop.f32.mrf.mxu0 }
  0xaa   : > { %v754_v6 = vadd.f32 %v1828_v56, %v753_v3  ;;  %v842_v7 = vpop.f32.mrf.mxu1 }
  0xac   : > { %792 = vmatmul.bf16.gmra.mxu0 %v1255_v1  ;;  %990 = vmatmul.bf16.vlgmr.msra.gmra.mxu3 %v1311_v2  ;;  %v843_v8 = vadd.f32 %v842_v7, %v754_v6  ;;  %v1479_v6 = vld [vmem:[%s1725_s8 + $0x10c] sm:$0xf]  ;;  %v1346_v7 = vld [vmem:[%s1725_s8 + $0x170] sm:$0xf] }
  0xad   : > { %881 = vmatmul.bf16.gmra.mxu1 %v1259_v4  ;;  %v1290_v4 = vld [vmem:[%s1725_s8 + $0x108] sm:$0xf] }
  0xae   : > { %970 = vmatmul.bf16.gmra.mxu2 %v1263_v5  ;;  %v1480_v5 = vld [vmem:[%s1725_s8 + $0x110] sm:$0xf0] }
  0xaf   : > { %v1840_v9 = vpop.f32.mrf.mxu3  ;;  %v1291_v16 = vor.u32 %v1480_v5, %v1290_v4 }
  0xb1   : > { %v931_v10 = vpop.f32.mrf.mxu2  ;;  %v755_v12 = vpop.f32.mrf.mxu0 }
  0xb2   : > { %v932_v11 = vadd.f32 %v931_v10, %v843_v8  ;;  %v844_v13 = vpop.f32.mrf.mxu1  ;;  %v756_v14 = vadd.f32 %v1828_v56, %v755_v12  ;;  %v1493_v8 = vld [vmem:[%s1725_s8 + $0x178] sm:$0xf0]  ;;  %v1292_v10 = vld [vmem:[%s1725_s8 + $0x114] sm:$0xf0] }
  0xb3   : > { %v1481_v12 = vld [vmem:[%s1725_s8 + $0x118] sm:$0xf0]  ;;  %v1347_v17 = vor.u32 %v1493_v8, %v1346_v7  ;;  %v1295_v20 = vor.u32 %v1479_v6, %v1292_v10 }
  0xb4   : > { %1011 = vst [vmem:[%s1845_s27] sm:$0xff] %v932_v11  ;;  %v845_v24 = vadd.f32 %v844_v13, %v756_v14  ;;  %v1298_v11 = vld [vmem:[%s1725_s8 + $0x110] sm:$0xf] }
  0xb5   : > { %v1299_v21 = vor.u32 %v1481_v12, %v1298_v11 }
  0xb7   : > { %v1857_v25 = vpop.f32.mrf.mxu3 }
  0xb9   : > { %v933_v23 = vpop.f32.mrf.mxu2  ;;  %v758_v29 = vpop.f32.mrf.mxu0 }
  0xba   : > { %v934_v28 = vadd.f32 %v933_v23, %v845_v24  ;;  %v759_v32 = vadd.f32 %v1828_v56, %v758_v29  ;;  %v847_v33 = vpop.f32.mrf.mxu1 }
  0xbc   : > { %1012 = vst [vmem:[%s1845_s27 + $0x8] sm:$0xff] %v934_v28  ;;  %797 = vmatmul.bf16.gmra.mxu0 %v1267_v26  ;;  %995 = vmatmul.bf16.gmra.mxu3 %v1323_v27  ;;  %v848_v34 = vadd.f32 %v847_v33, %v759_v32 }
  0xbd   : > { %886 = vmatmul.bf16.gmra.mxu1 %v1271_v30 }
  0xbe   : > { %975 = vmatmul.bf16.gmra.mxu2 %v1275_v31 }
  0xbf   : > { %v1861_v35 = vpop.f32.mrf.mxu3 }
  0xc1   : > { %v936_v36 = vpop.f32.mrf.mxu2  ;;  %v760_v38 = vpop.f32.mrf.mxu0 }
  0xc2   : > { %v937_v37 = vadd.f32 %v936_v36, %v848_v34  ;;  %v849_v39 = vpop.f32.mrf.mxu1  ;;  %v761_v40 = vadd.f32 %v1828_v56, %v760_v38 }
  0xc4   : > { %1013 = vst [vmem:[%s1845_s27 + $0x10] sm:$0xff] %v937_v37  ;;  %v850_v49 = vadd.f32 %v849_v39, %v761_v40 }
  0xc7   : > { %v1873_v50 = vpop.f32.mrf.mxu3 }
  0xc9   : > { %v938_v51 = vpop.f32.mrf.mxu2  ;;  %v763_v55 = vpop.f32.mrf.mxu0 }
  0xca   : > { %v939_v54 = vadd.f32 %v938_v51, %v850_v49  ;;  %v764_v59 = vadd.f32 %v1828_v56, %v763_v55  ;;  %v852_v60 = vpop.f32.mrf.mxu1 }
  0xcc   : > { %1014 = vst [vmem:[%s1845_s27 + $0x18] sm:$0xff] %v939_v54  ;;  %802 = vmatmul.bf16.gmra.mxu0 %v1279_v52  ;;  %1000 = vmatmul.bf16.gmra.mxu3 %v1335_v53  ;;  %v853_v61 = vadd.f32 %v852_v60, %v764_v59 }
  0xcd   : > { %891 = vmatmul.bf16.gmra.mxu1 %v1283_v57 }
  0xce   : > { %980 = vmatmul.bf16.gmra.mxu2 %v1287_v58 }
  0xcf   : > { %v1877_v62 = vpop.f32.mrf.mxu3 }
  0xd1   : > { %v941_v63 = vpop.f32.mrf.mxu2  ;;  %v765_v1 = vpop.f32.mrf.mxu0 }
  0xd2   : > { %v942_v0 = vadd.f32 %v941_v63, %v853_v61  ;;  %v854_v2 = vpop.f32.mrf.mxu1  ;;  %v766_v3 = vadd.f32 %v1828_v56, %v765_v1 }
  0xd4   : > { %1015 = vst [vmem:[%s1845_s27 + $0x20] sm:$0xff] %v942_v0  ;;  %v855_v13 = vadd.f32 %v854_v2, %v766_v3 }
  0xd7   : > { %v1889_v14 = vpop.f32.mrf.mxu3 }
  0xd9   : > { %v943_v15 = vpop.f32.mrf.mxu2  ;;  %v768_v19 = vpop.f32.mrf.mxu0 }
  0xda   : > { %v944_v18 = vadd.f32 %v943_v15, %v855_v13  ;;  %v769_v22 = vadd.f32 %v1828_v56, %v768_v19  ;;  %v857_v24 = vpop.f32.mrf.mxu1 }
  0xdc   : > { %1016 = vst [vmem:[%s1845_s27 + $0x28] sm:$0xff] %v944_v18  ;;  %807 = vmatmul.bf16.gmra.mxu0 %v1291_v16  ;;  %1005 = vmatmul.bf16.gmra.mxu3 %v1347_v17  ;;  %v858_v23 = vadd.f32 %v857_v24, %v769_v22 }
  0xdd   : > { %896 = vmatmul.bf16.gmra.mxu1 %v1295_v20 }
  0xde   : > { %985 = vmatmul.bf16.gmra.mxu2 %v1299_v21 }
  0xdf   : > { %v1893_v26 = vpop.f32.mrf.mxu3 }
  0xe1   : > { %v946_v27 = vpop.f32.mrf.mxu2  ;;  %v770_v29 = vpop.f32.mrf.mxu0 }
  0xe2   : > { %v947_v28 = vadd.f32 %v946_v27, %v858_v23  ;;  %v859_v30 = vpop.f32.mrf.mxu1  ;;  %v771_v31 = vadd.f32 %v1828_v56, %v770_v29 }
  0xe4   : > { %1017 = vst [vmem:[%s1845_s27 + $0x30] sm:$0xff] %v947_v28  ;;  %v860_v32 = vadd.f32 %v859_v30, %v771_v31 }
  0xe7   : > { %v1897_v33 = vpop.f32.mrf.mxu3 }
  0xe9   : > { %v948_v34 = vpop.f32.mrf.mxu2  ;;  %v773_v37 = vpop.f32.mrf.mxu0 }
  0xea   : > { %v949_v36 = vadd.f32 %v948_v34, %v860_v32  ;;  %v774_v38 = vadd.f32 %v1828_v56, %v773_v37  ;;  %v862_v39 = vpop.f32.mrf.mxu1 }
  0xec   : > { %1018 = vst [vmem:[%s1845_s27 + $0x38] sm:$0xff] %v949_v36  ;;  %v863_v40 = vadd.f32 %v862_v39, %v774_v38 }
  0xef   : > { %v1901_v41 = vpop.f32.mrf.mxu3 }
  0xf1   : > { %v951_v42 = vpop.f32.mrf.mxu2  ;;  %v775_v44 = vpop.f32.mrf.mxu0 }
  0xf2   : > { %v952_v43 = vadd.f32 %v951_v42, %v863_v40  ;;  %v864_v45 = vpop.f32.mrf.mxu1  ;;  %v776_v46 = vadd.f32 %v1828_v56, %v775_v44  ;;  %v814_v42 = vadd.f32 %v1828_v56, %v1840_v9 }
  0xf4   : > { %1019 = vst [vmem:[%s1845_s27 + $0x40] sm:$0xff] %v952_v43  ;;  %v865_v47 = vadd.f32 %v864_v45, %v776_v46  ;;  %v903_v44 = vadd.f32 %v1901_v41, %v814_v42 }
  0xf7   : > { %v1905_v48 = vpop.f32.mrf.mxu3 }
  0xf9   : > { %v953_v49 = vpop.f32.mrf.mxu2  ;;  %v778_v52 = vpop.f32.mrf.mxu0 }
  0xfa   : > { %v954_v51 = vadd.f32 %v953_v49, %v865_v47  ;;  %v779_v53 = vadd.f32 %v1828_v56, %v778_v52  ;;  %v867_v54 = vpop.f32.mrf.mxu1 }
  0xfc   : > { %1020 = vst [vmem:[%s1845_s27 + $0x48] sm:$0xff] %v954_v51  ;;  %v868_v55 = vadd.f32 %v867_v54, %v779_v53  ;;  %v816_v54 = vadd.f32 %v1828_v56, %v1857_v25 }
  0xfe   : > { %v905_v9 = vadd.f32 %v1905_v48, %v816_v54  ;;  %v831_v54 = vadd.f32 %v1828_v56, %v1897_v33 }
  0xff   : > { %v1909_v57 = vpop.f32.mrf.mxu3 }
 0x101   : > { %v956_v58 = vpop.f32.mrf.mxu2  ;;  %v780_v60 = vpop.f32.mrf.mxu0 }
 0x102   : > { %v957_v59 = vadd.f32 %v956_v58, %v868_v55  ;;  %v869_v61 = vpop.f32.mrf.mxu1  ;;  %v781_v63 = vadd.f32 %v1828_v56, %v780_v60 }
 0x104   : > { %1021 = vst [vmem:[%s1845_s27 + $0x50] sm:$0xff] %v957_v59  ;;  %v870_v0 = vadd.f32 %v869_v61, %v781_v63 }
 0x107   : > { %v1913_v1 = vpop.f32.mrf.mxu3 }
 0x109   : > { %v958_v2 = vpop.f32.mrf.mxu2  ;;  %v783_v4 = vpop.f32.mrf.mxu0 }
 0x10a   : > { %v959_v3 = vadd.f32 %v958_v2, %v870_v0  ;;  %v784_v5 = vadd.f32 %v1828_v56, %v783_v4  ;;  %v872_v6 = vpop.f32.mrf.mxu1  ;;  %v819_v2 = vadd.f32 %v1828_v56, %v1861_v35 }
 0x10c   : > { %1022 = vst [vmem:[%s1845_s27 + $0x58] sm:$0xff] %v959_v3  ;;  %v873_v7 = vadd.f32 %v872_v6, %v784_v5  ;;  %v908_v25 = vadd.f32 %v1909_v57, %v819_v2 }
 0x10f   : > { %v1917_v8 = vpop.f32.mrf.mxu3 }
 0x111   : > { %v961_v10 = vpop.f32.mrf.mxu2  ;;  %v785_v12 = vpop.f32.mrf.mxu0 }
 0x112   : > { %v962_v11 = vadd.f32 %v961_v10, %v873_v7  ;;  %v874_v13 = vpop.f32.mrf.mxu1  ;;  %v786_v15 = vadd.f32 %v1828_v56, %v785_v12  ;;  %v821_v12 = vadd.f32 %v1828_v56, %v1873_v50 }
 0x114   : > { %1023 = vst [vmem:[%s1845_s27 + $0x60] sm:$0xff] %v962_v11  ;;  %v875_v16 = vadd.f32 %v874_v13, %v786_v15  ;;  %v910_v35 = vadd.f32 %v1913_v1, %v821_v12 }
 0x117   : > { %v1921_v17 = vpop.f32.mrf.mxu3 }
 0x119   : > { %v963_v18 = vpop.f32.mrf.mxu2  ;;  %v788_v20 = vpop.f32.mrf.mxu0 }
 0x11a   : > { %v964_v19 = vadd.f32 %v963_v18, %v875_v16  ;;  %v789_v21 = vadd.f32 %v1828_v56, %v788_v20  ;;  %v877_v22 = vpop.f32.mrf.mxu1 }
 0x11c   : > { %1024 = vst [vmem:[%s1845_s27 + $0x68] sm:$0xff] %v964_v19  ;;  %v878_v24 = vadd.f32 %v877_v22, %v789_v21  ;;  %v824_v22 = vadd.f32 %v1828_v56, %v1877_v62 }
 0x11e   : > { %v913_v50 = vadd.f32 %v1917_v8, %v824_v22 }
 0x11f   : > { %v1925_v23 = vpop.f32.mrf.mxu3 }
 0x121   : > { %v966_v27 = vpop.f32.mrf.mxu2  ;;  %v790_v29 = vpop.f32.mrf.mxu0 }
 0x122   : > { %v967_v28 = vadd.f32 %v966_v27, %v878_v24  ;;  %v879_v30 = vpop.f32.mrf.mxu1  ;;  %v791_v31 = vadd.f32 %v1828_v56, %v790_v29 }
 0x124   : > { %1025 = vst [vmem:[%s1845_s27 + $0x70] sm:$0xff] %v967_v28  ;;  %v880_v32 = vadd.f32 %v879_v30, %v791_v31 }
 0x127   : > { %v1929_v34 = vpop.f32.mrf.mxu3 }
 0x129   : > { %v968_v36 = vpop.f32.mrf.mxu2  ;;  %v793_v38 = vpop.f32.mrf.mxu0 }
 0x12a   : > { %v969_v37 = vadd.f32 %v968_v36, %v880_v32  ;;  %v794_v39 = vadd.f32 %v1828_v56, %v793_v38  ;;  %v882_v40 = vpop.f32.mrf.mxu1  ;;  %v826_v36 = vadd.f32 %v1828_v56, %v1889_v14 }
 0x12c   : > { %1026 = vst [vmem:[%s1845_s27 + $0x78] sm:$0xff] %v969_v37  ;;  %v883_v43 = vadd.f32 %v882_v40, %v794_v39  ;;  %v915_v62 = vadd.f32 %v1921_v17, %v826_v36 }
 0x12f   : > { %v991_v45 = vpop.f32.mrf.mxu3 }
 0x130   : > { %v992_v47 = vadd.f32 %v991_v45, %v903_v44  ;;  %v829_v44 = vadd.f32 %v1828_v56, %v1893_v26  ;;  %v920_v26 = vadd.f32 %v1929_v34, %v831_v54 }
 0x131   : > { %v971_v46 = vpop.f32.mrf.mxu2  ;;  %v795_v51 = vpop.f32.mrf.mxu0 }
 0x132   : > { %v972_v49 = vadd.f32 %v971_v46, %v883_v43  ;;  %1035 = vst [vmem:[%s1845_s27 + $0xc0] sm:$0xff] %v992_v47  ;;  %v884_v52 = vpop.f32.mrf.mxu1  ;;  %v796_v53 = vadd.f32 %v1828_v56, %v795_v51  ;;  %v918_v14 = vadd.f32 %v1925_v23, %v829_v44 }
 0x134   : > { %1027 = vst [vmem:[%s1845_s27 + $0x80] sm:$0xff] %v972_v49  ;;  %v885_v55 = vadd.f32 %v884_v52, %v796_v53 }
 0x137   : > { %v993_v58 = vpop.f32.mrf.mxu3 }
 0x138   : > { %v994_v59 = vadd.f32 %v993_v58, %v905_v9 }
 0x139   : > { %v973_v41 = vpop.f32.mrf.mxu2  ;;  %v798_v61 = vpop.f32.mrf.mxu0 }
 0x13a   : > { %v974_v60 = vadd.f32 %v973_v41, %v885_v55  ;;  %1036 = vst [vmem:[%s1845_s27 + $0xc8] sm:$0xff] %v994_v59  ;;  %v799_v63 = vadd.f32 %v1828_v56, %v798_v61  ;;  %v887_v0 = vpop.f32.mrf.mxu1 }
 0x13c   : > { %1028 = vst [vmem:[%s1845_s27 + $0x88] sm:$0xff] %v974_v60  ;;  %v888_v3 = vadd.f32 %v887_v0, %v799_v63 }
 0x13f   : > { %v996_v48 = vpop.f32.mrf.mxu3 }
 0x140   : > { %v997_v5 = vadd.f32 %v996_v48, %v908_v25 }
 0x141   : > { %v976_v4 = vpop.f32.mrf.mxu2  ;;  %v800_v7 = vpop.f32.mrf.mxu0 }
 0x142   : > { %v977_v6 = vadd.f32 %v976_v4, %v888_v3  ;;  %1037 = vst [vmem:[%s1845_s27 + $0xd0] sm:$0xff] %v997_v5  ;;  %v889_v10 = vpop.f32.mrf.mxu1  ;;  %v801_v11 = vadd.f32 %v1828_v56, %v800_v7 }
 0x144   : > { %1029 = vst [vmem:[%s1845_s27 + $0x90] sm:$0xff] %v977_v6  ;;  %v890_v13 = vadd.f32 %v889_v10, %v801_v11 }
 0x147   : > { %v998_v15 = vpop.f32.mrf.mxu3 }
 0x148   : > { %v999_v16 = vadd.f32 %v998_v15, %v910_v35 }
 0x149   : > { %v978_v57 = vpop.f32.mrf.mxu2  ;;  %v803_v19 = vpop.f32.mrf.mxu0 }
 0x14a   : > { %v979_v18 = vadd.f32 %v978_v57, %v890_v13  ;;  %1038 = vst [vmem:[%s1845_s27 + $0xd8] sm:$0xff] %v999_v16  ;;  %v804_v20 = vadd.f32 %v1828_v56, %v803_v19  ;;  %v892_v21 = vpop.f32.mrf.mxu1 }
 0x14c   : > { %1030 = vst [vmem:[%s1845_s27 + $0x98] sm:$0xff] %v979_v18  ;;  %v893_v24 = vadd.f32 %v892_v21, %v804_v20 }
 0x14f   : > { %v1001_v1 = vpop.f32.mrf.mxu3 }
 0x150   : > { %v1002_v28 = vadd.f32 %v1001_v1, %v913_v50 }
 0x151   : > { %v981_v27 = vpop.f32.mrf.mxu2  ;;  %v805_v30 = vpop.f32.mrf.mxu0 }
 0x152   : > { %v982_v29 = vadd.f32 %v981_v27, %v893_v24  ;;  %1039 = vst [vmem:[%s1845_s27 + $0xe0] sm:$0xff] %v1002_v28  ;;  %v894_v31 = vpop.f32.mrf.mxu1  ;;  %v806_v32 = vadd.f32 %v1828_v56, %v805_v30 }
 0x154   : > { %1031 = vst [vmem:[%s1845_s27 + $0xa0] sm:$0xff] %v982_v29  ;;  %v895_v37 = vadd.f32 %v894_v31, %v806_v32 }
 0x157   : > { %v1003_v38 = vpop.f32.mrf.mxu3 }
 0x158   : > { %v1004_v39 = vadd.f32 %v1003_v38, %v915_v62 }
 0x159   : > { %v983_v8 = vpop.f32.mrf.mxu2  ;;  %v808_v42 = vpop.f32.mrf.mxu0 }
 0x15a   : > { %v984_v40 = vadd.f32 %v983_v8, %v895_v37  ;;  %1040 = vst [vmem:[%s1845_s27 + $0xe8] sm:$0xff] %v1004_v39  ;;  %v809_v43 = vadd.f32 %v1828_v56, %v808_v42  ;;  %v897_v45 = vpop.f32.mrf.mxu1 }
 0x15c   : > { %1032 = vst [vmem:[%s1845_s27 + $0xa8] sm:$0xff] %v984_v40  ;;  %v898_v46 = vadd.f32 %v897_v45, %v809_v43 }
 0x15f   : > { %v1006_v17 = vpop.f32.mrf.mxu3 }
 0x160   : > { %v1007_v49 = vadd.f32 %v1006_v17, %v918_v14 }
 0x161   : > { %v986_v47 = vpop.f32.mrf.mxu2  ;;  %v810_v52 = vpop.f32.mrf.mxu0 }
 0x162   : > { %v987_v51 = vadd.f32 %v986_v47, %v898_v46  ;;  %1041 = vst [vmem:[%s1845_s27 + $0xf0] sm:$0xff] %v1007_v49  ;;  %v811_v53 = vadd.f32 %v1828_v56, %v810_v52  ;;  %v899_v9 = vpop.f32.mrf.mxu1 }
 0x164   : > { %1033 = vst [vmem:[%s1845_s27 + $0xb0] sm:$0xff] %v987_v51  ;;  %v900_v55 = vadd.f32 %v899_v9, %v811_v53 }
 0x167   : > { %v1008_v58 = vpop.f32.mrf.mxu3 }
 0x168   : > { %v1009_v41 = vadd.f32 %v1008_v58, %v920_v26 }
 0x169   : > { %v988_v23 = vpop.f32.mrf.mxu2 }
 0x16a   : > { %v989_v59 = vadd.f32 %v988_v23, %v900_v55  ;;  %1042 = vst [vmem:[%s1845_s27 + $0xf8] sm:$0xff] %v1009_v41 }
 0x16c   : > { %1034 = vst [vmem:[%s1845_s27 + $0xb8] sm:$0xff] %v989_v59 }
 0x16d PF: > { %s13_s14 = sadd.s32 1, %s1590_s14   ;;  %s1993_s12 = smov %s1586_s13 }
 0x16e   : > { %p10_p5 = scmp.ge.s32.totalorder %s13_s14, 6   ;;  %s1994_s13 = smov %s1996_s15 }
 0x170   :  { %12 = sbr.rel (!%p10_p5) target bundleno = 2 (0x2), region = 68 }

// kernel: aesfa_forward.31
= control target key start
LH: loop header
LB: loop body
LE: loop exit
PB: predicated region body
PF: predicated region fallthrough
CT: control target
= control target key end

     0   :  { %s1708_s12 = smov 0   ;;  %s1710_s13 = smov 0   ;;  %s2085_s0 = inlined_call_operand.vmem [shape: bf16[1024,384], index: 0, kind: input, shape index: {}]   ;;  %s2086_s1 = inlined_call_operand.vmem [shape: bf16[384,128], index: 1, kind: input, shape index: {}]   ;;  %s2087_s2 = inlined_call_operand.vmem [shape: f32[1,128], index: 2, kind: input, shape index: {}]   ;;  %s2088_s3 = inlined_call_operand.vmem [shape: f32[1024,128], index: 3, kind: output, shape index: {}]  }
   0x1   :  { %s1712_s14 = smov 0  }
   0x2 LB: > { %s25_s15 = sadd.s32 1, %s1682_s13  ;;  %p1247_p0 = scmp.ge.s32.totalorder %s1686_s14, 1  ;;  %s1686_s14 = sphi %s1712_s14, %s13_s14   ;;  %s1682_s13 = sphi %s1710_s13, %s2090_s13   ;;  %s1678_s12 = sphi %s1708_s12, %s2089_s12  }
   0x3   : > { %p27_p1 = scmp.ge.s32.totalorder %s25_s15, 4  ;;  %p170_p2 = scmp.lt.s32.totalorder %s1686_s14, 5 }
   0x5   : > { %s2092_s15 = smov (%p27_p1, %s25_s15), 0  ;;  %p171_p3 = pnand %p1247_p0, %p170_p2 }
   0x6   : > { %s1248_s7 = sshll.u32 (!%p171_p3), %s1678_s12, 5 }
   0x7   : > { %174 = sbr.rel (%p171_p3) target bundleno = 368 (0x170), region = 32  ;;  %p206_p4 = scmp.lt.s32.totalorder (!%p171_p3), %s1248_s7, 127 }
   0xc   : > { %v1597_v0 = vld [vmem:[%s2086_s1 + $0x38] sm:$0xff]  ;;  %v1596_v3 = vld [vmem:[%s2086_s1 + $0x30] sm:$0xff]  ;;  %v1595_v6 = vld [vmem:[%s2086_s1 + $0x28] sm:$0xff]  ;;  %s2094_s7 = smov (!%p206_p4, %s1248_s7), 127 }
   0xd   : > { %v1734_v1 = vld [vmem:[%s2086_s1 + $0x78] sm:$0xff]  ;;  %744 = vmatpush.bf16.msra.mxu0 %v1597_v0  ;;  %1614 = vmatpush.bf16.msra.mxu3 %v1597_v0  ;;  %v1749_v4 = vld [vmem:[%s2086_s1 + $0x70] sm:$0xff]  ;;  %v1764_v7 = vld [vmem:[%s2086_s1 + $0x68] sm:$0xff]  ;;  %s1638_s25 = smul.u32 12, %s2094_s7  ;;  %s1251_s24 = sshll.u32 %s2094_s7, 3 }
   0xe   : > { %v1739_v2 = vld [vmem:[%s2086_s1 + $0xb8] sm:$0xff]  ;;  %833 = vmatpush.bf16.msra.mxu1 %v1734_v1  ;;  %v1754_v5 = vld [vmem:[%s2086_s1 + $0xb0] sm:$0xff]  ;;  %v1769_v8 = vld [vmem:[%s2086_s1 + $0xa8] sm:$0xff]  ;;  %s1941_s27 = scalar_lea.vmem %s2088_s3, %s1251_s24 }
   0xf   : > { %922 = vmatpush.bf16.msra.mxu2 %v1739_v2  ;;  %v1594_v9 = vld [vmem:[%s2086_s1 + $0x20] sm:$0xff]  ;;  %v1593_v12 = vld [vmem:[%s2086_s1 + $0x18] sm:$0xff]  ;;  %v1592_v15 = vld [vmem:[%s2086_s1 + $0x10] sm:$0xff]  ;;  %s1821_s8 = scalar_lea.vmem %s2085_s0, %s1638_s25 }
  0x10   : > { %v1780_v10 = vld [vmem:[%s2086_s1 + $0x60] sm:$0xff]  ;;  %v1601_v13 = vld [vmem:[%s2086_s1 + $0x58] sm:$0xff]  ;;  %v1600_v16 = vld [vmem:[%s2086_s1 + $0x50] sm:$0xff] }
  0x11   : > { %745 = vmatpush.bf16.msra.mxu0 %v1596_v3  ;;  %1615 = vmatpush.bf16.msra.mxu3 %v1596_v3  ;;  %v1785_v11 = vld [vmem:[%s2086_s1 + $0xa0] sm:$0xff]  ;;  %v1800_v14 = vld [vmem:[%s2086_s1 + $0x98] sm:$0xff]  ;;  %v1813_v17 = vld [vmem:[%s2086_s1 + $0x90] sm:$0xff] }
  0x12   : > { %834 = vmatpush.bf16.msra.mxu1 %v1749_v4  ;;  %v1591_v18 = vld [vmem:[%s2086_s1 + $0x8] sm:$0xff]  ;;  %v1590_v21 = vld [vmem:[%s2086_s1] sm:$0xff]  ;;  %v1256_v29 = vld [vmem:[%s1821_s8 + $0xc] sm:$0xf0] }
  0x13   : > { %923 = vmatpush.bf16.msra.mxu2 %v1754_v5  ;;  %v1599_v19 = vld [vmem:[%s2086_s1 + $0x48] sm:$0xff]  ;;  %v1598_v22 = vld [vmem:[%s2086_s1 + $0x40] sm:$0xff]  ;;  %v1544_v31 = vld [vmem:[%s1821_s8 + $0x10] sm:$0xf0] }
  0x14   : > { %v1830_v20 = vld [vmem:[%s2086_s1 + $0x88] sm:$0xff]  ;;  %v1841_v23 = vld [vmem:[%s2086_s1 + $0x80] sm:$0xff]  ;;  %v1266_v36 = vld [vmem:[%s1821_s8 + $0x18] sm:$0xf] }
  0x15   : > { %746 = vmatpush.bf16.msra.mxu0 %v1595_v6  ;;  %1616 = vmatpush.bf16.msra.mxu3 %v1595_v6  ;;  %v1254_v24 = vld [vmem:[%s1821_s8] sm:$0xf]  ;;  %v1543_v25 = vld [vmem:[%s1821_s8 + $0x8] sm:$0xf0]  ;;  %v1542_v28 = vld [vmem:[%s1821_s8 + $0x4] sm:$0xf] }
  0x16   : > { %835 = vmatpush.bf16.msra.mxu1 %v1764_v7  ;;  %v1398_v26 = vld [vmem:[%s1821_s8 + $0x120] sm:$0xf]  ;;  %v1579_v27 = vld [vmem:[%s1821_s8 + $0x128] sm:$0xf0]  ;;  %v1262_v30 = vld [vmem:[%s1821_s8 + $0x8] sm:$0xf]  ;;  %v1255_v32 = vor.u32 %v1543_v25, %v1254_v24  ;;  %v1259_v34 = vor.u32 %v1542_v28, %v1256_v29 }
  0x17   : > { %924 = vmatpush.bf16.msra.mxu2 %v1769_v8  ;;  %v1399_v33 = vor.u32 %v1579_v27, %v1398_v26  ;;  %v1263_v35 = vor.u32 %v1544_v31, %v1262_v30  ;;  %v1546_v37 = vld [vmem:[%s1821_s8 + $0x20] sm:$0xf0]  ;;  %v1410_v38 = vld [vmem:[%s1821_s8 + $0x138] sm:$0xf]  ;;  %v1545_v40 = vld [vmem:[%s1821_s8 + $0x1c] sm:$0xf] }
  0x18   : > { %v1582_v39 = vld [vmem:[%s1821_s8 + $0x140] sm:$0xf0]  ;;  %v1268_v41 = vld [vmem:[%s1821_s8 + $0x24] sm:$0xf0]  ;;  %v1274_v42 = vld [vmem:[%s1821_s8 + $0x20] sm:$0xf]  ;;  %v1267_v44 = vor.u32 %v1546_v37, %v1266_v36 }
  0x19   : > { %747 = vmatpush.bf16.msra.mxu0 %v1594_v9  ;;  %1617 = vmatpush.bf16.msra.mxu3 %v1594_v9  ;;  %v1547_v43 = vld [vmem:[%s1821_s8 + $0x28] sm:$0xf0]  ;;  %v1411_v45 = vor.u32 %v1582_v39, %v1410_v38  ;;  %v1271_v46 = vor.u32 %v1545_v40, %v1268_v41  ;;  %v1278_v48 = vld [vmem:[%s1821_s8 + $0x30] sm:$0xf]  ;;  %v1549_v49 = vld [vmem:[%s1821_s8 + $0x38] sm:$0xf0] }
  0x1a   : > { %836 = vmatpush.bf16.msra.mxu1 %v1780_v10  ;;  %v1275_v47 = vor.u32 %v1547_v43, %v1274_v42  ;;  %v1422_v50 = vld [vmem:[%s1821_s8 + $0x150] sm:$0xf]  ;;  %v1585_v51 = vld [vmem:[%s1821_s8 + $0x158] sm:$0xf0]  ;;  %v1548_v52 = vld [vmem:[%s1821_s8 + $0x34] sm:$0xf]  ;;  %v1279_v56 = vor.u32 %v1549_v49, %v1278_v48 }
  0x1b   : > { %925 = vmatpush.bf16.msra.mxu2 %v1785_v11  ;;  %v1280_v53 = vld [vmem:[%s1821_s8 + $0x3c] sm:$0xf0]  ;;  %v1286_v54 = vld [vmem:[%s1821_s8 + $0x38] sm:$0xf]  ;;  %v1550_v55 = vld [vmem:[%s1821_s8 + $0x40] sm:$0xf0]  ;;  %v1423_v57 = vor.u32 %v1585_v51, %v1422_v50 }
  0x1c   : > { %v1283_v58 = vor.u32 %v1548_v52, %v1280_v53  ;;  %v1287_v59 = vor.u32 %v1550_v55, %v1286_v54  ;;  %v1290_v60 = vld [vmem:[%s1821_s8 + $0x48] sm:$0xf]  ;;  %v1552_v61 = vld [vmem:[%s1821_s8 + $0x50] sm:$0xf0]  ;;  %v1551_v0 = vld [vmem:[%s1821_s8 + $0x4c] sm:$0xf] }
  0x1d   : > { %748 = vmatpush.bf16.msra.mxu0 %v1593_v12  ;;  %1618 = vmatpush.bf16.msra.mxu3 %v1593_v12  ;;  %v1434_v62 = vld [vmem:[%s1821_s8 + $0x168] sm:$0xf]  ;;  %v1588_v63 = vld [vmem:[%s1821_s8 + $0x170] sm:$0xf0]  ;;  %v1553_v3 = vld [vmem:[%s1821_s8 + $0x58] sm:$0xf0] }
  0x1e   : > { %837 = vmatpush.bf16.msra.mxu1 %v1601_v13  ;;  %v1555_v9 = vld [vmem:[%s1821_s8 + $0x68] sm:$0xf0]  ;;  %v1400_v12 = vld [vmem:[%s1821_s8 + $0x12c] sm:$0xf0]  ;;  %v1581_v24 = vld [vmem:[%s1821_s8 + $0x13c] sm:$0xf] }
  0x1f   : > { %926 = vmatpush.bf16.msra.mxu2 %v1800_v14  ;;  %v1412_v25 = vld [vmem:[%s1821_s8 + $0x144] sm:$0xf0]  ;;  %v1322_v26 = vld [vmem:[%s1821_s8 + $0x80] sm:$0xf]  ;;  %v1559_v27 = vld [vmem:[%s1821_s8 + $0x88] sm:$0xf0] }
  0x20   : > { %v1415_v29 = vor.u32 %v1581_v24, %v1412_v25  ;;  %v1323_v31 = vor.u32 %v1559_v27, %v1322_v26  ;;  %v1424_v36 = vld [vmem:[%s1821_s8 + $0x15c] sm:$0xf0]  ;;  %v1334_v38 = vld [vmem:[%s1821_s8 + $0x98] sm:$0xf]  ;;  %v1562_v39 = vld [vmem:[%s1821_s8 + $0xa0] sm:$0xf0] }
  0x21   : > { %749 = vmatpush.bf16.msra.mxu0 %v1592_v15  ;;  %1619 = vmatpush.bf16.msra.mxu3 %v1592_v15  ;;  %v1556_v15 = vld [vmem:[%s1821_s8 + $0x70] sm:$0xf0]  ;;  %v1328_v37 = vld [vmem:[%s1821_s8 + $0x9c] sm:$0xf0]  ;;  %v1335_v43 = vor.u32 %v1562_v39, %v1334_v38  ;;  %v1436_v48 = vld [vmem:[%s1821_s8 + $0x174] sm:$0xf0] }
  0x22   : > { %838 = vmatpush.bf16.msra.mxu1 %v1600_v16  ;;  %v1340_v49 = vld [vmem:[%s1821_s8 + $0xb4] sm:$0xf0]  ;;  %v1346_v50 = vld [vmem:[%s1821_s8 + $0xb0] sm:$0xf]  ;;  %v1565_v51 = vld [vmem:[%s1821_s8 + $0xb8] sm:$0xf0] }
  0x23   : > { %927 = vmatpush.bf16.msra.mxu2 %v1813_v17  ;;  %v1347_v55 = vor.u32 %v1565_v51, %v1346_v50  ;;  %v1370_v24 = vld [vmem:[%s1821_s8 + $0xe0] sm:$0xf]  ;;  %v1571_v25 = vld [vmem:[%s1821_s8 + $0xe8] sm:$0xf0]  ;;  %v1430_v51 = vld [vmem:[%s1821_s8 + $0x158] sm:$0xf] }
  0x24   : > { %v1376_v50 = vld [vmem:[%s1821_s8 + $0xfc] sm:$0xf0] }
  0x25   : > { %750 = vmatpush.bf16.msra.mxu0 %v1591_v18  ;;  %1620 = vmatpush.bf16.msra.mxu3 %v1591_v18 }
  0x26   : > { %839 = vmatpush.bf16.msra.mxu1 %v1599_v19 }
  0x27   : > { %928 = vmatpush.bf16.msra.mxu2 %v1830_v20 }
  0x29   : > { %751 = vmatpush.bf16.msra.mxu0 %v1590_v21  ;;  %1621 = vmatpush.bf16.msra.mxu3 %v1590_v21  ;;  %v1558_v21 = vld [vmem:[%s1821_s8 + $0x80] sm:$0xf0] }
  0x2a   : > { %840 = vmatpush.bf16.msra.mxu1 %v1598_v22 }
  0x2b   : > { %929 = vmatpush.bf16.msra.mxu2 %v1841_v23 }
  0x2c   : > { %752 = vmatmul.bf16.vlgmr.msra.gmra.mxu0 %v1255_v32  ;;  %812 = vmatmul.bf16.vlgmr.msra.gmra.mxu3 %v1399_v33  ;;  %v1326_v32 = vld [vmem:[%s1821_s8 + $0x90] sm:$0xf]  ;;  %v1561_v33 = vld [vmem:[%s1821_s8 + $0x98] sm:$0xf0] }
  0x2d   : > { %1622 = vmatpush.bf16.msrb.mxu3 %v1734_v1  ;;  %841 = vmatmul.bf16.vlgmr.msra.gmra.mxu1 %v1259_v34  ;;  %v1292_v1 = vld [vmem:[%s1821_s8 + $0x54] sm:$0xf0]  ;;  %v1560_v34 = vld [vmem:[%s1821_s8 + $0x94] sm:$0xf]  ;;  %v1327_v40 = vor.u32 %v1561_v33, %v1326_v32  ;;  %v1371_v33 = vor.u32 %v1571_v25, %v1370_v24 }
  0x2e   : > { %930 = vmatmul.bf16.vlgmr.msra.gmra.mxu2 %v1263_v35  ;;  %v1295_v6 = vor.u32 %v1551_v0, %v1292_v1  ;;  %v1584_v35 = vld [vmem:[%s1821_s8 + $0x154] sm:$0xf]  ;;  %v1331_v42 = vor.u32 %v1560_v34, %v1328_v37 }
  0x2f   : > { %v1427_v41 = vor.u32 %v1584_v35, %v1424_v36  ;;  %v1568_v0 = vld [vmem:[%s1821_s8 + $0xd0] sm:$0xf0] }
  0x31   : > { %1623 = vmatpush.bf16.msrb.mxu3 %v1749_v4  ;;  %v1291_v4 = vor.u32 %v1552_v61, %v1290_v60  ;;  %v1406_v60 = vld [vmem:[%s1821_s8 + $0x128] sm:$0xf]  ;;  %v1580_v61 = vld [vmem:[%s1821_s8 + $0x130] sm:$0xf0] }
  0x35   : > { %1624 = vmatpush.bf16.msrb.mxu3 %v1764_v7 }
  0x39   : > { %1625 = vmatpush.bf16.msrb.mxu3 %v1780_v10  ;;  %v1554_v10 = vld [vmem:[%s1821_s8 + $0x64] sm:$0xf] }
  0x3c   : > { %757 = vmatmul.bf16.gmra.mxu0 %v1267_v44  ;;  %817 = vmatmul.bf16.gmra.mxu3 %v1411_v45  ;;  %v1338_v44 = vld [vmem:[%s1821_s8 + $0xa8] sm:$0xf]  ;;  %v1564_v45 = vld [vmem:[%s1821_s8 + $0xb0] sm:$0xf0] }
  0x3d   : > { %1626 = vmatpush.bf16.msrb.mxu3 %v1601_v13  ;;  %846 = vmatmul.bf16.gmra.mxu1 %v1271_v46  ;;  %v1304_v13 = vld [vmem:[%s1821_s8 + $0x6c] sm:$0xf0]  ;;  %v1563_v46 = vld [vmem:[%s1821_s8 + $0xac] sm:$0xf]  ;;  %v1339_v52 = vor.u32 %v1564_v45, %v1338_v44 }
  0x3e   : > { %935 = vmatmul.bf16.gmra.mxu2 %v1275_v47  ;;  %v1307_v18 = vor.u32 %v1554_v10, %v1304_v13  ;;  %v1587_v47 = vld [vmem:[%s1821_s8 + $0x16c] sm:$0xf]  ;;  %v1343_v54 = vor.u32 %v1563_v46, %v1340_v49  ;;  %v1374_v46 = vld [vmem:[%s1821_s8 + $0xf0] sm:$0xf] }
  0x3f   : > { %v1439_v53 = vor.u32 %v1587_v47, %v1436_v48  ;;  %v1573_v47 = vld [vmem:[%s1821_s8 + $0xf8] sm:$0xf0]  ;;  %v1572_v48 = vld [vmem:[%s1821_s8 + $0xf4] sm:$0xf] }
  0x41   : > { %1627 = vmatpush.bf16.msrb.mxu3 %v1600_v16 }
  0x45   : > { %1628 = vmatpush.bf16.msrb.mxu3 %v1599_v19 }
  0x49   : > { %1629 = vmatpush.bf16.msrb.mxu3 %v1598_v22  ;;  %v1557_v22 = vld [vmem:[%s1821_s8 + $0x7c] sm:$0xf] }
  0x4c   : > { %762 = vmatmul.bf16.gmra.mxu0 %v1279_v56  ;;  %822 = vmatmul.bf16.gmra.mxu3 %v1423_v57  ;;  %v1924_v56 = vld [vmem:[%s2087_s2] ss:$0 sm:$0xff] }
  0x4d   : > { %1630 = vmatpush.bf16.msra.mxu3 %v1739_v2  ;;  %851 = vmatmul.bf16.gmra.mxu1 %v1283_v58  ;;  %v1298_v2 = vld [vmem:[%s1821_s8 + $0x50] sm:$0xf]  ;;  %v1350_v57 = vld [vmem:[%s1821_s8 + $0xc0] sm:$0xf]  ;;  %v1567_v58 = vld [vmem:[%s1821_s8 + $0xc8] sm:$0xf0] }
  0x4e   : > { %940 = vmatmul.bf16.gmra.mxu2 %v1287_v59  ;;  %v1299_v7 = vor.u32 %v1553_v3, %v1298_v2  ;;  %v1566_v59 = vld [vmem:[%s1821_s8 + $0xc4] sm:$0xf]  ;;  %v1351_v1 = vor.u32 %v1567_v58, %v1350_v57  ;;  %v1407_v2 = vor.u32 %v1580_v61, %v1406_v60 }
  0x51   : > { %1631 = vmatpush.bf16.msra.mxu3 %v1754_v5  ;;  %v1435_v5 = vor.u32 %v1588_v63, %v1434_v62  ;;  %v1352_v62 = vld [vmem:[%s1821_s8 + $0xcc] sm:$0xf0]  ;;  %v1358_v63 = vld [vmem:[%s1821_s8 + $0xc8] sm:$0xf] }
  0x55   : > { %1632 = vmatpush.bf16.msra.mxu3 %v1769_v8  ;;  %v1302_v8 = vld [vmem:[%s1821_s8 + $0x60] sm:$0xf] }
  0x56   : > { %v1303_v16 = vor.u32 %v1555_v9, %v1302_v8 }
  0x59   : > { %1633 = vmatpush.bf16.msra.mxu3 %v1785_v11  ;;  %v1578_v11 = vld [vmem:[%s1821_s8 + $0x124] sm:$0xf] }
  0x5c   : > { %767 = vmatmul.bf16.gmra.mxu0 %v1291_v4  ;;  %827 = vmatmul.bf16.gmra.mxu3 %v1435_v5  ;;  %v1355_v4 = vor.u32 %v1566_v59, %v1352_v62  ;;  %v1359_v5 = vor.u32 %v1568_v0, %v1358_v63  ;;  %v1375_v59 = vor.u32 %v1573_v47, %v1374_v46 }
  0x5d   : > { %1634 = vmatpush.bf16.msra.mxu3 %v1800_v14  ;;  %856 = vmatmul.bf16.gmra.mxu1 %v1295_v6  ;;  %v1310_v14 = vld [vmem:[%s1821_s8 + $0x68] sm:$0xf]  ;;  %v1379_v63 = vor.u32 %v1572_v48, %v1376_v50 }
  0x5e   : > { %945 = vmatmul.bf16.gmra.mxu2 %v1299_v7  ;;  %v1311_v19 = vor.u32 %v1556_v15, %v1310_v14 }
  0x61   : > { %1635 = vmatpush.bf16.msra.mxu3 %v1813_v17  ;;  %v1403_v17 = vor.u32 %v1578_v11, %v1400_v12 }
  0x65   : > { %1636 = vmatpush.bf16.msra.mxu3 %v1830_v20  ;;  %v1314_v20 = vld [vmem:[%s1821_s8 + $0x78] sm:$0xf] }
  0x66   : > { %v1315_v28 = vor.u32 %v1558_v21, %v1314_v20  ;;  %v1418_v20 = vld [vmem:[%s1821_s8 + $0x140] sm:$0xf]  ;;  %v1583_v21 = vld [vmem:[%s1821_s8 + $0x148] sm:$0xf0] }
  0x69   : > { %1637 = vmatpush.bf16.msra.mxu3 %v1841_v23  ;;  %v1316_v23 = vld [vmem:[%s1821_s8 + $0x84] sm:$0xf0] }
  0x6a   : > { %v1319_v30 = vor.u32 %v1557_v22, %v1316_v23  ;;  %v1364_v22 = vld [vmem:[%s1821_s8 + $0xe4] sm:$0xf0] }
  0x6c   : > { %772 = vmatmul.bf16.gmra.mxu0 %v1303_v16  ;;  %901 = vmatmul.bf16.vlgmr.msrb.gmra.mxu3 %v1403_v17  ;;  %v1362_v16 = vld [vmem:[%s1821_s8 + $0xd8] sm:$0xf]  ;;  %v1570_v17 = vld [vmem:[%s1821_s8 + $0xe0] sm:$0xf0] }
  0x6d   : > { %861 = vmatmul.bf16.gmra.mxu1 %v1307_v18 }
  0x6e   : > { %950 = vmatmul.bf16.gmra.mxu2 %v1311_v19  ;;  %v1569_v19 = vld [vmem:[%s1821_s8 + $0xdc] sm:$0xf] }
  0x6f   : > { %v1367_v32 = vor.u32 %v1569_v19, %v1364_v22  ;;  %v1442_v19 = vld [vmem:[%s1821_s8 + $0x170] sm:$0xf]  ;;  %v1577_v22 = vld [vmem:[%s1821_s8 + $0x118] sm:$0xf0] }
  0x7c   : > { %777 = vmatmul.bf16.gmra.mxu0 %v1315_v28  ;;  %906 = vmatmul.bf16.gmra.mxu3 %v1415_v29  ;;  %v1363_v28 = vor.u32 %v1570_v17, %v1362_v16  ;;  %v1419_v29 = vor.u32 %v1583_v21, %v1418_v20  ;;  %v1575_v16 = vld [vmem:[%s1821_s8 + $0x10c] sm:$0xf]  ;;  %v1589_v20 = vld [vmem:[%s1821_s8 + $0x178] sm:$0xf0]  ;;  %v1394_v21 = vld [vmem:[%s1821_s8 + $0x110] sm:$0xf] }
  0x7d   : > { %866 = vmatmul.bf16.gmra.mxu1 %v1319_v30 }
  0x7e   : > { %955 = vmatmul.bf16.gmra.mxu2 %v1323_v31 }
  0x8c   : > { %782 = vmatmul.bf16.gmra.mxu0 %v1327_v40  ;;  %911 = vmatmul.bf16.gmra.mxu3 %v1427_v41 }
  0x8d   : > { %871 = vmatmul.bf16.gmra.mxu1 %v1331_v42 }
  0x8e   : > { %960 = vmatmul.bf16.gmra.mxu2 %v1335_v43 }
  0x9c   : > { %787 = vmatmul.bf16.gmra.mxu0 %v1339_v52  ;;  %916 = vmatmul.bf16.gmra.mxu3 %v1439_v53  ;;  %v1586_v52 = vld [vmem:[%s1821_s8 + $0x160] sm:$0xf0]  ;;  %v1382_v53 = vld [vmem:[%s1821_s8 + $0xf8] sm:$0xf] }
  0x9d   : > { %876 = vmatmul.bf16.gmra.mxu1 %v1343_v54  ;;  %v1574_v54 = vld [vmem:[%s1821_s8 + $0x100] sm:$0xf0]  ;;  %v1431_v60 = vor.u32 %v1586_v52, %v1430_v51 }
  0x9e   : > { %965 = vmatmul.bf16.gmra.mxu2 %v1347_v55  ;;  %v1383_v0 = vor.u32 %v1574_v54, %v1382_v53 }
  0xa9   : > { %v753_v3 = vpop.f32.mrf.mxu0 }
  0xaa   : > { %v754_v6 = vadd.f32 %v1924_v56, %v753_v3  ;;  %v842_v7 = vpop.f32.mrf.mxu1 }
  0xac   : > { %792 = vmatmul.bf16.gmra.mxu0 %v1351_v1  ;;  %990 = vmatmul.bf16.vlgmr.msra.gmra.mxu3 %v1407_v2  ;;  %v843_v8 = vadd.f32 %v842_v7, %v754_v6 }
  0xad   : > { %881 = vmatmul.bf16.gmra.mxu1 %v1355_v4 }
  0xae   : > { %970 = vmatmul.bf16.gmra.mxu2 %v1359_v5 }
  0xaf   : > { %v1935_v9 = vpop.f32.mrf.mxu3 }
  0xb1   : > { %v931_v10 = vpop.f32.mrf.mxu2  ;;  %v755_v12 = vpop.f32.mrf.mxu0 }
  0xb2   : > { %v932_v11 = vadd.f32 %v931_v10, %v843_v8  ;;  %v844_v13 = vpop.f32.mrf.mxu1  ;;  %v756_v15 = vadd.f32 %v1924_v56, %v755_v12 }
  0xb4   : > { %vm1011_vm0 = vcmp.ge.f32.partialorder %v932_v11, 0.0  ;;  %v1043_v14 = vmul.f32 0.01, %v932_v11  ;;  %v845_v23 = vadd.f32 %v844_v13, %v756_v15  ;;  %v1576_v15 = vld [vmem:[%s1821_s8 + $0x110] sm:$0xf0] }
  0xb6   : > { %v1075_v18 = vsel %vm1011_vm0, %v932_v11, %v1043_v14  ;;  %v1386_v14 = vld [vmem:[%s1821_s8 + $0x108] sm:$0xf] }
  0xb7   : > { %1107 = vst [vmem:[%s1941_s27] sm:$0xff] %v1075_v18  ;;  %v1953_v26 = vpop.f32.mrf.mxu3  ;;  %v1388_v18 = vld [vmem:[%s1821_s8 + $0x114] sm:$0xf0] }
  0xb9   : > { %v933_v27 = vpop.f32.mrf.mxu2  ;;  %v758_v31 = vpop.f32.mrf.mxu0 }
  0xba   : > { %v934_v30 = vadd.f32 %v933_v27, %v845_v23  ;;  %v759_v34 = vadd.f32 %v1924_v56, %v758_v31  ;;  %v847_v35 = vpop.f32.mrf.mxu1  ;;  %v1387_v27 = vor.u32 %v1576_v15, %v1386_v14  ;;  %v1391_v31 = vor.u32 %v1575_v16, %v1388_v18 }
  0xbc   : > { %vm1012_vm1 = vcmp.ge.f32.partialorder %v934_v30, 0.0  ;;  %v1044_v36 = vmul.f32 0.01, %v934_v30  ;;  %797 = vmatmul.bf16.gmra.mxu0 %v1363_v28  ;;  %995 = vmatmul.bf16.gmra.mxu3 %v1419_v29  ;;  %v848_v38 = vadd.f32 %v847_v35, %v759_v34  ;;  %v1443_v28 = vor.u32 %v1589_v20, %v1442_v19 }
  0xbd   : > { %886 = vmatmul.bf16.gmra.mxu1 %v1367_v32  ;;  %v1395_v32 = vor.u32 %v1577_v22, %v1394_v21 }
  0xbe   : > { %v1076_v37 = vsel %vm1012_vm1, %v934_v30, %v1044_v36  ;;  %975 = vmatmul.bf16.gmra.mxu2 %v1371_v33 }
  0xbf   : > { %1108 = vst [vmem:[%s1941_s27 + $0x8] sm:$0xff] %v1076_v37  ;;  %v1957_v39 = vpop.f32.mrf.mxu3 }
  0xc1   : > { %v936_v40 = vpop.f32.mrf.mxu2  ;;  %v760_v42 = vpop.f32.mrf.mxu0 }
  0xc2   : > { %v937_v41 = vadd.f32 %v936_v40, %v848_v38  ;;  %v849_v43 = vpop.f32.mrf.mxu1  ;;  %v761_v45 = vadd.f32 %v1924_v56, %v760_v42 }
  0xc4   : > { %vm1013_vm2 = vcmp.ge.f32.partialorder %v937_v41, 0.0  ;;  %v1045_v44 = vmul.f32 0.01, %v937_v41  ;;  %v850_v55 = vadd.f32 %v849_v43, %v761_v45 }
  0xc6   : > { %v1077_v49 = vsel %vm1013_vm2, %v937_v41, %v1045_v44 }
  0xc7   : > { %1109 = vst [vmem:[%s1941_s27 + $0x10] sm:$0xff] %v1077_v49  ;;  %v1969_v57 = vpop.f32.mrf.mxu3 }
  0xc9   : > { %v938_v58 = vpop.f32.mrf.mxu2  ;;  %v763_v62 = vpop.f32.mrf.mxu0 }
  0xca   : > { %v939_v61 = vadd.f32 %v938_v58, %v850_v55  ;;  %v764_v1 = vadd.f32 %v1924_v56, %v763_v62  ;;  %v852_v2 = vpop.f32.mrf.mxu1 }
  0xcc   : > { %vm1014_vm3 = vcmp.ge.f32.partialorder %v939_v61, 0.0  ;;  %v1046_v3 = vmul.f32 0.01, %v939_v61  ;;  %802 = vmatmul.bf16.gmra.mxu0 %v1375_v59  ;;  %1000 = vmatmul.bf16.gmra.mxu3 %v1431_v60  ;;  %v853_v5 = vadd.f32 %v852_v2, %v764_v1 }
  0xcd   : > { %891 = vmatmul.bf16.gmra.mxu1 %v1379_v63 }
  0xce   : > { %v1078_v4 = vsel %vm1014_vm3, %v939_v61, %v1046_v3  ;;  %980 = vmatmul.bf16.gmra.mxu2 %v1383_v0 }
  0xcf   : > { %1110 = vst [vmem:[%s1941_s27 + $0x18] sm:$0xff] %v1078_v4  ;;  %v1973_v6 = vpop.f32.mrf.mxu3 }
  0xd1   : > { %v941_v7 = vpop.f32.mrf.mxu2  ;;  %v765_v10 = vpop.f32.mrf.mxu0 }
  0xd2   : > { %v942_v8 = vadd.f32 %v941_v7, %v853_v5  ;;  %v854_v11 = vpop.f32.mrf.mxu1  ;;  %v766_v13 = vadd.f32 %v1924_v56, %v765_v10 }
  0xd4   : > { %vm1015_vm4 = vcmp.ge.f32.partialorder %v942_v8, 0.0  ;;  %v1047_v12 = vmul.f32 0.01, %v942_v8  ;;  %v855_v24 = vadd.f32 %v854_v11, %v766_v13 }
  0xd6   : > { %v1079_v17 = vsel %vm1015_vm4, %v942_v8, %v1047_v12 }
  0xd7   : > { %1111 = vst [vmem:[%s1941_s27 + $0x20] sm:$0xff] %v1079_v17  ;;  %v1985_v25 = vpop.f32.mrf.mxu3 }
  0xd9   : > { %v943_v23 = vpop.f32.mrf.mxu2  ;;  %v768_v30 = vpop.f32.mrf.mxu0 }
  0xda   : > { %v944_v29 = vadd.f32 %v943_v23, %v855_v24  ;;  %v769_v33 = vadd.f32 %v1924_v56, %v768_v30  ;;  %v857_v34 = vpop.f32.mrf.mxu1 }
  0xdc   : > { %vm1016_vm5 = vcmp.ge.f32.partialorder %v944_v29, 0.0  ;;  %v1048_v35 = vmul.f32 0.01, %v944_v29  ;;  %807 = vmatmul.bf16.gmra.mxu0 %v1387_v27  ;;  %1005 = vmatmul.bf16.gmra.mxu3 %v1443_v28  ;;  %v858_v37 = vadd.f32 %v857_v34, %v769_v33 }
  0xdd   : > { %896 = vmatmul.bf16.gmra.mxu1 %v1391_v31 }
  0xde   : > { %v1080_v36 = vsel %vm1016_vm5, %v944_v29, %v1048_v35  ;;  %985 = vmatmul.bf16.gmra.mxu2 %v1395_v32 }
  0xdf   : > { %1112 = vst [vmem:[%s1941_s27 + $0x28] sm:$0xff] %v1080_v36  ;;  %v1989_v38 = vpop.f32.mrf.mxu3 }
  0xe1   : > { %v946_v40 = vpop.f32.mrf.mxu2  ;;  %v770_v42 = vpop.f32.mrf.mxu0 }
  0xe2   : > { %v947_v41 = vadd.f32 %v946_v40, %v858_v37  ;;  %v859_v43 = vpop.f32.mrf.mxu1  ;;  %v771_v45 = vadd.f32 %v1924_v56, %v770_v42 }
  0xe4   : > { %vm1017_vm6 = vcmp.ge.f32.partialorder %v947_v41, 0.0  ;;  %v1049_v44 = vmul.f32 0.01, %v947_v41  ;;  %v860_v47 = vadd.f32 %v859_v43, %v771_v45 }
  0xe6   : > { %v1081_v46 = vsel %vm1017_vm6, %v947_v41, %v1049_v44 }
  0xe7   : > { %1113 = vst [vmem:[%s1941_s27 + $0x30] sm:$0xff] %v1081_v46  ;;  %v1993_v48 = vpop.f32.mrf.mxu3 }
  0xe9   : > { %v948_v49 = vpop.f32.mrf.mxu2  ;;  %v773_v51 = vpop.f32.mrf.mxu0 }
  0xea   : > { %v949_v50 = vadd.f32 %v948_v49, %v860_v47  ;;  %v774_v52 = vadd.f32 %v1924_v56, %v773_v51  ;;  %v862_v53 = vpop.f32.mrf.mxu1 }
  0xec   : > { %vm1018_vm7 = vcmp.ge.f32.partialorder %v949_v50, 0.0  ;;  %v1050_v54 = vmul.f32 0.01, %v949_v50  ;;  %v863_v58 = vadd.f32 %v862_v53, %v774_v52 }
  0xee   : > { %v1082_v55 = vsel %vm1018_vm7, %v949_v50, %v1050_v54 }
  0xef   : > { %1114 = vst [vmem:[%s1941_s27 + $0x38] sm:$0xff] %v1082_v55  ;;  %v1997_v59 = vpop.f32.mrf.mxu3 }
  0xf1   : > { %v951_v60 = vpop.f32.mrf.mxu2  ;;  %v775_v62 = vpop.f32.mrf.mxu0 }
  0xf2   : > { %v952_v61 = vadd.f32 %v951_v60, %v863_v58  ;;  %v864_v63 = vpop.f32.mrf.mxu1  ;;  %v776_v1 = vadd.f32 %v1924_v56, %v775_v62 }
  0xf4   : > { %vm1019_vm8 = vcmp.ge.f32.partialorder %v952_v61, 0.0  ;;  %v1051_v0 = vmul.f32 0.01, %v952_v61  ;;  %v865_v3 = vadd.f32 %v864_v63, %v776_v1 }
  0xf6   : > { %v1083_v2 = vsel %vm1019_vm8, %v952_v61, %v1051_v0 }
  0xf7   : > { %1115 = vst [vmem:[%s1941_s27 + $0x40] sm:$0xff] %v1083_v2  ;;  %v2001_v4 = vpop.f32.mrf.mxu3 }
  0xf9   : > { %v953_v5 = vpop.f32.mrf.mxu2  ;;  %v778_v8 = vpop.f32.mrf.mxu0 }
  0xfa   : > { %v954_v7 = vadd.f32 %v953_v5, %v865_v3  ;;  %v779_v10 = vadd.f32 %v1924_v56, %v778_v8  ;;  %v867_v11 = vpop.f32.mrf.mxu1 }
  0xfc   : > { %vm1020_vm9 = vcmp.ge.f32.partialorder %v954_v7, 0.0  ;;  %v1052_v12 = vmul.f32 0.01, %v954_v7  ;;  %v868_v14 = vadd.f32 %v867_v11, %v779_v10 }
  0xfe   : > { %v1084_v13 = vsel %vm1020_vm9, %v954_v7, %v1052_v12 }
  0xff   : > { %1116 = vst [vmem:[%s1941_s27 + $0x48] sm:$0xff] %v1084_v13  ;;  %v2005_v15 = vpop.f32.mrf.mxu3 }
 0x101   : > { %v956_v16 = vpop.f32.mrf.mxu2  ;;  %v780_v18 = vpop.f32.mrf.mxu0 }
 0x102   : > { %v957_v17 = vadd.f32 %v956_v16, %v868_v14  ;;  %v869_v19 = vpop.f32.mrf.mxu1  ;;  %v781_v21 = vadd.f32 %v1924_v56, %v780_v18  ;;  %v814_v14 = vadd.f32 %v1924_v56, %v1935_v9  ;;  %v816_v9 = vadd.f32 %v1924_v56, %v1953_v26 }
 0x104   : > { %vm1021_vm10 = vcmp.ge.f32.partialorder %v957_v17, 0.0  ;;  %v1053_v20 = vmul.f32 0.01, %v957_v17  ;;  %v870_v24 = vadd.f32 %v869_v19, %v781_v21  ;;  %v903_v18 = vadd.f32 %v1997_v59, %v814_v14 }
 0x106   : > { %v1085_v22 = vsel %vm1021_vm10, %v957_v17, %v1053_v20 }
 0x107   : > { %1117 = vst [vmem:[%s1941_s27 + $0x50] sm:$0xff] %v1085_v22  ;;  %v2009_v23 = vpop.f32.mrf.mxu3 }
 0x109   : > { %v958_v27 = vpop.f32.mrf.mxu2  ;;  %v783_v29 = vpop.f32.mrf.mxu0 }
 0x10a   : > { %v959_v28 = vadd.f32 %v958_v27, %v870_v24  ;;  %v784_v30 = vadd.f32 %v1924_v56, %v783_v29  ;;  %v872_v31 = vpop.f32.mrf.mxu1 }
 0x10c   : > { %vm1022_vm11 = vcmp.ge.f32.partialorder %v959_v28, 0.0  ;;  %v1054_v32 = vmul.f32 0.01, %v959_v28  ;;  %v873_v34 = vadd.f32 %v872_v31, %v784_v30 }
 0x10e   : > { %v1086_v33 = vsel %vm1022_vm11, %v959_v28, %v1054_v32  ;;  %v905_v32 = vadd.f32 %v2001_v4, %v816_v9  ;;  %v826_v9 = vadd.f32 %v1924_v56, %v1985_v25 }
 0x10f   : > { %1118 = vst [vmem:[%s1941_s27 + $0x58] sm:$0xff] %v1086_v33  ;;  %v2013_v35 = vpop.f32.mrf.mxu3 }
 0x111   : > { %v961_v36 = vpop.f32.mrf.mxu2  ;;  %v785_v40 = vpop.f32.mrf.mxu0 }
 0x112   : > { %v962_v37 = vadd.f32 %v961_v36, %v873_v34  ;;  %v874_v41 = vpop.f32.mrf.mxu1  ;;  %v786_v43 = vadd.f32 %v1924_v56, %v785_v40 }
 0x114   : > { %vm1023_vm12 = vcmp.ge.f32.partialorder %v962_v37, 0.0  ;;  %v1055_v42 = vmul.f32 0.01, %v962_v37  ;;  %v875_v45 = vadd.f32 %v874_v41, %v786_v43 }
 0x116   : > { %v1087_v44 = vsel %vm1023_vm12, %v962_v37, %v1055_v42 }
 0x117   : > { %1119 = vst [vmem:[%s1941_s27 + $0x60] sm:$0xff] %v1087_v44  ;;  %v2017_v46 = vpop.f32.mrf.mxu3 }
 0x119   : > { %v963_v47 = vpop.f32.mrf.mxu2  ;;  %v788_v50 = vpop.f32.mrf.mxu0 }
 0x11a   : > { %v964_v49 = vadd.f32 %v963_v47, %v875_v45  ;;  %v789_v51 = vadd.f32 %v1924_v56, %v788_v50  ;;  %v877_v52 = vpop.f32.mrf.mxu1  ;;  %v819_v45 = vadd.f32 %v1924_v56, %v1957_v39 }
 0x11c   : > { %vm1024_vm13 = vcmp.ge.f32.partialorder %v964_v49, 0.0  ;;  %v1056_v53 = vmul.f32 0.01, %v964_v49  ;;  %v878_v55 = vadd.f32 %v877_v52, %v789_v51  ;;  %v908_v50 = vadd.f32 %v2005_v15, %v819_v45 }
 0x11e   : > { %v1088_v54 = vsel %vm1024_vm13, %v964_v49, %v1056_v53 }
 0x11f   : > { %1120 = vst [vmem:[%s1941_s27 + $0x68] sm:$0xff] %v1088_v54  ;;  %v2021_v58 = vpop.f32.mrf.mxu3 }
 0x121   : > { %v966_v60 = vpop.f32.mrf.mxu2  ;;  %v790_v62 = vpop.f32.mrf.mxu0 }
 0x122   : > { %v967_v61 = vadd.f32 %v966_v60, %v878_v55  ;;  %v879_v63 = vpop.f32.mrf.mxu1  ;;  %v791_v1 = vadd.f32 %v1924_v56, %v790_v62 }
 0x124   : > { %vm1025_vm14 = vcmp.ge.f32.partialorder %v967_v61, 0.0  ;;  %v1057_v0 = vmul.f32 0.01, %v967_v61  ;;  %v880_v3 = vadd.f32 %v879_v63, %v791_v1  ;;  %v821_v63 = vadd.f32 %v1924_v56, %v1969_v57 }
 0x126   : > { %v1089_v2 = vsel %vm1025_vm14, %v967_v61, %v1057_v0  ;;  %v910_v1 = vadd.f32 %v2009_v23, %v821_v63 }
 0x127   : > { %1121 = vst [vmem:[%s1941_s27 + $0x70] sm:$0xff] %v1089_v2  ;;  %v2025_v5 = vpop.f32.mrf.mxu3 }
 0x129   : > { %v968_v7 = vpop.f32.mrf.mxu2  ;;  %v793_v10 = vpop.f32.mrf.mxu0 }
 0x12a   : > { %v969_v8 = vadd.f32 %v968_v7, %v880_v3  ;;  %v794_v11 = vadd.f32 %v1924_v56, %v793_v10  ;;  %v882_v12 = vpop.f32.mrf.mxu1 }
 0x12c   : > { %vm1026_vm15 = vcmp.ge.f32.partialorder %v969_v8, 0.0  ;;  %v1058_v13 = vmul.f32 0.01, %v969_v8  ;;  %v883_v17 = vadd.f32 %v882_v12, %v794_v11 }
 0x12e   : > { %v1090_v16 = vsel %vm1026_vm15, %v969_v8, %v1058_v13 }
 0x12f   : > { %1122 = vst [vmem:[%s1941_s27 + $0x78] sm:$0xff] %v1090_v16  ;;  %v991_v19 = vpop.f32.mrf.mxu3  ;;  %v824_v16 = vadd.f32 %v1924_v56, %v1973_v6 }
 0x130   : > { %v992_v21 = vadd.f32 %v991_v19, %v903_v18 }
 0x131   : > { %v971_v20 = vpop.f32.mrf.mxu2  ;;  %v795_v24 = vpop.f32.mrf.mxu0  ;;  %v913_v19 = vadd.f32 %v2013_v35, %v824_v16 }
 0x132   : > { %v972_v22 = vadd.f32 %v971_v20, %v883_v17  ;;  %vm1035_vm0 = vcmp.ge.f32.partialorder %v992_v21, 0.0  ;;  %v1067_v27 = vmul.f32 0.01, %v992_v21  ;;  %v884_v28 = vpop.f32.mrf.mxu1  ;;  %v796_v30 = vadd.f32 %v1924_v56, %v795_v24 }
 0x134   : > { %vm1027_vm1 = vcmp.ge.f32.partialorder %v972_v22, 0.0  ;;  %v1059_v29 = vmul.f32 0.01, %v972_v22  ;;  %v1099_v31 = vsel %vm1035_vm0, %v992_v21, %v1067_v27  ;;  %v885_v33 = vadd.f32 %v884_v28, %v796_v30 }
 0x135   : > { %1131 = vst [vmem:[%s1941_s27 + $0xc0] sm:$0xff] %v1099_v31 }
 0x136   : > { %v1091_v59 = vsel %vm1027_vm1, %v972_v22, %v1059_v29 }
 0x137   : > { %1123 = vst [vmem:[%s1941_s27 + $0x80] sm:$0xff] %v1091_v59  ;;  %v993_v34 = vpop.f32.mrf.mxu3  ;;  %v915_v59 = vadd.f32 %v2017_v46, %v826_v9 }
 0x138   : > { %v994_v37 = vadd.f32 %v993_v34, %v905_v32 }
 0x139   : > { %v973_v36 = vpop.f32.mrf.mxu2  ;;  %v798_v41 = vpop.f32.mrf.mxu0 }
 0x13a   : > { %v974_v40 = vadd.f32 %v973_v36, %v885_v33  ;;  %vm1036_vm2 = vcmp.ge.f32.partialorder %v994_v37, 0.0  ;;  %v1068_v42 = vmul.f32 0.01, %v994_v37  ;;  %v799_v43 = vadd.f32 %v1924_v56, %v798_v41  ;;  %v887_v44 = vpop.f32.mrf.mxu1 }
 0x13c   : > { %vm1028_vm3 = vcmp.ge.f32.partialorder %v974_v40, 0.0  ;;  %v1060_v26 = vmul.f32 0.01, %v974_v40  ;;  %v1100_v4 = vsel %vm1036_vm2, %v994_v37, %v1068_v42  ;;  %v888_v49 = vadd.f32 %v887_v44, %v799_v43 }
 0x13d   : > { %1132 = vst [vmem:[%s1941_s27 + $0xc8] sm:$0xff] %v1100_v4  ;;  %v829_v43 = vadd.f32 %v1924_v56, %v1989_v38 }
 0x13e   : > { %v1092_v47 = vsel %vm1028_vm3, %v974_v40, %v1060_v26 }
 0x13f   : > { %1124 = vst [vmem:[%s1941_s27 + $0x88] sm:$0xff] %v1092_v47  ;;  %v996_v51 = vpop.f32.mrf.mxu3  ;;  %v918_v4 = vadd.f32 %v2021_v58, %v829_v43 }
 0x140   : > { %v997_v53 = vadd.f32 %v996_v51, %v908_v50 }
 0x141   : > { %v976_v52 = vpop.f32.mrf.mxu2  ;;  %v800_v55 = vpop.f32.mrf.mxu0 }
 0x142   : > { %v977_v54 = vadd.f32 %v976_v52, %v888_v49  ;;  %vm1037_vm4 = vcmp.ge.f32.partialorder %v997_v53, 0.0  ;;  %v1069_v60 = vmul.f32 0.01, %v997_v53  ;;  %v889_v61 = vpop.f32.mrf.mxu1  ;;  %v801_v39 = vadd.f32 %v1924_v56, %v800_v55 }
 0x143   : > { %v831_v55 = vadd.f32 %v1924_v56, %v1993_v48 }
 0x144   : > { %vm1029_vm5 = vcmp.ge.f32.partialorder %v977_v54, 0.0  ;;  %v1061_v62 = vmul.f32 0.01, %v977_v54  ;;  %v1101_v0 = vsel %vm1037_vm4, %v997_v53, %v1069_v60  ;;  %v890_v2 = vadd.f32 %v889_v61, %v801_v39 }
 0x145   : > { %1133 = vst [vmem:[%s1941_s27 + $0xd0] sm:$0xff] %v1101_v0  ;;  %v920_v58 = vadd.f32 %v2025_v5, %v831_v55 }
 0x146   : > { %v1093_v15 = vsel %vm1029_vm5, %v977_v54, %v1061_v62 }
 0x147   : > { %1125 = vst [vmem:[%s1941_s27 + $0x90] sm:$0xff] %v1093_v15  ;;  %v998_v3 = vpop.f32.mrf.mxu3 }
 0x148   : > { %v999_v8 = vadd.f32 %v998_v3, %v910_v1 }
 0x149   : > { %v978_v7 = vpop.f32.mrf.mxu2  ;;  %v803_v11 = vpop.f32.mrf.mxu0 }
 0x14a   : > { %v979_v10 = vadd.f32 %v978_v7, %v890_v2  ;;  %vm1038_vm6 = vcmp.ge.f32.partialorder %v999_v8, 0.0  ;;  %v1070_v12 = vmul.f32 0.01, %v999_v8  ;;  %v804_v13 = vadd.f32 %v1924_v56, %v803_v11  ;;  %v892_v14 = vpop.f32.mrf.mxu1 }
 0x14c   : > { %vm1030_vm7 = vcmp.ge.f32.partialorder %v979_v10, 0.0  ;;  %v1062_v57 = vmul.f32 0.01, %v979_v10  ;;  %v1102_v23 = vsel %vm1038_vm6, %v999_v8, %v1070_v12  ;;  %v893_v18 = vadd.f32 %v892_v14, %v804_v13 }
 0x14d   : > { %1134 = vst [vmem:[%s1941_s27 + $0xd8] sm:$0xff] %v1102_v23 }
 0x14e   : > { %v1094_v17 = vsel %vm1030_vm7, %v979_v10, %v1062_v57 }
 0x14f   : > { %1126 = vst [vmem:[%s1941_s27 + $0x98] sm:$0xff] %v1094_v17  ;;  %v1001_v20 = vpop.f32.mrf.mxu3 }
 0x150   : > { %v1002_v22 = vadd.f32 %v1001_v20, %v913_v19 }
 0x151   : > { %v981_v21 = vpop.f32.mrf.mxu2  ;;  %v805_v27 = vpop.f32.mrf.mxu0 }
 0x152   : > { %v982_v24 = vadd.f32 %v981_v21, %v893_v18  ;;  %vm1039_vm8 = vcmp.ge.f32.partialorder %v1002_v22, 0.0  ;;  %v1071_v28 = vmul.f32 0.01, %v1002_v22  ;;  %v894_v29 = vpop.f32.mrf.mxu1  ;;  %v806_v6 = vadd.f32 %v1924_v56, %v805_v27 }
 0x154   : > { %vm1031_vm9 = vcmp.ge.f32.partialorder %v982_v24, 0.0  ;;  %v1063_v30 = vmul.f32 0.01, %v982_v24  ;;  %v1103_v31 = vsel %vm1039_vm8, %v1002_v22, %v1071_v28  ;;  %v895_v32 = vadd.f32 %v894_v29, %v806_v6 }
 0x155   : > { %1135 = vst [vmem:[%s1941_s27 + $0xe0] sm:$0xff] %v1103_v31 }
 0x156   : > { %v1095_v35 = vsel %vm1031_vm9, %v982_v24, %v1063_v30 }
 0x157   : > { %1127 = vst [vmem:[%s1941_s27 + $0xa0] sm:$0xff] %v1095_v35  ;;  %v1003_v33 = vpop.f32.mrf.mxu3 }
 0x158   : > { %v1004_v36 = vadd.f32 %v1003_v33, %v915_v59 }
 0x159   : > { %v983_v34 = vpop.f32.mrf.mxu2  ;;  %v808_v40 = vpop.f32.mrf.mxu0 }
 0x15a   : > { %v984_v37 = vadd.f32 %v983_v34, %v895_v32  ;;  %vm1040_vm10 = vcmp.ge.f32.partialorder %v1004_v36, 0.0  ;;  %v1072_v41 = vmul.f32 0.01, %v1004_v36  ;;  %v809_v42 = vadd.f32 %v1924_v56, %v808_v40  ;;  %v897_v46 = vpop.f32.mrf.mxu1 }
 0x15c   : > { %vm1032_vm11 = vcmp.ge.f32.partialorder %v984_v37, 0.0  ;;  %v1064_v25 = vmul.f32 0.01, %v984_v37  ;;  %v1104_v44 = vsel %vm1040_vm10, %v1004_v36, %v1072_v41  ;;  %v898_v45 = vadd.f32 %v897_v46, %v809_v42 }
 0x15d   : > { %1136 = vst [vmem:[%s1941_s27 + $0xe8] sm:$0xff] %v1104_v44 }
 0x15e   : > { %v1096_v26 = vsel %vm1032_vm11, %v984_v37, %v1064_v25 }
 0x15f   : > { %1128 = vst [vmem:[%s1941_s27 + $0xa8] sm:$0xff] %v1096_v26  ;;  %v1006_v47 = vpop.f32.mrf.mxu3 }
 0x160   : > { %v1007_v50 = vadd.f32 %v1006_v47, %v918_v4 }
 0x161   : > { %v986_v49 = vpop.f32.mrf.mxu2  ;;  %v810_v52 = vpop.f32.mrf.mxu0 }
 0x162   : > { %v987_v51 = vadd.f32 %v986_v49, %v898_v45  ;;  %vm1041_vm12 = vcmp.ge.f32.partialorder %v1007_v50, 0.0  ;;  %v1073_v53 = vmul.f32 0.01, %v1007_v50  ;;  %v811_v38 = vadd.f32 %v1924_v56, %v810_v52  ;;  %v899_v62 = vpop.f32.mrf.mxu1 }
 0x164   : > { %vm1033_vm13 = vcmp.ge.f32.partialorder %v987_v51, 0.0  ;;  %v1065_v54 = vmul.f32 0.01, %v987_v51  ;;  %v1105_v60 = vsel %vm1041_vm12, %v1007_v50, %v1073_v53  ;;  %v900_v39 = vadd.f32 %v899_v62, %v811_v38 }
 0x165   : > { %1137 = vst [vmem:[%s1941_s27 + $0xf0] sm:$0xff] %v1105_v60 }
 0x166   : > { %v1097_v61 = vsel %vm1033_vm13, %v987_v51, %v1065_v54 }
 0x167   : > { %1129 = vst [vmem:[%s1941_s27 + $0xb0] sm:$0xff] %v1097_v61  ;;  %v1008_v63 = vpop.f32.mrf.mxu3 }
 0x168   : > { %v1009_v15 = vadd.f32 %v1008_v63, %v920_v58 }
 0x169   : > { %v988_v0 = vpop.f32.mrf.mxu2 }
 0x16a   : > { %v989_v1 = vadd.f32 %v988_v0, %v900_v39  ;;  %vm1042_vm14 = vcmp.ge.f32.partialorder %v1009_v15, 0.0  ;;  %v1074_v2 = vmul.f32 0.01, %v1009_v15 }
 0x16c   : > { %vm1034_vm15 = vcmp.ge.f32.partialorder %v989_v1, 0.0  ;;  %v1066_v3 = vmul.f32 0.01, %v989_v1  ;;  %v1106_v7 = vsel %vm1042_vm14, %v1009_v15, %v1074_v2 }
 0x16d   : > { %1138 = vst [vmem:[%s1941_s27 + $0xf8] sm:$0xff] %v1106_v7 }
 0x16e   : > { %v1098_v56 = vsel %vm1034_vm15, %v989_v1, %v1066_v3 }
 0x16f   : > { %1130 = vst [vmem:[%s1941_s27 + $0xb8] sm:$0xff] %v1098_v56 }
 0x170 PF: > { %s13_s14 = sadd.s32 1, %s1686_s14   ;;  %s2089_s12 = smov %s1682_s13 }
 0x171   : > { %p10_p5 = scmp.ge.s32.totalorder %s13_s14, 6   ;;  %s2090_s13 = smov %s2092_s15 }
 0x173   :  { %12 = sbr.rel (!%p10_p5) target bundleno = 2 (0x2), region = 68 }

</bundles_post_ra>
